<compile_context>
chip_gen: v6e
topology: v6e:2x2x1
jax: 0.10.0
libtpu: 0.0.40
codegen_flags: <defaults>
</compile_context>

<pallas_src>
import functools
import math

import jax
import jax.numpy as jnp
from jax.experimental import pallas as pl
from jax.experimental.pallas import tpu as pltpu

LANE = 128


# --------------------------- small helpers ---------------------------------- #

def _round_up(x, m):
    return (x + m - 1) // m * m


_VMEM_LIMIT = None


def _vmem_limit_bytes():
    """Per-generation VMEM limit: ~3/4 of physical, capped at 100 MiB."""
    global _VMEM_LIMIT
    if _VMEM_LIMIT is None:
        try:
            cap = int(pltpu.get_tpu_info().vmem_capacity_bytes)
        except Exception:
            cap = 64 * 1024 * 1024          # conservative (v7x) fallback
        _VMEM_LIMIT = max(32 << 20, min(int(cap * 3 // 4), 100 << 20))
    return _VMEM_LIMIT


def _cparams():
    return pltpu.CompilerParams(
        dimension_semantics=("parallel",),
        vmem_limit_bytes=_vmem_limit_bytes(),
    )


def _pick_rows(nrows, per_row_bytes, fixed_bytes, batch, budget=20 << 20):
    """Largest divisor of nrows whose per-step footprint fits the budget.
    Also guarantees >=2 grid steps (v7x megacore) when possible."""
    r = 1
    for cand in range(nrows, 0, -1):
        if nrows % cand == 0 and fixed_bytes + per_row_bytes * cand <= budget:
            r = cand
            break
    if batch * (nrows // r) < 2 and r % 2 == 0:
        r //= 2                              # make the 'parallel' grid >= 2 steps
    return r


# ----------------------------- Pallas kernels -------------------------------- #

def _conv3_kernel(x_ref, w_ref, b_ref, o_ref, acc_ref, *, offs, rows, wp, wout):
    """3x3/s1/p1 conv + bias + ReLU for one (batch, row-band) step.

    x_ref : (1, (rows+3)*wp, Cp)  flattened, zero-padded band (bf16)
    w_ref : (9, Cp, Coutp)        tap-major weight (bf16), resident
    b_ref : (1, Coutp)            f32 bias
    o_ref : (1, rows, wout, Coutp)
    acc   : (rows*wp, Coutp)      f32 scratch
    """
    L = acc_ref.shape[0]
    acc_ref[...] = jnp.dot(x_ref[0, pl.ds(offs[0], L), :], w_ref[0],
                           preferred_element_type=jnp.float32)
    for t in range(1, 9):
        acc_ref[...] += jnp.dot(x_ref[0, pl.ds(offs[t], L), :], w_ref[t],
                                preferred_element_type=jnp.float32)
    y = jnp.maximum(acc_ref[...] + b_ref[...], 0.0).astype(o_ref.dtype)
    # Store only the `wout` valid columns of each of the `rows` output rows.
    for r in range(rows):
        o_ref[0, r, :, :] = y[r * wp: r * wp + wout, :]


def _down2_kernel(x_ref, w_ref, b_ref, o_ref):
    """2x2/s2 conv + bias + ReLU (non-overlapping patches, no padding).

    x_ref : (rb, 2, Wh, 2*Cp)   free view: [out_row, row parity, out_col, (kx,c)]
    w_ref : (2, 2*Cp, Coutp)    [row parity][(kx, cin)] -> cout
    o_ref : (rb, Wh, Coutp)
    """
    rb, _, wh, k2 = x_ref.shape
    coutp = o_ref.shape[-1]
    xe = x_ref[:, 0, :, :].reshape(rb * wh, k2)
    xo = x_ref[:, 1, :, :].reshape(rb * wh, k2)
    y = jnp.dot(xe, w_ref[0], preferred_element_type=jnp.float32)
    y = y + jnp.dot(xo, w_ref[1], preferred_element_type=jnp.float32)
    y = jnp.maximum(y + b_ref[...], 0.0)
    o_ref[...] = y.reshape(rb, wh, coutp).astype(o_ref.dtype)


def _up2_kernel(x_ref, w_ref, b_ref, o_ref):
    """2x2/s2 ConvTranspose + bias + ReLU.

    x_ref : (rb, W, Cp)
    w_ref : (2, Cp, 2*Coutp)    [kH][cin] -> (kW, cout) columns
    o_ref : (rb, 2, W, 2*Coutp) free view of (.., 2H, 2W, Coutp)
    """
    rb, wd, cp = x_ref.shape
    c2 = o_ref.shape[-1]
    xf = x_ref[...].reshape(rb * wd, cp)
    for a in range(2):                       # kH index
        y = jnp.dot(xf, w_ref[a], preferred_element_type=jnp.float32)
        y = jnp.maximum(y + b_ref[...], 0.0)
        o_ref[:, a, :, :] = y.reshape(rb, wd, c2).astype(o_ref.dtype)


# ------------------------------ layer wrappers ------------------------------- #

def conv3x3_relu(x, w_mat, bias):
    """x: (N, H, W, Cp) bf16 (channel-padded). w_mat: (9, Cp, Coutp). bias: (1, Coutp)."""
    n, h, wd, cp = x.shape
    coutp = w_mat.shape[-1]
    wp = wd + 2
    per_row = 2 * wp * cp * 2 + 2 * wd * coutp * 2 + wp * coutp * 4
    fixed = 2 * 3 * wp * cp * 2 + 2 * w_mat.size * 2 + 4 * coutp
    r = _pick_rows(h, per_row, fixed, n)
    nb = h // r

    # zero halo: 1 top / 2 bottom rows, 1 left / 1 right column
    xpad = jnp.pad(x, ((0, 0), (1, 2), (1, 1), (0, 0)))
    if nb == 1:
        xb = xpad.reshape(n, (h + 3) * wp, cp)
    else:
        xb = jnp.stack([xpad[:, j * r: j * r + r + 3] for j in range(nb)], axis=1)
        xb = xb.reshape(n * nb, (r + 3) * wp, cp)

    offs = tuple(ky * wp + kx for ky in range(3) for kx in range(3))
    kern = functools.partial(_conv3_kernel, offs=offs, rows=r, wp=wp, wout=wd)

    out = pl.pallas_call(
        kern,
        out_shape=jax.ShapeDtypeStruct((n * nb, r, wd, coutp), jnp.bfloat16),
        grid_spec=pltpu.PrefetchScalarGridSpec(
            num_scalar_prefetch=0,
            grid=(n * nb,),
            in_specs=[
                pl.BlockSpec((1, (r + 3) * wp, cp), lambda i: (i, 0, 0)),
                pl.BlockSpec((9, cp, coutp), lambda i: (0, 0, 0)),
                pl.BlockSpec((1, coutp), lambda i: (0, 0)),
            ],
            out_specs=pl.BlockSpec((1, r, wd, coutp), lambda i: (i, 0, 0, 0)),
            scratch_shapes=[pltpu.VMEM((r * wp, coutp), jnp.float32)],
        ),
        compiler_params=_cparams(),
    )(xb, w_mat, bias)
    return out.reshape(n, h, wd, coutp)


def down2x2_relu(x, w_mat, bias):
    """x: (N, H, W, Cp) bf16. w_mat: (2, 2*Cp, Coutp). bias: (1, Coutp)."""
    n, h, wd, cp = x.shape
    coutp = w_mat.shape[-1]
    ho, wh = h // 2, wd // 2
    per_row = 2 * (2 * wd * cp * 2) + 2 * (wh * coutp * 2)
    fixed = 2 * w_mat.size * 2 + 4 * coutp
    rb = _pick_rows(ho, per_row, fixed, n)

    x5 = x.reshape(n * ho, 2, wh, 2 * cp)          # free view

    out = pl.pallas_call(
        _down2_kernel,
        out_shape=jax.ShapeDtypeStruct((n * ho, wh, coutp), jnp.bfloat16),
        grid_spec=pltpu.PrefetchScalarGridSpec(
            num_scalar_prefetch=0,
            grid=(n * ho // rb,),
            in_specs=[
                pl.BlockSpec((rb, 2, wh, 2 * cp), lambda i: (i, 0, 0, 0)),
                pl.BlockSpec((2, 2 * cp, coutp), lambda i: (0, 0, 0)),
                pl.BlockSpec((1, coutp), lambda i: (0, 0)),
            ],
            out_specs=pl.BlockSpec((rb, wh, coutp), lambda i: (i, 0, 0)),
        ),
        compiler_params=_cparams(),
    )(x5, w_mat, bias)
    return out.reshape(n, ho, wh, coutp)


def up2x2_relu(x, w_mat, bias):
    """x: (N, H, W, Cp) bf16. w_mat: (2, Cp, 2*Coutp). bias: (1, 2*Coutp)."""
    n, h, wd, cp = x.shape
    c2 = w_mat.shape[-1]
    coutp = c2 // 2
    per_row = 2 * (wd * cp * 2) + 2 * (2 * wd * c2 * 2)
    fixed = 2 * w_mat.size * 2 + 4 * c2
    rb = _pick_rows(h, per_row, fixed, n)

    xf = x.reshape(n * h, wd, cp)                  # free view

    out = pl.pallas_call(
        _up2_kernel,
        out_shape=jax.ShapeDtypeStruct((n * h, 2, wd, c2), jnp.bfloat16),
        grid_spec=pltpu.PrefetchScalarGridSpec(
            num_scalar_prefetch=0,
            grid=(n * h // rb,),
            in_specs=[
                pl.BlockSpec((rb, wd, cp), lambda i: (i, 0, 0)),
                pl.BlockSpec((2, cp, c2), lambda i: (0, 0, 0)),
                pl.BlockSpec((1, c2), lambda i: (0, 0)),
            ],
            out_specs=pl.BlockSpec((rb, 2, wd, c2), lambda i: (i, 0, 0, 0)),
        ),
        compiler_params=_cparams(),
    )(xf, w_mat, bias)
    return out.reshape(n, 2 * h, 2 * wd, coutp)    # free view back to NHWC


# ---------------------- model spec / params / forward ------------------------ #

def layer_specs(in_channels, inter_channels):
    specs = []
    c = in_channels
    for cout in (inter_channels, inter_channels * 2, inter_channels * 4):   # encoders
        specs += [("conv3", c, c), ("conv3", c, c), ("down2", c, cout)]
        c = cout
    specs += [("conv3", c, c)]                                              # bottleneck
    for cout in (inter_channels * 2, inter_channels, in_channels):          # decoders
        specs += [("conv3", c, c), ("conv3", c, c), ("up2", c, cout)]
        c = cout
    return tuple(specs)


def init_params(key, specs):
    """PyTorch-layout f32 parameters (Conv2d / ConvTranspose2d default init)."""
    layers = []
    for kind, cin, cout in specs:
        key, kw, kb = jax.random.split(key, 3)
        if kind == "conv3":
            shape, fan_in = (cout, cin, 3, 3), cin * 9
        elif kind == "down2":
            shape, fan_in = (cout, cin, 2, 2), cin * 4
        else:  # up2: ConvTranspose2d weight layout (Cin, Cout, kH, kW)
            shape, fan_in = (cin, cout, 2, 2), cout * 4
        bound = 1.0 / math.sqrt(fan_in)
        w = jax.random.uniform(kw, shape, jnp.float32, -bound, bound)
        b = jax.random.uniform(kb, (cout,), jnp.float32, -bound, bound)
        layers.append(dict(w=w, b=b))
    return layers


def prepare_params(params, specs):
    """One-time conversion to kernel layout: bf16, zero-padded to 128 channels."""
    prepped = []
    for (kind, cin, cout), layer in zip(specs, params):
        w = layer["w"].astype(jnp.float32)
        b = layer["b"].astype(jnp.float32)
        cinp = _round_up(cin, LANE)
        coutp = _round_up(cout, LANE)
        if kind == "conv3":
            wm = jnp.transpose(w, (2, 3, 1, 0)).reshape(9, cin, cout)
            wm = jnp.pad(wm, ((0, 0), (0, cinp - cin), (0, coutp - cout)))
            bp = jnp.pad(b, (0, coutp - cout)).reshape(1, coutp)
        elif kind == "down2":
            wt = jnp.transpose(w, (2, 3, 1, 0))          # (kH, kW, Cin, Cout)
            wt = jnp.pad(wt, ((0, 0), (0, 0), (0, cinp - cin), (0, coutp - cout)))
            wm = wt.reshape(2, 2 * cinp, coutp)
            bp = jnp.pad(b, (0, coutp - cout)).reshape(1, coutp)
        else:  # up2
            wt = jnp.transpose(w, (2, 0, 3, 1))          # (kH, Cin, kW, Cout)
            wt = jnp.pad(wt, ((0, 0), (0, cinp - cin), (0, 0), (0, coutp - cout)))
            wm = wt.reshape(2, cinp, 2 * coutp)
            bp = jnp.tile(jnp.pad(b, (0, coutp - cout)), 2).reshape(1, 2 * coutp)
        prepped.append(dict(w=wm.astype(jnp.bfloat16), b=bp))
    return prepped


def forward_pallas(x_nchw, kparams, *, specs, in_channels):
    x = jnp.transpose(x_nchw, (0, 2, 3, 1)).astype(jnp.bfloat16)   # NCHW -> NHWC
    cin0 = specs[0][1]
    cinp0 = kparams[0]["w"].shape[1]
    x = jnp.pad(x, ((0, 0), (0, 0), (0, 0), (0, cinp0 - cin0)))    # channel pad
    for (kind, _, _), layer in zip(specs, kparams):
        if kind == "conv3":
            x = conv3x3_relu(x, layer["w"], layer["b"])
        elif kind == "down2":
            x = down2x2_relu(x, layer["w"], layer["b"])
        else:
            x = up2x2_relu(x, layer["w"], layer["b"])
    x = x[..., :in_channels]                                       # drop channel pad
    return jnp.transpose(x, (0, 3, 1, 2)).astype(jnp.float32)      # NHWC -> NCHW


# ---------------- pure-XLA reference (same bf16 quantization points) --------- #

def forward_ref(x_nchw, params, *, specs):
    q = lambda a: a.astype(jnp.bfloat16).astype(jnp.float32)
    x = q(jnp.transpose(x_nchw, (0, 2, 3, 1)))
    for (kind, _, _), layer in zip(specs, params):
        w = q(layer["w"])
        b = layer["b"]
        if kind == "conv3":
            y = jax.lax.conv_general_dilated(
                x, jnp.transpose(w, (2, 3, 1, 0)), (1, 1), ((1, 1), (1, 1)),
                dimension_numbers=("NHWC", "HWIO", "NHWC")) + b
        elif kind == "down2":
            y = jax.lax.conv_general_dilated(
                x, jnp.transpose(w, (2, 3, 1, 0)), (2, 2), ((0, 0), (0, 0)),
                dimension_numbers=("NHWC", "HWIO", "NHWC")) + b
        else:  # up2 (ConvTranspose2d, k=2, s=2)
            n, h, wd, _ = x.shape
            cout = w.shape[1]
            blocks = jnp.einsum("nhwc,cokl->nhwklo", x, w)
            y = (blocks.transpose(0, 1, 3, 2, 4, 5)
                       .reshape(n, 2 * h, 2 * wd, cout)) + b
        x = q(jnp.maximum(y, 0.0))
    return jnp.transpose(x, (0, 3, 1, 2))


# ----------------------------------- main ------------------------------------ #

if __name__ == "__main__":
    IN_CH, INTER_CH = 16, 16           # small-shape stand-ins for the 64/64 defaults
    N, H, W = 2, 16, 16                # spatial must be divisible by 8 (3 downsamples)

    specs = layer_specs(IN_CH, INTER_CH)
    key = jax.random.PRNGKey(0)
    kimg, kparam = jax.random.split(key)
    img = jax.random.normal(kimg, (N, IN_CH, H, W), jnp.float32)
    raw_params = init_params(kparam, specs)
    kparams = prepare_params(raw_params, specs)      # one-time kernel-layout weights

    fwd = jax.jit(functools.partial(forward_pallas, specs=specs, in_channels=IN_CH))
    out = jax.block_until_ready(fwd(img, kparams))

    assert out.shape == (N, IN_CH, H, W), out.shape
    assert bool(jnp.all(jnp.isfinite(out)))

    ref = jax.block_until_ready(
        jax.jit(functools.partial(forward_ref, specs=specs))(img, raw_params))
    rel_err = jnp.linalg.norm(out - ref) / (jnp.linalg.norm(ref) + 1e-12)
    assert float(rel_err) < 2e-2, float(rel_err)

    print("KERNEL_OK")
</pallas_src>

<mosaic_0001>
module attributes {stable_mosaic.version = 11 : i64} {
  func.func @_conv3_kernel(%arg0: i32, %arg1: memref<1x342x128xbf16, #tpu.memory_space<vmem>>, %arg2: memref<9x128x128xbf16, #tpu.memory_space<vmem>>, %arg3: memref<1x128xf32, #tpu.memory_space<vmem>>, %arg4: memref<1x16x16x128xbf16, #tpu.memory_space<vmem>>, %arg5: memref<288x128xf32, #tpu.memory_space<vmem>>) attributes {dimension_semantics = [#tpu.dimension_semantics<parallel>], iteration_bounds = array<i64: 2>, scalar_prefetch = 0 : i64, scratch_operands = 1 : i64, tpu.core_type = #tpu.core_type<tc>, window_params = [{transform_indices = @transform_0, window_bounds = array<i64: 1, 342, 128>}, {pipeline_mode = #tpu.pipeline_mode<synchronous>, transform_indices = @transform_1, window_bounds = array<i64: 9, 128, 128>}, {pipeline_mode = #tpu.pipeline_mode<synchronous>, transform_indices = @transform_2, window_bounds = array<i64: 1, 128>}, {transform_indices = @transform_3, window_bounds = array<i64: 1, 16, 16, 128>}]} {
    %c0 = arith.constant 0 : index
    %c0_0 = arith.constant 0 : index
    %c0_1 = arith.constant 0 : index
    %0 = vector.load %arg1[%c0, %c0_0, %c0_1] : memref<1x342x128xbf16, #tpu.memory_space<vmem>>, vector<1x288x128xbf16>
    %1 = vector.shape_cast %0 : vector<1x288x128xbf16> to vector<288x128xbf16>
    %c0_2 = arith.constant 0 : index
    %c0_3 = arith.constant 0 : index
    %c0_4 = arith.constant 0 : index
    %2 = vector.load %arg2[%c0_2, %c0_3, %c0_4] : memref<9x128x128xbf16, #tpu.memory_space<vmem>>, vector<1x128x128xbf16>
    %3 = vector.shape_cast %2 : vector<1x128x128xbf16> to vector<128x128xbf16>
    %cst = arith.constant dense<0.000000e+00> : vector<288x128xf32>
    %4 = tpu.matmul %1, %3, %cst {dimension_numbers = #tpu.dot_dimension_numbers<[1], [0], [0], [1], [0, 0, 1, 1], [], []>} : vector<288x128xbf16>, vector<128x128xbf16>, vector<288x128xf32> -> vector<288x128xf32>
    %c0_5 = arith.constant 0 : index
    %c0_6 = arith.constant 0 : index
    %5 = vector.load %arg5[%c0_5, %c0_6] : memref<288x128xf32, #tpu.memory_space<vmem>>, vector<288x128xf32>
    tpu.vector_store %arg5[%c0_5, %c0_6], %4 {strides = array<i32>} : memref<288x128xf32, #tpu.memory_space<vmem>>, vector<288x128xf32>,
    %c0_7 = arith.constant 0 : index
    %c0_8 = arith.constant 0 : index
    %6 = vector.load %arg5[%c0_7, %c0_8] : memref<288x128xf32, #tpu.memory_space<vmem>>, vector<288x128xf32>
    %c0_9 = arith.constant 0 : index
    %c1 = arith.constant 1 : index
    %c0_10 = arith.constant 0 : index
    %7 = vector.load %arg1[%c0_9, %c1, %c0_10] : memref<1x342x128xbf16, #tpu.memory_space<vmem>>, vector<1x288x128xbf16>
    %8 = vector.shape_cast %7 : vector<1x288x128xbf16> to vector<288x128xbf16>
    %c1_11 = arith.constant 1 : index
    %c0_12 = arith.constant 0 : index
    %c0_13 = arith.constant 0 : index
    %9 = vector.load %arg2[%c1_11, %c0_12, %c0_13] : memref<9x128x128xbf16, #tpu.memory_space<vmem>>, vector<1x128x128xbf16>
    %10 = vector.shape_cast %9 : vector<1x128x128xbf16> to vector<128x128xbf16>
    %cst_14 = arith.constant dense<0.000000e+00> : vector<288x128xf32>
    %11 = tpu.matmul %8, %10, %cst_14 {dimension_numbers = #tpu.dot_dimension_numbers<[1], [0], [0], [1], [0, 0, 1, 1], [], []>} : vector<288x128xbf16>, vector<128x128xbf16>, vector<288x128xf32> -> vector<288x128xf32>
    %12 = arith.addf %6, %11 : vector<288x128xf32>
    %c0_15 = arith.constant 0 : index
    %c0_16 = arith.constant 0 : index
    %13 = vector.load %arg5[%c0_15, %c0_16] : memref<288x128xf32, #tpu.memory_space<vmem>>, vector<288x128xf32>
    tpu.vector_store %arg5[%c0_15, %c0_16], %12 {strides = array<i32>} : memref<288x128xf32, #tpu.memory_space<vmem>>, vector<288x128xf32>,
    %c0_17 = arith.constant 0 : index
    %c0_18 = arith.constant 0 : index
    %14 = vector.load %arg5[%c0_17, %c0_18] : memref<288x128xf32, #tpu.memory_space<vmem>>, vector<288x128xf32>
    %c0_19 = arith.constant 0 : index
    %c2 = arith.constant 2 : index
    %c0_20 = arith.constant 0 : index
    %15 = vector.load %arg1[%c0_19, %c2, %c0_20] : memref<1x342x128xbf16, #tpu.memory_space<vmem>>, vector<1x288x128xbf16>
    %16 = vector.shape_cast %15 : vector<1x288x128xbf16> to vector<288x128xbf16>
    %c2_21 = arith.constant 2 : index
    %c0_22 = arith.constant 0 : index
    %c0_23 = arith.constant 0 : index
    %17 = vector.load %arg2[%c2_21, %c0_22, %c0_23] : memref<9x128x128xbf16, #tpu.memory_space<vmem>>, vector<1x128x128xbf16>
    %18 = vector.shape_cast %17 : vector<1x128x128xbf16> to vector<128x128xbf16>
    %cst_24 = arith.constant dense<0.000000e+00> : vector<288x128xf32>
    %19 = tpu.matmul %16, %18, %cst_24 {dimension_numbers = #tpu.dot_dimension_numbers<[1], [0], [0], [1], [0, 0, 1, 1], [], []>} : vector<288x128xbf16>, vector<128x128xbf16>, vector<288x128xf32> -> vector<288x128xf32>
    %20 = arith.addf %14, %19 : vector<288x128xf32>
    %c0_25 = arith.constant 0 : index
    %c0_26 = arith.constant 0 : index
    %21 = vector.load %arg5[%c0_25, %c0_26] : memref<288x128xf32, #tpu.memory_space<vmem>>, vector<288x128xf32>
    tpu.vector_store %arg5[%c0_25, %c0_26], %20 {strides = array<i32>} : memref<288x128xf32, #tpu.memory_space<vmem>>, vector<288x128xf32>,
    %c0_27 = arith.constant 0 : index
    %c0_28 = arith.constant 0 : index
    %22 = vector.load %arg5[%c0_27, %c0_28] : memref<288x128xf32, #tpu.memory_space<vmem>>, vector<288x128xf32>
    %c0_29 = arith.constant 0 : index
    %c18 = arith.constant 18 : index
    %c0_30 = arith.constant 0 : index
    %23 = vector.load %arg1[%c0_29, %c18, %c0_30] : memref<1x342x128xbf16, #tpu.memory_space<vmem>>, vector<1x288x128xbf16>
    %24 = vector.shape_cast %23 : vector<1x288x128xbf16> to vector<288x128xbf16>
    %c3 = arith.constant 3 : index
    %c0_31 = arith.constant 0 : index
    %c0_32 = arith.constant 0 : index
    %25 = vector.load %arg2[%c3, %c0_31, %c0_32] : memref<9x128x128xbf16, #tpu.memory_space<vmem>>, vector<1x128x128xbf16>
    %26 = vector.shape_cast %25 : vector<1x128x128xbf16> to vector<128x128xbf16>
    %cst_33 = arith.constant dense<0.000000e+00> : vector<288x128xf32>
    %27 = tpu.matmul %24, %26, %cst_33 {dimension_numbers = #tpu.dot_dimension_numbers<[1], [0], [0], [1], [0, 0, 1, 1], [], []>} : vector<288x128xbf16>, vector<128x128xbf16>, vector<288x128xf32> -> vector<288x128xf32>
    %28 = arith.addf %22, %27 : vector<288x128xf32>
    %c0_34 = arith.constant 0 : index
    %c0_35 = arith.constant 0 : index
    %29 = vector.load %arg5[%c0_34, %c0_35] : memref<288x128xf32, #tpu.memory_space<vmem>>, vector<288x128xf32>
    tpu.vector_store %arg5[%c0_34, %c0_35], %28 {strides = array<i32>} : memref<288x128xf32, #tpu.memory_space<vmem>>, vector<288x128xf32>,
    %c0_36 = arith.constant 0 : index
    %c0_37 = arith.constant 0 : index
    %30 = vector.load %arg5[%c0_36, %c0_37] : memref<288x128xf32, #tpu.memory_space<vmem>>, vector<288x128xf32>
    %c0_38 = arith.constant 0 : index
    %c19 = arith.constant 19 : index
    %c0_39 = arith.constant 0 : index
    %31 = vector.load %arg1[%c0_38, %c19, %c0_39] : memref<1x342x128xbf16, #tpu.memory_space<vmem>>, vector<1x288x128xbf16>
    %32 = vector.shape_cast %31 : vector<1x288x128xbf16> to vector<288x128xbf16>
    %c4 = arith.constant 4 : index
    %c0_40 = arith.constant 0 : index
    %c0_41 = arith.constant 0 : index
    %33 = vector.load %arg2[%c4, %c0_40, %c0_41] : memref<9x128x128xbf16, #tpu.memory_space<vmem>>, vector<1x128x128xbf16>
    %34 = vector.shape_cast %33 : vector<1x128x128xbf16> to vector<128x128xbf16>
    %cst_42 = arith.constant dense<0.000000e+00> : vector<288x128xf32>
    %35 = tpu.matmul %32, %34, %cst_42 {dimension_numbers = #tpu.dot_dimension_numbers<[1], [0], [0], [1], [0, 0, 1, 1], [], []>} : vector<288x128xbf16>, vector<128x128xbf16>, vector<288x128xf32> -> vector<288x128xf32>
    %36 = arith.addf %30, %35 : vector<288x128xf32>
    %c0_43 = arith.constant 0 : index
    %c0_44 = arith.constant 0 : index
    %37 = vector.load %arg5[%c0_43, %c0_44] : memref<288x128xf32, #tpu.memory_space<vmem>>, vector<288x128xf32>
    tpu.vector_store %arg5[%c0_43, %c0_44], %36 {strides = array<i32>} : memref<288x128xf32, #tpu.memory_space<vmem>>, vector<288x128xf32>,
    %c0_45 = arith.constant 0 : index
    %c0_46 = arith.constant 0 : index
    %38 = vector.load %arg5[%c0_45, %c0_46] : memref<288x128xf32, #tpu.memory_space<vmem>>, vector<288x128xf32>
    %c0_47 = arith.constant 0 : index
    %c20 = arith.constant 20 : index
    %c0_48 = arith.constant 0 : index
    %39 = vector.load %arg1[%c0_47, %c20, %c0_48] : memref<1x342x128xbf16, #tpu.memory_space<vmem>>, vector<1x288x128xbf16>
    %40 = vector.shape_cast %39 : vector<1x288x128xbf16> to vector<288x128xbf16>
    %c5 = arith.constant 5 : index
    %c0_49 = arith.constant 0 : index
    %c0_50 = arith.constant 0 : index
    %41 = vector.load %arg2[%c5, %c0_49, %c0_50] : memref<9x128x128xbf16, #tpu.memory_space<vmem>>, vector<1x128x128xbf16>
    %42 = vector.shape_cast %41 : vector<1x128x128xbf16> to vector<128x128xbf16>
    %cst_51 = arith.constant dense<0.000000e+00> : vector<288x128xf32>
    %43 = tpu.matmul %40, %42, %cst_51 {dimension_numbers = #tpu.dot_dimension_numbers<[1], [0], [0], [1], [0, 0, 1, 1], [], []>} : vector<288x128xbf16>, vector<128x128xbf16>, vector<288x128xf32> -> vector<288x128xf32>
    %44 = arith.addf %38, %43 : vector<288x128xf32>
    %c0_52 = arith.constant 0 : index
    %c0_53 = arith.constant 0 : index
    %45 = vector.load %arg5[%c0_52, %c0_53] : memref<288x128xf32, #tpu.memory_space<vmem>>, vector<288x128xf32>
    tpu.vector_store %arg5[%c0_52, %c0_53], %44 {strides = array<i32>} : memref<288x128xf32, #tpu.memory_space<vmem>>, vector<288x128xf32>,
    %c0_54 = arith.constant 0 : index
    %c0_55 = arith.constant 0 : index
    %46 = vector.load %arg5[%c0_54, %c0_55] : memref<288x128xf32, #tpu.memory_space<vmem>>, vector<288x128xf32>
    %c0_56 = arith.constant 0 : index
    %c36 = arith.constant 36 : index
    %c0_57 = arith.constant 0 : index
    %47 = vector.load %arg1[%c0_56, %c36, %c0_57] : memref<1x342x128xbf16, #tpu.memory_space<vmem>>, vector<1x288x128xbf16>
    %48 = vector.shape_cast %47 : vector<1x288x128xbf16> to vector<288x128xbf16>
    %c6 = arith.constant 6 : index
    %c0_58 = arith.constant 0 : index
    %c0_59 = arith.constant 0 : index
    %49 = vector.load %arg2[%c6, %c0_58, %c0_59] : memref<9x128x128xbf16, #tpu.memory_space<vmem>>, vector<1x128x128xbf16>
    %50 = vector.shape_cast %49 : vector<1x128x128xbf16> to vector<128x128xbf16>
    %cst_60 = arith.constant dense<0.000000e+00> : vector<288x128xf32>
    %51 = tpu.matmul %48, %50, %cst_60 {dimension_numbers = #tpu.dot_dimension_numbers<[1], [0], [0], [1], [0, 0, 1, 1], [], []>} : vector<288x128xbf16>, vector<128x128xbf16>, vector<288x128xf32> -> vector<288x128xf32>
    %52 = arith.addf %46, %51 : vector<288x128xf32>
    %c0_61 = arith.constant 0 : index
    %c0_62 = arith.constant 0 : index
    %53 = vector.load %arg5[%c0_61, %c0_62] : memref<288x128xf32, #tpu.memory_space<vmem>>, vector<288x128xf32>
    tpu.vector_store %arg5[%c0_61, %c0_62], %52 {strides = array<i32>} : memref<288x128xf32, #tpu.memory_space<vmem>>, vector<288x128xf32>,
    %c0_63 = arith.constant 0 : index
    %c0_64 = arith.constant 0 : index
    %54 = vector.load %arg5[%c0_63, %c0_64] : memref<288x128xf32, #tpu.memory_space<vmem>>, vector<288x128xf32>
    %c0_65 = arith.constant 0 : index
    %c37 = arith.constant 37 : index
    %c0_66 = arith.constant 0 : index
    %55 = vector.load %arg1[%c0_65, %c37, %c0_66] : memref<1x342x128xbf16, #tpu.memory_space<vmem>>, vector<1x288x128xbf16>
    %56 = vector.shape_cast %55 : vector<1x288x128xbf16> to vector<288x128xbf16>
    %c7 = arith.constant 7 : index
    %c0_67 = arith.constant 0 : index
    %c0_68 = arith.constant 0 : index
    %57 = vector.load %arg2[%c7, %c0_67, %c0_68] : memref<9x128x128xbf16, #tpu.memory_space<vmem>>, vector<1x128x128xbf16>
    %58 = vector.shape_cast %57 : vector<1x128x128xbf16> to vector<128x128xbf16>
    %cst_69 = arith.constant dense<0.000000e+00> : vector<288x128xf32>
    %59 = tpu.matmul %56, %58, %cst_69 {dimension_numbers = #tpu.dot_dimension_numbers<[1], [0], [0], [1], [0, 0, 1, 1], [], []>} : vector<288x128xbf16>, vector<128x128xbf16>, vector<288x128xf32> -> vector<288x128xf32>
    %60 = arith.addf %54, %59 : vector<288x128xf32>
    %c0_70 = arith.constant 0 : index
    %c0_71 = arith.constant 0 : index
    %61 = vector.load %arg5[%c0_70, %c0_71] : memref<288x128xf32, #tpu.memory_space<vmem>>, vector<288x128xf32>
    tpu.vector_store %arg5[%c0_70, %c0_71], %60 {strides = array<i32>} : memref<288x128xf32, #tpu.memory_space<vmem>>, vector<288x128xf32>,
    %c0_72 = arith.constant 0 : index
    %c0_73 = arith.constant 0 : index
    %62 = vector.load %arg5[%c0_72, %c0_73] : memref<288x128xf32, #tpu.memory_space<vmem>>, vector<288x128xf32>
    %c0_74 = arith.constant 0 : index
    %c38 = arith.constant 38 : index
    %c0_75 = arith.constant 0 : index
    %63 = vector.load %arg1[%c0_74, %c38, %c0_75] : memref<1x342x128xbf16, #tpu.memory_space<vmem>>, vector<1x288x128xbf16>
    %64 = vector.shape_cast %63 : vector<1x288x128xbf16> to vector<288x128xbf16>
    %c8 = arith.constant 8 : index
    %c0_76 = arith.constant 0 : index
    %c0_77 = arith.constant 0 : index
    %65 = vector.load %arg2[%c8, %c0_76, %c0_77] : memref<9x128x128xbf16, #tpu.memory_space<vmem>>, vector<1x128x128xbf16>
    %66 = vector.shape_cast %65 : vector<1x128x128xbf16> to vector<128x128xbf16>
    %cst_78 = arith.constant dense<0.000000e+00> : vector<288x128xf32>
    %67 = tpu.matmul %64, %66, %cst_78 {dimension_numbers = #tpu.dot_dimension_numbers<[1], [0], [0], [1], [0, 0, 1, 1], [], []>} : vector<288x128xbf16>, vector<128x128xbf16>, vector<288x128xf32> -> vector<288x128xf32>
    %68 = arith.addf %62, %67 : vector<288x128xf32>
    %c0_79 = arith.constant 0 : index
    %c0_80 = arith.constant 0 : index
    %69 = vector.load %arg5[%c0_79, %c0_80] : memref<288x128xf32, #tpu.memory_space<vmem>>, vector<288x128xf32>
    tpu.vector_store %arg5[%c0_79, %c0_80], %68 {strides = array<i32>} : memref<288x128xf32, #tpu.memory_space<vmem>>, vector<288x128xf32>,
    %c0_81 = arith.constant 0 : index
    %c0_82 = arith.constant 0 : index
    %70 = vector.load %arg5[%c0_81, %c0_82] : memref<288x128xf32, #tpu.memory_space<vmem>>, vector<288x128xf32>
    %c0_83 = arith.constant 0 : index
    %c0_84 = arith.constant 0 : index
    %71 = vector.load %arg3[%c0_83, %c0_84] : memref<1x128xf32, #tpu.memory_space<vmem>>, vector<1x128xf32>
    %72 = vector.broadcast %71 : vector<1x128xf32> to vector<288x128xf32>
    %73 = arith.addf %70, %72 : vector<288x128xf32>
    %cst_85 = arith.constant 0.000000e+00 : f32
    %74 = vector.broadcast %cst_85 : f32 to vector<288x128xf32>
    %75 = arith.maximumf %73, %74 : vector<288x128xf32>
    %76 = arith.truncf %75 : vector<288x128xf32> to vector<288x128xbf16>
    %77 = vector.extract_strided_slice %76 {offsets = [0, 0], sizes = [16, 128], strides = [1, 1]} : vector<288x128xbf16> to vector<16x128xbf16>
    %c0_86 = arith.constant 0 : index
    %c0_87 = arith.constant 0 : index
    %c0_88 = arith.constant 0 : index
    %c0_89 = arith.constant 0 : index
    %78 = vector.load %arg4[%c0_86, %c0_87, %c0_88, %c0_89] : memref<1x16x16x128xbf16, #tpu.memory_space<vmem>>, vector<1x1x16x128xbf16>
    %79 = vector.shape_cast %78 : vector<1x1x16x128xbf16> to vector<16x128xbf16>
    %80 = vector.shape_cast %77 : vector<16x128xbf16> to vector<1x1x16x128xbf16>
    tpu.vector_store %arg4[%c0_86, %c0_87, %c0_88, %c0_89], %80 {strides = array<i32>} : memref<1x16x16x128xbf16, #tpu.memory_space<vmem>>, vector<1x1x16x128xbf16>,
    %81 = vector.extract_strided_slice %76 {offsets = [18, 0], sizes = [16, 128], strides = [1, 1]} : vector<288x128xbf16> to vector<16x128xbf16>
    %c0_90 = arith.constant 0 : index
    %c1_91 = arith.constant 1 : index
    %c0_92 = arith.constant 0 : index
    %c0_93 = arith.constant 0 : index
    %82 = vector.load %arg4[%c0_90, %c1_91, %c0_92, %c0_93] : memref<1x16x16x128xbf16, #tpu.memory_space<vmem>>, vector<1x1x16x128xbf16>
    %83 = vector.shape_cast %82 : vector<1x1x16x128xbf16> to vector<16x128xbf16>
    %84 = vector.shape_cast %81 : vector<16x128xbf16> to vector<1x1x16x128xbf16>
    tpu.vector_store %arg4[%c0_90, %c1_91, %c0_92, %c0_93], %84 {strides = array<i32>} : memref<1x16x16x128xbf16, #tpu.memory_space<vmem>>, vector<1x1x16x128xbf16>,
    %85 = vector.extract_strided_slice %76 {offsets = [36, 0], sizes = [16, 128], strides = [1, 1]} : vector<288x128xbf16> to vector<16x128xbf16>
    %c0_94 = arith.constant 0 : index
    %c2_95 = arith.constant 2 : index
    %c0_96 = arith.constant 0 : index
    %c0_97 = arith.constant 0 : index
    %86 = vector.load %arg4[%c0_94, %c2_95, %c0_96, %c0_97] : memref<1x16x16x128xbf16, #tpu.memory_space<vmem>>, vector<1x1x16x128xbf16>
    %87 = vector.shape_cast %86 : vector<1x1x16x128xbf16> to vector<16x128xbf16>
    %88 = vector.shape_cast %85 : vector<16x128xbf16> to vector<1x1x16x128xbf16>
    tpu.vector_store %arg4[%c0_94, %c2_95, %c0_96, %c0_97], %88 {strides = array<i32>} : memref<1x16x16x128xbf16, #tpu.memory_space<vmem>>, vector<1x1x16x128xbf16>,
    %89 = vector.extract_strided_slice %76 {offsets = [54, 0], sizes = [16, 128], strides = [1, 1]} : vector<288x128xbf16> to vector<16x128xbf16>
    %c0_98 = arith.constant 0 : index
    %c3_99 = arith.constant 3 : index
    %c0_100 = arith.constant 0 : index
    %c0_101 = arith.constant 0 : index
    %90 = vector.load %arg4[%c0_98, %c3_99, %c0_100, %c0_101] : memref<1x16x16x128xbf16, #tpu.memory_space<vmem>>, vector<1x1x16x128xbf16>
    %91 = vector.shape_cast %90 : vector<1x1x16x128xbf16> to vector<16x128xbf16>
    %92 = vector.shape_cast %89 : vector<16x128xbf16> to vector<1x1x16x128xbf16>
    tpu.vector_store %arg4[%c0_98, %c3_99, %c0_100, %c0_101], %92 {strides = array<i32>} : memref<1x16x16x128xbf16, #tpu.memory_space<vmem>>, vector<1x1x16x128xbf16>,
    %93 = vector.extract_strided_slice %76 {offsets = [72, 0], sizes = [16, 128], strides = [1, 1]} : vector<288x128xbf16> to vector<16x128xbf16>
    %c0_102 = arith.constant 0 : index
    %c4_103 = arith.constant 4 : index
    %c0_104 = arith.constant 0 : index
    %c0_105 = arith.constant 0 : index
    %94 = vector.load %arg4[%c0_102, %c4_103, %c0_104, %c0_105] : memref<1x16x16x128xbf16, #tpu.memory_space<vmem>>, vector<1x1x16x128xbf16>
    %95 = vector.shape_cast %94 : vector<1x1x16x128xbf16> to vector<16x128xbf16>
    %96 = vector.shape_cast %93 : vector<16x128xbf16> to vector<1x1x16x128xbf16>
    tpu.vector_store %arg4[%c0_102, %c4_103, %c0_104, %c0_105], %96 {strides = array<i32>} : memref<1x16x16x128xbf16, #tpu.memory_space<vmem>>, vector<1x1x16x128xbf16>,
    %97 = vector.extract_strided_slice %76 {offsets = [90, 0], sizes = [16, 128], strides = [1, 1]} : vector<288x128xbf16> to vector<16x128xbf16>
    %c0_106 = arith.constant 0 : index
    %c5_107 = arith.constant 5 : index
    %c0_108 = arith.constant 0 : index
    %c0_109 = arith.constant 0 : index
    %98 = vector.load %arg4[%c0_106, %c5_107, %c0_108, %c0_109] : memref<1x16x16x128xbf16, #tpu.memory_space<vmem>>, vector<1x1x16x128xbf16>
    %99 = vector.shape_cast %98 : vector<1x1x16x128xbf16> to vector<16x128xbf16>
    %100 = vector.shape_cast %97 : vector<16x128xbf16> to vector<1x1x16x128xbf16>
    tpu.vector_store %arg4[%c0_106, %c5_107, %c0_108, %c0_109], %100 {strides = array<i32>} : memref<1x16x16x128xbf16, #tpu.memory_space<vmem>>, vector<1x1x16x128xbf16>,
    %101 = vector.extract_strided_slice %76 {offsets = [108, 0], sizes = [16, 128], strides = [1, 1]} : vector<288x128xbf16> to vector<16x128xbf16>
    %c0_110 = arith.constant 0 : index
    %c6_111 = arith.constant 6 : index
    %c0_112 = arith.constant 0 : index
    %c0_113 = arith.constant 0 : index
    %102 = vector.load %arg4[%c0_110, %c6_111, %c0_112, %c0_113] : memref<1x16x16x128xbf16, #tpu.memory_space<vmem>>, vector<1x1x16x128xbf16>
    %103 = vector.shape_cast %102 : vector<1x1x16x128xbf16> to vector<16x128xbf16>
    %104 = vector.shape_cast %101 : vector<16x128xbf16> to vector<1x1x16x128xbf16>
    tpu.vector_store %arg4[%c0_110, %c6_111, %c0_112, %c0_113], %104 {strides = array<i32>} : memref<1x16x16x128xbf16, #tpu.memory_space<vmem>>, vector<1x1x16x128xbf16>,
    %105 = vector.extract_strided_slice %76 {offsets = [126, 0], sizes = [16, 128], strides = [1, 1]} : vector<288x128xbf16> to vector<16x128xbf16>
    %c0_114 = arith.constant 0 : index
    %c7_115 = arith.constant 7 : index
    %c0_116 = arith.constant 0 : index
    %c0_117 = arith.constant 0 : index
    %106 = vector.load %arg4[%c0_114, %c7_115, %c0_116, %c0_117] : memref<1x16x16x128xbf16, #tpu.memory_space<vmem>>, vector<1x1x16x128xbf16>
    %107 = vector.shape_cast %106 : vector<1x1x16x128xbf16> to vector<16x128xbf16>
    %108 = vector.shape_cast %105 : vector<16x128xbf16> to vector<1x1x16x128xbf16>
    tpu.vector_store %arg4[%c0_114, %c7_115, %c0_116, %c0_117], %108 {strides = array<i32>} : memref<1x16x16x128xbf16, #tpu.memory_space<vmem>>, vector<1x1x16x128xbf16>,
    %109 = vector.extract_strided_slice %76 {offsets = [144, 0], sizes = [16, 128], strides = [1, 1]} : vector<288x128xbf16> to vector<16x128xbf16>
    %c0_118 = arith.constant 0 : index
    %c8_119 = arith.constant 8 : index
    %c0_120 = arith.constant 0 : index
    %c0_121 = arith.constant 0 : index
    %110 = vector.load %arg4[%c0_118, %c8_119, %c0_120, %c0_121] : memref<1x16x16x128xbf16, #tpu.memory_space<vmem>>, vector<1x1x16x128xbf16>
    %111 = vector.shape_cast %110 : vector<1x1x16x128xbf16> to vector<16x128xbf16>
    %112 = vector.shape_cast %109 : vector<16x128xbf16> to vector<1x1x16x128xbf16>
    tpu.vector_store %arg4[%c0_118, %c8_119, %c0_120, %c0_121], %112 {strides = array<i32>} : memref<1x16x16x128xbf16, #tpu.memory_space<vmem>>, vector<1x1x16x128xbf16>,
    %113 = vector.extract_strided_slice %76 {offsets = [162, 0], sizes = [16, 128], strides = [1, 1]} : vector<288x128xbf16> to vector<16x128xbf16>
    %c0_122 = arith.constant 0 : index
    %c9 = arith.constant 9 : index
    %c0_123 = arith.constant 0 : index
    %c0_124 = arith.constant 0 : index
    %114 = vector.load %arg4[%c0_122, %c9, %c0_123, %c0_124] : memref<1x16x16x128xbf16, #tpu.memory_space<vmem>>, vector<1x1x16x128xbf16>
    %115 = vector.shape_cast %114 : vector<1x1x16x128xbf16> to vector<16x128xbf16>
    %116 = vector.shape_cast %113 : vector<16x128xbf16> to vector<1x1x16x128xbf16>
    tpu.vector_store %arg4[%c0_122, %c9, %c0_123, %c0_124], %116 {strides = array<i32>} : memref<1x16x16x128xbf16, #tpu.memory_space<vmem>>, vector<1x1x16x128xbf16>,
    %117 = vector.extract_strided_slice %76 {offsets = [180, 0], sizes = [16, 128], strides = [1, 1]} : vector<288x128xbf16> to vector<16x128xbf16>
    %c0_125 = arith.constant 0 : index
    %c10 = arith.constant 10 : index
    %c0_126 = arith.constant 0 : index
    %c0_127 = arith.constant 0 : index
    %118 = vector.load %arg4[%c0_125, %c10, %c0_126, %c0_127] : memref<1x16x16x128xbf16, #tpu.memory_space<vmem>>, vector<1x1x16x128xbf16>
    %119 = vector.shape_cast %118 : vector<1x1x16x128xbf16> to vector<16x128xbf16>
    %120 = vector.shape_cast %117 : vector<16x128xbf16> to vector<1x1x16x128xbf16>
    tpu.vector_store %arg4[%c0_125, %c10, %c0_126, %c0_127], %120 {strides = array<i32>} : memref<1x16x16x128xbf16, #tpu.memory_space<vmem>>, vector<1x1x16x128xbf16>,
    %121 = vector.extract_strided_slice %76 {offsets = [198, 0], sizes = [16, 128], strides = [1, 1]} : vector<288x128xbf16> to vector<16x128xbf16>
    %c0_128 = arith.constant 0 : index
    %c11 = arith.constant 11 : index
    %c0_129 = arith.constant 0 : index
    %c0_130 = arith.constant 0 : index
    %122 = vector.load %arg4[%c0_128, %c11, %c0_129, %c0_130] : memref<1x16x16x128xbf16, #tpu.memory_space<vmem>>, vector<1x1x16x128xbf16>
    %123 = vector.shape_cast %122 : vector<1x1x16x128xbf16> to vector<16x128xbf16>
    %124 = vector.shape_cast %121 : vector<16x128xbf16> to vector<1x1x16x128xbf16>
    tpu.vector_store %arg4[%c0_128, %c11, %c0_129, %c0_130], %124 {strides = array<i32>} : memref<1x16x16x128xbf16, #tpu.memory_space<vmem>>, vector<1x1x16x128xbf16>,
    %125 = vector.extract_strided_slice %76 {offsets = [216, 0], sizes = [16, 128], strides = [1, 1]} : vector<288x128xbf16> to vector<16x128xbf16>
    %c0_131 = arith.constant 0 : index
    %c12 = arith.constant 12 : index
    %c0_132 = arith.constant 0 : index
    %c0_133 = arith.constant 0 : index
    %126 = vector.load %arg4[%c0_131, %c12, %c0_132, %c0_133] : memref<1x16x16x128xbf16, #tpu.memory_space<vmem>>, vector<1x1x16x128xbf16>
    %127 = vector.shape_cast %126 : vector<1x1x16x128xbf16> to vector<16x128xbf16>
    %128 = vector.shape_cast %125 : vector<16x128xbf16> to vector<1x1x16x128xbf16>
    tpu.vector_store %arg4[%c0_131, %c12, %c0_132, %c0_133], %128 {strides = array<i32>} : memref<1x16x16x128xbf16, #tpu.memory_space<vmem>>, vector<1x1x16x128xbf16>,
    %129 = vector.extract_strided_slice %76 {offsets = [234, 0], sizes = [16, 128], strides = [1, 1]} : vector<288x128xbf16> to vector<16x128xbf16>
    %c0_134 = arith.constant 0 : index
    %c13 = arith.constant 13 : index
    %c0_135 = arith.constant 0 : index
    %c0_136 = arith.constant 0 : index
    %130 = vector.load %arg4[%c0_134, %c13, %c0_135, %c0_136] : memref<1x16x16x128xbf16, #tpu.memory_space<vmem>>, vector<1x1x16x128xbf16>
    %131 = vector.shape_cast %130 : vector<1x1x16x128xbf16> to vector<16x128xbf16>
    %132 = vector.shape_cast %129 : vector<16x128xbf16> to vector<1x1x16x128xbf16>
    tpu.vector_store %arg4[%c0_134, %c13, %c0_135, %c0_136], %132 {strides = array<i32>} : memref<1x16x16x128xbf16, #tpu.memory_space<vmem>>, vector<1x1x16x128xbf16>,
    %133 = vector.extract_strided_slice %76 {offsets = [252, 0], sizes = [16, 128], strides = [1, 1]} : vector<288x128xbf16> to vector<16x128xbf16>
    %c0_137 = arith.constant 0 : index
    %c14 = arith.constant 14 : index
    %c0_138 = arith.constant 0 : index
    %c0_139 = arith.constant 0 : index
    %134 = vector.load %arg4[%c0_137, %c14, %c0_138, %c0_139] : memref<1x16x16x128xbf16, #tpu.memory_space<vmem>>, vector<1x1x16x128xbf16>
    %135 = vector.shape_cast %134 : vector<1x1x16x128xbf16> to vector<16x128xbf16>
    %136 = vector.shape_cast %133 : vector<16x128xbf16> to vector<1x1x16x128xbf16>
    tpu.vector_store %arg4[%c0_137, %c14, %c0_138, %c0_139], %136 {strides = array<i32>} : memref<1x16x16x128xbf16, #tpu.memory_space<vmem>>, vector<1x1x16x128xbf16>,
    %137 = vector.extract_strided_slice %76 {offsets = [270, 0], sizes = [16, 128], strides = [1, 1]} : vector<288x128xbf16> to vector<16x128xbf16>
    %c0_140 = arith.constant 0 : index
    %c15 = arith.constant 15 : index
    %c0_141 = arith.constant 0 : index
    %c0_142 = arith.constant 0 : index
    %138 = vector.load %arg4[%c0_140, %c15, %c0_141, %c0_142] : memref<1x16x16x128xbf16, #tpu.memory_space<vmem>>, vector<1x1x16x128xbf16>
    %139 = vector.shape_cast %138 : vector<1x1x16x128xbf16> to vector<16x128xbf16>
    %140 = vector.shape_cast %137 : vector<16x128xbf16> to vector<1x1x16x128xbf16>
    tpu.vector_store %arg4[%c0_140, %c15, %c0_141, %c0_142], %140 {strides = array<i32>} : memref<1x16x16x128xbf16, #tpu.memory_space<vmem>>, vector<1x1x16x128xbf16>,
    return
  }
  func.func @transform_0(%arg0: i32) -> (i32, i32, i32) {
    %c0_i32 = arith.constant 0 : i32
    %c0_i32_0 = arith.constant 0 : i32
    %c0_i32_1 = arith.constant 0 : i32
    return %arg0, %c0_i32, %c0_i32_0 : i32, i32, i32
  }
  func.func @transform_1(%arg0: i32) -> (i32, i32, i32) {
    %c0_i32 = arith.constant 0 : i32
    %c0_i32_0 = arith.constant 0 : i32
    %c0_i32_1 = arith.constant 0 : i32
    %c0_i32_2 = arith.constant 0 : i32
    return %c0_i32, %c0_i32_0, %c0_i32_1 : i32, i32, i32
  }
  func.func @transform_2(%arg0: i32) -> (i32, i32) {
    %c0_i32 = arith.constant 0 : i32
    %c0_i32_0 = arith.constant 0 : i32
    %c0_i32_1 = arith.constant 0 : i32
    return %c0_i32, %c0_i32_0 : i32, i32
  }
  func.func @transform_3(%arg0: i32) -> (i32, i32, i32, i32) {
    %c0_i32 = arith.constant 0 : i32
    %c0_i32_0 = arith.constant 0 : i32
    %c0_i32_1 = arith.constant 0 : i32
    %c0_i32_2 = arith.constant 0 : i32
    return %arg0, %c0_i32, %c0_i32_0, %c0_i32_1 : i32, i32, i32, i32
  }
}

module attributes {stable_mosaic.version = 11 : i64} {
  func.func @_down2_kernel(%arg0: i32, %arg1: memref<8x2x8x256xbf16, #tpu.memory_space<vmem>>, %arg2: memref<2x256x128xbf16, #tpu.memory_space<vmem>>, %arg3: memref<1x128xf32, #tpu.memory_space<vmem>>, %arg4: memref<8x8x128xbf16, #tpu.memory_space<vmem>>) attributes {dimension_semantics = [#tpu.dimension_semantics<parallel>], iteration_bounds = array<i64: 2>, scalar_prefetch = 0 : i64, scratch_operands = 0 : i64, tpu.core_type = #tpu.core_type<tc>, window_params = [{transform_indices = @transform_0, window_bounds = array<i64: 8, 2, 8, 256>}, {pipeline_mode = #tpu.pipeline_mode<synchronous>, transform_indices = @transform_1, window_bounds = array<i64: 2, 256, 128>}, {pipeline_mode = #tpu.pipeline_mode<synchronous>, transform_indices = @transform_2, window_bounds = array<i64: 1, 128>}, {transform_indices = @transform_3, window_bounds = array<i64: 8, 8, 128>}]} {
    %c0 = arith.constant 0 : index
    %c0_0 = arith.constant 0 : index
    %c0_1 = arith.constant 0 : index
    %c0_2 = arith.constant 0 : index
    %0 = vector.load %arg1[%c0, %c0_0, %c0_1, %c0_2] : memref<8x2x8x256xbf16, #tpu.memory_space<vmem>>, vector<8x1x8x256xbf16>
    %1 = vector.shape_cast %0 : vector<8x1x8x256xbf16> to vector<8x8x256xbf16>
    %2 = vector.shape_cast %1 : vector<8x8x256xbf16> to vector<64x256xbf16>
    %c0_3 = arith.constant 0 : index
    %c1 = arith.constant 1 : index
    %c0_4 = arith.constant 0 : index
    %c0_5 = arith.constant 0 : index
    %3 = vector.load %arg1[%c0_3, %c1, %c0_4, %c0_5] : memref<8x2x8x256xbf16, #tpu.memory_space<vmem>>, vector<8x1x8x256xbf16>
    %4 = vector.shape_cast %3 : vector<8x1x8x256xbf16> to vector<8x8x256xbf16>
    %5 = vector.shape_cast %4 : vector<8x8x256xbf16> to vector<64x256xbf16>
    %c0_6 = arith.constant 0 : index
    %c0_7 = arith.constant 0 : index
    %c0_8 = arith.constant 0 : index
    %6 = vector.load %arg2[%c0_6, %c0_7, %c0_8] : memref<2x256x128xbf16, #tpu.memory_space<vmem>>, vector<1x256x128xbf16>
    %7 = vector.shape_cast %6 : vector<1x256x128xbf16> to vector<256x128xbf16>
    %cst = arith.constant dense<0.000000e+00> : vector<64x128xf32>
    %8 = tpu.matmul %2, %7, %cst {dimension_numbers = #tpu.dot_dimension_numbers<[1], [0], [0], [1], [0, 0, 1, 1], [], []>} : vector<64x256xbf16>, vector<256x128xbf16>, vector<64x128xf32> -> vector<64x128xf32>
    %c1_9 = arith.constant 1 : index
    %c0_10 = arith.constant 0 : index
    %c0_11 = arith.constant 0 : index
    %9 = vector.load %arg2[%c1_9, %c0_10, %c0_11] : memref<2x256x128xbf16, #tpu.memory_space<vmem>>, vector<1x256x128xbf16>
    %10 = vector.shape_cast %9 : vector<1x256x128xbf16> to vector<256x128xbf16>
    %cst_12 = arith.constant dense<0.000000e+00> : vector<64x128xf32>
    %11 = tpu.matmul %5, %10, %cst_12 {dimension_numbers = #tpu.dot_dimension_numbers<[1], [0], [0], [1], [0, 0, 1, 1], [], []>} : vector<64x256xbf16>, vector<256x128xbf16>, vector<64x128xf32> -> vector<64x128xf32>
    %12 = arith.addf %8, %11 : vector<64x128xf32>
    %c0_13 = arith.constant 0 : index
    %c0_14 = arith.constant 0 : index
    %13 = vector.load %arg3[%c0_13, %c0_14] : memref<1x128xf32, #tpu.memory_space<vmem>>, vector<1x128xf32>
    %14 = vector.broadcast %13 : vector<1x128xf32> to vector<64x128xf32>
    %15 = arith.addf %12, %14 : vector<64x128xf32>
    %cst_15 = arith.constant 0.000000e+00 : f32
    %16 = vector.broadcast %cst_15 : f32 to vector<64x128xf32>
    %17 = arith.maximumf %15, %16 : vector<64x128xf32>
    %18 = vector.shape_cast %17 : vector<64x128xf32> to vector<8x8x128xf32>
    %19 = arith.truncf %18 : vector<8x8x128xf32> to vector<8x8x128xbf16>
    %c0_16 = arith.constant 0 : index
    %c0_17 = arith.constant 0 : index
    %c0_18 = arith.constant 0 : index
    %20 = vector.load %arg4[%c0_16, %c0_17, %c0_18] : memref<8x8x128xbf16, #tpu.memory_space<vmem>>, vector<8x8x128xbf16>
    tpu.vector_store %arg4[%c0_16, %c0_17, %c0_18], %19 {strides = array<i32>} : memref<8x8x128xbf16, #tpu.memory_space<vmem>>, vector<8x8x128xbf16>,
    return
  }
  func.func @transform_0(%arg0: i32) -> (i32, i32, i32, i32) {
    %c0_i32 = arith.constant 0 : i32
    %c0_i32_0 = arith.constant 0 : i32
    %c0_i32_1 = arith.constant 0 : i32
    %c0_i32_2 = arith.constant 0 : i32
    return %arg0, %c0_i32, %c0_i32_0, %c0_i32_1 : i32, i32, i32, i32
  }
  func.func @transform_1(%arg0: i32) -> (i32, i32, i32) {
    %c0_i32 = arith.constant 0 : i32
    %c0_i32_0 = arith.constant 0 : i32
    %c0_i32_1 = arith.constant 0 : i32
    %c0_i32_2 = arith.constant 0 : i32
    return %c0_i32, %c0_i32_0, %c0_i32_1 : i32, i32, i32
  }
  func.func @transform_2(%arg0: i32) -> (i32, i32) {
    %c0_i32 = arith.constant 0 : i32
    %c0_i32_0 = arith.constant 0 : i32
    %c0_i32_1 = arith.constant 0 : i32
    return %c0_i32, %c0_i32_0 : i32, i32
  }
  func.func @transform_3(%arg0: i32) -> (i32, i32, i32) {
    %c0_i32 = arith.constant 0 : i32
    %c0_i32_0 = arith.constant 0 : i32
    %c0_i32_1 = arith.constant 0 : i32
    return %arg0, %c0_i32, %c0_i32_0 : i32, i32, i32
  }
}

module attributes {stable_mosaic.version = 11 : i64} {
  func.func @_conv3_kernel(%arg0: i32, %arg1: memref<1x110x128xbf16, #tpu.memory_space<vmem>>, %arg2: memref<9x128x128xbf16, #tpu.memory_space<vmem>>, %arg3: memref<1x128xf32, #tpu.memory_space<vmem>>, %arg4: memref<1x8x8x128xbf16, #tpu.memory_space<vmem>>, %arg5: memref<80x128xf32, #tpu.memory_space<vmem>>) attributes {dimension_semantics = [#tpu.dimension_semantics<parallel>], iteration_bounds = array<i64: 2>, scalar_prefetch = 0 : i64, scratch_operands = 1 : i64, tpu.core_type = #tpu.core_type<tc>, window_params = [{transform_indices = @transform_0, window_bounds = array<i64: 1, 110, 128>}, {pipeline_mode = #tpu.pipeline_mode<synchronous>, transform_indices = @transform_1, window_bounds = array<i64: 9, 128, 128>}, {pipeline_mode = #tpu.pipeline_mode<synchronous>, transform_indices = @transform_2, window_bounds = array<i64: 1, 128>}, {transform_indices = @transform_3, window_bounds = array<i64: 1, 8, 8, 128>}]} {
    %c0 = arith.constant 0 : index
    %c0_0 = arith.constant 0 : index
    %c0_1 = arith.constant 0 : index
    %0 = vector.load %arg1[%c0, %c0_0, %c0_1] : memref<1x110x128xbf16, #tpu.memory_space<vmem>>, vector<1x80x128xbf16>
    %1 = vector.shape_cast %0 : vector<1x80x128xbf16> to vector<80x128xbf16>
    %c0_2 = arith.constant 0 : index
    %c0_3 = arith.constant 0 : index
    %c0_4 = arith.constant 0 : index
    %2 = vector.load %arg2[%c0_2, %c0_3, %c0_4] : memref<9x128x128xbf16, #tpu.memory_space<vmem>>, vector<1x128x128xbf16>
    %3 = vector.shape_cast %2 : vector<1x128x128xbf16> to vector<128x128xbf16>
    %cst = arith.constant dense<0.000000e+00> : vector<80x128xf32>
    %4 = tpu.matmul %1, %3, %cst {dimension_numbers = #tpu.dot_dimension_numbers<[1], [0], [0], [1], [0, 0, 1, 1], [], []>} : vector<80x128xbf16>, vector<128x128xbf16>, vector<80x128xf32> -> vector<80x128xf32>
    %c0_5 = arith.constant 0 : index
    %c0_6 = arith.constant 0 : index
    %5 = vector.load %arg5[%c0_5, %c0_6] : memref<80x128xf32, #tpu.memory_space<vmem>>, vector<80x128xf32>
    tpu.vector_store %arg5[%c0_5, %c0_6], %4 {strides = array<i32>} : memref<80x128xf32, #tpu.memory_space<vmem>>, vector<80x128xf32>,
    %c0_7 = arith.constant 0 : index
    %c0_8 = arith.constant 0 : index
    %6 = vector.load %arg5[%c0_7, %c0_8] : memref<80x128xf32, #tpu.memory_space<vmem>>, vector<80x128xf32>
    %c0_9 = arith.constant 0 : index
    %c1 = arith.constant 1 : index
    %c0_10 = arith.constant 0 : index
    %7 = vector.load %arg1[%c0_9, %c1, %c0_10] : memref<1x110x128xbf16, #tpu.memory_space<vmem>>, vector<1x80x128xbf16>
    %8 = vector.shape_cast %7 : vector<1x80x128xbf16> to vector<80x128xbf16>
    %c1_11 = arith.constant 1 : index
    %c0_12 = arith.constant 0 : index
    %c0_13 = arith.constant 0 : index
    %9 = vector.load %arg2[%c1_11, %c0_12, %c0_13] : memref<9x128x128xbf16, #tpu.memory_space<vmem>>, vector<1x128x128xbf16>
    %10 = vector.shape_cast %9 : vector<1x128x128xbf16> to vector<128x128xbf16>
    %cst_14 = arith.constant dense<0.000000e+00> : vector<80x128xf32>
    %11 = tpu.matmul %8, %10, %cst_14 {dimension_numbers = #tpu.dot_dimension_numbers<[1], [0], [0], [1], [0, 0, 1, 1], [], []>} : vector<80x128xbf16>, vector<128x128xbf16>, vector<80x128xf32> -> vector<80x128xf32>
    %12 = arith.addf %6, %11 : vector<80x128xf32>
    %c0_15 = arith.constant 0 : index
    %c0_16 = arith.constant 0 : index
    %13 = vector.load %arg5[%c0_15, %c0_16] : memref<80x128xf32, #tpu.memory_space<vmem>>, vector<80x128xf32>
    tpu.vector_store %arg5[%c0_15, %c0_16], %12 {strides = array<i32>} : memref<80x128xf32, #tpu.memory_space<vmem>>, vector<80x128xf32>,
    %c0_17 = arith.constant 0 : index
    %c0_18 = arith.constant 0 : index
    %14 = vector.load %arg5[%c0_17, %c0_18] : memref<80x128xf32, #tpu.memory_space<vmem>>, vector<80x128xf32>
    %c0_19 = arith.constant 0 : index
    %c2 = arith.constant 2 : index
    %c0_20 = arith.constant 0 : index
    %15 = vector.load %arg1[%c0_19, %c2, %c0_20] : memref<1x110x128xbf16, #tpu.memory_space<vmem>>, vector<1x80x128xbf16>
    %16 = vector.shape_cast %15 : vector<1x80x128xbf16> to vector<80x128xbf16>
    %c2_21 = arith.constant 2 : index
    %c0_22 = arith.constant 0 : index
    %c0_23 = arith.constant 0 : index
    %17 = vector.load %arg2[%c2_21, %c0_22, %c0_23] : memref<9x128x128xbf16, #tpu.memory_space<vmem>>, vector<1x128x128xbf16>
    %18 = vector.shape_cast %17 : vector<1x128x128xbf16> to vector<128x128xbf16>
    %cst_24 = arith.constant dense<0.000000e+00> : vector<80x128xf32>
    %19 = tpu.matmul %16, %18, %cst_24 {dimension_numbers = #tpu.dot_dimension_numbers<[1], [0], [0], [1], [0, 0, 1, 1], [], []>} : vector<80x128xbf16>, vector<128x128xbf16>, vector<80x128xf32> -> vector<80x128xf32>
    %20 = arith.addf %14, %19 : vector<80x128xf32>
    %c0_25 = arith.constant 0 : index
    %c0_26 = arith.constant 0 : index
    %21 = vector.load %arg5[%c0_25, %c0_26] : memref<80x128xf32, #tpu.memory_space<vmem>>, vector<80x128xf32>
    tpu.vector_store %arg5[%c0_25, %c0_26], %20 {strides = array<i32>} : memref<80x128xf32, #tpu.memory_space<vmem>>, vector<80x128xf32>,
    %c0_27 = arith.constant 0 : index
    %c0_28 = arith.constant 0 : index
    %22 = vector.load %arg5[%c0_27, %c0_28] : memref<80x128xf32, #tpu.memory_space<vmem>>, vector<80x128xf32>
    %c0_29 = arith.constant 0 : index
    %c10 = arith.constant 10 : index
    %c0_30 = arith.constant 0 : index
    %23 = vector.load %arg1[%c0_29, %c10, %c0_30] : memref<1x110x128xbf16, #tpu.memory_space<vmem>>, vector<1x80x128xbf16>
    %24 = vector.shape_cast %23 : vector<1x80x128xbf16> to vector<80x128xbf16>
    %c3 = arith.constant 3 : index
    %c0_31 = arith.constant 0 : index
    %c0_32 = arith.constant 0 : index
    %25 = vector.load %arg2[%c3, %c0_31, %c0_32] : memref<9x128x128xbf16, #tpu.memory_space<vmem>>, vector<1x128x128xbf16>
    %26 = vector.shape_cast %25 : vector<1x128x128xbf16> to vector<128x128xbf16>
    %cst_33 = arith.constant dense<0.000000e+00> : vector<80x128xf32>
    %27 = tpu.matmul %24, %26, %cst_33 {dimension_numbers = #tpu.dot_dimension_numbers<[1], [0], [0], [1], [0, 0, 1, 1], [], []>} : vector<80x128xbf16>, vector<128x128xbf16>, vector<80x128xf32> -> vector<80x128xf32>
    %28 = arith.addf %22, %27 : vector<80x128xf32>
    %c0_34 = arith.constant 0 : index
    %c0_35 = arith.constant 0 : index
    %29 = vector.load %arg5[%c0_34, %c0_35] : memref<80x128xf32, #tpu.memory_space<vmem>>, vector<80x128xf32>
    tpu.vector_store %arg5[%c0_34, %c0_35], %28 {strides = array<i32>} : memref<80x128xf32, #tpu.memory_space<vmem>>, vector<80x128xf32>,
    %c0_36 = arith.constant 0 : index
    %c0_37 = arith.constant 0 : index
    %30 = vector.load %arg5[%c0_36, %c0_37] : memref<80x128xf32, #tpu.memory_space<vmem>>, vector<80x128xf32>
    %c0_38 = arith.constant 0 : index
    %c11 = arith.constant 11 : index
    %c0_39 = arith.constant 0 : index
    %31 = vector.load %arg1[%c0_38, %c11, %c0_39] : memref<1x110x128xbf16, #tpu.memory_space<vmem>>, vector<1x80x128xbf16>
    %32 = vector.shape_cast %31 : vector<1x80x128xbf16> to vector<80x128xbf16>
    %c4 = arith.constant 4 : index
    %c0_40 = arith.constant 0 : index
    %c0_41 = arith.constant 0 : index
    %33 = vector.load %arg2[%c4, %c0_40, %c0_41] : memref<9x128x128xbf16, #tpu.memory_space<vmem>>, vector<1x128x128xbf16>
    %34 = vector.shape_cast %33 : vector<1x128x128xbf16> to vector<128x128xbf16>
    %cst_42 = arith.constant dense<0.000000e+00> : vector<80x128xf32>
    %35 = tpu.matmul %32, %34, %cst_42 {dimension_numbers = #tpu.dot_dimension_numbers<[1], [0], [0], [1], [0, 0, 1, 1], [], []>} : vector<80x128xbf16>, vector<128x128xbf16>, vector<80x128xf32> -> vector<80x128xf32>
    %36 = arith.addf %30, %35 : vector<80x128xf32>
    %c0_43 = arith.constant 0 : index
    %c0_44 = arith.constant 0 : index
    %37 = vector.load %arg5[%c0_43, %c0_44] : memref<80x128xf32, #tpu.memory_space<vmem>>, vector<80x128xf32>
    tpu.vector_store %arg5[%c0_43, %c0_44], %36 {strides = array<i32>} : memref<80x128xf32, #tpu.memory_space<vmem>>, vector<80x128xf32>,
    %c0_45 = arith.constant 0 : index
    %c0_46 = arith.constant 0 : index
    %38 = vector.load %arg5[%c0_45, %c0_46] : memref<80x128xf32, #tpu.memory_space<vmem>>, vector<80x128xf32>
    %c0_47 = arith.constant 0 : index
    %c12 = arith.constant 12 : index
    %c0_48 = arith.constant 0 : index
    %39 = vector.load %arg1[%c0_47, %c12, %c0_48] : memref<1x110x128xbf16, #tpu.memory_space<vmem>>, vector<1x80x128xbf16>
    %40 = vector.shape_cast %39 : vector<1x80x128xbf16> to vector<80x128xbf16>
    %c5 = arith.constant 5 : index
    %c0_49 = arith.constant 0 : index
    %c0_50 = arith.constant 0 : index
    %41 = vector.load %arg2[%c5, %c0_49, %c0_50] : memref<9x128x128xbf16, #tpu.memory_space<vmem>>, vector<1x128x128xbf16>
    %42 = vector.shape_cast %41 : vector<1x128x128xbf16> to vector<128x128xbf16>
    %cst_51 = arith.constant dense<0.000000e+00> : vector<80x128xf32>
    %43 = tpu.matmul %40, %42, %cst_51 {dimension_numbers = #tpu.dot_dimension_numbers<[1], [0], [0], [1], [0, 0, 1, 1], [], []>} : vector<80x128xbf16>, vector<128x128xbf16>, vector<80x128xf32> -> vector<80x128xf32>
    %44 = arith.addf %38, %43 : vector<80x128xf32>
    %c0_52 = arith.constant 0 : index
    %c0_53 = arith.constant 0 : index
    %45 = vector.load %arg5[%c0_52, %c0_53] : memref<80x128xf32, #tpu.memory_space<vmem>>, vector<80x128xf32>
    tpu.vector_store %arg5[%c0_52, %c0_53], %44 {strides = array<i32>} : memref<80x128xf32, #tpu.memory_space<vmem>>, vector<80x128xf32>,
    %c0_54 = arith.constant 0 : index
    %c0_55 = arith.constant 0 : index
    %46 = vector.load %arg5[%c0_54, %c0_55] : memref<80x128xf32, #tpu.memory_space<vmem>>, vector<80x128xf32>
    %c0_56 = arith.constant 0 : index
    %c20 = arith.constant 20 : index
    %c0_57 = arith.constant 0 : index
    %47 = vector.load %arg1[%c0_56, %c20, %c0_57] : memref<1x110x128xbf16, #tpu.memory_space<vmem>>, vector<1x80x128xbf16>
    %48 = vector.shape_cast %47 : vector<1x80x128xbf16> to vector<80x128xbf16>
    %c6 = arith.constant 6 : index
    %c0_58 = arith.constant 0 : index
    %c0_59 = arith.constant 0 : index
    %49 = vector.load %arg2[%c6, %c0_58, %c0_59] : memref<9x128x128xbf16, #tpu.memory_space<vmem>>, vector<1x128x128xbf16>
    %50 = vector.shape_cast %49 : vector<1x128x128xbf16> to vector<128x128xbf16>
    %cst_60 = arith.constant dense<0.000000e+00> : vector<80x128xf32>
    %51 = tpu.matmul %48, %50, %cst_60 {dimension_numbers = #tpu.dot_dimension_numbers<[1], [0], [0], [1], [0, 0, 1, 1], [], []>} : vector<80x128xbf16>, vector<128x128xbf16>, vector<80x128xf32> -> vector<80x128xf32>
    %52 = arith.addf %46, %51 : vector<80x128xf32>
    %c0_61 = arith.constant 0 : index
    %c0_62 = arith.constant 0 : index
    %53 = vector.load %arg5[%c0_61, %c0_62] : memref<80x128xf32, #tpu.memory_space<vmem>>, vector<80x128xf32>
    tpu.vector_store %arg5[%c0_61, %c0_62], %52 {strides = array<i32>} : memref<80x128xf32, #tpu.memory_space<vmem>>, vector<80x128xf32>,
    %c0_63 = arith.constant 0 : index
    %c0_64 = arith.constant 0 : index
    %54 = vector.load %arg5[%c0_63, %c0_64] : memref<80x128xf32, #tpu.memory_space<vmem>>, vector<80x128xf32>
    %c0_65 = arith.constant 0 : index
    %c21 = arith.constant 21 : index
    %c0_66 = arith.constant 0 : index
    %55 = vector.load %arg1[%c0_65, %c21, %c0_66] : memref<1x110x128xbf16, #tpu.memory_space<vmem>>, vector<1x80x128xbf16>
    %56 = vector.shape_cast %55 : vector<1x80x128xbf16> to vector<80x128xbf16>
    %c7 = arith.constant 7 : index
    %c0_67 = arith.constant 0 : index
    %c0_68 = arith.constant 0 : index
    %57 = vector.load %arg2[%c7, %c0_67, %c0_68] : memref<9x128x128xbf16, #tpu.memory_space<vmem>>, vector<1x128x128xbf16>
    %58 = vector.shape_cast %57 : vector<1x128x128xbf16> to vector<128x128xbf16>
    %cst_69 = arith.constant dense<0.000000e+00> : vector<80x128xf32>
    %59 = tpu.matmul %56, %58, %cst_69 {dimension_numbers = #tpu.dot_dimension_numbers<[1], [0], [0], [1], [0, 0, 1, 1], [], []>} : vector<80x128xbf16>, vector<128x128xbf16>, vector<80x128xf32> -> vector<80x128xf32>
    %60 = arith.addf %54, %59 : vector<80x128xf32>
    %c0_70 = arith.constant 0 : index
    %c0_71 = arith.constant 0 : index
    %61 = vector.load %arg5[%c0_70, %c0_71] : memref<80x128xf32, #tpu.memory_space<vmem>>, vector<80x128xf32>
    tpu.vector_store %arg5[%c0_70, %c0_71], %60 {strides = array<i32>} : memref<80x128xf32, #tpu.memory_space<vmem>>, vector<80x128xf32>,
    %c0_72 = arith.constant 0 : index
    %c0_73 = arith.constant 0 : index
    %62 = vector.load %arg5[%c0_72, %c0_73] : memref<80x128xf32, #tpu.memory_space<vmem>>, vector<80x128xf32>
    %c0_74 = arith.constant 0 : index
    %c22 = arith.constant 22 : index
    %c0_75 = arith.constant 0 : index
    %63 = vector.load %arg1[%c0_74, %c22, %c0_75] : memref<1x110x128xbf16, #tpu.memory_space<vmem>>, vector<1x80x128xbf16>
    %64 = vector.shape_cast %63 : vector<1x80x128xbf16> to vector<80x128xbf16>
    %c8 = arith.constant 8 : index
    %c0_76 = arith.constant 0 : index
    %c0_77 = arith.constant 0 : index
    %65 = vector.load %arg2[%c8, %c0_76, %c0_77] : memref<9x128x128xbf16, #tpu.memory_space<vmem>>, vector<1x128x128xbf16>
    %66 = vector.shape_cast %65 : vector<1x128x128xbf16> to vector<128x128xbf16>
    %cst_78 = arith.constant dense<0.000000e+00> : vector<80x128xf32>
    %67 = tpu.matmul %64, %66, %cst_78 {dimension_numbers = #tpu.dot_dimension_numbers<[1], [0], [0], [1], [0, 0, 1, 1], [], []>} : vector<80x128xbf16>, vector<128x128xbf16>, vector<80x128xf32> -> vector<80x128xf32>
    %68 = arith.addf %62, %67 : vector<80x128xf32>
    %c0_79 = arith.constant 0 : index
    %c0_80 = arith.constant 0 : index
    %69 = vector.load %arg5[%c0_79, %c0_80] : memref<80x128xf32, #tpu.memory_space<vmem>>, vector<80x128xf32>
    tpu.vector_store %arg5[%c0_79, %c0_80], %68 {strides = array<i32>} : memref<80x128xf32, #tpu.memory_space<vmem>>, vector<80x128xf32>,
    %c0_81 = arith.constant 0 : index
    %c0_82 = arith.constant 0 : index
    %70 = vector.load %arg5[%c0_81, %c0_82] : memref<80x128xf32, #tpu.memory_space<vmem>>, vector<80x128xf32>
    %c0_83 = arith.constant 0 : index
    %c0_84 = arith.constant 0 : index
    %71 = vector.load %arg3[%c0_83, %c0_84] : memref<1x128xf32, #tpu.memory_space<vmem>>, vector<1x128xf32>
    %72 = vector.broadcast %71 : vector<1x128xf32> to vector<80x128xf32>
    %73 = arith.addf %70, %72 : vector<80x128xf32>
    %cst_85 = arith.constant 0.000000e+00 : f32
    %74 = vector.broadcast %cst_85 : f32 to vector<80x128xf32>
    %75 = arith.maximumf %73, %74 : vector<80x128xf32>
    %76 = arith.truncf %75 : vector<80x128xf32> to vector<80x128xbf16>
    %77 = vector.extract_strided_slice %76 {offsets = [0, 0], sizes = [8, 128], strides = [1, 1]} : vector<80x128xbf16> to vector<8x128xbf16>
    %c0_86 = arith.constant 0 : index
    %c0_87 = arith.constant 0 : index
    %c0_88 = arith.constant 0 : index
    %c0_89 = arith.constant 0 : index
    %78 = vector.load %arg4[%c0_86, %c0_87, %c0_88, %c0_89] : memref<1x8x8x128xbf16, #tpu.memory_space<vmem>>, vector<1x1x8x128xbf16>
    %79 = vector.shape_cast %78 : vector<1x1x8x128xbf16> to vector<8x128xbf16>
    %80 = vector.shape_cast %77 : vector<8x128xbf16> to vector<1x1x8x128xbf16>
    tpu.vector_store %arg4[%c0_86, %c0_87, %c0_88, %c0_89], %80 {strides = array<i32>} : memref<1x8x8x128xbf16, #tpu.memory_space<vmem>>, vector<1x1x8x128xbf16>,
    %81 = vector.extract_strided_slice %76 {offsets = [10, 0], sizes = [8, 128], strides = [1, 1]} : vector<80x128xbf16> to vector<8x128xbf16>
    %c0_90 = arith.constant 0 : index
    %c1_91 = arith.constant 1 : index
    %c0_92 = arith.constant 0 : index
    %c0_93 = arith.constant 0 : index
    %82 = vector.load %arg4[%c0_90, %c1_91, %c0_92, %c0_93] : memref<1x8x8x128xbf16, #tpu.memory_space<vmem>>, vector<1x1x8x128xbf16>
    %83 = vector.shape_cast %82 : vector<1x1x8x128xbf16> to vector<8x128xbf16>
    %84 = vector.shape_cast %81 : vector<8x128xbf16> to vector<1x1x8x128xbf16>
    tpu.vector_store %arg4[%c0_90, %c1_91, %c0_92, %c0_93], %84 {strides = array<i32>} : memref<1x8x8x128xbf16, #tpu.memory_space<vmem>>, vector<1x1x8x128xbf16>,
    %85 = vector.extract_strided_slice %76 {offsets = [20, 0], sizes = [8, 128], strides = [1, 1]} : vector<80x128xbf16> to vector<8x128xbf16>
    %c0_94 = arith.constant 0 : index
    %c2_95 = arith.constant 2 : index
    %c0_96 = arith.constant 0 : index
    %c0_97 = arith.constant 0 : index
    %86 = vector.load %arg4[%c0_94, %c2_95, %c0_96, %c0_97] : memref<1x8x8x128xbf16, #tpu.memory_space<vmem>>, vector<1x1x8x128xbf16>
    %87 = vector.shape_cast %86 : vector<1x1x8x128xbf16> to vector<8x128xbf16>
    %88 = vector.shape_cast %85 : vector<8x128xbf16> to vector<1x1x8x128xbf16>
    tpu.vector_store %arg4[%c0_94, %c2_95, %c0_96, %c0_97], %88 {strides = array<i32>} : memref<1x8x8x128xbf16, #tpu.memory_space<vmem>>, vector<1x1x8x128xbf16>,
    %89 = vector.extract_strided_slice %76 {offsets = [30, 0], sizes = [8, 128], strides = [1, 1]} : vector<80x128xbf16> to vector<8x128xbf16>
    %c0_98 = arith.constant 0 : index
    %c3_99 = arith.constant 3 : index
    %c0_100 = arith.constant 0 : index
    %c0_101 = arith.constant 0 : index
    %90 = vector.load %arg4[%c0_98, %c3_99, %c0_100, %c0_101] : memref<1x8x8x128xbf16, #tpu.memory_space<vmem>>, vector<1x1x8x128xbf16>
    %91 = vector.shape_cast %90 : vector<1x1x8x128xbf16> to vector<8x128xbf16>
    %92 = vector.shape_cast %89 : vector<8x128xbf16> to vector<1x1x8x128xbf16>
    tpu.vector_store %arg4[%c0_98, %c3_99, %c0_100, %c0_101], %92 {strides = array<i32>} : memref<1x8x8x128xbf16, #tpu.memory_space<vmem>>, vector<1x1x8x128xbf16>,
    %93 = vector.extract_strided_slice %76 {offsets = [40, 0], sizes = [8, 128], strides = [1, 1]} : vector<80x128xbf16> to vector<8x128xbf16>
    %c0_102 = arith.constant 0 : index
    %c4_103 = arith.constant 4 : index
    %c0_104 = arith.constant 0 : index
    %c0_105 = arith.constant 0 : index
    %94 = vector.load %arg4[%c0_102, %c4_103, %c0_104, %c0_105] : memref<1x8x8x128xbf16, #tpu.memory_space<vmem>>, vector<1x1x8x128xbf16>
    %95 = vector.shape_cast %94 : vector<1x1x8x128xbf16> to vector<8x128xbf16>
    %96 = vector.shape_cast %93 : vector<8x128xbf16> to vector<1x1x8x128xbf16>
    tpu.vector_store %arg4[%c0_102, %c4_103, %c0_104, %c0_105], %96 {strides = array<i32>} : memref<1x8x8x128xbf16, #tpu.memory_space<vmem>>, vector<1x1x8x128xbf16>,
    %97 = vector.extract_strided_slice %76 {offsets = [50, 0], sizes = [8, 128], strides = [1, 1]} : vector<80x128xbf16> to vector<8x128xbf16>
    %c0_106 = arith.constant 0 : index
    %c5_107 = arith.constant 5 : index
    %c0_108 = arith.constant 0 : index
    %c0_109 = arith.constant 0 : index
    %98 = vector.load %arg4[%c0_106, %c5_107, %c0_108, %c0_109] : memref<1x8x8x128xbf16, #tpu.memory_space<vmem>>, vector<1x1x8x128xbf16>
    %99 = vector.shape_cast %98 : vector<1x1x8x128xbf16> to vector<8x128xbf16>
    %100 = vector.shape_cast %97 : vector<8x128xbf16> to vector<1x1x8x128xbf16>
    tpu.vector_store %arg4[%c0_106, %c5_107, %c0_108, %c0_109], %100 {strides = array<i32>} : memref<1x8x8x128xbf16, #tpu.memory_space<vmem>>, vector<1x1x8x128xbf16>,
    %101 = vector.extract_strided_slice %76 {offsets = [60, 0], sizes = [8, 128], strides = [1, 1]} : vector<80x128xbf16> to vector<8x128xbf16>
    %c0_110 = arith.constant 0 : index
    %c6_111 = arith.constant 6 : index
    %c0_112 = arith.constant 0 : index
    %c0_113 = arith.constant 0 : index
    %102 = vector.load %arg4[%c0_110, %c6_111, %c0_112, %c0_113] : memref<1x8x8x128xbf16, #tpu.memory_space<vmem>>, vector<1x1x8x128xbf16>
    %103 = vector.shape_cast %102 : vector<1x1x8x128xbf16> to vector<8x128xbf16>
    %104 = vector.shape_cast %101 : vector<8x128xbf16> to vector<1x1x8x128xbf16>
    tpu.vector_store %arg4[%c0_110, %c6_111, %c0_112, %c0_113], %104 {strides = array<i32>} : memref<1x8x8x128xbf16, #tpu.memory_space<vmem>>, vector<1x1x8x128xbf16>,
    %105 = vector.extract_strided_slice %76 {offsets = [70, 0], sizes = [8, 128], strides = [1, 1]} : vector<80x128xbf16> to vector<8x128xbf16>
    %c0_114 = arith.constant 0 : index
    %c7_115 = arith.constant 7 : index
    %c0_116 = arith.constant 0 : index
    %c0_117 = arith.constant 0 : index
    %106 = vector.load %arg4[%c0_114, %c7_115, %c0_116, %c0_117] : memref<1x8x8x128xbf16, #tpu.memory_space<vmem>>, vector<1x1x8x128xbf16>
    %107 = vector.shape_cast %106 : vector<1x1x8x128xbf16> to vector<8x128xbf16>
    %108 = vector.shape_cast %105 : vector<8x128xbf16> to vector<1x1x8x128xbf16>
    tpu.vector_store %arg4[%c0_114, %c7_115, %c0_116, %c0_117], %108 {strides = array<i32>} : memref<1x8x8x128xbf16, #tpu.memory_space<vmem>>, vector<1x1x8x128xbf16>,
    return
  }
  func.func @transform_0(%arg0: i32) -> (i32, i32, i32) {
    %c0_i32 = arith.constant 0 : i32
    %c0_i32_0 = arith.constant 0 : i32
    %c0_i32_1 = arith.constant 0 : i32
    return %arg0, %c0_i32, %c0_i32_0 : i32, i32, i32
  }
  func.func @transform_1(%arg0: i32) -> (i32, i32, i32) {
    %c0_i32 = arith.constant 0 : i32
    %c0_i32_0 = arith.constant 0 : i32
    %c0_i32_1 = arith.constant 0 : i32
    %c0_i32_2 = arith.constant 0 : i32
    return %c0_i32, %c0_i32_0, %c0_i32_1 : i32, i32, i32
  }
  func.func @transform_2(%arg0: i32) -> (i32, i32) {
    %c0_i32 = arith.constant 0 : i32
    %c0_i32_0 = arith.constant 0 : i32
    %c0_i32_1 = arith.constant 0 : i32
    return %c0_i32, %c0_i32_0 : i32, i32
  }
  func.func @transform_3(%arg0: i32) -> (i32, i32, i32, i32) {
    %c0_i32 = arith.constant 0 : i32
    %c0_i32_0 = arith.constant 0 : i32
    %c0_i32_1 = arith.constant 0 : i32
    %c0_i32_2 = arith.constant 0 : i32
    return %arg0, %c0_i32, %c0_i32_0, %c0_i32_1 : i32, i32, i32, i32
  }
}

module attributes {stable_mosaic.version = 11 : i64} {
  func.func @_down2_kernel(%arg0: i32, %arg1: memref<4x2x4x256xbf16, #tpu.memory_space<vmem>>, %arg2: memref<2x256x128xbf16, #tpu.memory_space<vmem>>, %arg3: memref<1x128xf32, #tpu.memory_space<vmem>>, %arg4: memref<4x4x128xbf16, #tpu.memory_space<vmem>>) attributes {dimension_semantics = [#tpu.dimension_semantics<parallel>], iteration_bounds = array<i64: 2>, scalar_prefetch = 0 : i64, scratch_operands = 0 : i64, tpu.core_type = #tpu.core_type<tc>, window_params = [{transform_indices = @transform_0, window_bounds = array<i64: 4, 2, 4, 256>}, {pipeline_mode = #tpu.pipeline_mode<synchronous>, transform_indices = @transform_1, window_bounds = array<i64: 2, 256, 128>}, {pipeline_mode = #tpu.pipeline_mode<synchronous>, transform_indices = @transform_2, window_bounds = array<i64: 1, 128>}, {transform_indices = @transform_3, window_bounds = array<i64: 4, 4, 128>}]} {
    %c0 = arith.constant 0 : index
    %c0_0 = arith.constant 0 : index
    %c0_1 = arith.constant 0 : index
    %c0_2 = arith.constant 0 : index
    %0 = vector.load %arg1[%c0, %c0_0, %c0_1, %c0_2] : memref<4x2x4x256xbf16, #tpu.memory_space<vmem>>, vector<4x1x4x256xbf16>
    %1 = vector.shape_cast %0 : vector<4x1x4x256xbf16> to vector<4x4x256xbf16>
    %2 = vector.shape_cast %1 : vector<4x4x256xbf16> to vector<16x256xbf16>
    %c0_3 = arith.constant 0 : index
    %c1 = arith.constant 1 : index
    %c0_4 = arith.constant 0 : index
    %c0_5 = arith.constant 0 : index
    %3 = vector.load %arg1[%c0_3, %c1, %c0_4, %c0_5] : memref<4x2x4x256xbf16, #tpu.memory_space<vmem>>, vector<4x1x4x256xbf16>
    %4 = vector.shape_cast %3 : vector<4x1x4x256xbf16> to vector<4x4x256xbf16>
    %5 = vector.shape_cast %4 : vector<4x4x256xbf16> to vector<16x256xbf16>
    %c0_6 = arith.constant 0 : index
    %c0_7 = arith.constant 0 : index
    %c0_8 = arith.constant 0 : index
    %6 = vector.load %arg2[%c0_6, %c0_7, %c0_8] : memref<2x256x128xbf16, #tpu.memory_space<vmem>>, vector<1x256x128xbf16>
    %7 = vector.shape_cast %6 : vector<1x256x128xbf16> to vector<256x128xbf16>
    %cst = arith.constant dense<0.000000e+00> : vector<16x128xf32>
    %8 = tpu.matmul %2, %7, %cst {dimension_numbers = #tpu.dot_dimension_numbers<[1], [0], [0], [1], [0, 0, 1, 1], [], []>} : vector<16x256xbf16>, vector<256x128xbf16>, vector<16x128xf32> -> vector<16x128xf32>
    %c1_9 = arith.constant 1 : index
    %c0_10 = arith.constant 0 : index
    %c0_11 = arith.constant 0 : index
    %9 = vector.load %arg2[%c1_9, %c0_10, %c0_11] : memref<2x256x128xbf16, #tpu.memory_space<vmem>>, vector<1x256x128xbf16>
    %10 = vector.shape_cast %9 : vector<1x256x128xbf16> to vector<256x128xbf16>
    %cst_12 = arith.constant dense<0.000000e+00> : vector<16x128xf32>
    %11 = tpu.matmul %5, %10, %cst_12 {dimension_numbers = #tpu.dot_dimension_numbers<[1], [0], [0], [1], [0, 0, 1, 1], [], []>} : vector<16x256xbf16>, vector<256x128xbf16>, vector<16x128xf32> -> vector<16x128xf32>
    %12 = arith.addf %8, %11 : vector<16x128xf32>
    %c0_13 = arith.constant 0 : index
    %c0_14 = arith.constant 0 : index
    %13 = vector.load %arg3[%c0_13, %c0_14] : memref<1x128xf32, #tpu.memory_space<vmem>>, vector<1x128xf32>
    %14 = vector.broadcast %13 : vector<1x128xf32> to vector<16x128xf32>
    %15 = arith.addf %12, %14 : vector<16x128xf32>
    %cst_15 = arith.constant 0.000000e+00 : f32
    %16 = vector.broadcast %cst_15 : f32 to vector<16x128xf32>
    %17 = arith.maximumf %15, %16 : vector<16x128xf32>
    %18 = vector.shape_cast %17 : vector<16x128xf32> to vector<4x4x128xf32>
    %19 = arith.truncf %18 : vector<4x4x128xf32> to vector<4x4x128xbf16>
    %c0_16 = arith.constant 0 : index
    %c0_17 = arith.constant 0 : index
    %c0_18 = arith.constant 0 : index
    %20 = vector.load %arg4[%c0_16, %c0_17, %c0_18] : memref<4x4x128xbf16, #tpu.memory_space<vmem>>, vector<4x4x128xbf16>
    tpu.vector_store %arg4[%c0_16, %c0_17, %c0_18], %19 {strides = array<i32>} : memref<4x4x128xbf16, #tpu.memory_space<vmem>>, vector<4x4x128xbf16>,
    return
  }
  func.func @transform_0(%arg0: i32) -> (i32, i32, i32, i32) {
    %c0_i32 = arith.constant 0 : i32
    %c0_i32_0 = arith.constant 0 : i32
    %c0_i32_1 = arith.constant 0 : i32
    %c0_i32_2 = arith.constant 0 : i32
    return %arg0, %c0_i32, %c0_i32_0, %c0_i32_1 : i32, i32, i32, i32
  }
  func.func @transform_1(%arg0: i32) -> (i32, i32, i32) {
    %c0_i32 = arith.constant 0 : i32
    %c0_i32_0 = arith.constant 0 : i32
    %c0_i32_1 = arith.constant 0 : i32
    %c0_i32_2 = arith.constant 0 : i32
    return %c0_i32, %c0_i32_0, %c0_i32_1 : i32, i32, i32
  }
  func.func @transform_2(%arg0: i32) -> (i32, i32) {
    %c0_i32 = arith.constant 0 : i32
    %c0_i32_0 = arith.constant 0 : i32
    %c0_i32_1 = arith.constant 0 : i32
    return %c0_i32, %c0_i32_0 : i32, i32
  }
  func.func @transform_3(%arg0: i32) -> (i32, i32, i32) {
    %c0_i32 = arith.constant 0 : i32
    %c0_i32_0 = arith.constant 0 : i32
    %c0_i32_1 = arith.constant 0 : i32
    return %arg0, %c0_i32, %c0_i32_0 : i32, i32, i32
  }
}

module attributes {stable_mosaic.version = 11 : i64} {
  func.func @_down2_kernel(%arg0: i32, %arg1: memref<2x2x2x256xbf16, #tpu.memory_space<vmem>>, %arg2: memref<2x256x128xbf16, #tpu.memory_space<vmem>>, %arg3: memref<1x128xf32, #tpu.memory_space<vmem>>, %arg4: memref<2x2x128xbf16, #tpu.memory_space<vmem>>) attributes {dimension_semantics = [#tpu.dimension_semantics<parallel>], iteration_bounds = array<i64: 2>, scalar_prefetch = 0 : i64, scratch_operands = 0 : i64, tpu.core_type = #tpu.core_type<tc>, window_params = [{transform_indices = @transform_0, window_bounds = array<i64: 2, 2, 2, 256>}, {pipeline_mode = #tpu.pipeline_mode<synchronous>, transform_indices = @transform_1, window_bounds = array<i64: 2, 256, 128>}, {pipeline_mode = #tpu.pipeline_mode<synchronous>, transform_indices = @transform_2, window_bounds = array<i64: 1, 128>}, {transform_indices = @transform_3, window_bounds = array<i64: 2, 2, 128>}]} {
    %c0 = arith.constant 0 : index
    %c0_0 = arith.constant 0 : index
    %c0_1 = arith.constant 0 : index
    %c0_2 = arith.constant 0 : index
    %0 = vector.load %arg1[%c0, %c0_0, %c0_1, %c0_2] : memref<2x2x2x256xbf16, #tpu.memory_space<vmem>>, vector<2x1x2x256xbf16>
    %1 = vector.shape_cast %0 : vector<2x1x2x256xbf16> to vector<2x2x256xbf16>
    %2 = vector.shape_cast %1 : vector<2x2x256xbf16> to vector<4x256xbf16>
    %c0_3 = arith.constant 0 : index
    %c1 = arith.constant 1 : index
    %c0_4 = arith.constant 0 : index
    %c0_5 = arith.constant 0 : index
    %3 = vector.load %arg1[%c0_3, %c1, %c0_4, %c0_5] : memref<2x2x2x256xbf16, #tpu.memory_space<vmem>>, vector<2x1x2x256xbf16>
    %4 = vector.shape_cast %3 : vector<2x1x2x256xbf16> to vector<2x2x256xbf16>
    %5 = vector.shape_cast %4 : vector<2x2x256xbf16> to vector<4x256xbf16>
    %c0_6 = arith.constant 0 : index
    %c0_7 = arith.constant 0 : index
    %c0_8 = arith.constant 0 : index
    %6 = vector.load %arg2[%c0_6, %c0_7, %c0_8] : memref<2x256x128xbf16, #tpu.memory_space<vmem>>, vector<1x256x128xbf16>
    %7 = vector.shape_cast %6 : vector<1x256x128xbf16> to vector<256x128xbf16>
    %cst = arith.constant dense<0.000000e+00> : vector<4x128xf32>
    %8 = tpu.matmul %2, %7, %cst {dimension_numbers = #tpu.dot_dimension_numbers<[1], [0], [0], [1], [0, 0, 1, 1], [], []>} : vector<4x256xbf16>, vector<256x128xbf16>, vector<4x128xf32> -> vector<4x128xf32>
    %c1_9 = arith.constant 1 : index
    %c0_10 = arith.constant 0 : index
    %c0_11 = arith.constant 0 : index
    %9 = vector.load %arg2[%c1_9, %c0_10, %c0_11] : memref<2x256x128xbf16, #tpu.memory_space<vmem>>, vector<1x256x128xbf16>
    %10 = vector.shape_cast %9 : vector<1x256x128xbf16> to vector<256x128xbf16>
    %cst_12 = arith.constant dense<0.000000e+00> : vector<4x128xf32>
    %11 = tpu.matmul %5, %10, %cst_12 {dimension_numbers = #tpu.dot_dimension_numbers<[1], [0], [0], [1], [0, 0, 1, 1], [], []>} : vector<4x256xbf16>, vector<256x128xbf16>, vector<4x128xf32> -> vector<4x128xf32>
    %12 = arith.addf %8, %11 : vector<4x128xf32>
    %c0_13 = arith.constant 0 : index
    %c0_14 = arith.constant 0 : index
    %13 = vector.load %arg3[%c0_13, %c0_14] : memref<1x128xf32, #tpu.memory_space<vmem>>, vector<1x128xf32>
    %14 = vector.broadcast %13 : vector<1x128xf32> to vector<4x128xf32>
    %15 = arith.addf %12, %14 : vector<4x128xf32>
    %cst_15 = arith.constant 0.000000e+00 : f32
    %16 = vector.broadcast %cst_15 : f32 to vector<4x128xf32>
    %17 = arith.maximumf %15, %16 : vector<4x128xf32>
    %18 = vector.shape_cast %17 : vector<4x128xf32> to vector<2x2x128xf32>
    %19 = arith.truncf %18 : vector<2x2x128xf32> to vector<2x2x128xbf16>
    %c0_16 = arith.constant 0 : index
    %c0_17 = arith.constant 0 : index
    %c0_18 = arith.constant 0 : index
    %20 = vector.load %arg4[%c0_16, %c0_17, %c0_18] : memref<2x2x128xbf16, #tpu.memory_space<vmem>>, vector<2x2x128xbf16>
    tpu.vector_store %arg4[%c0_16, %c0_17, %c0_18], %19 {strides = array<i32>} : memref<2x2x128xbf16, #tpu.memory_space<vmem>>, vector<2x2x128xbf16>,
    return
  }
  func.func @transform_0(%arg0: i32) -> (i32, i32, i32, i32) {
    %c0_i32 = arith.constant 0 : i32
    %c0_i32_0 = arith.constant 0 : i32
    %c0_i32_1 = arith.constant 0 : i32
    %c0_i32_2 = arith.constant 0 : i32
    return %arg0, %c0_i32, %c0_i32_0, %c0_i32_1 : i32, i32, i32, i32
  }
  func.func @transform_1(%arg0: i32) -> (i32, i32, i32) {
    %c0_i32 = arith.constant 0 : i32
    %c0_i32_0 = arith.constant 0 : i32
    %c0_i32_1 = arith.constant 0 : i32
    %c0_i32_2 = arith.constant 0 : i32
    return %c0_i32, %c0_i32_0, %c0_i32_1 : i32, i32, i32
  }
  func.func @transform_2(%arg0: i32) -> (i32, i32) {
    %c0_i32 = arith.constant 0 : i32
    %c0_i32_0 = arith.constant 0 : i32
    %c0_i32_1 = arith.constant 0 : i32
    return %c0_i32, %c0_i32_0 : i32, i32
  }
  func.func @transform_3(%arg0: i32) -> (i32, i32, i32) {
    %c0_i32 = arith.constant 0 : i32
    %c0_i32_0 = arith.constant 0 : i32
    %c0_i32_1 = arith.constant 0 : i32
    return %arg0, %c0_i32, %c0_i32_0 : i32, i32, i32
  }
}

module attributes {stable_mosaic.version = 11 : i64} {
  func.func @_conv3_kernel(%arg0: i32, %arg1: memref<1x42x128xbf16, #tpu.memory_space<vmem>>, %arg2: memref<9x128x128xbf16, #tpu.memory_space<vmem>>, %arg3: memref<1x128xf32, #tpu.memory_space<vmem>>, %arg4: memref<1x4x4x128xbf16, #tpu.memory_space<vmem>>, %arg5: memref<24x128xf32, #tpu.memory_space<vmem>>) attributes {dimension_semantics = [#tpu.dimension_semantics<parallel>], iteration_bounds = array<i64: 2>, scalar_prefetch = 0 : i64, scratch_operands = 1 : i64, tpu.core_type = #tpu.core_type<tc>, window_params = [{transform_indices = @transform_0, window_bounds = array<i64: 1, 42, 128>}, {pipeline_mode = #tpu.pipeline_mode<synchronous>, transform_indices = @transform_1, window_bounds = array<i64: 9, 128, 128>}, {pipeline_mode = #tpu.pipeline_mode<synchronous>, transform_indices = @transform_2, window_bounds = array<i64: 1, 128>}, {transform_indices = @transform_3, window_bounds = array<i64: 1, 4, 4, 128>}]} {
    %c0 = arith.constant 0 : index
    %c0_0 = arith.constant 0 : index
    %c0_1 = arith.constant 0 : index
    %0 = vector.load %arg1[%c0, %c0_0, %c0_1] : memref<1x42x128xbf16, #tpu.memory_space<vmem>>, vector<1x24x128xbf16>
    %1 = vector.shape_cast %0 : vector<1x24x128xbf16> to vector<24x128xbf16>
    %c0_2 = arith.constant 0 : index
    %c0_3 = arith.constant 0 : index
    %c0_4 = arith.constant 0 : index
    %2 = vector.load %arg2[%c0_2, %c0_3, %c0_4] : memref<9x128x128xbf16, #tpu.memory_space<vmem>>, vector<1x128x128xbf16>
    %3 = vector.shape_cast %2 : vector<1x128x128xbf16> to vector<128x128xbf16>
    %cst = arith.constant dense<0.000000e+00> : vector<24x128xf32>
    %4 = tpu.matmul %1, %3, %cst {dimension_numbers = #tpu.dot_dimension_numbers<[1], [0], [0], [1], [0, 0, 1, 1], [], []>} : vector<24x128xbf16>, vector<128x128xbf16>, vector<24x128xf32> -> vector<24x128xf32>
    %c0_5 = arith.constant 0 : index
    %c0_6 = arith.constant 0 : index
    %5 = vector.load %arg5[%c0_5, %c0_6] : memref<24x128xf32, #tpu.memory_space<vmem>>, vector<24x128xf32>
    tpu.vector_store %arg5[%c0_5, %c0_6], %4 {strides = array<i32>} : memref<24x128xf32, #tpu.memory_space<vmem>>, vector<24x128xf32>,
    %c0_7 = arith.constant 0 : index
    %c0_8 = arith.constant 0 : index
    %6 = vector.load %arg5[%c0_7, %c0_8] : memref<24x128xf32, #tpu.memory_space<vmem>>, vector<24x128xf32>
    %c0_9 = arith.constant 0 : index
    %c1 = arith.constant 1 : index
    %c0_10 = arith.constant 0 : index
    %7 = vector.load %arg1[%c0_9, %c1, %c0_10] : memref<1x42x128xbf16, #tpu.memory_space<vmem>>, vector<1x24x128xbf16>
    %8 = vector.shape_cast %7 : vector<1x24x128xbf16> to vector<24x128xbf16>
    %c1_11 = arith.constant 1 : index
    %c0_12 = arith.constant 0 : index
    %c0_13 = arith.constant 0 : index
    %9 = vector.load %arg2[%c1_11, %c0_12, %c0_13] : memref<9x128x128xbf16, #tpu.memory_space<vmem>>, vector<1x128x128xbf16>
    %10 = vector.shape_cast %9 : vector<1x128x128xbf16> to vector<128x128xbf16>
    %cst_14 = arith.constant dense<0.000000e+00> : vector<24x128xf32>
    %11 = tpu.matmul %8, %10, %cst_14 {dimension_numbers = #tpu.dot_dimension_numbers<[1], [0], [0], [1], [0, 0, 1, 1], [], []>} : vector<24x128xbf16>, vector<128x128xbf16>, vector<24x128xf32> -> vector<24x128xf32>
    %12 = arith.addf %6, %11 : vector<24x128xf32>
    %c0_15 = arith.constant 0 : index
    %c0_16 = arith.constant 0 : index
    %13 = vector.load %arg5[%c0_15, %c0_16] : memref<24x128xf32, #tpu.memory_space<vmem>>, vector<24x128xf32>
    tpu.vector_store %arg5[%c0_15, %c0_16], %12 {strides = array<i32>} : memref<24x128xf32, #tpu.memory_space<vmem>>, vector<24x128xf32>,
    %c0_17 = arith.constant 0 : index
    %c0_18 = arith.constant 0 : index
    %14 = vector.load %arg5[%c0_17, %c0_18] : memref<24x128xf32, #tpu.memory_space<vmem>>, vector<24x128xf32>
    %c0_19 = arith.constant 0 : index
    %c2 = arith.constant 2 : index
    %c0_20 = arith.constant 0 : index
    %15 = vector.load %arg1[%c0_19, %c2, %c0_20] : memref<1x42x128xbf16, #tpu.memory_space<vmem>>, vector<1x24x128xbf16>
    %16 = vector.shape_cast %15 : vector<1x24x128xbf16> to vector<24x128xbf16>
    %c2_21 = arith.constant 2 : index
    %c0_22 = arith.constant 0 : index
    %c0_23 = arith.constant 0 : index
    %17 = vector.load %arg2[%c2_21, %c0_22, %c0_23] : memref<9x128x128xbf16, #tpu.memory_space<vmem>>, vector<1x128x128xbf16>
    %18 = vector.shape_cast %17 : vector<1x128x128xbf16> to vector<128x128xbf16>
    %cst_24 = arith.constant dense<0.000000e+00> : vector<24x128xf32>
    %19 = tpu.matmul %16, %18, %cst_24 {dimension_numbers = #tpu.dot_dimension_numbers<[1], [0], [0], [1], [0, 0, 1, 1], [], []>} : vector<24x128xbf16>, vector<128x128xbf16>, vector<24x128xf32> -> vector<24x128xf32>
    %20 = arith.addf %14, %19 : vector<24x128xf32>
    %c0_25 = arith.constant 0 : index
    %c0_26 = arith.constant 0 : index
    %21 = vector.load %arg5[%c0_25, %c0_26] : memref<24x128xf32, #tpu.memory_space<vmem>>, vector<24x128xf32>
    tpu.vector_store %arg5[%c0_25, %c0_26], %20 {strides = array<i32>} : memref<24x128xf32, #tpu.memory_space<vmem>>, vector<24x128xf32>,
    %c0_27 = arith.constant 0 : index
    %c0_28 = arith.constant 0 : index
    %22 = vector.load %arg5[%c0_27, %c0_28] : memref<24x128xf32, #tpu.memory_space<vmem>>, vector<24x128xf32>
    %c0_29 = arith.constant 0 : index
    %c6 = arith.constant 6 : index
    %c0_30 = arith.constant 0 : index
    %23 = vector.load %arg1[%c0_29, %c6, %c0_30] : memref<1x42x128xbf16, #tpu.memory_space<vmem>>, vector<1x24x128xbf16>
    %24 = vector.shape_cast %23 : vector<1x24x128xbf16> to vector<24x128xbf16>
    %c3 = arith.constant 3 : index
    %c0_31 = arith.constant 0 : index
    %c0_32 = arith.constant 0 : index
    %25 = vector.load %arg2[%c3, %c0_31, %c0_32] : memref<9x128x128xbf16, #tpu.memory_space<vmem>>, vector<1x128x128xbf16>
    %26 = vector.shape_cast %25 : vector<1x128x128xbf16> to vector<128x128xbf16>
    %cst_33 = arith.constant dense<0.000000e+00> : vector<24x128xf32>
    %27 = tpu.matmul %24, %26, %cst_33 {dimension_numbers = #tpu.dot_dimension_numbers<[1], [0], [0], [1], [0, 0, 1, 1], [], []>} : vector<24x128xbf16>, vector<128x128xbf16>, vector<24x128xf32> -> vector<24x128xf32>
    %28 = arith.addf %22, %27 : vector<24x128xf32>
    %c0_34 = arith.constant 0 : index
    %c0_35 = arith.constant 0 : index
    %29 = vector.load %arg5[%c0_34, %c0_35] : memref<24x128xf32, #tpu.memory_space<vmem>>, vector<24x128xf32>
    tpu.vector_store %arg5[%c0_34, %c0_35], %28 {strides = array<i32>} : memref<24x128xf32, #tpu.memory_space<vmem>>, vector<24x128xf32>,
    %c0_36 = arith.constant 0 : index
    %c0_37 = arith.constant 0 : index
    %30 = vector.load %arg5[%c0_36, %c0_37] : memref<24x128xf32, #tpu.memory_space<vmem>>, vector<24x128xf32>
    %c0_38 = arith.constant 0 : index
    %c7 = arith.constant 7 : index
    %c0_39 = arith.constant 0 : index
    %31 = vector.load %arg1[%c0_38, %c7, %c0_39] : memref<1x42x128xbf16, #tpu.memory_space<vmem>>, vector<1x24x128xbf16>
    %32 = vector.shape_cast %31 : vector<1x24x128xbf16> to vector<24x128xbf16>
    %c4 = arith.constant 4 : index
    %c0_40 = arith.constant 0 : index
    %c0_41 = arith.constant 0 : index
    %33 = vector.load %arg2[%c4, %c0_40, %c0_41] : memref<9x128x128xbf16, #tpu.memory_space<vmem>>, vector<1x128x128xbf16>
    %34 = vector.shape_cast %33 : vector<1x128x128xbf16> to vector<128x128xbf16>
    %cst_42 = arith.constant dense<0.000000e+00> : vector<24x128xf32>
    %35 = tpu.matmul %32, %34, %cst_42 {dimension_numbers = #tpu.dot_dimension_numbers<[1], [0], [0], [1], [0, 0, 1, 1], [], []>} : vector<24x128xbf16>, vector<128x128xbf16>, vector<24x128xf32> -> vector<24x128xf32>
    %36 = arith.addf %30, %35 : vector<24x128xf32>
    %c0_43 = arith.constant 0 : index
    %c0_44 = arith.constant 0 : index
    %37 = vector.load %arg5[%c0_43, %c0_44] : memref<24x128xf32, #tpu.memory_space<vmem>>, vector<24x128xf32>
    tpu.vector_store %arg5[%c0_43, %c0_44], %36 {strides = array<i32>} : memref<24x128xf32, #tpu.memory_space<vmem>>, vector<24x128xf32>,
    %c0_45 = arith.constant 0 : index
    %c0_46 = arith.constant 0 : index
    %38 = vector.load %arg5[%c0_45, %c0_46] : memref<24x128xf32, #tpu.memory_space<vmem>>, vector<24x128xf32>
    %c0_47 = arith.constant 0 : index
    %c8 = arith.constant 8 : index
    %c0_48 = arith.constant 0 : index
    %39 = vector.load %arg1[%c0_47, %c8, %c0_48] : memref<1x42x128xbf16, #tpu.memory_space<vmem>>, vector<1x24x128xbf16>
    %40 = vector.shape_cast %39 : vector<1x24x128xbf16> to vector<24x128xbf16>
    %c5 = arith.constant 5 : index
    %c0_49 = arith.constant 0 : index
    %c0_50 = arith.constant 0 : index
    %41 = vector.load %arg2[%c5, %c0_49, %c0_50] : memref<9x128x128xbf16, #tpu.memory_space<vmem>>, vector<1x128x128xbf16>
    %42 = vector.shape_cast %41 : vector<1x128x128xbf16> to vector<128x128xbf16>
    %cst_51 = arith.constant dense<0.000000e+00> : vector<24x128xf32>
    %43 = tpu.matmul %40, %42, %cst_51 {dimension_numbers = #tpu.dot_dimension_numbers<[1], [0], [0], [1], [0, 0, 1, 1], [], []>} : vector<24x128xbf16>, vector<128x128xbf16>, vector<24x128xf32> -> vector<24x128xf32>
    %44 = arith.addf %38, %43 : vector<24x128xf32>
    %c0_52 = arith.constant 0 : index
    %c0_53 = arith.constant 0 : index
    %45 = vector.load %arg5[%c0_52, %c0_53] : memref<24x128xf32, #tpu.memory_space<vmem>>, vector<24x128xf32>
    tpu.vector_store %arg5[%c0_52, %c0_53], %44 {strides = array<i32>} : memref<24x128xf32, #tpu.memory_space<vmem>>, vector<24x128xf32>,
    %c0_54 = arith.constant 0 : index
    %c0_55 = arith.constant 0 : index
    %46 = vector.load %arg5[%c0_54, %c0_55] : memref<24x128xf32, #tpu.memory_space<vmem>>, vector<24x128xf32>
    %c0_56 = arith.constant 0 : index
    %c12 = arith.constant 12 : index
    %c0_57 = arith.constant 0 : index
    %47 = vector.load %arg1[%c0_56, %c12, %c0_57] : memref<1x42x128xbf16, #tpu.memory_space<vmem>>, vector<1x24x128xbf16>
    %48 = vector.shape_cast %47 : vector<1x24x128xbf16> to vector<24x128xbf16>
    %c6_58 = arith.constant 6 : index
    %c0_59 = arith.constant 0 : index
    %c0_60 = arith.constant 0 : index
    %49 = vector.load %arg2[%c6_58, %c0_59, %c0_60] : memref<9x128x128xbf16, #tpu.memory_space<vmem>>, vector<1x128x128xbf16>
    %50 = vector.shape_cast %49 : vector<1x128x128xbf16> to vector<128x128xbf16>
    %cst_61 = arith.constant dense<0.000000e+00> : vector<24x128xf32>
    %51 = tpu.matmul %48, %50, %cst_61 {dimension_numbers = #tpu.dot_dimension_numbers<[1], [0], [0], [1], [0, 0, 1, 1], [], []>} : vector<24x128xbf16>, vector<128x128xbf16>, vector<24x128xf32> -> vector<24x128xf32>
    %52 = arith.addf %46, %51 : vector<24x128xf32>
    %c0_62 = arith.constant 0 : index
    %c0_63 = arith.constant 0 : index
    %53 = vector.load %arg5[%c0_62, %c0_63] : memref<24x128xf32, #tpu.memory_space<vmem>>, vector<24x128xf32>
    tpu.vector_store %arg5[%c0_62, %c0_63], %52 {strides = array<i32>} : memref<24x128xf32, #tpu.memory_space<vmem>>, vector<24x128xf32>,
    %c0_64 = arith.constant 0 : index
    %c0_65 = arith.constant 0 : index
    %54 = vector.load %arg5[%c0_64, %c0_65] : memref<24x128xf32, #tpu.memory_space<vmem>>, vector<24x128xf32>
    %c0_66 = arith.constant 0 : index
    %c13 = arith.constant 13 : index
    %c0_67 = arith.constant 0 : index
    %55 = vector.load %arg1[%c0_66, %c13, %c0_67] : memref<1x42x128xbf16, #tpu.memory_space<vmem>>, vector<1x24x128xbf16>
    %56 = vector.shape_cast %55 : vector<1x24x128xbf16> to vector<24x128xbf16>
    %c7_68 = arith.constant 7 : index
    %c0_69 = arith.constant 0 : index
    %c0_70 = arith.constant 0 : index
    %57 = vector.load %arg2[%c7_68, %c0_69, %c0_70] : memref<9x128x128xbf16, #tpu.memory_space<vmem>>, vector<1x128x128xbf16>
    %58 = vector.shape_cast %57 : vector<1x128x128xbf16> to vector<128x128xbf16>
    %cst_71 = arith.constant dense<0.000000e+00> : vector<24x128xf32>
    %59 = tpu.matmul %56, %58, %cst_71 {dimension_numbers = #tpu.dot_dimension_numbers<[1], [0], [0], [1], [0, 0, 1, 1], [], []>} : vector<24x128xbf16>, vector<128x128xbf16>, vector<24x128xf32> -> vector<24x128xf32>
    %60 = arith.addf %54, %59 : vector<24x128xf32>
    %c0_72 = arith.constant 0 : index
    %c0_73 = arith.constant 0 : index
    %61 = vector.load %arg5[%c0_72, %c0_73] : memref<24x128xf32, #tpu.memory_space<vmem>>, vector<24x128xf32>
    tpu.vector_store %arg5[%c0_72, %c0_73], %60 {strides = array<i32>} : memref<24x128xf32, #tpu.memory_space<vmem>>, vector<24x128xf32>,
    %c0_74 = arith.constant 0 : index
    %c0_75 = arith.constant 0 : index
    %62 = vector.load %arg5[%c0_74, %c0_75] : memref<24x128xf32, #tpu.memory_space<vmem>>, vector<24x128xf32>
    %c0_76 = arith.constant 0 : index
    %c14 = arith.constant 14 : index
    %c0_77 = arith.constant 0 : index
    %63 = vector.load %arg1[%c0_76, %c14, %c0_77] : memref<1x42x128xbf16, #tpu.memory_space<vmem>>, vector<1x24x128xbf16>
    %64 = vector.shape_cast %63 : vector<1x24x128xbf16> to vector<24x128xbf16>
    %c8_78 = arith.constant 8 : index
    %c0_79 = arith.constant 0 : index
    %c0_80 = arith.constant 0 : index
    %65 = vector.load %arg2[%c8_78, %c0_79, %c0_80] : memref<9x128x128xbf16, #tpu.memory_space<vmem>>, vector<1x128x128xbf16>
    %66 = vector.shape_cast %65 : vector<1x128x128xbf16> to vector<128x128xbf16>
    %cst_81 = arith.constant dense<0.000000e+00> : vector<24x128xf32>
    %67 = tpu.matmul %64, %66, %cst_81 {dimension_numbers = #tpu.dot_dimension_numbers<[1], [0], [0], [1], [0, 0, 1, 1], [], []>} : vector<24x128xbf16>, vector<128x128xbf16>, vector<24x128xf32> -> vector<24x128xf32>
    %68 = arith.addf %62, %67 : vector<24x128xf32>
    %c0_82 = arith.constant 0 : index
    %c0_83 = arith.constant 0 : index
    %69 = vector.load %arg5[%c0_82, %c0_83] : memref<24x128xf32, #tpu.memory_space<vmem>>, vector<24x128xf32>
    tpu.vector_store %arg5[%c0_82, %c0_83], %68 {strides = array<i32>} : memref<24x128xf32, #tpu.memory_space<vmem>>, vector<24x128xf32>,
    %c0_84 = arith.constant 0 : index
    %c0_85 = arith.constant 0 : index
    %70 = vector.load %arg5[%c0_84, %c0_85] : memref<24x128xf32, #tpu.memory_space<vmem>>, vector<24x128xf32>
    %c0_86 = arith.constant 0 : index
    %c0_87 = arith.constant 0 : index
    %71 = vector.load %arg3[%c0_86, %c0_87] : memref<1x128xf32, #tpu.memory_space<vmem>>, vector<1x128xf32>
    %72 = vector.broadcast %71 : vector<1x128xf32> to vector<24x128xf32>
    %73 = arith.addf %70, %72 : vector<24x128xf32>
    %cst_88 = arith.constant 0.000000e+00 : f32
    %74 = vector.broadcast %cst_88 : f32 to vector<24x128xf32>
    %75 = arith.maximumf %73, %74 : vector<24x128xf32>
    %76 = arith.truncf %75 : vector<24x128xf32> to vector<24x128xbf16>
    %77 = vector.extract_strided_slice %76 {offsets = [0, 0], sizes = [4, 128], strides = [1, 1]} : vector<24x128xbf16> to vector<4x128xbf16>
    %c0_89 = arith.constant 0 : index
    %c0_90 = arith.constant 0 : index
    %c0_91 = arith.constant 0 : index
    %c0_92 = arith.constant 0 : index
    %78 = vector.load %arg4[%c0_89, %c0_90, %c0_91, %c0_92] : memref<1x4x4x128xbf16, #tpu.memory_space<vmem>>, vector<1x1x4x128xbf16>
    %79 = vector.shape_cast %78 : vector<1x1x4x128xbf16> to vector<4x128xbf16>
    %80 = vector.shape_cast %77 : vector<4x128xbf16> to vector<1x1x4x128xbf16>
    tpu.vector_store %arg4[%c0_89, %c0_90, %c0_91, %c0_92], %80 {strides = array<i32>} : memref<1x4x4x128xbf16, #tpu.memory_space<vmem>>, vector<1x1x4x128xbf16>,
    %81 = vector.extract_strided_slice %76 {offsets = [6, 0], sizes = [4, 128], strides = [1, 1]} : vector<24x128xbf16> to vector<4x128xbf16>
    %c0_93 = arith.constant 0 : index
    %c1_94 = arith.constant 1 : index
    %c0_95 = arith.constant 0 : index
    %c0_96 = arith.constant 0 : index
    %82 = vector.load %arg4[%c0_93, %c1_94, %c0_95, %c0_96] : memref<1x4x4x128xbf16, #tpu.memory_space<vmem>>, vector<1x1x4x128xbf16>
    %83 = vector.shape_cast %82 : vector<1x1x4x128xbf16> to vector<4x128xbf16>
    %84 = vector.shape_cast %81 : vector<4x128xbf16> to vector<1x1x4x128xbf16>
    tpu.vector_store %arg4[%c0_93, %c1_94, %c0_95, %c0_96], %84 {strides = array<i32>} : memref<1x4x4x128xbf16, #tpu.memory_space<vmem>>, vector<1x1x4x128xbf16>,
    %85 = vector.extract_strided_slice %76 {offsets = [12, 0], sizes = [4, 128], strides = [1, 1]} : vector<24x128xbf16> to vector<4x128xbf16>
    %c0_97 = arith.constant 0 : index
    %c2_98 = arith.constant 2 : index
    %c0_99 = arith.constant 0 : index
    %c0_100 = arith.constant 0 : index
    %86 = vector.load %arg4[%c0_97, %c2_98, %c0_99, %c0_100] : memref<1x4x4x128xbf16, #tpu.memory_space<vmem>>, vector<1x1x4x128xbf16>
    %87 = vector.shape_cast %86 : vector<1x1x4x128xbf16> to vector<4x128xbf16>
    %88 = vector.shape_cast %85 : vector<4x128xbf16> to vector<1x1x4x128xbf16>
    tpu.vector_store %arg4[%c0_97, %c2_98, %c0_99, %c0_100], %88 {strides = array<i32>} : memref<1x4x4x128xbf16, #tpu.memory_space<vmem>>, vector<1x1x4x128xbf16>,
    %89 = vector.extract_strided_slice %76 {offsets = [18, 0], sizes = [4, 128], strides = [1, 1]} : vector<24x128xbf16> to vector<4x128xbf16>
    %c0_101 = arith.constant 0 : index
    %c3_102 = arith.constant 3 : index
    %c0_103 = arith.constant 0 : index
    %c0_104 = arith.constant 0 : index
    %90 = vector.load %arg4[%c0_101, %c3_102, %c0_103, %c0_104] : memref<1x4x4x128xbf16, #tpu.memory_space<vmem>>, vector<1x1x4x128xbf16>
    %91 = vector.shape_cast %90 : vector<1x1x4x128xbf16> to vector<4x128xbf16>
    %92 = vector.shape_cast %89 : vector<4x128xbf16> to vector<1x1x4x128xbf16>
    tpu.vector_store %arg4[%c0_101, %c3_102, %c0_103, %c0_104], %92 {strides = array<i32>} : memref<1x4x4x128xbf16, #tpu.memory_space<vmem>>, vector<1x1x4x128xbf16>,
    return
  }
  func.func @transform_0(%arg0: i32) -> (i32, i32, i32) {
    %c0_i32 = arith.constant 0 : i32
    %c0_i32_0 = arith.constant 0 : i32
    %c0_i32_1 = arith.constant 0 : i32
    return %arg0, %c0_i32, %c0_i32_0 : i32, i32, i32
  }
  func.func @transform_1(%arg0: i32) -> (i32, i32, i32) {
    %c0_i32 = arith.constant 0 : i32
    %c0_i32_0 = arith.constant 0 : i32
    %c0_i32_1 = arith.constant 0 : i32
    %c0_i32_2 = arith.constant 0 : i32
    return %c0_i32, %c0_i32_0, %c0_i32_1 : i32, i32, i32
  }
  func.func @transform_2(%arg0: i32) -> (i32, i32) {
    %c0_i32 = arith.constant 0 : i32
    %c0_i32_0 = arith.constant 0 : i32
    %c0_i32_1 = arith.constant 0 : i32
    return %c0_i32, %c0_i32_0 : i32, i32
  }
  func.func @transform_3(%arg0: i32) -> (i32, i32, i32, i32) {
    %c0_i32 = arith.constant 0 : i32
    %c0_i32_0 = arith.constant 0 : i32
    %c0_i32_1 = arith.constant 0 : i32
    %c0_i32_2 = arith.constant 0 : i32
    return %arg0, %c0_i32, %c0_i32_0, %c0_i32_1 : i32, i32, i32, i32
  }
}

module attributes {stable_mosaic.version = 11 : i64} {
  func.func @_conv3_kernel(%arg0: i32, %arg1: memref<1x20x128xbf16, #tpu.memory_space<vmem>>, %arg2: memref<9x128x128xbf16, #tpu.memory_space<vmem>>, %arg3: memref<1x128xf32, #tpu.memory_space<vmem>>, %arg4: memref<1x2x2x128xbf16, #tpu.memory_space<vmem>>, %arg5: memref<8x128xf32, #tpu.memory_space<vmem>>) attributes {dimension_semantics = [#tpu.dimension_semantics<parallel>], iteration_bounds = array<i64: 2>, scalar_prefetch = 0 : i64, scratch_operands = 1 : i64, tpu.core_type = #tpu.core_type<tc>, window_params = [{transform_indices = @transform_0, window_bounds = array<i64: 1, 20, 128>}, {pipeline_mode = #tpu.pipeline_mode<synchronous>, transform_indices = @transform_1, window_bounds = array<i64: 9, 128, 128>}, {pipeline_mode = #tpu.pipeline_mode<synchronous>, transform_indices = @transform_2, window_bounds = array<i64: 1, 128>}, {transform_indices = @transform_3, window_bounds = array<i64: 1, 2, 2, 128>}]} {
    %c0 = arith.constant 0 : index
    %c0_0 = arith.constant 0 : index
    %c0_1 = arith.constant 0 : index
    %0 = vector.load %arg1[%c0, %c0_0, %c0_1] : memref<1x20x128xbf16, #tpu.memory_space<vmem>>, vector<1x8x128xbf16>
    %1 = vector.shape_cast %0 : vector<1x8x128xbf16> to vector<8x128xbf16>
    %c0_2 = arith.constant 0 : index
    %c0_3 = arith.constant 0 : index
    %c0_4 = arith.constant 0 : index
    %2 = vector.load %arg2[%c0_2, %c0_3, %c0_4] : memref<9x128x128xbf16, #tpu.memory_space<vmem>>, vector<1x128x128xbf16>
    %3 = vector.shape_cast %2 : vector<1x128x128xbf16> to vector<128x128xbf16>
    %cst = arith.constant dense<0.000000e+00> : vector<8x128xf32>
    %4 = tpu.matmul %1, %3, %cst {dimension_numbers = #tpu.dot_dimension_numbers<[1], [0], [0], [1], [0, 0, 1, 1], [], []>} : vector<8x128xbf16>, vector<128x128xbf16>, vector<8x128xf32> -> vector<8x128xf32>
    %c0_5 = arith.constant 0 : index
    %c0_6 = arith.constant 0 : index
    %5 = vector.load %arg5[%c0_5, %c0_6] : memref<8x128xf32, #tpu.memory_space<vmem>>, vector<8x128xf32>
    tpu.vector_store %arg5[%c0_5, %c0_6], %4 {strides = array<i32>} : memref<8x128xf32, #tpu.memory_space<vmem>>, vector<8x128xf32>,
    %c0_7 = arith.constant 0 : index
    %c0_8 = arith.constant 0 : index
    %6 = vector.load %arg5[%c0_7, %c0_8] : memref<8x128xf32, #tpu.memory_space<vmem>>, vector<8x128xf32>
    %c0_9 = arith.constant 0 : index
    %c1 = arith.constant 1 : index
    %c0_10 = arith.constant 0 : index
    %7 = vector.load %arg1[%c0_9, %c1, %c0_10] : memref<1x20x128xbf16, #tpu.memory_space<vmem>>, vector<1x8x128xbf16>
    %8 = vector.shape_cast %7 : vector<1x8x128xbf16> to vector<8x128xbf16>
    %c1_11 = arith.constant 1 : index
    %c0_12 = arith.constant 0 : index
    %c0_13 = arith.constant 0 : index
    %9 = vector.load %arg2[%c1_11, %c0_12, %c0_13] : memref<9x128x128xbf16, #tpu.memory_space<vmem>>, vector<1x128x128xbf16>
    %10 = vector.shape_cast %9 : vector<1x128x128xbf16> to vector<128x128xbf16>
    %cst_14 = arith.constant dense<0.000000e+00> : vector<8x128xf32>
    %11 = tpu.matmul %8, %10, %cst_14 {dimension_numbers = #tpu.dot_dimension_numbers<[1], [0], [0], [1], [0, 0, 1, 1], [], []>} : vector<8x128xbf16>, vector<128x128xbf16>, vector<8x128xf32> -> vector<8x128xf32>
    %12 = arith.addf %6, %11 : vector<8x128xf32>
    %c0_15 = arith.constant 0 : index
    %c0_16 = arith.constant 0 : index
    %13 = vector.load %arg5[%c0_15, %c0_16] : memref<8x128xf32, #tpu.memory_space<vmem>>, vector<8x128xf32>
    tpu.vector_store %arg5[%c0_15, %c0_16], %12 {strides = array<i32>} : memref<8x128xf32, #tpu.memory_space<vmem>>, vector<8x128xf32>,
    %c0_17 = arith.constant 0 : index
    %c0_18 = arith.constant 0 : index
    %14 = vector.load %arg5[%c0_17, %c0_18] : memref<8x128xf32, #tpu.memory_space<vmem>>, vector<8x128xf32>
    %c0_19 = arith.constant 0 : index
    %c2 = arith.constant 2 : index
    %c0_20 = arith.constant 0 : index
    %15 = vector.load %arg1[%c0_19, %c2, %c0_20] : memref<1x20x128xbf16, #tpu.memory_space<vmem>>, vector<1x8x128xbf16>
    %16 = vector.shape_cast %15 : vector<1x8x128xbf16> to vector<8x128xbf16>
    %c2_21 = arith.constant 2 : index
    %c0_22 = arith.constant 0 : index
    %c0_23 = arith.constant 0 : index
    %17 = vector.load %arg2[%c2_21, %c0_22, %c0_23] : memref<9x128x128xbf16, #tpu.memory_space<vmem>>, vector<1x128x128xbf16>
    %18 = vector.shape_cast %17 : vector<1x128x128xbf16> to vector<128x128xbf16>
    %cst_24 = arith.constant dense<0.000000e+00> : vector<8x128xf32>
    %19 = tpu.matmul %16, %18, %cst_24 {dimension_numbers = #tpu.dot_dimension_numbers<[1], [0], [0], [1], [0, 0, 1, 1], [], []>} : vector<8x128xbf16>, vector<128x128xbf16>, vector<8x128xf32> -> vector<8x128xf32>
    %20 = arith.addf %14, %19 : vector<8x128xf32>
    %c0_25 = arith.constant 0 : index
    %c0_26 = arith.constant 0 : index
    %21 = vector.load %arg5[%c0_25, %c0_26] : memref<8x128xf32, #tpu.memory_space<vmem>>, vector<8x128xf32>
    tpu.vector_store %arg5[%c0_25, %c0_26], %20 {strides = array<i32>} : memref<8x128xf32, #tpu.memory_space<vmem>>, vector<8x128xf32>,
    %c0_27 = arith.constant 0 : index
    %c0_28 = arith.constant 0 : index
    %22 = vector.load %arg5[%c0_27, %c0_28] : memref<8x128xf32, #tpu.memory_space<vmem>>, vector<8x128xf32>
    %c0_29 = arith.constant 0 : index
    %c4 = arith.constant 4 : index
    %c0_30 = arith.constant 0 : index
    %23 = vector.load %arg1[%c0_29, %c4, %c0_30] : memref<1x20x128xbf16, #tpu.memory_space<vmem>>, vector<1x8x128xbf16>
    %24 = vector.shape_cast %23 : vector<1x8x128xbf16> to vector<8x128xbf16>
    %c3 = arith.constant 3 : index
    %c0_31 = arith.constant 0 : index
    %c0_32 = arith.constant 0 : index
    %25 = vector.load %arg2[%c3, %c0_31, %c0_32] : memref<9x128x128xbf16, #tpu.memory_space<vmem>>, vector<1x128x128xbf16>
    %26 = vector.shape_cast %25 : vector<1x128x128xbf16> to vector<128x128xbf16>
    %cst_33 = arith.constant dense<0.000000e+00> : vector<8x128xf32>
    %27 = tpu.matmul %24, %26, %cst_33 {dimension_numbers = #tpu.dot_dimension_numbers<[1], [0], [0], [1], [0, 0, 1, 1], [], []>} : vector<8x128xbf16>, vector<128x128xbf16>, vector<8x128xf32> -> vector<8x128xf32>
    %28 = arith.addf %22, %27 : vector<8x128xf32>
    %c0_34 = arith.constant 0 : index
    %c0_35 = arith.constant 0 : index
    %29 = vector.load %arg5[%c0_34, %c0_35] : memref<8x128xf32, #tpu.memory_space<vmem>>, vector<8x128xf32>
    tpu.vector_store %arg5[%c0_34, %c0_35], %28 {strides = array<i32>} : memref<8x128xf32, #tpu.memory_space<vmem>>, vector<8x128xf32>,
    %c0_36 = arith.constant 0 : index
    %c0_37 = arith.constant 0 : index
    %30 = vector.load %arg5[%c0_36, %c0_37] : memref<8x128xf32, #tpu.memory_space<vmem>>, vector<8x128xf32>
    %c0_38 = arith.constant 0 : index
    %c5 = arith.constant 5 : index
    %c0_39 = arith.constant 0 : index
    %31 = vector.load %arg1[%c0_38, %c5, %c0_39] : memref<1x20x128xbf16, #tpu.memory_space<vmem>>, vector<1x8x128xbf16>
    %32 = vector.shape_cast %31 : vector<1x8x128xbf16> to vector<8x128xbf16>
    %c4_40 = arith.constant 4 : index
    %c0_41 = arith.constant 0 : index
    %c0_42 = arith.constant 0 : index
    %33 = vector.load %arg2[%c4_40, %c0_41, %c0_42] : memref<9x128x128xbf16, #tpu.memory_space<vmem>>, vector<1x128x128xbf16>
    %34 = vector.shape_cast %33 : vector<1x128x128xbf16> to vector<128x128xbf16>
    %cst_43 = arith.constant dense<0.000000e+00> : vector<8x128xf32>
    %35 = tpu.matmul %32, %34, %cst_43 {dimension_numbers = #tpu.dot_dimension_numbers<[1], [0], [0], [1], [0, 0, 1, 1], [], []>} : vector<8x128xbf16>, vector<128x128xbf16>, vector<8x128xf32> -> vector<8x128xf32>
    %36 = arith.addf %30, %35 : vector<8x128xf32>
    %c0_44 = arith.constant 0 : index
    %c0_45 = arith.constant 0 : index
    %37 = vector.load %arg5[%c0_44, %c0_45] : memref<8x128xf32, #tpu.memory_space<vmem>>, vector<8x128xf32>
    tpu.vector_store %arg5[%c0_44, %c0_45], %36 {strides = array<i32>} : memref<8x128xf32, #tpu.memory_space<vmem>>, vector<8x128xf32>,
    %c0_46 = arith.constant 0 : index
    %c0_47 = arith.constant 0 : index
    %38 = vector.load %arg5[%c0_46, %c0_47] : memref<8x128xf32, #tpu.memory_space<vmem>>, vector<8x128xf32>
    %c0_48 = arith.constant 0 : index
    %c6 = arith.constant 6 : index
    %c0_49 = arith.constant 0 : index
    %39 = vector.load %arg1[%c0_48, %c6, %c0_49] : memref<1x20x128xbf16, #tpu.memory_space<vmem>>, vector<1x8x128xbf16>
    %40 = vector.shape_cast %39 : vector<1x8x128xbf16> to vector<8x128xbf16>
    %c5_50 = arith.constant 5 : index
    %c0_51 = arith.constant 0 : index
    %c0_52 = arith.constant 0 : index
    %41 = vector.load %arg2[%c5_50, %c0_51, %c0_52] : memref<9x128x128xbf16, #tpu.memory_space<vmem>>, vector<1x128x128xbf16>
    %42 = vector.shape_cast %41 : vector<1x128x128xbf16> to vector<128x128xbf16>
    %cst_53 = arith.constant dense<0.000000e+00> : vector<8x128xf32>
    %43 = tpu.matmul %40, %42, %cst_53 {dimension_numbers = #tpu.dot_dimension_numbers<[1], [0], [0], [1], [0, 0, 1, 1], [], []>} : vector<8x128xbf16>, vector<128x128xbf16>, vector<8x128xf32> -> vector<8x128xf32>
    %44 = arith.addf %38, %43 : vector<8x128xf32>
    %c0_54 = arith.constant 0 : index
    %c0_55 = arith.constant 0 : index
    %45 = vector.load %arg5[%c0_54, %c0_55] : memref<8x128xf32, #tpu.memory_space<vmem>>, vector<8x128xf32>
    tpu.vector_store %arg5[%c0_54, %c0_55], %44 {strides = array<i32>} : memref<8x128xf32, #tpu.memory_space<vmem>>, vector<8x128xf32>,
    %c0_56 = arith.constant 0 : index
    %c0_57 = arith.constant 0 : index
    %46 = vector.load %arg5[%c0_56, %c0_57] : memref<8x128xf32, #tpu.memory_space<vmem>>, vector<8x128xf32>
    %c0_58 = arith.constant 0 : index
    %c8 = arith.constant 8 : index
    %c0_59 = arith.constant 0 : index
    %47 = vector.load %arg1[%c0_58, %c8, %c0_59] : memref<1x20x128xbf16, #tpu.memory_space<vmem>>, vector<1x8x128xbf16>
    %48 = vector.shape_cast %47 : vector<1x8x128xbf16> to vector<8x128xbf16>
    %c6_60 = arith.constant 6 : index
    %c0_61 = arith.constant 0 : index
    %c0_62 = arith.constant 0 : index
    %49 = vector.load %arg2[%c6_60, %c0_61, %c0_62] : memref<9x128x128xbf16, #tpu.memory_space<vmem>>, vector<1x128x128xbf16>
    %50 = vector.shape_cast %49 : vector<1x128x128xbf16> to vector<128x128xbf16>
    %cst_63 = arith.constant dense<0.000000e+00> : vector<8x128xf32>
    %51 = tpu.matmul %48, %50, %cst_63 {dimension_numbers = #tpu.dot_dimension_numbers<[1], [0], [0], [1], [0, 0, 1, 1], [], []>} : vector<8x128xbf16>, vector<128x128xbf16>, vector<8x128xf32> -> vector<8x128xf32>
    %52 = arith.addf %46, %51 : vector<8x128xf32>
    %c0_64 = arith.constant 0 : index
    %c0_65 = arith.constant 0 : index
    %53 = vector.load %arg5[%c0_64, %c0_65] : memref<8x128xf32, #tpu.memory_space<vmem>>, vector<8x128xf32>
    tpu.vector_store %arg5[%c0_64, %c0_65], %52 {strides = array<i32>} : memref<8x128xf32, #tpu.memory_space<vmem>>, vector<8x128xf32>,
    %c0_66 = arith.constant 0 : index
    %c0_67 = arith.constant 0 : index
    %54 = vector.load %arg5[%c0_66, %c0_67] : memref<8x128xf32, #tpu.memory_space<vmem>>, vector<8x128xf32>
    %c0_68 = arith.constant 0 : index
    %c9 = arith.constant 9 : index
    %c0_69 = arith.constant 0 : index
    %55 = vector.load %arg1[%c0_68, %c9, %c0_69] : memref<1x20x128xbf16, #tpu.memory_space<vmem>>, vector<1x8x128xbf16>
    %56 = vector.shape_cast %55 : vector<1x8x128xbf16> to vector<8x128xbf16>
    %c7 = arith.constant 7 : index
    %c0_70 = arith.constant 0 : index
    %c0_71 = arith.constant 0 : index
    %57 = vector.load %arg2[%c7, %c0_70, %c0_71] : memref<9x128x128xbf16, #tpu.memory_space<vmem>>, vector<1x128x128xbf16>
    %58 = vector.shape_cast %57 : vector<1x128x128xbf16> to vector<128x128xbf16>
    %cst_72 = arith.constant dense<0.000000e+00> : vector<8x128xf32>
    %59 = tpu.matmul %56, %58, %cst_72 {dimension_numbers = #tpu.dot_dimension_numbers<[1], [0], [0], [1], [0, 0, 1, 1], [], []>} : vector<8x128xbf16>, vector<128x128xbf16>, vector<8x128xf32> -> vector<8x128xf32>
    %60 = arith.addf %54, %59 : vector<8x128xf32>
    %c0_73 = arith.constant 0 : index
    %c0_74 = arith.constant 0 : index
    %61 = vector.load %arg5[%c0_73, %c0_74] : memref<8x128xf32, #tpu.memory_space<vmem>>, vector<8x128xf32>
    tpu.vector_store %arg5[%c0_73, %c0_74], %60 {strides = array<i32>} : memref<8x128xf32, #tpu.memory_space<vmem>>, vector<8x128xf32>,
    %c0_75 = arith.constant 0 : index
    %c0_76 = arith.constant 0 : index
    %62 = vector.load %arg5[%c0_75, %c0_76] : memref<8x128xf32, #tpu.memory_space<vmem>>, vector<8x128xf32>
    %c0_77 = arith.constant 0 : index
    %c10 = arith.constant 10 : index
    %c0_78 = arith.constant 0 : index
    %63 = vector.load %arg1[%c0_77, %c10, %c0_78] : memref<1x20x128xbf16, #tpu.memory_space<vmem>>, vector<1x8x128xbf16>
    %64 = vector.shape_cast %63 : vector<1x8x128xbf16> to vector<8x128xbf16>
    %c8_79 = arith.constant 8 : index
    %c0_80 = arith.constant 0 : index
    %c0_81 = arith.constant 0 : index
    %65 = vector.load %arg2[%c8_79, %c0_80, %c0_81] : memref<9x128x128xbf16, #tpu.memory_space<vmem>>, vector<1x128x128xbf16>
    %66 = vector.shape_cast %65 : vector<1x128x128xbf16> to vector<128x128xbf16>
    %cst_82 = arith.constant dense<0.000000e+00> : vector<8x128xf32>
    %67 = tpu.matmul %64, %66, %cst_82 {dimension_numbers = #tpu.dot_dimension_numbers<[1], [0], [0], [1], [0, 0, 1, 1], [], []>} : vector<8x128xbf16>, vector<128x128xbf16>, vector<8x128xf32> -> vector<8x128xf32>
    %68 = arith.addf %62, %67 : vector<8x128xf32>
    %c0_83 = arith.constant 0 : index
    %c0_84 = arith.constant 0 : index
    %69 = vector.load %arg5[%c0_83, %c0_84] : memref<8x128xf32, #tpu.memory_space<vmem>>, vector<8x128xf32>
    tpu.vector_store %arg5[%c0_83, %c0_84], %68 {strides = array<i32>} : memref<8x128xf32, #tpu.memory_space<vmem>>, vector<8x128xf32>,
    %c0_85 = arith.constant 0 : index
    %c0_86 = arith.constant 0 : index
    %70 = vector.load %arg5[%c0_85, %c0_86] : memref<8x128xf32, #tpu.memory_space<vmem>>, vector<8x128xf32>
    %c0_87 = arith.constant 0 : index
    %c0_88 = arith.constant 0 : index
    %71 = vector.load %arg3[%c0_87, %c0_88] : memref<1x128xf32, #tpu.memory_space<vmem>>, vector<1x128xf32>
    %72 = vector.broadcast %71 : vector<1x128xf32> to vector<8x128xf32>
    %73 = arith.addf %70, %72 : vector<8x128xf32>
    %cst_89 = arith.constant 0.000000e+00 : f32
    %74 = vector.broadcast %cst_89 : f32 to vector<8x128xf32>
    %75 = arith.maximumf %73, %74 : vector<8x128xf32>
    %76 = arith.truncf %75 : vector<8x128xf32> to vector<8x128xbf16>
    %77 = vector.extract_strided_slice %76 {offsets = [0, 0], sizes = [2, 128], strides = [1, 1]} : vector<8x128xbf16> to vector<2x128xbf16>
    %c0_90 = arith.constant 0 : index
    %c0_91 = arith.constant 0 : index
    %c0_92 = arith.constant 0 : index
    %c0_93 = arith.constant 0 : index
    %78 = vector.load %arg4[%c0_90, %c0_91, %c0_92, %c0_93] : memref<1x2x2x128xbf16, #tpu.memory_space<vmem>>, vector<1x1x2x128xbf16>
    %79 = vector.shape_cast %78 : vector<1x1x2x128xbf16> to vector<2x128xbf16>
    %80 = vector.shape_cast %77 : vector<2x128xbf16> to vector<1x1x2x128xbf16>
    tpu.vector_store %arg4[%c0_90, %c0_91, %c0_92, %c0_93], %80 {strides = array<i32>} : memref<1x2x2x128xbf16, #tpu.memory_space<vmem>>, vector<1x1x2x128xbf16>,
    %81 = vector.extract_strided_slice %76 {offsets = [4, 0], sizes = [2, 128], strides = [1, 1]} : vector<8x128xbf16> to vector<2x128xbf16>
    %c0_94 = arith.constant 0 : index
    %c1_95 = arith.constant 1 : index
    %c0_96 = arith.constant 0 : index
    %c0_97 = arith.constant 0 : index
    %82 = vector.load %arg4[%c0_94, %c1_95, %c0_96, %c0_97] : memref<1x2x2x128xbf16, #tpu.memory_space<vmem>>, vector<1x1x2x128xbf16>
    %83 = vector.shape_cast %82 : vector<1x1x2x128xbf16> to vector<2x128xbf16>
    %84 = vector.shape_cast %81 : vector<2x128xbf16> to vector<1x1x2x128xbf16>
    tpu.vector_store %arg4[%c0_94, %c1_95, %c0_96, %c0_97], %84 {strides = array<i32>} : memref<1x2x2x128xbf16, #tpu.memory_space<vmem>>, vector<1x1x2x128xbf16>,
    return
  }
  func.func @transform_0(%arg0: i32) -> (i32, i32, i32) {
    %c0_i32 = arith.constant 0 : i32
    %c0_i32_0 = arith.constant 0 : i32
    %c0_i32_1 = arith.constant 0 : i32
    return %arg0, %c0_i32, %c0_i32_0 : i32, i32, i32
  }
  func.func @transform_1(%arg0: i32) -> (i32, i32, i32) {
    %c0_i32 = arith.constant 0 : i32
    %c0_i32_0 = arith.constant 0 : i32
    %c0_i32_1 = arith.constant 0 : i32
    %c0_i32_2 = arith.constant 0 : i32
    return %c0_i32, %c0_i32_0, %c0_i32_1 : i32, i32, i32
  }
  func.func @transform_2(%arg0: i32) -> (i32, i32) {
    %c0_i32 = arith.constant 0 : i32
    %c0_i32_0 = arith.constant 0 : i32
    %c0_i32_1 = arith.constant 0 : i32
    return %c0_i32, %c0_i32_0 : i32, i32
  }
  func.func @transform_3(%arg0: i32) -> (i32, i32, i32, i32) {
    %c0_i32 = arith.constant 0 : i32
    %c0_i32_0 = arith.constant 0 : i32
    %c0_i32_1 = arith.constant 0 : i32
    %c0_i32_2 = arith.constant 0 : i32
    return %arg0, %c0_i32, %c0_i32_0, %c0_i32_1 : i32, i32, i32, i32
  }
}

module attributes {stable_mosaic.version = 11 : i64} {
  func.func @_up2_kernel(%arg0: i32, %arg1: memref<2x2x128xbf16, #tpu.memory_space<vmem>>, %arg2: memref<2x128x256xbf16, #tpu.memory_space<vmem>>, %arg3: memref<1x256xf32, #tpu.memory_space<vmem>>, %arg4: memref<2x2x2x256xbf16, #tpu.memory_space<vmem>>) attributes {dimension_semantics = [#tpu.dimension_semantics<parallel>], iteration_bounds = array<i64: 2>, scalar_prefetch = 0 : i64, scratch_operands = 0 : i64, tpu.core_type = #tpu.core_type<tc>, window_params = [{transform_indices = @transform_0, window_bounds = array<i64: 2, 2, 128>}, {pipeline_mode = #tpu.pipeline_mode<synchronous>, transform_indices = @transform_1, window_bounds = array<i64: 2, 128, 256>}, {pipeline_mode = #tpu.pipeline_mode<synchronous>, transform_indices = @transform_2, window_bounds = array<i64: 1, 256>}, {transform_indices = @transform_3, window_bounds = array<i64: 2, 2, 2, 256>}]} {
    %c0 = arith.constant 0 : index
    %c0_0 = arith.constant 0 : index
    %c0_1 = arith.constant 0 : index
    %0 = vector.load %arg1[%c0, %c0_0, %c0_1] : memref<2x2x128xbf16, #tpu.memory_space<vmem>>, vector<2x2x128xbf16>
    %1 = vector.shape_cast %0 : vector<2x2x128xbf16> to vector<4x128xbf16>
    %c0_2 = arith.constant 0 : index
    %c0_3 = arith.constant 0 : index
    %c0_4 = arith.constant 0 : index
    %2 = vector.load %arg2[%c0_2, %c0_3, %c0_4] : memref<2x128x256xbf16, #tpu.memory_space<vmem>>, vector<1x128x256xbf16>
    %3 = vector.shape_cast %2 : vector<1x128x256xbf16> to vector<128x256xbf16>
    %cst = arith.constant dense<0.000000e+00> : vector<4x256xf32>
    %4 = tpu.matmul %1, %3, %cst {dimension_numbers = #tpu.dot_dimension_numbers<[1], [0], [0], [1], [0, 0, 1, 1], [], []>} : vector<4x128xbf16>, vector<128x256xbf16>, vector<4x256xf32> -> vector<4x256xf32>
    %c0_5 = arith.constant 0 : index
    %c0_6 = arith.constant 0 : index
    %5 = vector.load %arg3[%c0_5, %c0_6] : memref<1x256xf32, #tpu.memory_space<vmem>>, vector<1x256xf32>
    %6 = vector.broadcast %5 : vector<1x256xf32> to vector<4x256xf32>
    %7 = arith.addf %4, %6 : vector<4x256xf32>
    %cst_7 = arith.constant 0.000000e+00 : f32
    %8 = vector.broadcast %cst_7 : f32 to vector<4x256xf32>
    %9 = arith.maximumf %7, %8 : vector<4x256xf32>
    %10 = vector.shape_cast %9 : vector<4x256xf32> to vector<2x2x256xf32>
    %11 = arith.truncf %10 : vector<2x2x256xf32> to vector<2x2x256xbf16>
    %c0_8 = arith.constant 0 : index
    %c0_9 = arith.constant 0 : index
    %c0_10 = arith.constant 0 : index
    %c0_11 = arith.constant 0 : index
    %12 = vector.load %arg4[%c0_8, %c0_9, %c0_10, %c0_11] : memref<2x2x2x256xbf16, #tpu.memory_space<vmem>>, vector<2x1x2x256xbf16>
    %13 = vector.shape_cast %12 : vector<2x1x2x256xbf16> to vector<2x2x256xbf16>
    %14 = vector.shape_cast %11 : vector<2x2x256xbf16> to vector<2x1x2x256xbf16>
    tpu.vector_store %arg4[%c0_8, %c0_9, %c0_10, %c0_11], %14 {strides = array<i32>} : memref<2x2x2x256xbf16, #tpu.memory_space<vmem>>, vector<2x1x2x256xbf16>,
    %c1 = arith.constant 1 : index
    %c0_12 = arith.constant 0 : index
    %c0_13 = arith.constant 0 : index
    %15 = vector.load %arg2[%c1, %c0_12, %c0_13] : memref<2x128x256xbf16, #tpu.memory_space<vmem>>, vector<1x128x256xbf16>
    %16 = vector.shape_cast %15 : vector<1x128x256xbf16> to vector<128x256xbf16>
    %cst_14 = arith.constant dense<0.000000e+00> : vector<4x256xf32>
    %17 = tpu.matmul %1, %16, %cst_14 {dimension_numbers = #tpu.dot_dimension_numbers<[1], [0], [0], [1], [0, 0, 1, 1], [], []>} : vector<4x128xbf16>, vector<128x256xbf16>, vector<4x256xf32> -> vector<4x256xf32>
    %c0_15 = arith.constant 0 : index
    %c0_16 = arith.constant 0 : index
    %18 = vector.load %arg3[%c0_15, %c0_16] : memref<1x256xf32, #tpu.memory_space<vmem>>, vector<1x256xf32>
    %19 = vector.broadcast %18 : vector<1x256xf32> to vector<4x256xf32>
    %20 = arith.addf %17, %19 : vector<4x256xf32>
    %cst_17 = arith.constant 0.000000e+00 : f32
    %21 = vector.broadcast %cst_17 : f32 to vector<4x256xf32>
    %22 = arith.maximumf %20, %21 : vector<4x256xf32>
    %23 = vector.shape_cast %22 : vector<4x256xf32> to vector<2x2x256xf32>
    %24 = arith.truncf %23 : vector<2x2x256xf32> to vector<2x2x256xbf16>
    %c0_18 = arith.constant 0 : index
    %c1_19 = arith.constant 1 : index
    %c0_20 = arith.constant 0 : index
    %c0_21 = arith.constant 0 : index
    %25 = vector.load %arg4[%c0_18, %c1_19, %c0_20, %c0_21] : memref<2x2x2x256xbf16, #tpu.memory_space<vmem>>, vector<2x1x2x256xbf16>
    %26 = vector.shape_cast %25 : vector<2x1x2x256xbf16> to vector<2x2x256xbf16>
    %27 = vector.shape_cast %24 : vector<2x2x256xbf16> to vector<2x1x2x256xbf16>
    tpu.vector_store %arg4[%c0_18, %c1_19, %c0_20, %c0_21], %27 {strides = array<i32>} : memref<2x2x2x256xbf16, #tpu.memory_space<vmem>>, vector<2x1x2x256xbf16>,
    return
  }
  func.func @transform_0(%arg0: i32) -> (i32, i32, i32) {
    %c0_i32 = arith.constant 0 : i32
    %c0_i32_0 = arith.constant 0 : i32
    %c0_i32_1 = arith.constant 0 : i32
    return %arg0, %c0_i32, %c0_i32_0 : i32, i32, i32
  }
  func.func @transform_1(%arg0: i32) -> (i32, i32, i32) {
    %c0_i32 = arith.constant 0 : i32
    %c0_i32_0 = arith.constant 0 : i32
    %c0_i32_1 = arith.constant 0 : i32
    %c0_i32_2 = arith.constant 0 : i32
    return %c0_i32, %c0_i32_0, %c0_i32_1 : i32, i32, i32
  }
  func.func @transform_2(%arg0: i32) -> (i32, i32) {
    %c0_i32 = arith.constant 0 : i32
    %c0_i32_0 = arith.constant 0 : i32
    %c0_i32_1 = arith.constant 0 : i32
    return %c0_i32, %c0_i32_0 : i32, i32
  }
  func.func @transform_3(%arg0: i32) -> (i32, i32, i32, i32) {
    %c0_i32 = arith.constant 0 : i32
    %c0_i32_0 = arith.constant 0 : i32
    %c0_i32_1 = arith.constant 0 : i32
    %c0_i32_2 = arith.constant 0 : i32
    return %arg0, %c0_i32, %c0_i32_0, %c0_i32_1 : i32, i32, i32, i32
  }
}

module attributes {stable_mosaic.version = 11 : i64} {
  func.func @_up2_kernel(%arg0: i32, %arg1: memref<4x4x128xbf16, #tpu.memory_space<vmem>>, %arg2: memref<2x128x256xbf16, #tpu.memory_space<vmem>>, %arg3: memref<1x256xf32, #tpu.memory_space<vmem>>, %arg4: memref<4x2x4x256xbf16, #tpu.memory_space<vmem>>) attributes {dimension_semantics = [#tpu.dimension_semantics<parallel>], iteration_bounds = array<i64: 2>, scalar_prefetch = 0 : i64, scratch_operands = 0 : i64, tpu.core_type = #tpu.core_type<tc>, window_params = [{transform_indices = @transform_0, window_bounds = array<i64: 4, 4, 128>}, {pipeline_mode = #tpu.pipeline_mode<synchronous>, transform_indices = @transform_1, window_bounds = array<i64: 2, 128, 256>}, {pipeline_mode = #tpu.pipeline_mode<synchronous>, transform_indices = @transform_2, window_bounds = array<i64: 1, 256>}, {transform_indices = @transform_3, window_bounds = array<i64: 4, 2, 4, 256>}]} {
    %c0 = arith.constant 0 : index
    %c0_0 = arith.constant 0 : index
    %c0_1 = arith.constant 0 : index
    %0 = vector.load %arg1[%c0, %c0_0, %c0_1] : memref<4x4x128xbf16, #tpu.memory_space<vmem>>, vector<4x4x128xbf16>
    %1 = vector.shape_cast %0 : vector<4x4x128xbf16> to vector<16x128xbf16>
    %c0_2 = arith.constant 0 : index
    %c0_3 = arith.constant 0 : index
    %c0_4 = arith.constant 0 : index
    %2 = vector.load %arg2[%c0_2, %c0_3, %c0_4] : memref<2x128x256xbf16, #tpu.memory_space<vmem>>, vector<1x128x256xbf16>
    %3 = vector.shape_cast %2 : vector<1x128x256xbf16> to vector<128x256xbf16>
    %cst = arith.constant dense<0.000000e+00> : vector<16x256xf32>
    %4 = tpu.matmul %1, %3, %cst {dimension_numbers = #tpu.dot_dimension_numbers<[1], [0], [0], [1], [0, 0, 1, 1], [], []>} : vector<16x128xbf16>, vector<128x256xbf16>, vector<16x256xf32> -> vector<16x256xf32>
    %c0_5 = arith.constant 0 : index
    %c0_6 = arith.constant 0 : index
    %5 = vector.load %arg3[%c0_5, %c0_6] : memref<1x256xf32, #tpu.memory_space<vmem>>, vector<1x256xf32>
    %6 = vector.broadcast %5 : vector<1x256xf32> to vector<16x256xf32>
    %7 = arith.addf %4, %6 : vector<16x256xf32>
    %cst_7 = arith.constant 0.000000e+00 : f32
    %8 = vector.broadcast %cst_7 : f32 to vector<16x256xf32>
    %9 = arith.maximumf %7, %8 : vector<16x256xf32>
    %10 = vector.shape_cast %9 : vector<16x256xf32> to vector<4x4x256xf32>
    %11 = arith.truncf %10 : vector<4x4x256xf32> to vector<4x4x256xbf16>
    %c0_8 = arith.constant 0 : index
    %c0_9 = arith.constant 0 : index
    %c0_10 = arith.constant 0 : index
    %c0_11 = arith.constant 0 : index
    %12 = vector.load %arg4[%c0_8, %c0_9, %c0_10, %c0_11] : memref<4x2x4x256xbf16, #tpu.memory_space<vmem>>, vector<4x1x4x256xbf16>
    %13 = vector.shape_cast %12 : vector<4x1x4x256xbf16> to vector<4x4x256xbf16>
    %14 = vector.shape_cast %11 : vector<4x4x256xbf16> to vector<4x1x4x256xbf16>
    tpu.vector_store %arg4[%c0_8, %c0_9, %c0_10, %c0_11], %14 {strides = array<i32>} : memref<4x2x4x256xbf16, #tpu.memory_space<vmem>>, vector<4x1x4x256xbf16>,
    %c1 = arith.constant 1 : index
    %c0_12 = arith.constant 0 : index
    %c0_13 = arith.constant 0 : index
    %15 = vector.load %arg2[%c1, %c0_12, %c0_13] : memref<2x128x256xbf16, #tpu.memory_space<vmem>>, vector<1x128x256xbf16>
    %16 = vector.shape_cast %15 : vector<1x128x256xbf16> to vector<128x256xbf16>
    %cst_14 = arith.constant dense<0.000000e+00> : vector<16x256xf32>
    %17 = tpu.matmul %1, %16, %cst_14 {dimension_numbers = #tpu.dot_dimension_numbers<[1], [0], [0], [1], [0, 0, 1, 1], [], []>} : vector<16x128xbf16>, vector<128x256xbf16>, vector<16x256xf32> -> vector<16x256xf32>
    %c0_15 = arith.constant 0 : index
    %c0_16 = arith.constant 0 : index
    %18 = vector.load %arg3[%c0_15, %c0_16] : memref<1x256xf32, #tpu.memory_space<vmem>>, vector<1x256xf32>
    %19 = vector.broadcast %18 : vector<1x256xf32> to vector<16x256xf32>
    %20 = arith.addf %17, %19 : vector<16x256xf32>
    %cst_17 = arith.constant 0.000000e+00 : f32
    %21 = vector.broadcast %cst_17 : f32 to vector<16x256xf32>
    %22 = arith.maximumf %20, %21 : vector<16x256xf32>
    %23 = vector.shape_cast %22 : vector<16x256xf32> to vector<4x4x256xf32>
    %24 = arith.truncf %23 : vector<4x4x256xf32> to vector<4x4x256xbf16>
    %c0_18 = arith.constant 0 : index
    %c1_19 = arith.constant 1 : index
    %c0_20 = arith.constant 0 : index
    %c0_21 = arith.constant 0 : index
    %25 = vector.load %arg4[%c0_18, %c1_19, %c0_20, %c0_21] : memref<4x2x4x256xbf16, #tpu.memory_space<vmem>>, vector<4x1x4x256xbf16>
    %26 = vector.shape_cast %25 : vector<4x1x4x256xbf16> to vector<4x4x256xbf16>
    %27 = vector.shape_cast %24 : vector<4x4x256xbf16> to vector<4x1x4x256xbf16>
    tpu.vector_store %arg4[%c0_18, %c1_19, %c0_20, %c0_21], %27 {strides = array<i32>} : memref<4x2x4x256xbf16, #tpu.memory_space<vmem>>, vector<4x1x4x256xbf16>,
    return
  }
  func.func @transform_0(%arg0: i32) -> (i32, i32, i32) {
    %c0_i32 = arith.constant 0 : i32
    %c0_i32_0 = arith.constant 0 : i32
    %c0_i32_1 = arith.constant 0 : i32
    return %arg0, %c0_i32, %c0_i32_0 : i32, i32, i32
  }
  func.func @transform_1(%arg0: i32) -> (i32, i32, i32) {
    %c0_i32 = arith.constant 0 : i32
    %c0_i32_0 = arith.constant 0 : i32
    %c0_i32_1 = arith.constant 0 : i32
    %c0_i32_2 = arith.constant 0 : i32
    return %c0_i32, %c0_i32_0, %c0_i32_1 : i32, i32, i32
  }
  func.func @transform_2(%arg0: i32) -> (i32, i32) {
    %c0_i32 = arith.constant 0 : i32
    %c0_i32_0 = arith.constant 0 : i32
    %c0_i32_1 = arith.constant 0 : i32
    return %c0_i32, %c0_i32_0 : i32, i32
  }
  func.func @transform_3(%arg0: i32) -> (i32, i32, i32, i32) {
    %c0_i32 = arith.constant 0 : i32
    %c0_i32_0 = arith.constant 0 : i32
    %c0_i32_1 = arith.constant 0 : i32
    %c0_i32_2 = arith.constant 0 : i32
    return %arg0, %c0_i32, %c0_i32_0, %c0_i32_1 : i32, i32, i32, i32
  }
}

module attributes {stable_mosaic.version = 11 : i64} {
  func.func @_up2_kernel(%arg0: i32, %arg1: memref<8x8x128xbf16, #tpu.memory_space<vmem>>, %arg2: memref<2x128x256xbf16, #tpu.memory_space<vmem>>, %arg3: memref<1x256xf32, #tpu.memory_space<vmem>>, %arg4: memref<8x2x8x256xbf16, #tpu.memory_space<vmem>>) attributes {dimension_semantics = [#tpu.dimension_semantics<parallel>], iteration_bounds = array<i64: 2>, scalar_prefetch = 0 : i64, scratch_operands = 0 : i64, tpu.core_type = #tpu.core_type<tc>, window_params = [{transform_indices = @transform_0, window_bounds = array<i64: 8, 8, 128>}, {pipeline_mode = #tpu.pipeline_mode<synchronous>, transform_indices = @transform_1, window_bounds = array<i64: 2, 128, 256>}, {pipeline_mode = #tpu.pipeline_mode<synchronous>, transform_indices = @transform_2, window_bounds = array<i64: 1, 256>}, {transform_indices = @transform_3, window_bounds = array<i64: 8, 2, 8, 256>}]} {
    %c0 = arith.constant 0 : index
    %c0_0 = arith.constant 0 : index
    %c0_1 = arith.constant 0 : index
    %0 = vector.load %arg1[%c0, %c0_0, %c0_1] : memref<8x8x128xbf16, #tpu.memory_space<vmem>>, vector<8x8x128xbf16>
    %1 = vector.shape_cast %0 : vector<8x8x128xbf16> to vector<64x128xbf16>
    %c0_2 = arith.constant 0 : index
    %c0_3 = arith.constant 0 : index
    %c0_4 = arith.constant 0 : index
    %2 = vector.load %arg2[%c0_2, %c0_3, %c0_4] : memref<2x128x256xbf16, #tpu.memory_space<vmem>>, vector<1x128x256xbf16>
    %3 = vector.shape_cast %2 : vector<1x128x256xbf16> to vector<128x256xbf16>
    %cst = arith.constant dense<0.000000e+00> : vector<64x256xf32>
    %4 = tpu.matmul %1, %3, %cst {dimension_numbers = #tpu.dot_dimension_numbers<[1], [0], [0], [1], [0, 0, 1, 1], [], []>} : vector<64x128xbf16>, vector<128x256xbf16>, vector<64x256xf32> -> vector<64x256xf32>
    %c0_5 = arith.constant 0 : index
    %c0_6 = arith.constant 0 : index
    %5 = vector.load %arg3[%c0_5, %c0_6] : memref<1x256xf32, #tpu.memory_space<vmem>>, vector<1x256xf32>
    %6 = vector.broadcast %5 : vector<1x256xf32> to vector<64x256xf32>
    %7 = arith.addf %4, %6 : vector<64x256xf32>
    %cst_7 = arith.constant 0.000000e+00 : f32
    %8 = vector.broadcast %cst_7 : f32 to vector<64x256xf32>
    %9 = arith.maximumf %7, %8 : vector<64x256xf32>
    %10 = vector.shape_cast %9 : vector<64x256xf32> to vector<8x8x256xf32>
    %11 = arith.truncf %10 : vector<8x8x256xf32> to vector<8x8x256xbf16>
    %c0_8 = arith.constant 0 : index
    %c0_9 = arith.constant 0 : index
    %c0_10 = arith.constant 0 : index
    %c0_11 = arith.constant 0 : index
    %12 = vector.load %arg4[%c0_8, %c0_9, %c0_10, %c0_11] : memref<8x2x8x256xbf16, #tpu.memory_space<vmem>>, vector<8x1x8x256xbf16>
    %13 = vector.shape_cast %12 : vector<8x1x8x256xbf16> to vector<8x8x256xbf16>
    %14 = vector.shape_cast %11 : vector<8x8x256xbf16> to vector<8x1x8x256xbf16>
    tpu.vector_store %arg4[%c0_8, %c0_9, %c0_10, %c0_11], %14 {strides = array<i32>} : memref<8x2x8x256xbf16, #tpu.memory_space<vmem>>, vector<8x1x8x256xbf16>,
    %c1 = arith.constant 1 : index
    %c0_12 = arith.constant 0 : index
    %c0_13 = arith.constant 0 : index
    %15 = vector.load %arg2[%c1, %c0_12, %c0_13] : memref<2x128x256xbf16, #tpu.memory_space<vmem>>, vector<1x128x256xbf16>
    %16 = vector.shape_cast %15 : vector<1x128x256xbf16> to vector<128x256xbf16>
    %cst_14 = arith.constant dense<0.000000e+00> : vector<64x256xf32>
    %17 = tpu.matmul %1, %16, %cst_14 {dimension_numbers = #tpu.dot_dimension_numbers<[1], [0], [0], [1], [0, 0, 1, 1], [], []>} : vector<64x128xbf16>, vector<128x256xbf16>, vector<64x256xf32> -> vector<64x256xf32>
    %c0_15 = arith.constant 0 : index
    %c0_16 = arith.constant 0 : index
    %18 = vector.load %arg3[%c0_15, %c0_16] : memref<1x256xf32, #tpu.memory_space<vmem>>, vector<1x256xf32>
    %19 = vector.broadcast %18 : vector<1x256xf32> to vector<64x256xf32>
    %20 = arith.addf %17, %19 : vector<64x256xf32>
    %cst_17 = arith.constant 0.000000e+00 : f32
    %21 = vector.broadcast %cst_17 : f32 to vector<64x256xf32>
    %22 = arith.maximumf %20, %21 : vector<64x256xf32>
    %23 = vector.shape_cast %22 : vector<64x256xf32> to vector<8x8x256xf32>
    %24 = arith.truncf %23 : vector<8x8x256xf32> to vector<8x8x256xbf16>
    %c0_18 = arith.constant 0 : index
    %c1_19 = arith.constant 1 : index
    %c0_20 = arith.constant 0 : index
    %c0_21 = arith.constant 0 : index
    %25 = vector.load %arg4[%c0_18, %c1_19, %c0_20, %c0_21] : memref<8x2x8x256xbf16, #tpu.memory_space<vmem>>, vector<8x1x8x256xbf16>
    %26 = vector.shape_cast %25 : vector<8x1x8x256xbf16> to vector<8x8x256xbf16>
    %27 = vector.shape_cast %24 : vector<8x8x256xbf16> to vector<8x1x8x256xbf16>
    tpu.vector_store %arg4[%c0_18, %c1_19, %c0_20, %c0_21], %27 {strides = array<i32>} : memref<8x2x8x256xbf16, #tpu.memory_space<vmem>>, vector<8x1x8x256xbf16>,
    return
  }
  func.func @transform_0(%arg0: i32) -> (i32, i32, i32) {
    %c0_i32 = arith.constant 0 : i32
    %c0_i32_0 = arith.constant 0 : i32
    %c0_i32_1 = arith.constant 0 : i32
    return %arg0, %c0_i32, %c0_i32_0 : i32, i32, i32
  }
  func.func @transform_1(%arg0: i32) -> (i32, i32, i32) {
    %c0_i32 = arith.constant 0 : i32
    %c0_i32_0 = arith.constant 0 : i32
    %c0_i32_1 = arith.constant 0 : i32
    %c0_i32_2 = arith.constant 0 : i32
    return %c0_i32, %c0_i32_0, %c0_i32_1 : i32, i32, i32
  }
  func.func @transform_2(%arg0: i32) -> (i32, i32) {
    %c0_i32 = arith.constant 0 : i32
    %c0_i32_0 = arith.constant 0 : i32
    %c0_i32_1 = arith.constant 0 : i32
    return %c0_i32, %c0_i32_0 : i32, i32
  }
  func.func @transform_3(%arg0: i32) -> (i32, i32, i32, i32) {
    %c0_i32 = arith.constant 0 : i32
    %c0_i32_0 = arith.constant 0 : i32
    %c0_i32_1 = arith.constant 0 : i32
    %c0_i32_2 = arith.constant 0 : i32
    return %arg0, %c0_i32, %c0_i32_0, %c0_i32_1 : i32, i32, i32, i32
  }
}

</mosaic_0001>

<bundles_post_ra>
// kernel: forward_pallas.21
= control target key start
LH: loop header
LB: loop body
LE: loop exit
PB: predicated region body
PF: predicated region fallthrough
CT: control target
= control target key end

     0   :  { %s1054_s12 = smov 0   ;;  %s1210_s0 = inlined_call_operand.vmem [shape: bf16[16,2,8,256], index: 0, kind: input, shape index: {}]   ;;  %s1211_s1 = inlined_call_operand.vmem [shape: bf16[2,256,128], index: 1, kind: input, shape index: {}]   ;;  %s1212_s2 = inlined_call_operand.vmem [shape: f32[1,128], index: 2, kind: input, shape index: {}]   ;;  %s1213_s3 = inlined_call_operand.vmem [shape: bf16[16,8,128], index: 3, kind: output, shape index: {}]  }
   0x1 LB: > { %s757_s13 = sadd.s32 4294967295, %s1032_s12   ;;  %p761_p0 = scmp.ge.s32.totalorder %s1032_s12, 1  ;;  %s1032_s12 = sphi %s1054_s12, %s13_s12  }
   0x2   : > { %p139_p1 = scmp.lt.s32.totalorder %s1032_s12, 3 }
   0x4   : > { %p140_p2 = pnand %p761_p0, %p139_p1 }
   0x5   : > { %s762_s21 = sshll.u32 (!%p140_p2), %s757_s13, 3 }
   0x6   : > { %143 = sbr.rel (%p140_p2) target bundleno = 280 (0x118), region = 32  ;;  %p165_p3 = scmp.lt.s32.totalorder (!%p140_p2), %s762_s21, 15 }
   0xb   : > { %v970_v0 = vld [vmem:[%s1211_s1 + $0xf8] sm:$0xff]   ;;  %v974_v4 = vld [vmem:[%s1211_s1 + $0xf0] sm:$0xff]   ;;  %v978_v8 = vld [vmem:[%s1211_s1 + $0xe8] sm:$0xff]   ;;  %s1215_s21 = smov (!%p165_p3, %s762_s21), 15 }
   0xc   : > { %v971_v1 = vld [vmem:[%s1211_s1 + $0x78] sm:$0xff]   ;;  %882 = vmatprep.subr.bf16.mxu0 %v970_v0  ;;  %v975_v5 = vld [vmem:[%s1211_s1 + $0x70] sm:$0xff]   ;;  %v979_v9 = vld [vmem:[%s1211_s1 + $0x68] sm:$0xff]   ;;  %s858_s18 = sshll.u32 %s1215_s21, 4  ;;  %s766_s7 = sshll.u32 %s1215_s21, 2 }
   0xd   : > { %v972_v2 = vld [vmem:[%s1211_s1 + $0xb8] sm:$0xff]   ;;  %922 = vmatprep.subr.bf16.mxu1 %v971_v1  ;;  %v976_v6 = vld [vmem:[%s1211_s1 + $0xb0] sm:$0xff]   ;;  %v980_v10 = vld [vmem:[%s1211_s1 + $0xa8] sm:$0xff]   ;;  %s1160_s28 = scalar_lea.vmem %s1210_s0, %s858_s18  ;;  %s1195_s10 = scalar_lea.vmem %s1213_s3, %s766_s7 }
   0xe   : > { %v973_v3 = vld [vmem:[%s1211_s1 + $0x38] sm:$0xff]   ;;  %883 = vmatpush3.bf16.msra.mxu0 %v972_v2  ;;  %v977_v7 = vld [vmem:[%s1211_s1 + $0x30] sm:$0xff]   ;;  %v981_v11 = vld [vmem:[%s1211_s1 + $0x28] sm:$0xff]  }
   0xf   : > { %923 = vmatpush3.bf16.msra.mxu1 %v973_v3  ;;  %884 = vmatprep.subr.bf16.mxu0 %v974_v4  ;;  %v982_v12 = vld [vmem:[%s1211_s1 + $0xe0] sm:$0xff]   ;;  %v986_v16 = vld [vmem:[%s1211_s1 + $0xd8] sm:$0xff]   ;;  %v990_v20 = vld [vmem:[%s1211_s1 + $0xd0] sm:$0xff]  }
  0x10   : > { %924 = vmatprep.subr.bf16.mxu1 %v975_v5  ;;  %v983_v13 = vld [vmem:[%s1211_s1 + $0x60] sm:$0xff]   ;;  %v987_v17 = vld [vmem:[%s1211_s1 + $0x58] sm:$0xff]   ;;  %v991_v21 = vld [vmem:[%s1211_s1 + $0x50] sm:$0xff]  }
  0x11   : > { %v984_v14 = vld [vmem:[%s1211_s1 + $0xa0] sm:$0xff]   ;;  %v988_v18 = vld [vmem:[%s1211_s1 + $0x98] sm:$0xff]   ;;  %v992_v22 = vld [vmem:[%s1211_s1 + $0x90] sm:$0xff]  }
  0x12   : > { %885 = vmatpush3.bf16.msra.mxu0 %v976_v6  ;;  %v985_v15 = vld [vmem:[%s1211_s1 + $0x20] sm:$0xff]   ;;  %v989_v19 = vld [vmem:[%s1211_s1 + $0x18] sm:$0xff]   ;;  %v993_v23 = vld [vmem:[%s1211_s1 + $0x10] sm:$0xff]  }
  0x13   : > { %925 = vmatpush3.bf16.msra.mxu1 %v977_v7  ;;  %886 = vmatprep.subr.bf16.mxu0 %v978_v8  ;;  %v994_v24 = vld [vmem:[%s1211_s1 + $0xc8] sm:$0xff]   ;;  %v998_v28 = vld [vmem:[%s1211_s1 + $0xc0] sm:$0xff]  }
  0x14   : > { %926 = vmatprep.subr.bf16.mxu1 %v979_v9  ;;  %v995_v25 = vld [vmem:[%s1211_s1 + $0x48] sm:$0xff]   ;;  %v999_v29 = vld [vmem:[%s1211_s1 + $0x40] sm:$0xff]  }
  0x15   : > { %v996_v26 = vld [vmem:[%s1211_s1 + $0x88] sm:$0xff]   ;;  %v1000_v30 = vld [vmem:[%s1211_s1 + $0x80] sm:$0xff]  }
  0x16   : > { %887 = vmatpush3.bf16.msra.mxu0 %v980_v10  ;;  %v997_v27 = vld [vmem:[%s1211_s1 + $0x8] sm:$0xff]   ;;  %v1001_v31 = vld [vmem:[%s1211_s1] sm:$0xff]  }
  0x17   : > { %927 = vmatpush3.bf16.msra.mxu1 %v981_v11  ;;  %888 = vmatprep.subr.bf16.mxu0 %v982_v12  ;;  %v1002_v32 = vld [vmem:[%s1160_s28 + $0x8] ss:$16 sps:$4 sm:$0xff]   ;;  %v1004_v33 = vld [vmem:[%s1160_s28 + $0xc] ss:$16 sps:$4 sm:$0xff]   ;;  %v1005_v34 = vld [vmem:[%s1160_s28] ss:$16 sps:$4 sm:$0xff]  }
  0x18   : > { %928 = vmatprep.subr.bf16.mxu1 %v983_v13  ;;  %v1007_v35 = vld [vmem:[%s1160_s28 + $0x4] ss:$16 sps:$4 sm:$0xff]   ;;  %428 = vmatprep.mubr.bf16.mxu0 %v1004_v33  ;;  %v1008_v36 = vld [vmem:[%s1160_s28 + $0x2c] ss:$16 sps:$4 sm:$0xff]   ;;  %v1012_v38 = vld [vmem:[%s1160_s28 + $0x28] ss:$16 sps:$4 sm:$0xff]  }
  0x19   : > { %629 = vmatprep.mubr.bf16.mxu1 %v1007_v35  ;;  %v1010_v37 = vld [vmem:[%s1160_s28 + $0x24] ss:$16 sps:$4 sm:$0xff]   ;;  %v1013_v39 = vld [vmem:[%s1160_s28 + $0x20] ss:$16 sps:$4 sm:$0xff]   ;;  %v1014_v40 = vld [vmem:[%s1160_s28 + $0x4c] ss:$16 sps:$4 sm:$0xff]  }
  0x1a   : > { %889 = vmatpush3.bf16.msra.mxu0 %v984_v14  ;;  %v1016_v41 = vld [vmem:[%s1160_s28 + $0x44] ss:$16 sps:$4 sm:$0xff]   ;;  %v1018_v42 = vld [vmem:[%s1160_s28 + $0x48] ss:$16 sps:$4 sm:$0xff]   ;;  %v1019_v43 = vld [vmem:[%s1160_s28 + $0x40] ss:$16 sps:$4 sm:$0xff]  }
  0x1b   : > { %929 = vmatpush3.bf16.msra.mxu1 %v985_v15  ;;  %890 = vmatprep.subr.bf16.mxu0 %v986_v16  ;;  %v1020_v44 = vld [vmem:[%s1160_s28 + $0x6c] ss:$16 sps:$4 sm:$0xff]   ;;  %v1022_v45 = vld [vmem:[%s1160_s28 + $0x64] ss:$16 sps:$4 sm:$0xff]   ;;  %v1024_v46 = vld [vmem:[%s1160_s28 + $0x68] ss:$16 sps:$4 sm:$0xff]  }
  0x1c   : > { %930 = vmatprep.subr.bf16.mxu1 %v987_v17  ;;  %v1025_v47 = vld [vmem:[%s1160_s28 + $0x60] ss:$16 sps:$4 sm:$0xff]  }
  0x1d   : > { %v1187_v58 = vld [vmem:[%s1212_s2] ss:$0 sm:$0xff] }
  0x1e   : > { %891 = vmatpush3.bf16.msra.mxu0 %v988_v18 }
  0x1f   : > { %931 = vmatpush3.bf16.msra.mxu1 %v989_v19  ;;  %892 = vmatprep.subr.bf16.mxu0 %v990_v20 }
  0x20   : > { %932 = vmatprep.subr.bf16.mxu1 %v991_v21 }
  0x22   : > { %893 = vmatpush3.bf16.msra.mxu0 %v992_v22 }
  0x23   : > { %933 = vmatpush3.bf16.msra.mxu1 %v993_v23  ;;  %894 = vmatprep.subr.bf16.mxu0 %v994_v24 }
  0x24   : > { %934 = vmatprep.subr.bf16.mxu1 %v995_v25 }
  0x26   : > { %895 = vmatpush3.bf16.msra.mxu0 %v996_v26 }
  0x27   : > { %935 = vmatpush3.bf16.msra.mxu1 %v997_v27  ;;  %896 = vmatprep.subr.bf16.mxu0 %v998_v28 }
  0x28   : > { %936 = vmatprep.subr.bf16.mxu1 %v999_v29 }
  0x2a   : > { %897 = vmatpush3.bf16.msra.mxu0 %v1000_v30 }
  0x2b   : > { %937 = vmatpush3.bf16.msra.mxu1 %v1001_v31 }
  0x2d   : > { %429 = vmatmul.mubr.bf16.vlgmr.msra.gmra.mxu0 %v1002_v32 }
  0x2e   : > { %630 = vmatmul.mubr.bf16.vlgmr.msra.gmra.mxu1 %v1005_v34  ;;  %436 = vmatprep.mubr.bf16.mxu0 %v1008_v36 }
  0x2f   : > { %637 = vmatprep.mubr.bf16.mxu1 %v1010_v37 }
  0x35   : > { %437 = vmatmul.mubr.bf16.gmra.mxu0 %v1012_v38 }
  0x36   : > { %638 = vmatmul.mubr.bf16.gmra.mxu1 %v1013_v39  ;;  %444 = vmatprep.mubr.bf16.mxu0 %v1014_v40 }
  0x37   : > { %645 = vmatprep.mubr.bf16.mxu1 %v1016_v41 }
  0x3d   : > { %445 = vmatmul.mubr.bf16.gmra.mxu0 %v1018_v42 }
  0x3e   : > { %646 = vmatmul.mubr.bf16.gmra.mxu1 %v1019_v43  ;;  %452 = vmatprep.mubr.bf16.mxu0 %v1020_v44 }
  0x3f   : > { %653 = vmatprep.mubr.bf16.mxu1 %v1022_v45 }
  0x45   : > { %453 = vmatmul.mubr.bf16.gmra.mxu0 %v1024_v46 }
  0x46   : > { %654 = vmatmul.mubr.bf16.gmra.mxu1 %v1025_v47 }
  0xed   : > { %v898_v48 = vpop.f32.mrf.mxu0 }
  0xee   : > { %v938_v49 = vpop.f32.mrf.mxu1 }
  0xef   : > { %v899_v50 = vpop.f32.mrf.mxu0 }
  0xf0   : > { %v900_v51 = vadd.f32 %v899_v50, %v898_v48  ;;  %v939_v52 = vpop.f32.mrf.mxu1 }
  0xf1   : > { %v940_v53 = vadd.f32 %v939_v52, %v938_v49  ;;  %v901_v54 = vpop.f32.mrf.mxu0 }
  0xf2   : > { %v941_v55 = vpop.f32.mrf.mxu1 }
  0xf3   : > { %v632_v56 = vadd.f32 %v940_v53, %v900_v51  ;;  %v902_v57 = vpop.f32.mrf.mxu0 }
  0xf4   : > { %v903_v59 = vadd.f32 %v902_v57, %v901_v54  ;;  %v942_v60 = vpop.f32.mrf.mxu1 }
  0xf5   : > { %v943_v61 = vadd.f32 %v942_v60, %v941_v55  ;;  %v904_v62 = vpop.f32.mrf.mxu0  ;;  %v669_v0 = vadd.f32 %v1187_v58, %v632_v56 }
  0xf6   : > { %v944_v63 = vpop.f32.mrf.mxu1 }
  0xf7   : > { %v635_v1 = vadd.f32 %v943_v61, %v903_v59  ;;  %v905_v2 = vpop.f32.mrf.mxu0  ;;  %v677_v9 = vmax.f32 %v669_v0, 0.0 }
  0xf8   : > { %v906_v3 = vadd.f32 %v905_v2, %v904_v62  ;;  %v945_v4 = vpop.f32.mrf.mxu1 }
  0xf9   : > { %v670_v5 = vadd.f32 %v1187_v58, %v635_v1  ;;  %v946_v6 = vadd.f32 %v945_v4, %v944_v63  ;;  %v907_v7 = vpop.f32.mrf.mxu0 }
  0xfa   : > { %v947_v8 = vpop.f32.mrf.mxu1 }
  0xfb   : > { %v678_v10 = vmax.f32 %v670_v5, 0.0  ;;  %v640_v11 = vadd.f32 %v946_v6, %v906_v3  ;;  %v908_v12 = vpop.f32.mrf.mxu0 }
  0xfc   : > { %v909_v13 = vadd.f32 %v908_v12, %v907_v7  ;;  %v948_v14 = vpop.f32.mrf.mxu1 }
  0xfd   : > { %v862_v15 = vpack.c.bf16 %v678_v10, %v677_v9  ;;  %v949_v16 = vadd.f32 %v948_v14, %v947_v8  ;;  %v910_v17 = vpop.f32.mrf.mxu0  ;;  %v671_v19 = vadd.f32 %v1187_v58, %v640_v11 }
  0xfe   : > { %v950_v18 = vpop.f32.mrf.mxu1 }
  0xff   : > { %863 = vst [vmem:[%s1195_s10] sm:$0xff] %v862_v15   ;;  %v643_v20 = vadd.f32 %v949_v16, %v909_v13  ;;  %v911_v21 = vpop.f32.mrf.mxu0  ;;  %v679_v28 = vmax.f32 %v671_v19, 0.0 }
 0x100   : > { %v912_v22 = vadd.f32 %v911_v21, %v910_v17  ;;  %v951_v23 = vpop.f32.mrf.mxu1 }
 0x101   : > { %v672_v24 = vadd.f32 %v1187_v58, %v643_v20  ;;  %v952_v25 = vadd.f32 %v951_v23, %v950_v18  ;;  %v913_v26 = vpop.f32.mrf.mxu0 }
 0x102   : > { %v953_v27 = vpop.f32.mrf.mxu1 }
 0x103   : > { %v680_v29 = vmax.f32 %v672_v24, 0.0  ;;  %v648_v30 = vadd.f32 %v952_v25, %v912_v22  ;;  %v914_v31 = vpop.f32.mrf.mxu0 }
 0x104   : > { %v915_v32 = vadd.f32 %v914_v31, %v913_v26  ;;  %v954_v33 = vpop.f32.mrf.mxu1 }
 0x105   : > { %v867_v34 = vpack.c.bf16 %v680_v29, %v679_v28  ;;  %v955_v35 = vadd.f32 %v954_v33, %v953_v27  ;;  %v916_v36 = vpop.f32.mrf.mxu0  ;;  %v673_v38 = vadd.f32 %v1187_v58, %v648_v30 }
 0x106   : > { %v956_v37 = vpop.f32.mrf.mxu1 }
 0x107   : > { %879 = vst [vmem:[%s1195_s10 + $0x8] sm:$0xff] %v867_v34   ;;  %v651_v39 = vadd.f32 %v955_v35, %v915_v32  ;;  %v917_v40 = vpop.f32.mrf.mxu0  ;;  %v681_v47 = vmax.f32 %v673_v38, 0.0 }
 0x108   : > { %v918_v41 = vadd.f32 %v917_v40, %v916_v36  ;;  %v957_v42 = vpop.f32.mrf.mxu1 }
 0x109   : > { %v674_v43 = vadd.f32 %v1187_v58, %v651_v39  ;;  %v958_v44 = vadd.f32 %v957_v42, %v956_v37  ;;  %v919_v45 = vpop.f32.mrf.mxu0 }
 0x10a   : > { %v959_v46 = vpop.f32.mrf.mxu1 }
 0x10b   : > { %v682_v48 = vmax.f32 %v674_v43, 0.0  ;;  %v656_v49 = vadd.f32 %v958_v44, %v918_v41  ;;  %v920_v50 = vpop.f32.mrf.mxu0 }
 0x10c   : > { %v921_v51 = vadd.f32 %v920_v50, %v919_v45  ;;  %v960_v52 = vpop.f32.mrf.mxu1 }
 0x10d   : > { %v872_v53 = vpack.c.bf16 %v682_v48, %v681_v47  ;;  %v961_v54 = vadd.f32 %v960_v52, %v959_v46  ;;  %v675_v55 = vadd.f32 %v1187_v58, %v656_v49 }
 0x10f   : > { %880 = vst [vmem:[%s1195_s10 + $0x10] sm:$0xff] %v872_v53   ;;  %v659_v56 = vadd.f32 %v961_v54, %v921_v51  ;;  %v683_v59 = vmax.f32 %v675_v55, 0.0 }
 0x111   : > { %v676_v57 = vadd.f32 %v1187_v58, %v659_v56 }
 0x113   : > { %v684_v60 = vmax.f32 %v676_v57, 0.0 }
 0x115   : > { %v877_v61 = vpack.c.bf16 %v684_v60, %v683_v59 }
 0x117   : > { %881 = vst [vmem:[%s1195_s10 + $0x18] sm:$0xff] %v877_v61  }
 0x118 PF: > { %s13_s12 = sadd.s32 1, %s1032_s12  }
 0x119   : > { %p10_p4 = scmp.ge.s32.totalorder %s13_s12, 4  }
 0x11b   :  { %12 = sbr.rel (!%p10_p4) target bundleno = 1 (0x1), region = 64 }

// kernel: forward_pallas.24
= control target key start
LH: loop header
LB: loop body
LE: loop exit
PB: predicated region body
PF: predicated region fallthrough
CT: control target
= control target key end

     0   :  { %s855_s12 = smov 0   ;;  %s977_s0 = inlined_call_operand.vmem [shape: bf16[8,2,4,256], index: 0, kind: input, shape index: {}]   ;;  %s978_s1 = inlined_call_operand.vmem [shape: bf16[2,256,128], index: 1, kind: input, shape index: {}]   ;;  %s979_s2 = inlined_call_operand.vmem [shape: f32[1,128], index: 2, kind: input, shape index: {}]   ;;  %s980_s3 = inlined_call_operand.vmem [shape: bf16[8,4,128], index: 3, kind: output, shape index: {}]  }
   0x1 LB: > { %s655_s13 = sadd.s32 4294967295, %s832_s12   ;;  %p659_p0 = scmp.ge.s32.totalorder %s832_s12, 1  ;;  %s832_s12 = sphi %s855_s12, %s13_s12  }
   0x2   : > { %p139_p1 = scmp.lt.s32.totalorder %s832_s12, 3 }
   0x4   : > { %p140_p2 = pnand %p659_p0, %p139_p1 }
   0x5   : > { %s660_s25 = sshll.u32 (!%p140_p2), %s655_s13, 2 }
   0x6   : > { %143 = sbr.rel (%p140_p2) target bundleno = 258 (0x102), region = 32  ;;  %p165_p3 = scmp.lt.s32.totalorder (!%p140_p2), %s660_s25, 7 }
   0xb   : > { %v790_v0 = vld [vmem:[%s978_s1 + $0xf8] sm:$0xff]   ;;  %v794_v4 = vld [vmem:[%s978_s1 + $0xf0] sm:$0xff]   ;;  %v798_v8 = vld [vmem:[%s978_s1 + $0xe8] sm:$0xff]   ;;  %s982_s25 = smov (!%p165_p3, %s660_s25), 7  ;;  %v261_v32 = vlaneseq  ;;  %v834_v33 = vmov 1983009808  }
   0xc   : > { %v791_v1 = vld [vmem:[%s978_s1 + $0x78] sm:$0xff]   ;;  %737 = vmatprep.subr.bf16.mxu0 %v790_v0  ;;  %v795_v5 = vld [vmem:[%s978_s1 + $0x70] sm:$0xff]   ;;  %v799_v9 = vld [vmem:[%s978_s1 + $0x68] sm:$0xff]   ;;  %s736_s22 = sshll.u32 %s982_s25, 3  ;;  %v259_v34 = vunpack.c.l.s4 %v834_v33  ;;  %s664_s7 = sshll.u32 %s982_s25, 1 }
   0xd   : > { %v792_v2 = vld [vmem:[%s978_s1 + $0xb8] sm:$0xff]   ;;  %759 = vmatprep.subr.bf16.mxu1 %v791_v1  ;;  %v796_v6 = vld [vmem:[%s978_s1 + $0xb0] sm:$0xff]   ;;  %v800_v10 = vld [vmem:[%s978_s1 + $0xa8] sm:$0xff]   ;;  %s169_s5 = scalar_lea.vmem %s977_s0, %s736_s22  ;;  %v262_v35 = vshrl.u32 %v261_v32, 7  ;;  %s175_s10 = scalar_lea.vmem %s980_s3, %s664_s7 }
   0xe   : > { %v793_v3 = vld [vmem:[%s978_s1 + $0x38] sm:$0xff]   ;;  %738 = vmatpush3.bf16.msra.mxu0 %v792_v2  ;;  %v797_v7 = vld [vmem:[%s978_s1 + $0x30] sm:$0xff]   ;;  %v801_v11 = vld [vmem:[%s978_s1 + $0x28] sm:$0xff]   ;;  %v260_v38 = vunpack.c.0.s8 %v259_v34 }
   0xf   : > { %760 = vmatpush3.bf16.msra.mxu1 %v793_v3  ;;  %739 = vmatprep.subr.bf16.mxu0 %v794_v4  ;;  %v802_v12 = vld [vmem:[%s978_s1 + $0xe0] sm:$0xff]   ;;  %v806_v16 = vld [vmem:[%s978_s1 + $0xd8] sm:$0xff]   ;;  %v810_v20 = vld [vmem:[%s978_s1 + $0xd0] sm:$0xff]  }
  0x10   : > { %761 = vmatprep.subr.bf16.mxu1 %v795_v5  ;;  %v803_v13 = vld [vmem:[%s978_s1 + $0x60] sm:$0xff]   ;;  %v807_v17 = vld [vmem:[%s978_s1 + $0x58] sm:$0xff]   ;;  %v811_v21 = vld [vmem:[%s978_s1 + $0x50] sm:$0xff]   ;;  %v263_v41 = vsub.s32 %v260_v38, %v262_v35 }
  0x11   : > { %v804_v14 = vld [vmem:[%s978_s1 + $0xa0] sm:$0xff]   ;;  %v808_v18 = vld [vmem:[%s978_s1 + $0x98] sm:$0xff]   ;;  %v812_v22 = vld [vmem:[%s978_s1 + $0x90] sm:$0xff]  }
  0x12   : > { %740 = vmatpush3.bf16.msra.mxu0 %v796_v6  ;;  %v805_v15 = vld [vmem:[%s978_s1 + $0x20] sm:$0xff]   ;;  %v809_v19 = vld [vmem:[%s978_s1 + $0x18] sm:$0xff]   ;;  %v813_v23 = vld [vmem:[%s978_s1 + $0x10] sm:$0xff]  }
  0x13   : > { %762 = vmatpush3.bf16.msra.mxu1 %v797_v7  ;;  %741 = vmatprep.subr.bf16.mxu0 %v798_v8  ;;  %v814_v24 = vld [vmem:[%s978_s1 + $0xc8] sm:$0xff]   ;;  %v818_v28 = vld [vmem:[%s978_s1 + $0xc0] sm:$0xff]   ;;  %v823_v37 = vld [vmem:[%s169_s5 + $0x14] ss:$8 sps:$4 sm:$0xff]  }
  0x14   : > { %763 = vmatprep.subr.bf16.mxu1 %v799_v9  ;;  %v815_v25 = vld [vmem:[%s978_s1 + $0x48] sm:$0xff]   ;;  %v819_v29 = vld [vmem:[%s978_s1 + $0x40] sm:$0xff]   ;;  %v825_v40 = vld [vmem:[%s169_s5 + $0x10] ss:$8 sps:$4 sm:$0xff]   ;;  %v271_v43 = vrot.slane %v823_v37, %v263_v41 }
  0x15   : > { %v816_v26 = vld [vmem:[%s978_s1 + $0x88] sm:$0xff]   ;;  %v820_v30 = vld [vmem:[%s978_s1 + $0x80] sm:$0xff]   ;;  %v432_v45 = vrot.slane %v825_v40, %v263_v41 }
  0x16   : > { %742 = vmatpush3.bf16.msra.mxu0 %v800_v10  ;;  %v817_v27 = vld [vmem:[%s978_s1 + $0x8] sm:$0xff]   ;;  %v821_v31 = vld [vmem:[%s978_s1] sm:$0xff]  }
  0x17   : > { %764 = vmatpush3.bf16.msra.mxu1 %v801_v11  ;;  %743 = vmatprep.subr.bf16.mxu0 %v802_v12  ;;  %v822_v36 = vld [vmem:[%s169_s5 + $0x4] ss:$8 sps:$4 sm:$0xff]   ;;  %v824_v39 = vld [vmem:[%s169_s5] ss:$8 sps:$4 sm:$0xff]  }
  0x18   : > { %765 = vmatprep.subr.bf16.mxu1 %v803_v13  ;;  %v264_v42 = vrot.slane %v822_v36, %v263_v41  ;;  %v425_v44 = vrot.slane %v824_v39, %v263_v41  ;;  %v733_v56 = vld [vmem:[%s979_s2] ss:$0 sm:$0xff] }
  0x1a   : > { %744 = vmatpush3.bf16.msra.mxu0 %v804_v14  ;;  %v273_v46 = vcombine.high %v264_v42, %v271_v43  ;;  %v434_v47 = vcombine.high %v425_v44, %v432_v45  ;;  %v272_v48 = vcombine.low %v264_v42, %v271_v43  ;;  %v433_v49 = vcombine.low %v425_v44, %v432_v45 }
  0x1b   : > { %766 = vmatpush3.bf16.msra.mxu1 %v805_v15  ;;  %745 = vmatprep.subr.bf16.mxu0 %v806_v16 }
  0x1c   : > { %767 = vmatprep.subr.bf16.mxu1 %v807_v17  ;;  %404 = vmatprep.mubr.bf16.mxu0 %v273_v46 }
  0x1d   : > { %565 = vmatprep.mubr.bf16.mxu1 %v434_v47 }
  0x1e   : > { %746 = vmatpush3.bf16.msra.mxu0 %v808_v18 }
  0x1f   : > { %768 = vmatpush3.bf16.msra.mxu1 %v809_v19  ;;  %747 = vmatprep.subr.bf16.mxu0 %v810_v20 }
  0x20   : > { %769 = vmatprep.subr.bf16.mxu1 %v811_v21 }
  0x22   : > { %748 = vmatpush3.bf16.msra.mxu0 %v812_v22 }
  0x23   : > { %770 = vmatpush3.bf16.msra.mxu1 %v813_v23  ;;  %749 = vmatprep.subr.bf16.mxu0 %v814_v24 }
  0x24   : > { %771 = vmatprep.subr.bf16.mxu1 %v815_v25 }
  0x26   : > { %750 = vmatpush3.bf16.msra.mxu0 %v816_v26 }
  0x27   : > { %772 = vmatpush3.bf16.msra.mxu1 %v817_v27  ;;  %751 = vmatprep.subr.bf16.mxu0 %v818_v28 }
  0x28   : > { %773 = vmatprep.subr.bf16.mxu1 %v819_v29 }
  0x2a   : > { %752 = vmatpush3.bf16.msra.mxu0 %v820_v30 }
  0x2b   : > { %774 = vmatpush3.bf16.msra.mxu1 %v821_v31 }
  0x2d   : > { %405 = vmatmul.mubr.bf16.vlgmr.msra.gmra.mxu0 %v272_v48 }
  0x2e   : > { %566 = vmatmul.mubr.bf16.vlgmr.msra.gmra.mxu1 %v433_v49 }
  0xed   : > { %v753_v50 = vpop.f32.mrf.mxu0 }
  0xee   : > { %v775_v51 = vpop.f32.mrf.mxu1 }
  0xef   : > { %v754_v52 = vpop.f32.mrf.mxu0 }
  0xf0   : > { %v776_v53 = vpop.f32.mrf.mxu1  ;;  %v755_v54 = vadd.f32 %v754_v52, %v753_v50 }
  0xf1   : > { %v777_v55 = vadd.f32 %v776_v53, %v775_v51  ;;  %v756_v57 = vpop.f32.mrf.mxu0 }
  0xf2   : > { %v778_v58 = vpop.f32.mrf.mxu1 }
  0xf3   : > { %v568_v59 = vadd.f32 %v777_v55, %v755_v54  ;;  %v757_v60 = vpop.f32.mrf.mxu0 }
  0xf4   : > { %v779_v61 = vpop.f32.mrf.mxu1  ;;  %v758_v63 = vadd.f32 %v757_v60, %v756_v57 }
  0xf5   : > { %v581_v62 = vadd.f32 %v733_v56, %v568_v59  ;;  %v780_v0 = vadd.f32 %v779_v61, %v778_v58 }
  0xf7   : > { %v583_v1 = vmax.f32 %v581_v62, 0.0  ;;  %v571_v2 = vadd.f32 %v780_v0, %v758_v63 }
  0xf9   : > { %v587_v3 = vcombine.high %v583_v1, %v583_v1  ;;  %v591_v4 = vpack.c.bf16 %v583_v1, %v583_v1  ;;  %v582_v5 = vadd.f32 %v733_v56, %v571_v2 }
  0xfb   : > { %v592_v6 = vpack.c.bf16 %v587_v3, %v587_v3  ;;  %595 = vst [vmem:[%s175_s10] sm:$0x3] %v591_v4  ;;  %v584_v7 = vmax.f32 %v582_v5, 0.0 }
  0xfd   : > { %596 = vst [vmem:[%s175_s10 + $0x2] sm:$0x3] %v592_v6  ;;  %v588_v8 = vcombine.high %v584_v7, %v584_v7  ;;  %v593_v9 = vpack.c.bf16 %v584_v7, %v584_v7 }
  0xff   : > { %v594_v10 = vpack.c.bf16 %v588_v8, %v588_v8  ;;  %597 = vst [vmem:[%s175_s10 + $0x4] sm:$0x3] %v593_v9 }
 0x101   : > { %598 = vst [vmem:[%s175_s10 + $0x6] sm:$0x3] %v594_v10 }
 0x102 PF: > { %s13_s12 = sadd.s32 1, %s832_s12  }
 0x103   : > { %p10_p4 = scmp.ge.s32.totalorder %s13_s12, 4  }
 0x105   :  { %12 = sbr.rel (!%p10_p4) target bundleno = 1 (0x1), region = 64 }

// kernel: forward_pallas.27
= control target key start
LH: loop header
LB: loop body
LE: loop exit
PB: predicated region body
PF: predicated region fallthrough
CT: control target
= control target key end

     0   :  { %s840_s12 = smov 0   ;;  %s962_s0 = inlined_call_operand.vmem [shape: bf16[4,2,2,256], index: 0, kind: input, shape index: {}]   ;;  %s963_s1 = inlined_call_operand.vmem [shape: bf16[2,256,128], index: 1, kind: input, shape index: {}]   ;;  %s964_s2 = inlined_call_operand.vmem [shape: f32[1,128], index: 2, kind: input, shape index: {}]   ;;  %s965_s3 = inlined_call_operand.vmem [shape: bf16[4,2,128], index: 3, kind: output, shape index: {}]  }
   0x1 LB: > { %s643_s13 = sadd.s32 4294967295, %s816_s12   ;;  %p647_p0 = scmp.ge.s32.totalorder %s816_s12, 1  ;;  %s816_s12 = sphi %s840_s12, %s13_s12  }
   0x2   : > { %p138_p1 = scmp.lt.s32.totalorder %s816_s12, 3 }
   0x4   : > { %p139_p2 = pnand %p647_p0, %p138_p1 }
   0x5   : > { %s648_s25 = sshll.u32 (!%p139_p2), %s643_s13, 1 }
   0x6   : > { %142 = sbr.rel (%p139_p2) target bundleno = 256 (0x100), region = 32  ;;  %p162_p3 = scmp.lt.s32.totalorder (!%p139_p2), %s648_s25, 3 }
   0xb   : > { %v774_v0 = vld [vmem:[%s963_s1 + $0xf8] sm:$0xff]   ;;  %v778_v4 = vld [vmem:[%s963_s1 + $0xf0] sm:$0xff]   ;;  %v782_v8 = vld [vmem:[%s963_s1 + $0xe8] sm:$0xff]   ;;  %s967_s25 = smov (!%p162_p3, %s648_s25), 3  ;;  %v249_v31 = vlaneseq  ;;  %v818_v33 = vmov 1966171168  }
   0xc   : > { %v775_v1 = vld [vmem:[%s963_s1 + $0x78] sm:$0xff]   ;;  %720 = vmatprep.subr.bf16.mxu0 %v774_v0  ;;  %v779_v5 = vld [vmem:[%s963_s1 + $0x70] sm:$0xff]   ;;  %v783_v9 = vld [vmem:[%s963_s1 + $0x68] sm:$0xff]   ;;  %s649_s22 = sshll.u32 %s967_s25, 2  ;;  %v247_v34 = vunpack.c.l.s4 %v818_v33  ;;  %v819_v46 = vmov 1983009808   ;;  %s170_s9 = scalar_lea.vmem %s965_s3, %s967_s25 }
   0xd   : > { %v776_v2 = vld [vmem:[%s963_s1 + $0xb8] sm:$0xff]   ;;  %742 = vmatprep.subr.bf16.mxu1 %v775_v1  ;;  %v780_v6 = vld [vmem:[%s963_s1 + $0xb0] sm:$0xff]   ;;  %v784_v10 = vld [vmem:[%s963_s1 + $0xa8] sm:$0xff]   ;;  %s165_s5 = scalar_lea.vmem %s962_s0, %s649_s22  ;;  %v250_v35 = vshrl.u32 %v249_v31, 7  ;;  %v580_v47 = vunpack.c.l.s4 %v819_v46 }
   0xe   : > { %v777_v3 = vld [vmem:[%s963_s1 + $0x38] sm:$0xff]   ;;  %721 = vmatpush3.bf16.msra.mxu0 %v776_v2  ;;  %v781_v7 = vld [vmem:[%s963_s1 + $0x30] sm:$0xff]   ;;  %v785_v11 = vld [vmem:[%s963_s1 + $0x28] sm:$0xff]   ;;  %v248_v37 = vunpack.c.0.s8 %v247_v34 }
   0xf   : > { %743 = vmatpush3.bf16.msra.mxu1 %v777_v3  ;;  %722 = vmatprep.subr.bf16.mxu0 %v778_v4  ;;  %v786_v12 = vld [vmem:[%s963_s1 + $0xe0] sm:$0xff]   ;;  %v790_v16 = vld [vmem:[%s963_s1 + $0xd8] sm:$0xff]   ;;  %v794_v20 = vld [vmem:[%s963_s1 + $0xd0] sm:$0xff]   ;;  %v581_v54 = vunpack.c.0.s8 %v580_v47 }
  0x10   : > { %744 = vmatprep.subr.bf16.mxu1 %v779_v5  ;;  %v787_v13 = vld [vmem:[%s963_s1 + $0x60] sm:$0xff]   ;;  %v791_v17 = vld [vmem:[%s963_s1 + $0x58] sm:$0xff]   ;;  %v795_v21 = vld [vmem:[%s963_s1 + $0x50] sm:$0xff]   ;;  %v251_v39 = vsub.s32 %v248_v37, %v250_v35 }
  0x11   : > { %v788_v14 = vld [vmem:[%s963_s1 + $0xa0] sm:$0xff]   ;;  %v792_v18 = vld [vmem:[%s963_s1 + $0x98] sm:$0xff]   ;;  %v796_v22 = vld [vmem:[%s963_s1 + $0x90] sm:$0xff]   ;;  %v584_v62 = vsub.s32 %v581_v54, %v250_v35 }
  0x12   : > { %723 = vmatpush3.bf16.msra.mxu0 %v780_v6  ;;  %v789_v15 = vld [vmem:[%s963_s1 + $0x20] sm:$0xff]   ;;  %v793_v19 = vld [vmem:[%s963_s1 + $0x18] sm:$0xff]   ;;  %v797_v23 = vld [vmem:[%s963_s1 + $0x10] sm:$0xff]  }
  0x13   : > { %745 = vmatpush3.bf16.msra.mxu1 %v781_v7  ;;  %724 = vmatprep.subr.bf16.mxu0 %v782_v8  ;;  %v798_v24 = vld [vmem:[%s963_s1 + $0xc8] sm:$0xff]   ;;  %v802_v28 = vld [vmem:[%s963_s1 + $0xc0] sm:$0xff]  }
  0x14   : > { %746 = vmatprep.subr.bf16.mxu1 %v783_v9  ;;  %v799_v25 = vld [vmem:[%s963_s1 + $0x48] sm:$0xff]   ;;  %v803_v29 = vld [vmem:[%s963_s1 + $0x40] sm:$0xff]  }
  0x15   : > { %v800_v26 = vld [vmem:[%s963_s1 + $0x88] sm:$0xff]   ;;  %v804_v30 = vld [vmem:[%s963_s1 + $0x80] sm:$0xff]  }
  0x16   : > { %725 = vmatpush3.bf16.msra.mxu0 %v784_v10  ;;  %v801_v27 = vld [vmem:[%s963_s1 + $0x8] sm:$0xff]   ;;  %v805_v32 = vld [vmem:[%s963_s1] sm:$0xff]  }
  0x17   : > { %747 = vmatpush3.bf16.msra.mxu1 %v785_v11  ;;  %726 = vmatprep.subr.bf16.mxu0 %v786_v12  ;;  %v808_v36 = vld.sshfl [vmem:[%s165_s5 + $0x2] sm:$0x55 pattern:$0x75316420]  ;;  %v717_v55 = vld [vmem:[%s964_s2] ss:$0 sm:$0xff] }
  0x18   : > { %748 = vmatprep.subr.bf16.mxu1 %v787_v13  ;;  %v809_v38 = vld.sshfl [vmem:[%s165_s5] sm:$0x55 pattern:$0x75316420]  ;;  %v253_v40 = vcombine.high %v808_v36, %v808_v36  ;;  %v260_v42 = vrot.slane %v808_v36, %v251_v39 }
  0x19   : > { %v416_v41 = vcombine.high %v809_v38, %v809_v38  ;;  %v423_v43 = vrot.slane %v809_v38, %v251_v39 }
  0x1a   : > { %727 = vmatpush3.bf16.msra.mxu0 %v788_v14  ;;  %v267_v44 = vrot.slane %v253_v40, %v251_v39 }
  0x1b   : > { %749 = vmatpush3.bf16.msra.mxu1 %v789_v15  ;;  %728 = vmatprep.subr.bf16.mxu0 %v790_v16  ;;  %v430_v45 = vrot.slane %v416_v41, %v251_v39 }
  0x1c   : > { %750 = vmatprep.subr.bf16.mxu1 %v791_v17  ;;  %398 = vmatprep.mubr.bf16.mxu0 %v267_v44 }
  0x1d   : > { %561 = vmatprep.mubr.bf16.mxu1 %v430_v45 }
  0x1e   : > { %729 = vmatpush3.bf16.msra.mxu0 %v792_v18 }
  0x1f   : > { %751 = vmatpush3.bf16.msra.mxu1 %v793_v19  ;;  %730 = vmatprep.subr.bf16.mxu0 %v794_v20 }
  0x20   : > { %752 = vmatprep.subr.bf16.mxu1 %v795_v21 }
  0x22   : > { %731 = vmatpush3.bf16.msra.mxu0 %v796_v22 }
  0x23   : > { %753 = vmatpush3.bf16.msra.mxu1 %v797_v23  ;;  %732 = vmatprep.subr.bf16.mxu0 %v798_v24 }
  0x24   : > { %754 = vmatprep.subr.bf16.mxu1 %v799_v25 }
  0x26   : > { %733 = vmatpush3.bf16.msra.mxu0 %v800_v26 }
  0x27   : > { %755 = vmatpush3.bf16.msra.mxu1 %v801_v27  ;;  %734 = vmatprep.subr.bf16.mxu0 %v802_v28 }
  0x28   : > { %756 = vmatprep.subr.bf16.mxu1 %v803_v29 }
  0x2a   : > { %735 = vmatpush3.bf16.msra.mxu0 %v804_v30 }
  0x2b   : > { %757 = vmatpush3.bf16.msra.mxu1 %v805_v32 }
  0x2d   : > { %399 = vmatmul.mubr.bf16.vlgmr.msra.gmra.mxu0 %v260_v42 }
  0x2e   : > { %562 = vmatmul.mubr.bf16.vlgmr.msra.gmra.mxu1 %v423_v43 }
  0xed   : > { %v736_v48 = vpop.f32.mrf.mxu0 }
  0xee   : > { %v758_v49 = vpop.f32.mrf.mxu1 }
  0xef   : > { %v737_v50 = vpop.f32.mrf.mxu0 }
  0xf0   : > { %v759_v51 = vpop.f32.mrf.mxu1  ;;  %v738_v52 = vadd.f32 %v737_v50, %v736_v48 }
  0xf1   : > { %v760_v53 = vadd.f32 %v759_v51, %v758_v49  ;;  %v739_v56 = vpop.f32.mrf.mxu0 }
  0xf2   : > { %v761_v57 = vpop.f32.mrf.mxu1 }
  0xf3   : > { %v564_v58 = vadd.f32 %v760_v53, %v738_v52  ;;  %v740_v59 = vpop.f32.mrf.mxu0 }
  0xf4   : > { %v762_v60 = vpop.f32.mrf.mxu1 }
  0xf5   : > { %v576_v61 = vadd.f32 %v717_v55, %v564_v58 }
  0xf7   : > { %v577_v63 = vmax.f32 %v576_v61, 0.0 }
  0xf9   : > { %v585_v0 = vrot.slane %v577_v63, %v584_v62 }
  0xfb   : > { %v586_v1 = vcombine.high %v585_v0, %v585_v0  ;;  %v589_v2 = vpack.c.bf16 %v585_v0, %v585_v0 }
  0xfd   : > { %v590_v3 = vpack.c.bf16 %v586_v1, %v586_v1  ;;  %591 = vst [vmem:[%s170_s9] sm:$0x1] %v589_v2 }
  0xff   : > { %592 = vst [vmem:[%s170_s9 + $0x1] sm:$0x1] %v590_v3 }
 0x100 PF: > { %s13_s12 = sadd.s32 1, %s816_s12  }
 0x101   : > { %p10_p4 = scmp.ge.s32.totalorder %s13_s12, 4  }
 0x103   :  { %12 = sbr.rel (!%p10_p4) target bundleno = 1 (0x1), region = 64 }

// kernel: forward_pallas.22
= control target key start
LH: loop header
LB: loop body
LE: loop exit
PB: predicated region body
PF: predicated region fallthrough
CT: control target
= control target key end

     0   :  { %s3360_s12 = smov 0   ;;  %s3959_s0 = inlined_call_operand.vmem [shape: bf16[2,110,128], index: 0, kind: input, shape index: {}]   ;;  %s3960_s1 = inlined_call_operand.vmem [shape: bf16[9,128,128], index: 1, kind: input, shape index: {}]   ;;  %s3961_s2 = inlined_call_operand.vmem [shape: f32[1,128], index: 2, kind: input, shape index: {}]   ;;  %s3962_s3 = inlined_call_operand.vmem [shape: bf16[2,8,8,128], index: 3, kind: output, shape index: {}]  }
   0x1 LB: > { %s2441_s13 = sadd.s32 4294967295, %s3336_s12   ;;  %p2445_p0 = scmp.ge.s32.totalorder %s3336_s12, 1  ;;  %s3336_s12 = sphi %s3360_s12, %s13_s12  }
   0x2   : > { %p137_p1 = scmp.lt.s32.totalorder %s3336_s12, 3 }
   0x4   : > { %p138_p2 = pnand %p2445_p0, %p137_p1 }
   0x5   : > { %p161_p3 = scmp.lt.s32.totalorder (!%p138_p2), %s2441_s13, 1 }
   0x6   : > { %141 = sbr.rel (%p138_p2) target bundleno = 426 (0x1aa), region = 32 }
   0xb   : > { %v3205_v0 = vld [vmem:[%s3960_s1 + $0x38] sm:$0xff]   ;;  %v3338_v1 = vmov 0.0   ;;  %v3207_v3 = vld [vmem:[%s3960_s1 + $0x30] sm:$0xff]   ;;  %vm3339_vm0 = vmmov 0   ;;  %v3209_v5 = vld [vmem:[%s3960_s1 + $0x28] sm:$0xff]   ;;  %s3968_s13 = smov (!%p161_p3, %s2441_s13), 1 }
   0xc   : > { %2854 = vmatprep.subr.bf16.mxu0 %v3338_v1  ;;  %2890 = vmatprep.subr.bf16.mxu1 %v3338_v1  ;;  %v3206_v2 = vld [vmem:[%s3960_s1 + $0x78] sm:$0xff]   ;;  %v3208_v4 = vld [vmem:[%s3960_s1 + $0x70] sm:$0xff]   ;;  %v3210_v6 = vld [vmem:[%s3960_s1 + $0x68] sm:$0xff]   ;;  %s3194_s30 = smul.u32 56, %s3968_s13  ;;  %vm425_vm1 = vsmask.f32 7424 }
   0xd   : > { %2855 = vmatpush3.bf16.msra.mxu0 %v3205_v0  ;;  %2870 = vmatprep.mubr.msk.bf16.mxu0 %vm3339_vm0, %v3338_v1  ;;  %v3211_v7 = vld [vmem:[%s3960_s1 + $0x20] sm:$0xff]   ;;  %v3213_v9 = vld [vmem:[%s3960_s1 + $0x18] sm:$0xff]   ;;  %v3215_v11 = vld [vmem:[%s3960_s1 + $0x10] sm:$0xff]   ;;  %vm682_vm2 = vcmask 1046528   ;;  %vm1129_vm3 = vsmask.f32 6400 }
   0xe   : > { %2891 = vmatpush3.bf16.msra.mxu1 %v3206_v2  ;;  %2856 = vmatprep.subr.bf16.mxu0 %v3338_v1  ;;  %v3212_v8 = vld [vmem:[%s3960_s1 + $0x60] sm:$0xff]   ;;  %v3214_v10 = vld [vmem:[%s3960_s1 + $0x58] sm:$0xff]   ;;  %s3417_s10 = scalar_lea.vmem %s3959_s0, %s3194_s30  ;;  %v3216_v14 = vld [vmem:[%s3960_s1 + $0x50] sm:$0xff]   ;;  %vm1395_vm4 = vcmask 1045504   ;;  %vm1842_vm5 = vsmask.f32 5376 }
   0xf   : > { %2892 = vmatprep.subr.bf16.mxu1 %v3338_v1  ;;  %2906 = vmatprep.mubr.msk.bf16.mxu1 %vm3339_vm0, %v3338_v1  ;;  %v3222_v12 = vld [vmem:[%s3417_s10] sm:$0xff]   ;;  %v3223_v13 = vld [vmem:[%s3417_s10 + $0x8] sm:$0xff]   ;;  %v3228_v26 = vld [vmem:[%s3417_s10 + $0x10] sm:$0xff]   ;;  %vm2108_vm6 = vcmask 1044480   ;;  %s2727_s18 = sshll.u32 %s3968_s13, 5  ;;  %vm2315_vm7 = vcmask 1042432  }
  0x10   : > { %v3217_v15 = vld [vmem:[%s3960_s1 + $0x8] sm:$0xff]   ;;  %v429_v16 = vshll.u32 %v3222_v12, 16  ;;  %v427_v18 = vshrl.u32 %v3222_v12, 16  ;;  %v434_v20 = vshll.u32 %v3223_v13, 16  ;;  %v3219_v21 = vld [vmem:[%s3960_s1] sm:$0xff]   ;;  %v3224_v27 = vld [vmem:[%s3960_s1 + $0xb8] sm:$0xff]   ;;  %s3912_s21 = scalar_lea.vmem %s3962_s3, %s2727_s18 }
  0x11   : > { %2857 = vmatpush3.bf16.msra.mxu0 %v3207_v3  ;;  %v3218_v17 = vld [vmem:[%s3960_s1 + $0x48] sm:$0xff]   ;;  %v3220_v22 = vld [vmem:[%s3960_s1 + $0x40] sm:$0xff]   ;;  %v3226_v28 = vld [vmem:[%s3960_s1 + $0xf8] sm:$0xff]   ;;  %v438_v30 = vshrl.u32 %v3223_v13, 16  ;;  %v442_v31 = vshll.u32 %v3228_v26, 16  ;;  %v446_v40 = vshrl.u32 %v3228_v26, 16 }
  0x12   : > { %2893 = vmatpush3.bf16.msra.mxu1 %v3208_v4  ;;  %2858 = vmatprep.subr.bf16.mxu0 %v3338_v1  ;;  %v431_v19 = vrot.slane %v429_v16, 1  ;;  %v3221_v23 = vld [vmem:[%s3417_s10] sm:$0xff]   ;;  %v436_v25 = vrot.slane %v434_v20, 1  ;;  %v3225_v32 = vld [vmem:[%s3960_s1 + $0xb0] sm:$0xff]   ;;  %v3232_v36 = vld [vmem:[%s3417_s10 + $0x18] sm:$0xff]   ;;  %vm2316_vm8 = vcmask 1046532  }
  0x13   : > { %2894 = vmatprep.subr.bf16.mxu1 %v3338_v1  ;;  %v3230_v33 = vld [vmem:[%s3960_s1 + $0xf0] sm:$0xff]   ;;  %v444_v35 = vrot.slane %v442_v31, 1  ;;  %v3227_v37 = vld [vmem:[%s3417_s10 + $0x8] sm:$0xff]   ;;  %v450_v41 = vshll.u32 %v3232_v36, 16  ;;  %v3233_v43 = vld [vmem:[%s3960_s1 + $0xa0] sm:$0xff]   ;;  %v454_v51 = vshrl.u32 %v3232_v36, 16 }
  0x14   : > { %v432_v24 = vor.u32 %v431_v19, %v427_v18  ;;  %v440_v34 = vor.u32 %v438_v30, %v436_v25  ;;  %v3229_v38 = vld [vmem:[%s3960_s1 + $0xa8] sm:$0xff]   ;;  %v3238_v46 = vld [vmem:[%s3417_s10 + $0x20] sm:$0xff]   ;;  %v3231_v48 = vld [vmem:[%s3417_s10 + $0x10] sm:$0xff]   ;;  %vm2327_vm9 = vcmask 1041408   ;;  %vm2328_vm11 = vcmask 1045508  }
  0x15   : > { %2859 = vmatpush3.bf16.msra.mxu0 %v3209_v5  ;;  %v3234_v42 = vld [vmem:[%s3960_s1 + $0xe8] sm:$0xff]   ;;  %v448_v44 = vor.u32 %v446_v40, %v444_v35  ;;  %v452_v45 = vrot.slane %v450_v41, 1  ;;  %v3236_v47 = vld [vmem:[%s3960_s1 + $0xe0] sm:$0xff]   ;;  %v3235_v49 = vld [vmem:[%s3960_s1 + $0x98] sm:$0xff]   ;;  %v458_v52 = vshll.u32 %v3238_v46, 16  ;;  %v462_v60 = vshrl.u32 %v3238_v46, 16 }
  0x16   : > { %2895 = vmatpush3.bf16.msra.mxu1 %v3210_v6  ;;  %2860 = vmatprep.subr.bf16.mxu0 %v3338_v1  ;;  %v437_v29 = vsel %vm425_vm1, %v432_v24, %v436_v25  ;;  %v445_v39 = vsel %vm425_vm1, %v440_v34, %v444_v35  ;;  %v3239_v53 = vld [vmem:[%s3960_s1 + $0xd8] sm:$0xff]   ;;  %v3244_v54 = vld [vmem:[%s3417_s10 + $0x28] ss:$0 sps:$4 sm:$0x11]   ;;  %v3240_v55 = vld [vmem:[%s3960_s1 + $0x90] sm:$0xff]   ;;  %vm2340_vm12 = vcmask 1040384  }
  0x17   : > { %2896 = vmatprep.subr.bf16.mxu1 %v3338_v1  ;;  %v453_v50 = vsel %vm425_vm1, %v448_v44, %v452_v45  ;;  %v456_v56 = vor.u32 %v454_v51, %v452_v45  ;;  %v460_v57 = vrot.slane %v458_v52, 1  ;;  %v3241_v58 = vld [vmem:[%s3960_s1 + $0xd0] sm:$0xff]   ;;  %v3237_v59 = vld [vmem:[%s3417_s10 + $0x18] sm:$0xff]   ;;  %v3242_v62 = vld [vmem:[%s3960_s1 + $0x88] sm:$0xff]   ;;  %v466_v63 = vshll.u32 %v3244_v54, 16 }
  0x18   : > { %v3245_v0 = vld [vmem:[%s3960_s1 + $0xc8] sm:$0xff]   ;;  %v3246_v2 = vld [vmem:[%s3960_s1 + $0x80] sm:$0xff]   ;;  %v3252_v16 = vld [vmem:[%s3960_s1 + $0x138] sm:$0xff]   ;;  %vm2341_vm14 = vcmask 1044484  }
  0x19   : > { %2861 = vmatpush3.bf16.msra.mxu0 %v3211_v7  ;;  %v461_v61 = vsel %vm425_vm1, %v456_v56, %v460_v57  ;;  %v3243_v3 = vld [vmem:[%s3417_s10 + $0x20] sm:$0xff]   ;;  %v464_v4 = vor.u32 %v462_v60, %v460_v57  ;;  %v468_v5 = vrot.slane %v466_v63, 1  ;;  %v3249_v7 = vld [vmem:[%s3417_s10 + $0x8] sm:$0xff]   ;;  %v3254_v18 = vld [vmem:[%s3960_s1 + $0x178] sm:$0xff]  }
  0x1a   : > { %2897 = vmatpush3.bf16.msra.mxu1 %v3212_v8  ;;  %2862 = vmatprep.subr.bf16.mxu0 %v3338_v1  ;;  %v3247_v6 = vld [vmem:[%s3960_s1 + $0xc0] sm:$0xff]   ;;  %v684_v13 = vrot.slane %v3249_v7, 1  ;;  %v3256_v19 = vld [vmem:[%s3417_s10 + $0x14] sm:$0xff]   ;;  %v3257_v26 = vld [vmem:[%s3960_s1 + $0x128] sm:$0xff]  }
  0x1b   : > { %2898 = vmatprep.subr.bf16.mxu1 %v3338_v1  ;;  %v3248_v8 = vld [vmem:[%s3417_s10] sm:$0xfe]   ;;  %v909_v24 = vrot.slane %v3256_v19, 1  ;;  %v3258_v25 = vld [vmem:[%s3960_s1 + $0x170] sm:$0xff]   ;;  %v3262_v31 = vld [vmem:[%s3960_s1 + $0x168] sm:$0xff]  }
  0x1c   : > { %v683_v12 = vrot.slane %v3248_v8, 1  ;;  %v3260_v30 = vld [vmem:[%s3417_s10 + $0x1c] sm:$0xff]   ;;  %v3266_v40 = vld [vmem:[%s3417_s10 + $0x24] sm:$0xff]   ;;  %v3269_v45 = vld [vmem:[%s3960_s1 + $0x150] sm:$0xff]  }
  0x1d   : > { %2863 = vmatpush3.bf16.msra.mxu0 %v3213_v9  ;;  %v3251_v9 = vld [vmem:[%s3417_s10 + $0xc] sm:$0xff]   ;;  %v911_v34 = vrot.slane %v3260_v30, 1  ;;  %v3264_v35 = vld [vmem:[%s3960_s1 + $0x160] sm:$0xff]   ;;  %v3263_v36 = vld [vmem:[%s3960_s1 + $0x118] sm:$0xff]   ;;  %v913_v44 = vrot.slane %v3266_v40, 1 }
  0x1e   : > { %2899 = vmatpush3.bf16.msra.mxu1 %v3214_v10  ;;  %2864 = vmatprep.subr.bf16.mxu0 %v3338_v1  ;;  %v469_v10 = vsel %vm425_vm1, %v464_v4, %v468_v5  ;;  %v685_v20 = vsel %vm682_vm2, %v683_v12, %v684_v13  ;;  %v3267_v41 = vld [vmem:[%s3960_s1 + $0x158] sm:$0xff]   ;;  %v3271_v46 = vld [vmem:[%s3417_s10 + $0x28] ss:$0 sps:$4 sm:$0x11]   ;;  %v3274_v56 = vld [vmem:[%s3960_s1 + $0x100] sm:$0xff]  }
  0x1f   : > { %2900 = vmatprep.subr.bf16.mxu1 %v3338_v1  ;;  %v914_v51 = vsel %vm682_vm2, %v911_v34, %v913_v44  ;;  %v3270_v52 = vld [vmem:[%s3960_s1 + $0x108] sm:$0xff]   ;;  %v3283_v63 = vld [vmem:[%s3417_s10 + $0x14] sm:$0xff]   ;;  %vm3922_vm10 = vmor %vm2315_vm7, %vm2316_vm8 }
  0x20   : > { %v1148_v8 = vshrl.u32 %v3283_v63, 16  ;;  %vm3936_vm13 = vmor %vm2327_vm9, %vm2328_vm11 }
  0x21   : > { %2865 = vmatpush3.bf16.msra.mxu0 %v3215_v11  ;;  %v3250_v11 = vld [vmem:[%s3417_s10 + $0x4] sm:$0xfe]   ;;  %vm2342_vm15 = vmor %vm2340_vm12, %vm2341_vm14 }
  0x22   : > { %2901 = vmatpush3.bf16.msra.mxu1 %v3216_v14  ;;  %2866 = vmatprep.subr.bf16.mxu0 %v3338_v1  ;;  %v906_v14 = vrot.slane %v3250_v11, 1 }
  0x23   : > { %2902 = vmatprep.subr.bf16.mxu1 %v3338_v1 }
  0x25   : > { %2867 = vmatpush3.bf16.msra.mxu0 %v3217_v15  ;;  %v907_v15 = vrot.slane %v3251_v9, 1  ;;  %v1151_v9 = vshll.u32 %v3283_v63, 16  ;;  %v3307_v63 = vld [vmem:[%s3417_s10 + $0x10] sm:$0xff]  }
  0x26   : > { %2903 = vmatpush3.bf16.msra.mxu1 %v3218_v17  ;;  %2868 = vmatprep.subr.bf16.mxu0 %v3338_v1  ;;  %v3255_v17 = vld [vmem:[%s3417_s10 + $0x10] sm:$0xff]  }
  0x27   : > { %2904 = vmatprep.subr.bf16.mxu1 %v3338_v1 }
  0x29   : > { %2869 = vmatpush3.bf16.msra.mxu0 %v3219_v21  ;;  %v908_v21 = vsel %vm682_vm2, %v906_v14, %v907_v15  ;;  %v3280_v14 = vld [vmem:[%s3960_s1 + $0x1b8] sm:$0xff]  }
  0x2a   : > { %2905 = vmatpush3.bf16.msra.mxu1 %v3220_v22  ;;  %2926 = vmatprep.subr.bf16.mxu0 %v3338_v1  ;;  %v3253_v22 = vld [vmem:[%s3960_s1 + $0x130] sm:$0xff]  }
  0x2b   : > { %2962 = vmatprep.subr.bf16.mxu1 %v3338_v1 }
  0x2c   : > { %2871 = vmatmul.mubr.bf16.vlgmr.msra.gmra.mxu0 %v3221_v23  ;;  %v686_v23 = vrot.slane %v3255_v17, 1  ;;  %v3287_v17 = vld [vmem:[%s3417_s10 + $0x1c] sm:$0xff]  }
  0x2d   : > { %2907 = vmatmul.mubr.bf16.vlgmr.msra.gmra.mxu1 %v437_v29  ;;  %2927 = vmatpush3.bf16.msra.mxu0 %v3224_v27  ;;  %v910_v29 = vsel %vm682_vm2, %v907_v15, %v909_v24  ;;  %v1150_v15 = vrot.slane %v1148_v8, 1  ;;  %v1855_v8 = vshll.u32 %v3307_v63, 16 }
  0x2e   : > { %2928 = vmatprep.subr.bf16.mxu0 %v3338_v1  ;;  %2963 = vmatpush3.bf16.msra.mxu1 %v3226_v28  ;;  %v687_v27 = vsel %vm682_vm2, %v684_v13, %v686_v23  ;;  %v3259_v28 = vld [vmem:[%s3417_s10 + $0x18] sm:$0xff]  }
  0x2f   : > { %2874 = vmatprep.mubr.msk.bf16.mxu0 %vm3339_vm0, %v3338_v1  ;;  %2910 = vmatprep.mubr.msk.bf16.mxu1 %vm3339_vm0, %v3338_v1 }
  0x30   : > { %2964 = vmatprep.subr.bf16.mxu1 %v3338_v1 }
  0x31   : > { %2929 = vmatpush3.bf16.msra.mxu0 %v3225_v32  ;;  %v688_v32 = vrot.slane %v3259_v28, 1  ;;  %v3285_v28 = vld [vmem:[%s3960_s1 + $0x1a8] sm:$0xff]  }
  0x32   : > { %2930 = vmatprep.subr.bf16.mxu0 %v3338_v1  ;;  %2965 = vmatpush3.bf16.msra.mxu1 %v3230_v33  ;;  %v3261_v33 = vld [vmem:[%s3960_s1 + $0x120] sm:$0xff]  }
  0x33   : > { %2966 = vmatprep.subr.bf16.mxu1 %v3338_v1 }
  0x34   : > { %2875 = vmatmul.mubr.bf16.gmra.mxu0 %v3227_v37  ;;  %v3265_v37 = vld [vmem:[%s3417_s10 + $0x20] sm:$0xff]  }
  0x35   : > { %2911 = vmatmul.mubr.bf16.gmra.mxu1 %v445_v39  ;;  %2931 = vmatpush3.bf16.msra.mxu0 %v3229_v38  ;;  %v689_v38 = vsel %vm682_vm2, %v686_v23, %v688_v32  ;;  %v912_v39 = vsel %vm682_vm2, %v909_v24, %v911_v34  ;;  %v3281_v23 = vld [vmem:[%s3960_s1 + $0x1b0] sm:$0xff]   ;;  %v3288_v34 = vld [vmem:[%s3417_s10 + $0x1c] sm:$0xff]  }
  0x36   : > { %2878 = vmatprep.mubr.msk.bf16.mxu0 %vm3339_vm0, %v3338_v1  ;;  %2914 = vmatprep.mubr.msk.bf16.mxu1 %vm3339_vm0, %v3338_v1  ;;  %v1401_v40 = vrot.slane %v3288_v34, 2 }
  0x37   : > { %2932 = vmatprep.subr.bf16.mxu0 %v3338_v1  ;;  %2967 = vmatpush3.bf16.msra.mxu1 %v3234_v42  ;;  %v690_v42 = vrot.slane %v3265_v37, 1  ;;  %v3289_v37 = vld [vmem:[%s3960_s1 + $0x1a0] sm:$0xff]  }
  0x38   : > { %2968 = vmatprep.subr.bf16.mxu1 %v3338_v1 }
  0x39   : > { %2933 = vmatpush3.bf16.msra.mxu0 %v3233_v43  ;;  %v3268_v43 = vld [vmem:[%s3960_s1 + $0x110] sm:$0xff]  }
  0x3a   : > { %2934 = vmatprep.subr.bf16.mxu0 %v3338_v1 }
  0x3b   : > { %2969 = vmatpush3.bf16.msra.mxu1 %v3236_v47  ;;  %v3277_v47 = vld [vmem:[%s3417_s10 + $0xc] sm:$0xff]  }
  0x3c   : > { %2879 = vmatmul.mubr.bf16.gmra.mxu0 %v3231_v48  ;;  %2970 = vmatprep.subr.bf16.mxu1 %v3338_v1  ;;  %v3272_v48 = vld [vmem:[%s3417_s10 + $0x2c] ss:$0 sps:$4 sm:$0x11]   ;;  %v1139_v54 = vshrl.u32 %v3277_v47, 16  ;;  %v1142_v57 = vshll.u32 %v3277_v47, 16 }
  0x3d   : > { %2915 = vmatmul.mubr.bf16.gmra.mxu1 %v453_v50  ;;  %2935 = vmatpush3.bf16.msra.mxu0 %v3235_v49  ;;  %v691_v49 = vsel %vm682_vm2, %v688_v32, %v690_v42  ;;  %v3276_v50 = vld [vmem:[%s3417_s10 + $0x4] sm:$0xfe]   ;;  %v915_v60 = vrot.slane %v3272_v48, 1 }
  0x3e   : > { %2882 = vmatprep.mubr.msk.bf16.mxu0 %vm3339_vm0, %v3338_v1  ;;  %2918 = vmatprep.mubr.msk.bf16.mxu1 %vm3339_vm0, %v3338_v1  ;;  %v1144_v5 = vrot.slane %v1142_v57, 2  ;;  %v3293_v32 = vld [vmem:[%s3417_s10 + $0x24] sm:$0xff]  }
  0x3f   : > { %2936 = vmatprep.subr.bf16.mxu0 %v3338_v1  ;;  %2971 = vmatpush3.bf16.msra.mxu1 %v3239_v53  ;;  %v3273_v53 = vld [vmem:[%s3960_s1 + $0x148] sm:$0xff]   ;;  %v916_v7 = vsel %vm682_vm2, %v913_v44, %v915_v60 }
  0x40   : > { %2972 = vmatprep.subr.bf16.mxu1 %v3338_v1  ;;  %v3294_v48 = vld [vmem:[%s3417_s10 + $0x24] sm:$0xff]  }
  0x41   : > { %2937 = vmatpush3.bf16.msra.mxu0 %v3240_v55  ;;  %v692_v55 = vrot.slane %v3271_v46, 1 }
  0x42   : > { %2938 = vmatprep.subr.bf16.mxu0 %v3338_v1 }
  0x43   : > { %2973 = vmatpush3.bf16.msra.mxu1 %v3241_v58  ;;  %v1131_v58 = vshrl.u32 %v3276_v50, 16 }
  0x44   : > { %2883 = vmatmul.mubr.bf16.gmra.mxu0 %v3237_v59  ;;  %2974 = vmatprep.subr.bf16.mxu1 %v3338_v1  ;;  %v1134_v59 = vshll.u32 %v3276_v50, 16 }
  0x45   : > { %2919 = vmatmul.mubr.bf16.gmra.mxu1 %v461_v61  ;;  %2886 = vmatprep.mubr.msk.bf16.mxu0 %vm3339_vm0, %v3338_v1  ;;  %v3275_v61 = vld [vmem:[%s3960_s1 + $0x140] sm:$0xff]  }
  0x46   : > { %2922 = vmatprep.mubr.msk.bf16.mxu1 %vm3339_vm0, %v3338_v1  ;;  %2939 = vmatpush3.bf16.msra.mxu0 %v3242_v62  ;;  %v1141_v62 = vrot.slane %v1139_v54, 1  ;;  %v1136_v4 = vrot.slane %v1134_v59, 2  ;;  %v1403_v54 = vrot.slane %v3294_v48, 2  ;;  %v3300_v59 = vld [vmem:[%s3417_s10 + $0x2c] ss:$0 sps:$4 sm:$0x33]  }
  0x47   : > { %2975 = vmatpush3.bf16.msra.mxu1 %v3245_v0  ;;  %2940 = vmatprep.subr.bf16.mxu0 %v3338_v1  ;;  %v3278_v0 = vld [vmem:[%s3417_s10 + $0x4] sm:$0xfc]  }
  0x48   : > { %2976 = vmatprep.subr.bf16.mxu1 %v3338_v1  ;;  %v1145_v11 = vor.u32 %v1144_v5, %v1141_v62  ;;  %v1396_v12 = vrot.slane %v3278_v0, 2  ;;  %v1404_v60 = vsel %vm1395_vm4, %v1401_v40, %v1403_v54  ;;  %v3306_v62 = vld [vmem:[%s3417_s10 + $0x8] sm:$0xfc]  }
  0x49   : > { %v3301_v0 = vld [vmem:[%s3960_s1 + $0x1c8] sm:$0xff]   ;;  %v1844_v5 = vshrl.u32 %v3306_v62, 16 }
  0x4a   : > { %2941 = vmatpush3.bf16.msra.mxu0 %v3246_v2  ;;  %v693_v2 = vsel %vm682_vm2, %v690_v42, %v692_v55  ;;  %v3291_v42 = vld [vmem:[%s3960_s1 + $0x198] sm:$0xff]   ;;  %v3297_v55 = vld [vmem:[%s3960_s1 + $0x1d0] sm:$0xff]  }
  0x4b   : > { %2977 = vmatpush3.bf16.msra.mxu1 %v3247_v6  ;;  %2998 = vmatprep.subr.bf16.mxu0 %v3338_v1  ;;  %v3279_v6 = vld [vmem:[%s3417_s10 + $0xc] sm:$0xff]  }
  0x4c   : > { %2887 = vmatmul.mubr.bf16.gmra.mxu0 %v3243_v3  ;;  %3034 = vmatprep.subr.bf16.mxu1 %v3338_v1  ;;  %v1133_v3 = vrot.slane %v1131_v58, 1  ;;  %v1397_v13 = vrot.slane %v3279_v6, 2  ;;  %v1847_v6 = vshll.u32 %v3306_v62, 16  ;;  %v3321_v62 = vld [vmem:[%s3417_s10 + $0x30] ss:$0 sps:$4 sm:$0x33]  }
  0x4d   : > { %2923 = vmatmul.mubr.bf16.gmra.mxu1 %v469_v10  ;;  %2942 = vmatprep.mubr.msk.bf16.mxu0 %vm3339_vm0, %v3338_v1 }
  0x4e   : > { %2978 = vmatprep.mubr.msk.bf16.mxu1 %vm3339_vm0, %v3338_v1  ;;  %v1137_v10 = vor.u32 %v1136_v4, %v1133_v3  ;;  %v1398_v19 = vsel %vm1395_vm4, %v1396_v12, %v1397_v13  ;;  %v1405_v3 = vrot.slane %v3300_v59, 2  ;;  %v3302_v4 = vld [vmem:[%s3960_s1 + $0x180] sm:$0xff]   ;;  %v3304_v12 = vld [vmem:[%s3417_s10 + $0x8] sm:$0xfc]  }
  0x54   : > { %2943 = vmatmul.mubr.bf16.vlgmr.msra.gmra.mxu0 %v685_v20  ;;  %v3282_v20 = vld [vmem:[%s3960_s1 + $0x1f8] sm:$0xff]  }
  0x55   : > { %2979 = vmatmul.mubr.bf16.vlgmr.msra.gmra.mxu1 %v908_v21  ;;  %2999 = vmatpush3.bf16.msra.mxu0 %v3252_v16  ;;  %v1153_v16 = vrot.slane %v1151_v9, 2  ;;  %v3284_v21 = vld [vmem:[%s3417_s10 + $0x14] sm:$0xff]   ;;  %v3303_v9 = vld [vmem:[%s3960_s1 + $0x1c0] sm:$0xff]  }
  0x56   : > { %3000 = vmatprep.subr.bf16.mxu0 %v3338_v1  ;;  %3035 = vmatpush3.bf16.msra.mxu1 %v3254_v18  ;;  %v1146_v18 = vsel %vm1129_vm3, %v1137_v10, %v1145_v11 }
  0x57   : > { %2946 = vmatprep.mubr.msk.bf16.mxu0 %vm3339_vm0, %v3338_v1  ;;  %2982 = vmatprep.mubr.msk.bf16.mxu1 %vm3339_vm0, %v3338_v1  ;;  %v1154_v24 = vor.u32 %v1153_v16, %v1150_v15  ;;  %v1849_v15 = vrot.slane %v1847_v6, 3  ;;  %v3323_v6 = vld [vmem:[%s3960_s1 + $0x200] sm:$0xff]  }
  0x58   : > { %3036 = vmatprep.subr.bf16.mxu1 %v3338_v1 }
  0x59   : > { %3001 = vmatpush3.bf16.msra.mxu0 %v3253_v22  ;;  %v1157_v22 = vshrl.u32 %v3287_v17, 16  ;;  %v1155_v30 = vsel %vm1129_vm3, %v1145_v11, %v1154_v24  ;;  %v1406_v11 = vsel %vm1395_vm4, %v1403_v54, %v1405_v3 }
  0x5a   : > { %3002 = vmatprep.subr.bf16.mxu0 %v3338_v1  ;;  %3037 = vmatpush3.bf16.msra.mxu1 %v3258_v25  ;;  %v1160_v25 = vshll.u32 %v3287_v17, 16  ;;  %v1857_v17 = vrot.slane %v1855_v8, 3  ;;  %v3324_v8 = vld [vmem:[%s3417_s10 + $0x8] sm:$0xf8]  }
  0x5b   : > { %3038 = vmatprep.subr.bf16.mxu1 %v3338_v1 }
  0x5c   : > { %2947 = vmatmul.mubr.bf16.gmra.mxu0 %v687_v27  ;;  %v3286_v27 = vld [vmem:[%s3960_s1 + $0x1f0] sm:$0xff]  }
  0x5d   : > { %2983 = vmatmul.mubr.bf16.gmra.mxu1 %v910_v29  ;;  %3003 = vmatpush3.bf16.msra.mxu0 %v3257_v26  ;;  %v1399_v26 = vrot.slane %v3284_v21, 2  ;;  %v1159_v29 = vrot.slane %v1157_v22, 1 }
  0x5e   : > { %2950 = vmatprep.mubr.msk.bf16.mxu0 %vm3339_vm0, %v3338_v1  ;;  %2986 = vmatprep.mubr.msk.bf16.mxu1 %vm3339_vm0, %v3338_v1 }
  0x5f   : > { %3004 = vmatprep.subr.bf16.mxu0 %v3338_v1  ;;  %3039 = vmatpush3.bf16.msra.mxu1 %v3262_v31  ;;  %v1162_v31 = vrot.slane %v1160_v25, 2  ;;  %v1402_v47 = vsel %vm1395_vm4, %v1399_v26, %v1401_v40 }
  0x60   : > { %3040 = vmatprep.subr.bf16.mxu1 %v3338_v1 }
  0x61   : > { %3005 = vmatpush3.bf16.msra.mxu0 %v3261_v33  ;;  %v1400_v33 = vsel %vm1395_vm4, %v1397_v13, %v1399_v26  ;;  %v3305_v13 = vld [vmem:[%s3417_s10 + $0x10] sm:$0xff]   ;;  %v3308_v26 = vld [vmem:[%s3960_s1 + $0x238] sm:$0xff]  }
  0x62   : > { %3006 = vmatprep.subr.bf16.mxu0 %v3338_v1 }
  0x63   : > { %3041 = vmatpush3.bf16.msra.mxu1 %v3264_v35  ;;  %v3290_v35 = vld [vmem:[%s3960_s1 + $0x1e8] sm:$0xff]  }
  0x64   : > { %2951 = vmatmul.mubr.bf16.gmra.mxu0 %v689_v38  ;;  %3042 = vmatprep.subr.bf16.mxu1 %v3338_v1  ;;  %v1166_v38 = vshrl.u32 %v3293_v32, 16 }
  0x65   : > { %2987 = vmatmul.mubr.bf16.gmra.mxu1 %v912_v39  ;;  %3007 = vmatpush3.bf16.msra.mxu0 %v3263_v36  ;;  %v1163_v36 = vor.u32 %v1162_v31, %v1159_v29  ;;  %v1169_v39 = vshll.u32 %v3293_v32, 16  ;;  %v3314_v31 = vld [vmem:[%s3417_s10 + $0x20] sm:$0xff]   ;;  %v3309_v32 = vld [vmem:[%s3960_s1 + $0x230] sm:$0xff]  }
  0x66   : > { %2954 = vmatprep.mubr.msk.bf16.mxu0 %vm3339_vm0, %v3338_v1  ;;  %2990 = vmatprep.mubr.msk.bf16.mxu1 %vm3339_vm0, %v3338_v1 }
  0x67   : > { %3008 = vmatprep.subr.bf16.mxu0 %v3338_v1  ;;  %3043 = vmatpush3.bf16.msra.mxu1 %v3267_v41  ;;  %v3292_v41 = vld [vmem:[%s3960_s1 + $0x1e0] sm:$0xff]   ;;  %v1164_v44 = vsel %vm1129_vm3, %v1154_v24, %v1163_v36  ;;  %v1171_v46 = vrot.slane %v1169_v39, 2 }
  0x68   : > { %3044 = vmatprep.subr.bf16.mxu1 %v3338_v1  ;;  %v3313_v39 = vld [vmem:[%s3417_s10 + $0x20] sm:$0xff]  }
  0x69   : > { %3009 = vmatpush3.bf16.msra.mxu0 %v3268_v43  ;;  %v3299_v43 = vld [vmem:[%s3417_s10 + $0x2c] ss:$0 sps:$4 sm:$0x33]  }
  0x6a   : > { %3010 = vmatprep.subr.bf16.mxu0 %v3338_v1 }
  0x6b   : > { %3045 = vmatpush3.bf16.msra.mxu1 %v3269_v45  ;;  %v1168_v45 = vrot.slane %v1166_v38, 1  ;;  %v3312_v38 = vld [vmem:[%s3960_s1 + $0x228] sm:$0xff]  }
  0x6c   : > { %2955 = vmatmul.mubr.bf16.gmra.mxu0 %v691_v49  ;;  %3046 = vmatprep.subr.bf16.mxu1 %v3338_v1  ;;  %v3295_v49 = vld [vmem:[%s3960_s1 + $0x1d8] sm:$0xff]  }
  0x6d   : > { %2991 = vmatmul.mubr.bf16.gmra.mxu1 %v914_v51  ;;  %2958 = vmatprep.mubr.msk.bf16.mxu0 %vm3339_vm0, %v3338_v1  ;;  %v1172_v50 = vor.u32 %v1171_v46, %v1168_v45  ;;  %v3296_v51 = vld [vmem:[%s3960_s1 + $0x190] sm:$0xff]   ;;  %v3315_v45 = vld [vmem:[%s3960_s1 + $0x220] sm:$0xff]  }
  0x6e   : > { %2994 = vmatprep.mubr.msk.bf16.mxu1 %vm3339_vm0, %v3338_v1  ;;  %3011 = vmatpush3.bf16.msra.mxu0 %v3270_v52  ;;  %v1175_v52 = vshrl.u32 %v3299_v43, 16 }
  0x6f   : > { %3047 = vmatpush3.bf16.msra.mxu1 %v3273_v53  ;;  %3012 = vmatprep.subr.bf16.mxu0 %v3338_v1  ;;  %v1178_v53 = vshll.u32 %v3299_v43, 16  ;;  %v3318_v43 = vld [vmem:[%s3417_s10 + $0x28] sm:$0xff]  }
  0x70   : > { %3048 = vmatprep.subr.bf16.mxu1 %v3338_v1  ;;  %v1177_v57 = vrot.slane %v1175_v52, 1  ;;  %v1882_v48 = vshll.u32 %v3318_v43, 16 }
  0x71   : > { %v1180_v58 = vrot.slane %v1178_v53, 2 }
  0x72   : > { %3013 = vmatpush3.bf16.msra.mxu0 %v3274_v56  ;;  %v1173_v56 = vsel %vm1129_vm3, %v1163_v36, %v1172_v50  ;;  %v1873_v36 = vshll.u32 %v3314_v31, 16  ;;  %v1884_v54 = vrot.slane %v1882_v48, 3 }
  0x73   : > { %3049 = vmatpush3.bf16.msra.mxu1 %v3275_v61  ;;  %3070 = vmatprep.subr.bf16.mxu0 %v3338_v1  ;;  %v3298_v61 = vld [vmem:[%s3960_s1 + $0x188] sm:$0xff]  }
  0x74   : > { %2959 = vmatmul.mubr.bf16.gmra.mxu0 %v693_v2  ;;  %3106 = vmatprep.subr.bf16.mxu1 %v3338_v1  ;;  %v1181_v2 = vor.u32 %v1180_v58, %v1177_v57  ;;  %v3319_v57 = vld [vmem:[%s3960_s1 + $0x210] sm:$0xff]  }
  0x75   : > { %2995 = vmatmul.mubr.bf16.gmra.mxu1 %v916_v7  ;;  %3014 = vmatprep.mubr.msk.bf16.mxu0 %vm3339_vm0, %v3338_v1  ;;  %v1852_v7 = vshrl.u32 %v3307_v63, 16 }
  0x76   : > { %3050 = vmatprep.mubr.msk.bf16.mxu1 %vm3339_vm0, %v3338_v1  ;;  %v1182_v10 = vsel %vm1129_vm3, %v1172_v50, %v1181_v2  ;;  %v3316_v50 = vld [vmem:[%s3960_s1 + $0x218] sm:$0xff]  }
  0x77   : > { %v1854_v16 = vrot.slane %v1852_v7, 2 }
  0x79   : > { %v1858_v22 = vor.u32 %v1857_v17, %v1854_v16 }
  0x7c   : > { %3015 = vmatmul.mubr.bf16.vlgmr.msra.gmra.mxu0 %v1146_v18  ;;  %v3311_v18 = vld [vmem:[%s3417_s10 + $0x18] sm:$0xff]  }
  0x7d   : > { %3051 = vmatmul.mubr.bf16.vlgmr.msra.gmra.mxu1 %v1398_v19  ;;  %3071 = vmatpush3.bf16.msra.mxu0 %v3280_v14  ;;  %v1846_v14 = vrot.slane %v1844_v5, 2  ;;  %v1619_v19 = vrot.slane %v3304_v12, 2  ;;  %v1864_v24 = vshll.u32 %v3311_v18, 16  ;;  %v3327_v12 = vld [vmem:[%s3417_s10 + $0x28] sm:$0xff]  }
  0x7e   : > { %3072 = vmatprep.subr.bf16.mxu0 %v3338_v1  ;;  %3107 = vmatpush3.bf16.msra.mxu1 %v3282_v20  ;;  %v1620_v20 = vrot.slane %v3305_v13, 2  ;;  %v2109_v13 = vrot.slane %v3324_v8, 3  ;;  %v2116_v16 = vrot.slane %v3327_v12, 3 }
  0x7f   : > { %3018 = vmatprep.mubr.msk.bf16.mxu0 %vm3339_vm0, %v3338_v1  ;;  %3054 = vmatprep.mubr.msk.bf16.mxu1 %vm3339_vm0, %v3338_v1  ;;  %v1850_v21 = vor.u32 %v1849_v15, %v1846_v14 }
  0x80   : > { %3108 = vmatprep.subr.bf16.mxu1 %v3338_v1  ;;  %v1621_v25 = vsel %vm1395_vm4, %v1619_v19, %v1620_v20 }
  0x81   : > { %3073 = vmatpush3.bf16.msra.mxu0 %v3281_v23  ;;  %v1861_v23 = vshrl.u32 %v3311_v18, 16  ;;  %v3328_v18 = vld [vmem:[%s3417_s10 + $0x18] sm:$0xff]  }
  0x82   : > { %3074 = vmatprep.subr.bf16.mxu0 %v3338_v1  ;;  %3109 = vmatpush3.bf16.msra.mxu1 %v3286_v27  ;;  %v3310_v27 = vld [vmem:[%s3417_s10 + $0x18] sm:$0xff]  }
  0x83   : > { %3110 = vmatprep.subr.bf16.mxu1 %v3338_v1  ;;  %v1863_v29 = vrot.slane %v1861_v23, 2 }
  0x84   : > { %3019 = vmatmul.mubr.bf16.gmra.mxu0 %v1155_v30  ;;  %v1866_v30 = vrot.slane %v1864_v24, 3 }
  0x85   : > { %3055 = vmatmul.mubr.bf16.gmra.mxu1 %v1400_v33  ;;  %3075 = vmatpush3.bf16.msra.mxu0 %v3285_v28  ;;  %v1859_v28 = vsel %vm1842_vm5, %v1850_v21, %v1858_v22  ;;  %v1622_v33 = vrot.slane %v3310_v27, 2  ;;  %v2112_v21 = vrot.slane %v3328_v18, 3 }
  0x86   : > { %3022 = vmatprep.mubr.msk.bf16.mxu0 %vm3339_vm0, %v3338_v1  ;;  %3058 = vmatprep.mubr.msk.bf16.mxu1 %vm3339_vm0, %v3338_v1  ;;  %v1867_v34 = vor.u32 %v1866_v30, %v1863_v29 }
  0x87   : > { %3076 = vmatprep.subr.bf16.mxu0 %v3338_v1  ;;  %3111 = vmatpush3.bf16.msra.mxu1 %v3290_v35  ;;  %v1870_v35 = vshrl.u32 %v3314_v31, 16 }
  0x88   : > { %3112 = vmatprep.subr.bf16.mxu1 %v3338_v1  ;;  %v1868_v40 = vsel %vm1842_vm5, %v1858_v22, %v1867_v34 }
  0x89   : > { %3077 = vmatpush3.bf16.msra.mxu0 %v3289_v37  ;;  %v1623_v37 = vsel %vm1395_vm4, %v1620_v20, %v1622_v33  ;;  %v3329_v20 = vld [vmem:[%s3417_s10 + $0x30] ss:$0 sps:$4 sm:$0x77]  }
  0x8a   : > { %3078 = vmatprep.subr.bf16.mxu0 %v3338_v1  ;;  %v2118_v22 = vrot.slane %v3329_v20, 3 }
  0x8b   : > { %3113 = vmatpush3.bf16.msra.mxu1 %v3292_v41  ;;  %v1872_v41 = vrot.slane %v1870_v35, 2 }
  0x8c   : > { %3023 = vmatmul.mubr.bf16.gmra.mxu0 %v1164_v44  ;;  %3114 = vmatprep.subr.bf16.mxu1 %v3338_v1  ;;  %v1624_v44 = vrot.slane %v3313_v39, 2  ;;  %v2119_v24 = vsel %vm2108_vm6, %v2116_v16, %v2118_v22 }
  0x8d   : > { %3059 = vmatmul.mubr.bf16.gmra.mxu1 %v1402_v47  ;;  %3079 = vmatpush3.bf16.msra.mxu0 %v3291_v42  ;;  %v1875_v42 = vrot.slane %v1873_v36, 3  ;;  %v1879_v47 = vshrl.u32 %v3318_v43, 16 }
  0x8e   : > { %3026 = vmatprep.mubr.msk.bf16.mxu0 %vm3339_vm0, %v3338_v1  ;;  %3062 = vmatprep.mubr.msk.bf16.mxu1 %vm3339_vm0, %v3338_v1 }
  0x8f   : > { %3080 = vmatprep.subr.bf16.mxu0 %v3338_v1  ;;  %3115 = vmatpush3.bf16.msra.mxu1 %v3295_v49  ;;  %v1876_v46 = vor.u32 %v1875_v42, %v1872_v41  ;;  %v1625_v49 = vsel %vm1395_vm4, %v1622_v33, %v1624_v44  ;;  %v1881_v53 = vrot.slane %v1879_v47, 2 }
  0x90   : > { %3116 = vmatprep.subr.bf16.mxu1 %v3338_v1 }
  0x91   : > { %3081 = vmatpush3.bf16.msra.mxu0 %v3296_v51  ;;  %v3317_v51 = vld [vmem:[%s3417_s10 + $0x28] sm:$0xff]   ;;  %v1877_v52 = vsel %vm1842_vm5, %v1867_v34, %v1876_v46  ;;  %v1885_v58 = vor.u32 %v1884_v54, %v1881_v53 }
  0x92   : > { %3082 = vmatprep.subr.bf16.mxu0 %v3338_v1 }
  0x93   : > { %3117 = vmatpush3.bf16.msra.mxu1 %v3297_v55  ;;  %v3322_v55 = vld [vmem:[%s3417_s10 + $0x30] ss:$0 sps:$4 sm:$0x77]   ;;  %v1886_v63 = vsel %vm1842_vm5, %v1876_v46, %v1885_v58 }
  0x94   : > { %3027 = vmatmul.mubr.bf16.gmra.mxu0 %v1173_v56  ;;  %3118 = vmatprep.subr.bf16.mxu1 %v3338_v1  ;;  %v1626_v56 = vrot.slane %v3317_v51, 2  ;;  %v1888_v59 = vshrl.u32 %v3322_v55, 16 }
  0x95   : > { %3063 = vmatmul.mubr.bf16.gmra.mxu1 %v1404_v60  ;;  %3030 = vmatprep.mubr.msk.bf16.mxu0 %vm3339_vm0, %v3338_v1  ;;  %v1891_v60 = vshll.u32 %v3322_v55, 16 }
  0x96   : > { %3066 = vmatprep.mubr.msk.bf16.mxu1 %vm3339_vm0, %v3338_v1  ;;  %3083 = vmatpush3.bf16.msra.mxu0 %v3298_v61  ;;  %v1627_v61 = vsel %vm1395_vm4, %v1624_v44, %v1626_v56  ;;  %v1890_v2 = vrot.slane %v1888_v59, 2 }
  0x97   : > { %3119 = vmatpush3.bf16.msra.mxu1 %v3301_v0  ;;  %3084 = vmatprep.subr.bf16.mxu0 %v3338_v1  ;;  %v3320_v0 = vld [vmem:[%s3960_s1 + $0x208] sm:$0xff]   ;;  %v1893_v3 = vrot.slane %v1891_v60, 3 }
  0x98   : > { %3120 = vmatprep.subr.bf16.mxu1 %v3338_v1 }
  0x99   : > { %v1894_v5 = vor.u32 %v1893_v3, %v1890_v2 }
  0x9a   : > { %3085 = vmatpush3.bf16.msra.mxu0 %v3302_v4  ;;  %v1628_v4 = vrot.slane %v3321_v62, 2 }
  0x9b   : > { %3121 = vmatpush3.bf16.msra.mxu1 %v3303_v9  ;;  %3142 = vmatprep.subr.bf16.mxu0 %v3338_v1  ;;  %v3325_v9 = vld [vmem:[%s3417_s10 + $0x10] sm:$0xff]  }
  0x9c   : > { %3031 = vmatmul.mubr.bf16.gmra.mxu0 %v1182_v10  ;;  %3178 = vmatprep.subr.bf16.mxu1 %v3338_v1  ;;  %v1629_v7 = vsel %vm1395_vm4, %v1626_v56, %v1628_v4  ;;  %v1895_v10 = vsel %vm1842_vm5, %v1885_v58, %v1894_v5  ;;  %v2110_v14 = vrot.slane %v3325_v9, 3 }
  0x9d   : > { %3067 = vmatmul.mubr.bf16.gmra.mxu1 %v1406_v11  ;;  %3086 = vmatprep.mubr.msk.bf16.mxu0 %vm3339_vm0, %v3338_v1  ;;  %v3326_v11 = vld [vmem:[%s3417_s10 + $0x20] sm:$0xff]  }
  0x9e   : > { %3122 = vmatprep.mubr.msk.bf16.mxu1 %vm3339_vm0, %v3338_v1  ;;  %v2114_v15 = vrot.slane %v3326_v11, 3  ;;  %v2111_v17 = vsel %vm2108_vm6, %v2109_v13, %v2110_v14  ;;  %v2113_v23 = vsel %vm2108_vm6, %v2110_v14, %v2112_v21 }
  0xa0   : > { %v2117_v19 = vsel %vm2108_vm6, %v2114_v15, %v2116_v16 }
  0xa4   : > { %3087 = vmatmul.mubr.bf16.vlgmr.msra.gmra.mxu0 %v1621_v25  ;;  %v2115_v25 = vsel %vm2108_vm6, %v2112_v21, %v2114_v15 }
  0xa5   : > { %3123 = vmatmul.mubr.bf16.vlgmr.msra.gmra.mxu1 %v1859_v28  ;;  %3143 = vmatpush3.bf16.msra.mxu0 %v3308_v26 }
  0xa6   : > { %3144 = vmatprep.subr.bf16.mxu0 %v3338_v1  ;;  %3186 = vmatpush3.bf16.msra.mxu1 %v3308_v26 }
  0xa7   : > { %3090 = vmatprep.mubr.msk.bf16.mxu0 %vm3339_vm0, %v3338_v1  ;;  %3126 = vmatprep.mubr.msk.bf16.mxu1 %vm3339_vm0, %v3338_v1 }
  0xa8   : > { %3179 = vmatprep.subr.bf16.mxu1 %v3338_v1 }
  0xa9   : > { %3145 = vmatpush3.bf16.msra.mxu0 %v3309_v32 }
  0xaa   : > { %3146 = vmatprep.subr.bf16.mxu0 %v3338_v1  ;;  %3187 = vmatpush3.bf16.msra.mxu1 %v3309_v32 }
  0xab   : > { %3180 = vmatprep.subr.bf16.mxu1 %v3338_v1 }
  0xac   : > { %3091 = vmatmul.mubr.bf16.gmra.mxu0 %v1623_v37 }
  0xad   : > { %3127 = vmatmul.mubr.bf16.gmra.mxu1 %v1868_v40  ;;  %3147 = vmatpush3.bf16.msra.mxu0 %v3312_v38 }
  0xae   : > { %3094 = vmatprep.mubr.msk.bf16.mxu0 %vm3339_vm0, %v3338_v1  ;;  %3130 = vmatprep.mubr.msk.bf16.mxu1 %vm3339_vm0, %v3338_v1 }
  0xaf   : > { %3148 = vmatprep.subr.bf16.mxu0 %v3338_v1  ;;  %3188 = vmatpush3.bf16.msra.mxu1 %v3312_v38 }
  0xb0   : > { %3181 = vmatprep.subr.bf16.mxu1 %v3338_v1 }
  0xb1   : > { %3149 = vmatpush3.bf16.msra.mxu0 %v3315_v45 }
  0xb2   : > { %3150 = vmatprep.subr.bf16.mxu0 %v3338_v1 }
  0xb3   : > { %3189 = vmatpush3.bf16.msra.mxu1 %v3315_v45 }
  0xb4   : > { %3095 = vmatmul.mubr.bf16.gmra.mxu0 %v1625_v49  ;;  %3182 = vmatprep.subr.bf16.mxu1 %v3338_v1 }
  0xb5   : > { %3131 = vmatmul.mubr.bf16.gmra.mxu1 %v1877_v52  ;;  %3151 = vmatpush3.bf16.msra.mxu0 %v3316_v50 }
  0xb6   : > { %3098 = vmatprep.mubr.msk.bf16.mxu0 %vm3339_vm0, %v3338_v1  ;;  %3134 = vmatprep.mubr.msk.bf16.mxu1 %vm3339_vm0, %v3338_v1 }
  0xb7   : > { %3190 = vmatpush3.bf16.msra.mxu1 %v3316_v50  ;;  %3152 = vmatprep.subr.bf16.mxu0 %v3338_v1 }
  0xb8   : > { %3183 = vmatprep.subr.bf16.mxu1 %v3338_v1 }
  0xb9   : > { %3153 = vmatpush3.bf16.msra.mxu0 %v3319_v57 }
  0xba   : > { %3154 = vmatprep.subr.bf16.mxu0 %v3338_v1 }
  0xbb   : > { %3191 = vmatpush3.bf16.msra.mxu1 %v3319_v57 }
  0xbc   : > { %3099 = vmatmul.mubr.bf16.gmra.mxu0 %v1627_v61  ;;  %3184 = vmatprep.subr.bf16.mxu1 %v3338_v1 }
  0xbd   : > { %3135 = vmatmul.mubr.bf16.gmra.mxu1 %v1886_v63  ;;  %3102 = vmatprep.mubr.msk.bf16.mxu0 %vm3339_vm0, %v3338_v1 }
  0xbe   : > { %3138 = vmatprep.mubr.msk.bf16.mxu1 %vm3339_vm0, %v3338_v1  ;;  %3155 = vmatpush3.bf16.msra.mxu0 %v3320_v0 }
  0xbf   : > { %3192 = vmatpush3.bf16.msra.mxu1 %v3320_v0  ;;  %3156 = vmatprep.subr.bf16.mxu0 %v3338_v1 }
  0xc0   : > { %3185 = vmatprep.subr.bf16.mxu1 %v3338_v1 }
  0xc2   : > { %3157 = vmatpush3.bf16.msra.mxu0 %v3323_v6 }
  0xc3   : > { %3193 = vmatpush3.bf16.msra.mxu1 %v3323_v6 }
  0xc4   : > { %3103 = vmatmul.mubr.bf16.gmra.mxu0 %v1629_v7 }
  0xc5   : > { %3139 = vmatmul.mubr.bf16.gmra.mxu1 %v1895_v10  ;;  %3158 = vmatprep.mubr.msk.bf16.mxu0 %vm3339_vm0, %v3338_v1 }
  0xc6   : > { %3170 = vmatprep.mubr.msk.bf16.mxu1 %vm3339_vm0, %v3338_v1 }
  0xcc   : > { %3159 = vmatmul.mubr.bf16.vlgmr.msra.gmra.mxu0 %v2111_v17 }
  0xcd   : > { %3171 = vmatmul.mubr.bf16.vlgmr.msra.gmra.mxu1 %v2117_v19  ;;  %3162 = vmatprep.mubr.msk.bf16.mxu0 %vm3339_vm0, %v3338_v1 }
  0xce   : > { %3174 = vmatprep.mubr.msk.bf16.mxu1 %vm3339_vm0, %v3338_v1 }
  0xd4   : > { %3163 = vmatmul.mubr.bf16.gmra.mxu0 %v2113_v23 }
  0xd5   : > { %3175 = vmatmul.mubr.bf16.gmra.mxu1 %v2119_v24  ;;  %3166 = vmatprep.mubr.msk.bf16.mxu0 %vm3339_vm0, %v3338_v1 }
  0xdc   : > { %3167 = vmatmul.mubr.bf16.gmra.mxu0 %v2115_v25 }
  0xec   : > { %v310_v26 = vpop.f32.mrf.mxu0 }
  0xed   : > { %v557_v27 = vpop.f32.mrf.mxu1 }
  0xee   : > { %v596_v28 = vadd.f32 %v557_v27, %v310_v26  ;;  %v2872_v29 = vpop.f32.mrf.mxu0 }
  0xef   : > { %v2908_v30 = vpop.f32.mrf.mxu1 }
  0xf0   : > { %v313_v31 = vpop.f32.mrf.mxu0 }
  0xf1   : > { %v560_v32 = vpop.f32.mrf.mxu1 }
  0xf2   : > { %v597_v33 = vadd.f32 %v560_v32, %v313_v31  ;;  %v2873_v34 = vpop.f32.mrf.mxu0 }
  0xf3   : > { %v2909_v35 = vpop.f32.mrf.mxu1 }
  0xf4   : > { %v318_v36 = vpop.f32.mrf.mxu0 }
  0xf5   : > { %v565_v37 = vpop.f32.mrf.mxu1 }
  0xf6   : > { %v598_v38 = vadd.f32 %v565_v37, %v318_v36  ;;  %v2876_v39 = vpop.f32.mrf.mxu0 }
  0xf7   : > { %v2912_v40 = vpop.f32.mrf.mxu1 }
  0xf8   : > { %v321_v41 = vpop.f32.mrf.mxu0 }
  0xf9   : > { %v568_v1 = vpop.f32.mrf.mxu1 }
  0xfa   : > { %v599_v42 = vadd.f32 %v568_v1, %v321_v41  ;;  %v2877_v43 = vpop.f32.mrf.mxu0 }
  0xfb   : > { %v2913_v44 = vpop.f32.mrf.mxu1 }
  0xfc   : > { %v326_v45 = vpop.f32.mrf.mxu0 }
  0xfd   : > { %v573_v46 = vpop.f32.mrf.mxu1 }
  0xfe   : > { %v600_v47 = vadd.f32 %v573_v46, %v326_v45  ;;  %v2880_v48 = vpop.f32.mrf.mxu0 }
  0xff   : > { %v2916_v49 = vpop.f32.mrf.mxu1 }
 0x100   : > { %v329_v50 = vpop.f32.mrf.mxu0 }
 0x101   : > { %v576_v51 = vpop.f32.mrf.mxu1 }
 0x102   : > { %v601_v52 = vadd.f32 %v576_v51, %v329_v50  ;;  %v2881_v53 = vpop.f32.mrf.mxu0 }
 0x103   : > { %v2917_v54 = vpop.f32.mrf.mxu1 }
 0x104   : > { %v334_v55 = vpop.f32.mrf.mxu0 }
 0x105   : > { %v581_v56 = vpop.f32.mrf.mxu1 }
 0x106   : > { %v602_v57 = vadd.f32 %v581_v56, %v334_v55  ;;  %v2884_v58 = vpop.f32.mrf.mxu0 }
 0x107   : > { %v2920_v59 = vpop.f32.mrf.mxu1 }
 0x108   : > { %v337_v60 = vpop.f32.mrf.mxu0 }
 0x109   : > { %v584_v61 = vpop.f32.mrf.mxu1 }
 0x10a   : > { %v603_v62 = vadd.f32 %v584_v61, %v337_v60  ;;  %v2885_v63 = vpop.f32.mrf.mxu0 }
 0x10b   : > { %v2921_v0 = vpop.f32.mrf.mxu1 }
 0x10c   : > { %v342_v2 = vpop.f32.mrf.mxu0 }
 0x10d   : > { %v589_v3 = vpop.f32.mrf.mxu1 }
 0x10e   : > { %v604_v4 = vadd.f32 %v589_v3, %v342_v2  ;;  %v2888_v5 = vpop.f32.mrf.mxu0 }
 0x10f   : > { %v2924_v6 = vpop.f32.mrf.mxu1 }
 0x110   : > { %v345_v7 = vpop.f32.mrf.mxu0 }
 0x111   : > { %v592_v8 = vpop.f32.mrf.mxu1 }
 0x112   : > { %v605_v9 = vadd.f32 %v592_v8, %v345_v7  ;;  %v2889_v10 = vpop.f32.mrf.mxu0 }
 0x113   : > { %v2925_v11 = vpop.f32.mrf.mxu1 }
 0x114   : > { %v781_v12 = vpop.f32.mrf.mxu0 }
 0x115   : > { %v820_v13 = vadd.f32 %v781_v12, %v596_v28  ;;  %v1004_v14 = vpop.f32.mrf.mxu1 }
 0x116   : > { %v2944_v15 = vpop.f32.mrf.mxu0 }
 0x117   : > { %v1043_v16 = vadd.f32 %v1004_v14, %v820_v13  ;;  %v2980_v17 = vpop.f32.mrf.mxu1 }
 0x118   : > { %v784_v18 = vpop.f32.mrf.mxu0 }
 0x119   : > { %v821_v19 = vadd.f32 %v784_v18, %v597_v33  ;;  %v1007_v20 = vpop.f32.mrf.mxu1 }
 0x11a   : > { %v2945_v21 = vpop.f32.mrf.mxu0 }
 0x11b   : > { %v1044_v22 = vadd.f32 %v1007_v20, %v821_v19  ;;  %v2981_v23 = vpop.f32.mrf.mxu1 }
 0x11c   : > { %v789_v24 = vpop.f32.mrf.mxu0 }
 0x11d   : > { %v822_v25 = vadd.f32 %v789_v24, %v598_v38  ;;  %v1012_v26 = vpop.f32.mrf.mxu1 }
 0x11e   : > { %v2948_v27 = vpop.f32.mrf.mxu0 }
 0x11f   : > { %v1045_v29 = vadd.f32 %v1012_v26, %v822_v25  ;;  %v2984_v30 = vpop.f32.mrf.mxu1 }
 0x120   : > { %v792_v31 = vpop.f32.mrf.mxu0 }
 0x121   : > { %v823_v32 = vadd.f32 %v792_v31, %v599_v42  ;;  %v1015_v34 = vpop.f32.mrf.mxu1 }
 0x122   : > { %v2949_v28 = vpop.f32.mrf.mxu0 }
 0x123   : > { %v1046_v35 = vadd.f32 %v1015_v34, %v823_v32  ;;  %v2985_v36 = vpop.f32.mrf.mxu1 }
 0x124   : > { %v797_v37 = vpop.f32.mrf.mxu0 }
 0x125   : > { %v824_v39 = vadd.f32 %v797_v37, %v600_v47  ;;  %v1020_v40 = vpop.f32.mrf.mxu1 }
 0x126   : > { %v2952_v33 = vpop.f32.mrf.mxu0 }
 0x127   : > { %v1047_v41 = vadd.f32 %v1020_v40, %v824_v39  ;;  %v2988_v1 = vpop.f32.mrf.mxu1 }
 0x128   : > { %v800_v43 = vpop.f32.mrf.mxu0 }
 0x129   : > { %v825_v44 = vadd.f32 %v800_v43, %v601_v52  ;;  %v1023_v45 = vpop.f32.mrf.mxu1 }
 0x12a   : > { %v2953_v38 = vpop.f32.mrf.mxu0 }
 0x12b   : > { %v1048_v46 = vadd.f32 %v1023_v45, %v825_v44  ;;  %v2989_v48 = vpop.f32.mrf.mxu1 }
 0x12c   : > { %v805_v49 = vpop.f32.mrf.mxu0 }
 0x12d   : > { %v826_v50 = vadd.f32 %v805_v49, %v602_v57  ;;  %v1028_v51 = vpop.f32.mrf.mxu1 }
 0x12e   : > { %v2956_v42 = vpop.f32.mrf.mxu0 }
 0x12f   : > { %v3855_v53 = vadd.f32 %v1028_v51, %v826_v50  ;;  %v2992_v54 = vpop.f32.mrf.mxu1 }
 0x130   : > { %v808_v55 = vpop.f32.mrf.mxu0 }
 0x131   : > { %v827_v56 = vadd.f32 %v808_v55, %v603_v62  ;;  %v1031_v47 = vpop.f32.mrf.mxu1 }
 0x132   : > { %v2957_v58 = vpop.f32.mrf.mxu0 }
 0x133   : > { %v3857_v59 = vadd.f32 %v1031_v47, %v827_v56  ;;  %v2993_v60 = vpop.f32.mrf.mxu1 }
 0x134   : > { %v813_v61 = vpop.f32.mrf.mxu0 }
 0x135   : > { %v828_v52 = vadd.f32 %v813_v61, %v604_v4  ;;  %v1036_v63 = vpop.f32.mrf.mxu1 }
 0x136   : > { %v2960_v0 = vpop.f32.mrf.mxu0 }
 0x137   : > { %v3859_v2 = vadd.f32 %v1036_v63, %v828_v52  ;;  %v2996_v3 = vpop.f32.mrf.mxu1 }
 0x138   : > { %v816_v57 = vpop.f32.mrf.mxu0 }
 0x139   : > { %v829_v5 = vadd.f32 %v816_v57, %v605_v9  ;;  %v1039_v6 = vpop.f32.mrf.mxu1 }
 0x13a   : > { %v2961_v7 = vpop.f32.mrf.mxu0 }
 0x13b   : > { %v3861_v8 = vadd.f32 %v1039_v6, %v829_v5  ;;  %v2997_v10 = vpop.f32.mrf.mxu1 }
 0x13c   : > { %v1270_v62 = vpop.f32.mrf.mxu0 }
 0x13d   : > { %v1309_v11 = vadd.f32 %v1270_v62, %v1043_v16  ;;  %v1494_v12 = vpop.f32.mrf.mxu1 }
 0x13e   : > { %v3016_v13 = vpop.f32.mrf.mxu0 }
 0x13f   : > { %v3863_v14 = vadd.f32 %v1494_v12, %v1309_v11  ;;  %v3052_v15 = vpop.f32.mrf.mxu1 }
 0x140   : > { %v1273_v4 = vpop.f32.mrf.mxu0 }
 0x141   : > { %v1310_v17 = vadd.f32 %v1273_v4, %v1044_v22  ;;  %v1497_v18 = vpop.f32.mrf.mxu1 }
 0x142   : > { %v3017_v19 = vpop.f32.mrf.mxu0 }
 0x143   : > { %v3865_v20 = vadd.f32 %v1497_v18, %v1310_v17  ;;  %v3053_v21 = vpop.f32.mrf.mxu1 }
 0x144   : > { %v1278_v9 = vpop.f32.mrf.mxu0 }
 0x145   : > { %v1311_v23 = vadd.f32 %v1278_v9, %v1045_v29  ;;  %v1502_v24 = vpop.f32.mrf.mxu1 }
 0x146   : > { %v3020_v25 = vpop.f32.mrf.mxu0 }
 0x147   : > { %v3867_v26 = vadd.f32 %v1502_v24, %v1311_v23  ;;  %v3056_v27 = vpop.f32.mrf.mxu1 }
 0x148   : > { %v1281_v16 = vpop.f32.mrf.mxu0 }
 0x149   : > { %v1312_v30 = vadd.f32 %v1281_v16, %v1046_v35  ;;  %v1505_v31 = vpop.f32.mrf.mxu1 }
 0x14a   : > { %v3021_v32 = vpop.f32.mrf.mxu0 }
 0x14b   : > { %v3869_v34 = vadd.f32 %v1505_v31, %v1312_v30  ;;  %v3057_v28 = vpop.f32.mrf.mxu1 }
 0x14c   : > { %v1286_v22 = vpop.f32.mrf.mxu0 }
 0x14d   : > { %v1313_v36 = vadd.f32 %v1286_v22, %v1047_v41  ;;  %v1510_v37 = vpop.f32.mrf.mxu1 }
 0x14e   : > { %v3024_v39 = vpop.f32.mrf.mxu0 }
 0x14f   : > { %v3871_v40 = vadd.f32 %v1510_v37, %v1313_v36  ;;  %v3060_v33 = vpop.f32.mrf.mxu1 }
 0x150   : > { %v1289_v29 = vpop.f32.mrf.mxu0 }
 0x151   : > { %v1314_v1 = vadd.f32 %v1289_v29, %v1048_v46  ;;  %v1513_v43 = vpop.f32.mrf.mxu1 }
 0x152   : > { %v3025_v44 = vpop.f32.mrf.mxu0 }
 0x153   : > { %v3873_v45 = vadd.f32 %v1513_v43, %v1314_v1  ;;  %v3061_v38 = vpop.f32.mrf.mxu1 }
 0x154   : > { %v1294_v35 = vpop.f32.mrf.mxu0 }
 0x155   : > { %v1518_v48 = vpop.f32.mrf.mxu1  ;;  %v1315_v37 = vadd.f32 %v1294_v35, %v3855_v53 }
 0x156   : > { %v3028_v49 = vpop.f32.mrf.mxu0 }
 0x157   : > { %v3064_v50 = vpop.f32.mrf.mxu1  ;;  %v1539_v43 = vadd.f32 %v1518_v48, %v1315_v37 }
 0x158   : > { %v1297_v51 = vpop.f32.mrf.mxu0 }
 0x159   : > { %v1521_v42 = vpop.f32.mrf.mxu1  ;;  %v1316_v44 = vadd.f32 %v1297_v51, %v3857_v59  ;;  %v3897_v59 = vld [vmem:[%s3961_s2] ss:$0 sm:$0xff] }
 0x15a   : > { %v3029_v54 = vpop.f32.mrf.mxu0 }
 0x15b   : > { %v3065_v41 = vpop.f32.mrf.mxu1 }
 0x15c   : > { %v1302_v55 = vpop.f32.mrf.mxu0 }
 0x15d   : > { %v1526_v56 = vpop.f32.mrf.mxu1 }
 0x15e   : > { %v3032_v47 = vpop.f32.mrf.mxu0 }
 0x15f   : > { %v3068_v58 = vpop.f32.mrf.mxu1 }
 0x160   : > { %v1305_v60 = vpop.f32.mrf.mxu0  ;;  %v1540_v58 = vadd.f32 %v1521_v42, %v1316_v44 }
 0x161   : > { %v3875_v61 = vpop.f32.mrf.mxu1  ;;  %v1318_v42 = vadd.f32 %v1305_v60, %v3861_v8 }
 0x162   : > { %v3033_v46 = vpop.f32.mrf.mxu0 }
 0x163   : > { %v3069_v52 = vpop.f32.mrf.mxu1  ;;  %v1317_v46 = vadd.f32 %v1302_v55, %v3859_v2 }
 0x164   : > { %v1717_v63 = vpop.f32.mrf.mxu0 }
 0x165   : > { %v1983_v0 = vpop.f32.mrf.mxu1  ;;  %v1756_v49 = vadd.f32 %v1717_v63, %v3863_v14  ;;  %v1541_v51 = vadd.f32 %v1526_v56, %v1317_v46  ;;  %v1542_v56 = vadd.f32 %v3875_v61, %v1318_v42 }
 0x166   : > { %v3088_v3 = vpop.f32.mrf.mxu0 }
 0x167   : > { %v3124_v57 = vpop.f32.mrf.mxu1  ;;  %v2022_v3 = vadd.f32 %v1983_v0, %v1756_v49 }
 0x168   : > { %v1720_v5 = vpop.f32.mrf.mxu0 }
 0x169   : > { %v1986_v6 = vpop.f32.mrf.mxu1  ;;  %v1757_v53 = vadd.f32 %v1720_v5, %v3865_v20 }
 0x16a   : > { %v3089_v7 = vpop.f32.mrf.mxu0 }
 0x16b   : > { %v3125_v10 = vpop.f32.mrf.mxu1  ;;  %v2023_v55 = vadd.f32 %v1986_v6, %v1757_v53 }
 0x16c   : > { %v1725_v62 = vpop.f32.mrf.mxu0 }
 0x16d   : > { %v3877_v11 = vpop.f32.mrf.mxu1  ;;  %v1758_v20 = vadd.f32 %v1725_v62, %v3867_v26 }
 0x16e   : > { %v3092_v12 = vpop.f32.mrf.mxu0 }
 0x16f   : > { %v3128_v13 = vpop.f32.mrf.mxu1  ;;  %v2024_v6 = vadd.f32 %v3877_v11, %v1758_v20 }
 0x170   : > { %v1728_v15 = vpop.f32.mrf.mxu0 }
 0x171   : > { %v3879_v4 = vpop.f32.mrf.mxu1 }
 0x172   : > { %v3093_v17 = vpop.f32.mrf.mxu0 }
 0x173   : > { %v3129_v18 = vpop.f32.mrf.mxu1 }
 0x174   : > { %v3881_v19 = vpop.f32.mrf.mxu0 }
 0x175   : > { %v3883_v21 = vpop.f32.mrf.mxu1 }
 0x176   : > { %v3096_v9 = vpop.f32.mrf.mxu0 }
 0x177   : > { %v3132_v23 = vpop.f32.mrf.mxu1 }
 0x178   : > { %v3885_v24 = vpop.f32.mrf.mxu0 }
 0x179   : > { %v3887_v25 = vpop.f32.mrf.mxu1 }
 0x17a   : > { %v3097_v27 = vpop.f32.mrf.mxu0 }
 0x17b   : > { %v3133_v16 = vpop.f32.mrf.mxu1 }
 0x17c   : > { %v1741_v30 = vpop.f32.mrf.mxu0  ;;  %v1759_v16 = vadd.f32 %v1728_v15, %v3869_v34 }
 0x17d   : > { %v2007_v31 = vpop.f32.mrf.mxu1  ;;  %v1762_v54 = vadd.f32 %v1741_v30, %v1539_v43 }
 0x17e   : > { %v3100_v32 = vpop.f32.mrf.mxu0 }
 0x17f   : > { %v3136_v28 = vpop.f32.mrf.mxu1  ;;  %v2028_v57 = vadd.f32 %v2007_v31, %v1762_v54 }
 0x180   : > { %v1744_v22 = vpop.f32.mrf.mxu0 }
 0x181   : > { %v2010_v36 = vpop.f32.mrf.mxu1  ;;  %v1763_v7 = vadd.f32 %v1744_v22, %v1540_v58 }
 0x182   : > { %v3101_v39 = vpop.f32.mrf.mxu0 }
 0x183   : > { %v3137_v33 = vpop.f32.mrf.mxu1  ;;  %v2029_v5 = vadd.f32 %v2010_v36, %v1763_v7 }
 0x184   : > { %v1749_v29 = vpop.f32.mrf.mxu0  ;;  %v2025_v33 = vadd.f32 %v3879_v4, %v1759_v16 }
 0x185   : > { %v2015_v1 = vpop.f32.mrf.mxu1  ;;  %v1764_v12 = vadd.f32 %v1749_v29, %v1541_v51  ;;  %v1760_v29 = vadd.f32 %v3881_v19, %v3871_v40 }
 0x186   : > { %v3104_v38 = vpop.f32.mrf.mxu0 }
 0x187   : > { %v3140_v50 = vpop.f32.mrf.mxu1  ;;  %v2030_v30 = vadd.f32 %v2015_v1, %v1764_v12 }
 0x188   : > { %v1752_v41 = vpop.f32.mrf.mxu0 }
 0x189   : > { %v2018_v47 = vpop.f32.mrf.mxu1  ;;  %v1765_v31 = vadd.f32 %v1752_v41, %v1542_v56 }
 0x18a   : > { %v3105_v52 = vpop.f32.mrf.mxu0 }
 0x18b   : > { %v3141_v35 = vpop.f32.mrf.mxu1  ;;  %v2031_v38 = vadd.f32 %v2018_v47, %v1765_v31 }
 0x18c   : > { %v2207_v48 = vpop.f32.mrf.mxu0  ;;  %v2026_v35 = vadd.f32 %v3883_v21, %v1760_v29 }
 0x18d   : > { %v2246_v10 = vadd.f32 %v2207_v48, %v2022_v3  ;;  %v2231_v14 = vpop.f32.mrf.mxu1 }
 0x18e   : > { %v2252_v63 = vadd.f32 %v2231_v14, %v2028_v57  ;;  %v3160_v2 = vpop.f32.mrf.mxu0  ;;  %v1761_v57 = vadd.f32 %v3885_v24, %v3873_v45 }
 0x18f   : > { %v3172_v0 = vpop.f32.mrf.mxu1  ;;  %v2283_v18 = vadd.f32 %v3897_v59, %v2246_v10 }
 0x190   : > { %v2289_v13 = vadd.f32 %v3897_v59, %v2252_v63  ;;  %v2210_v17 = vpop.f32.mrf.mxu0 }
 0x191   : > { %v2247_v9 = vadd.f32 %v2210_v17, %v2023_v55  ;;  %v2234_v23 = vpop.f32.mrf.mxu1  ;;  %v2293_v22 = vmax.f32 %v2283_v18, 0.0 }
 0x192   : > { %v2299_v27 = vmax.f32 %v2289_v13, 0.0  ;;  %v2253_v8 = vadd.f32 %v2234_v23, %v2029_v5  ;;  %v3161_v60 = vpop.f32.mrf.mxu0  ;;  %v2027_v13 = vadd.f32 %v3887_v25, %v1761_v57 }
 0x193   : > { %v2284_v26 = vadd.f32 %v3897_v59, %v2247_v9  ;;  %v3173_v62 = vpop.f32.mrf.mxu1 }
 0x194   : > { %v2290_v32 = vadd.f32 %v3897_v59, %v2253_v8  ;;  %v2215_v28 = vpop.f32.mrf.mxu0  ;;  %v2733_v39 = vpack.c.bf16 %v2299_v27, %v2299_v27 }
 0x195   : > { %v2294_v36 = vmax.f32 %v2284_v26, 0.0  ;;  %v2248_v61 = vadd.f32 %v2215_v28, %v2024_v6  ;;  %v2239_v37 = vpop.f32.mrf.mxu1 }
 0x196   : > { %v2300_v34 = vmax.f32 %v2290_v32, 0.0  ;;  %v2254_v11 = vadd.f32 %v2239_v37, %v2030_v30  ;;  %v3164_v15 = vpop.f32.mrf.mxu0  ;;  %v2717_v46 = vrot.slane %v2733_v39, 9 }
 0x197   : > { %v2303_v1 = vpack.c.bf16 %v2294_v36, %v2293_v22  ;;  %v2285_v43 = vadd.f32 %v3897_v59, %v2248_v61  ;;  %v3176_v44 = vpop.f32.mrf.mxu1  ;;  %v2728_v41 = vpack.c.bf16 %v2294_v36, %v2294_v36 }
 0x198   : > { %v2734_v49 = vpack.c.bf16 %v2300_v34, %v2300_v34  ;;  %v2291_v50 = vadd.f32 %v3897_v59, %v2254_v11  ;;  %v2218_v54 = vpop.f32.mrf.mxu0 }
 0x199   : > { %2308 = vst [vmem:[%s3912_s21] sm:$0xf] %v2303_v1  ;;  %v2295_v4 = vmax.f32 %v2285_v43, 0.0  ;;  %v2249_v40 = vadd.f32 %v2218_v54, %v2025_v33  ;;  %v2242_v19 = vpop.f32.mrf.mxu1  ;;  %v2705_v2 = vrot.slane %v2728_v41, 9 }
 0x19a   : > { %v2362_v47 = vrot.slane %v2734_v49, 5  ;;  %v2301_v52 = vmax.f32 %v2291_v50, 0.0  ;;  %v2255_v3 = vadd.f32 %v2242_v19, %v2031_v38  ;;  %v3165_v53 = vpop.f32.mrf.mxu0  ;;  %v2720_v20 = vrot.slane %v2734_v49, 10 }
 0x19b   : > { %v2729_v7 = vpack.c.bf16 %v2295_v4, %v2295_v4  ;;  %v2286_v48 = vadd.f32 %v3897_v59, %v2249_v40  ;;  %v3177_v10 = vpop.f32.mrf.mxu1 }
 0x19c   : > { %v2363_v14 = vsel %vm3922_vm10, %v2717_v46, %v2362_v47  ;;  %v2735_v51 = vpack.c.bf16 %v2301_v52, %v2301_v52  ;;  %v2292_v42 = vadd.f32 %v3897_v59, %v2255_v3  ;;  %v2223_v63 = vpop.f32.mrf.mxu0 }
 0x19d   : > { %2718 = vst [vmem:[%s3912_s21 + $0x14] sm:$0xf] %v2363_v14  ;;  %v2320_v55 = vrot.slane %v2729_v7, 5  ;;  %v2296_v21 = vmax.f32 %v2286_v48, 0.0  ;;  %v2250_v24 = vadd.f32 %v2223_v63, %v2026_v35  ;;  %v2708_v8 = vrot.slane %v2729_v7, 10 }
 0x19e   : > { %v2372_v0 = vrot.slane %v2735_v51, 6  ;;  %v2302_v5 = vmax.f32 %v2292_v42, 0.0  ;;  %v3168_v12 = vpop.f32.mrf.mxu0  ;;  %v2723_v16 = vrot.slane %v2735_v51, 11 }
 0x19f   : > { %v2321_v17 = vsel %vm3922_vm10, %v2705_v2, %v2320_v55  ;;  %v2730_v18 = vpack.c.bf16 %v2296_v21, %v2296_v21  ;;  %v2287_v9 = vadd.f32 %v3897_v59, %v2250_v24 }
 0x1a0   : > { %2706 = vst [vmem:[%s3912_s21 + $0x4] sm:$0xf] %v2321_v17  ;;  %v2373_v23 = vsel %vm3936_vm13, %v2720_v20, %v2372_v0  ;;  %v2736_v56 = vpack.c.bf16 %v2302_v5, %v2302_v5  ;;  %v2226_v27 = vpop.f32.mrf.mxu0 }
 0x1a1   : > { %2721 = vst [vmem:[%s3912_s21 + $0x18] sm:$0xf] %v2373_v23  ;;  %v2332_v60 = vrot.slane %v2730_v18, 6  ;;  %v2297_v25 = vmax.f32 %v2287_v9, 0.0  ;;  %v2251_v6 = vadd.f32 %v2226_v27, %v2027_v13  ;;  %v2711_v22 = vrot.slane %v2730_v18, 11 }
 0x1a2   : > { %v2381_v26 = vrot.slane %v2736_v56, 7  ;;  %v3169_v62 = vpop.f32.mrf.mxu0 }
 0x1a3   : > { %v2333_v30 = vsel %vm3936_vm13, %v2708_v8, %v2332_v60  ;;  %v2731_v31 = vpack.c.bf16 %v2297_v25, %v2297_v25  ;;  %v2288_v32 = vadd.f32 %v3897_v59, %v2251_v6 }
 0x1a4   : > { %2709 = vst [vmem:[%s3912_s21 + $0x8] sm:$0xf] %v2333_v30  ;;  %v2382_v28 = vsel %vm2342_vm15, %v2723_v16, %v2381_v26 }
 0x1a5   : > { %2724 = vst [vmem:[%s3912_s21 + $0x1c] sm:$0xf] %v2382_v28  ;;  %v2345_v36 = vrot.slane %v2731_v31, 7  ;;  %v2298_v61 = vmax.f32 %v2288_v32, 0.0 }
 0x1a7   : > { %v2346_v37 = vsel %vm2342_vm15, %v2711_v22, %v2345_v36  ;;  %v2732_v39 = vpack.c.bf16 %v2298_v61, %v2298_v61 }
 0x1a8   : > { %2712 = vst [vmem:[%s3912_s21 + $0xc] sm:$0xf] %v2346_v37 }
 0x1a9   : > { %2714 = vst [vmem:[%s3912_s21 + $0x10] sm:$0xf] %v2732_v39 }
 0x1aa PF: > { %s13_s12 = sadd.s32 1, %s3336_s12  }
 0x1ab   : > { %p10_p4 = scmp.ge.s32.totalorder %s13_s12, 4  }
 0x1ad   :  { %12 = sbr.rel (!%p10_p4) target bundleno = 1 (0x1), region = 77 }

// kernel: forward_pallas.25
= control target key start
LH: loop header
LB: loop body
LE: loop exit
PB: predicated region body
PF: predicated region fallthrough
CT: control target
= control target key end

     0   :  { %s2228_s12 = smov 0   ;;  %s2516_s0 = inlined_call_operand.vmem [shape: bf16[2,42,128], index: 0, kind: input, shape index: {}]   ;;  %s2517_s1 = inlined_call_operand.vmem [shape: bf16[9,128,128], index: 1, kind: input, shape index: {}]   ;;  %s2518_s2 = inlined_call_operand.vmem [shape: f32[1,128], index: 2, kind: input, shape index: {}]   ;;  %s2519_s3 = inlined_call_operand.vmem [shape: bf16[2,4,4,128], index: 3, kind: output, shape index: {}]  }
   0x1 LB: > { %s1593_s13 = sadd.s32 4294967295, %s2205_s12   ;;  %p1597_p0 = scmp.ge.s32.totalorder %s2205_s12, 1  ;;  %s2205_s12 = sphi %s2228_s12, %s13_s12  }
   0x2   : > { %p137_p1 = scmp.lt.s32.totalorder %s2205_s12, 3 }
   0x4   : > { %p138_p2 = pnand %p1597_p0, %p137_p1 }
   0x5   : > { %p161_p3 = scmp.lt.s32.totalorder (!%p138_p2), %s1593_s13, 1 }
   0x6   : > { %141 = sbr.rel (%p138_p2) target bundleno = 387 (0x183), region = 32 }
   0xb   : > { %v2109_v0 = vld [vmem:[%s2517_s1 + $0x38] sm:$0xff]   ;;  %v2111_v2 = vld [vmem:[%s2517_s1 + $0x30] sm:$0xff]   ;;  %v2113_v4 = vld [vmem:[%s2517_s1 + $0x28] sm:$0xff]   ;;  %s2523_s13 = smov (!%p161_p3, %s1593_s13), 1  ;;  %vm334_vm0 = vsmask.f32 7424 }
   0xc   : > { %v2110_v1 = vld [vmem:[%s2517_s1 + $0x78] sm:$0xff]   ;;  %1919 = vmatprep.subr.bf16.mxu0 %v2109_v0  ;;  %v2112_v3 = vld [vmem:[%s2517_s1 + $0x70] sm:$0xff]   ;;  %v2114_v5 = vld [vmem:[%s2517_s1 + $0x68] sm:$0xff]   ;;  %s2099_s30 = smul.u32 24, %s2523_s13  ;;  %vm488_vm1 = vcmask 1046528   ;;  %vm630_vm2 = vcmask 1044480  }
   0xd   : > { %1939 = vmatprep.subr.bf16.mxu1 %v2110_v1  ;;  %1920 = vmatpush3.bf16.msra.mxu0 %v2109_v0  ;;  %v2115_v6 = vld [vmem:[%s2517_s1 + $0x20] sm:$0xff]   ;;  %v2117_v8 = vld [vmem:[%s2517_s1 + $0x18] sm:$0xff]   ;;  %v2119_v10 = vld [vmem:[%s2517_s1 + $0x10] sm:$0xff]   ;;  %vm772_vm3 = vsmask.f32 4352  ;;  %vm1063_vm4 = vcmask 1045504  }
   0xe   : > { %1940 = vmatpush3.bf16.msra.mxu1 %v2110_v1  ;;  %1921 = vmatprep.subr.bf16.mxu0 %v2111_v2  ;;  %v2116_v7 = vld [vmem:[%s2517_s1 + $0x60] sm:$0xff]   ;;  %v2118_v9 = vld [vmem:[%s2517_s1 + $0x58] sm:$0xff]   ;;  %v2120_v11 = vld [vmem:[%s2517_s1 + $0x50] sm:$0xff]   ;;  %s2278_s16 = scalar_lea.vmem %s2516_s0, %s2099_s30  ;;  %vm1205_vm5 = vsmask.f32 5376  ;;  %vm1504_vm6 = vcmask 1040384  }
   0xf   : > { %1941 = vmatprep.subr.bf16.mxu1 %v2112_v3  ;;  %v2125_v12 = vld [vmem:[%s2278_s16] sm:$0xff]   ;;  %v2127_v14 = vld [vmem:[%s2278_s16 + $0x8] sm:$0x1f]   ;;  %v2129_v27 = vld [vmem:[%s2517_s1 + $0xb8] sm:$0xff]   ;;  %vm1505_vm7 = vcmask 1042434   ;;  %vm1507_vm9 = vcmask 1044484  }
  0x10   : > { %1935 = vmatprep.mubr.bf16.mxu0 %v2125_v12  ;;  %v2126_v13 = vld [vmem:[%s2278_s16] sm:$0xff]   ;;  %v2121_v15 = vld [vmem:[%s2517_s1 + $0x8] sm:$0xff]   ;;  %v343_v18 = vshll.u32 %v2127_v14, 16  ;;  %v347_v26 = vshrl.u32 %v2127_v14, 16  ;;  %v2130_v28 = vld [vmem:[%s2517_s1 + $0xf8] sm:$0xff]   ;;  %vm1509_vm11 = vcmask 1046534  }
  0x11   : > { %1922 = vmatpush3.bf16.msra.mxu0 %v2111_v2  ;;  %v336_v16 = vshrl.u32 %v2126_v13, 16  ;;  %v338_v17 = vshll.u32 %v2126_v13, 16  ;;  %v2122_v19 = vld [vmem:[%s2517_s1 + $0x48] sm:$0xff]   ;;  %v2123_v22 = vld [vmem:[%s2517_s1] sm:$0xff]   ;;  %v2131_v31 = vld [vmem:[%s2517_s1 + $0xb0] sm:$0xff]   ;;  %s1828_s18 = sshll.u32 %s2523_s13, 3 }
  0x12   : > { %1942 = vmatpush3.bf16.msra.mxu1 %v2112_v3  ;;  %1923 = vmatprep.subr.bf16.mxu0 %v2113_v4  ;;  %v345_v21 = vrot.slane %v343_v18, 1  ;;  %v2124_v24 = vld [vmem:[%s2517_s1 + $0x40] sm:$0xff]   ;;  %v2128_v29 = vld [vmem:[%s2278_s16 + $0x8] ss:$0 sps:$4 sm:$0xff]   ;;  %v2132_v32 = vld [vmem:[%s2517_s1 + $0xf0] sm:$0xff]   ;;  %s170_s21 = scalar_lea.vmem %s2519_s3, %s1828_s18 }
  0x13   : > { %1943 = vmatprep.subr.bf16.mxu1 %v2114_v5  ;;  %v340_v20 = vrot.slane %v338_v17, 1  ;;  %v2133_v33 = vld [vmem:[%s2517_s1 + $0xa8] sm:$0xff]   ;;  %v2135_v35 = vld [vmem:[%s2517_s1 + $0xa0] sm:$0xff]   ;;  %v2137_v46 = vld [vmem:[%s2517_s1 + $0x98] sm:$0xff]  }
  0x14   : > { %v349_v30 = vor.u32 %v347_v26, %v345_v21  ;;  %v2134_v34 = vld [vmem:[%s2517_s1 + $0xe8] sm:$0xff]   ;;  %v2145_v36 = vld [vmem:[%s2278_s16] sm:$0xfe]   ;;  %v2138_v47 = vld [vmem:[%s2517_s1 + $0xd8] sm:$0xff]  }
  0x15   : > { %1924 = vmatpush3.bf16.msra.mxu0 %v2113_v4  ;;  %v341_v23 = vor.u32 %v340_v20, %v336_v16  ;;  %v2319_v37 = vld [vmem:[%s2278_s16 + $0x8] sm:$0x1f]   ;;  %v2136_v38 = vld [vmem:[%s2517_s1 + $0xe0] sm:$0xff]   ;;  %v489_v39 = vrot.slane %v2145_v36, 1  ;;  %v2139_v49 = vld [vmem:[%s2517_s1 + $0x90] sm:$0xff]  }
  0x16   : > { %1944 = vmatpush3.bf16.msra.mxu1 %v2114_v5  ;;  %1925 = vmatprep.subr.bf16.mxu0 %v2115_v6  ;;  %v490_v40 = vrot.slane %v2319_v37, 1  ;;  %v2148_v41 = vld [vmem:[%s2278_s16] sm:$0xf8]   ;;  %v2149_v42 = vld [vmem:[%s2278_s16 + $0x8] sm:$0x7f]   ;;  %v2140_v50 = vld [vmem:[%s2517_s1 + $0xd0] sm:$0xff]  }
  0x17   : > { %1945 = vmatprep.subr.bf16.mxu1 %v2116_v7  ;;  %v346_v25 = vsel %vm334_vm0, %v341_v23, %v345_v21  ;;  %v631_v44 = vrot.slane %v2148_v41, 3  ;;  %v632_v45 = vrot.slane %v2149_v42, 3  ;;  %v2141_v51 = vld [vmem:[%s2517_s1 + $0x88] sm:$0xff]   ;;  %v2143_v53 = vld [vmem:[%s2517_s1 + $0x80] sm:$0xff]   ;;  %v2147_v56 = vld [vmem:[%s2517_s1 + $0x138] sm:$0xff]  }
  0x18   : > { %1955 = vmatprep.mubr.bf16.mxu1 %v346_v25  ;;  %v491_v43 = vsel %vm488_vm1, %v489_v39, %v490_v40  ;;  %v2142_v52 = vld [vmem:[%s2517_s1 + $0xc8] sm:$0xff]   ;;  %v2144_v54 = vld [vmem:[%s2517_s1 + $0xc0] sm:$0xff]   ;;  %v2150_v60 = vld [vmem:[%s2517_s1 + $0x178] sm:$0xff]  }
  0x19   : > { %1926 = vmatpush3.bf16.msra.mxu0 %v2115_v6  ;;  %v633_v48 = vsel %vm630_vm2, %v631_v44, %v632_v45  ;;  %v2165_v55 = vld [vmem:[%s2278_s16] sm:$0xf8]   ;;  %v2166_v57 = vld [vmem:[%s2278_s16 + $0x8] sm:$0xff]   ;;  %v2151_v63 = vld [vmem:[%s2517_s1 + $0x130] sm:$0xff]  }
  0x1a   : > { %1946 = vmatpush3.bf16.msra.mxu1 %v2116_v7  ;;  %1927 = vmatprep.subr.bf16.mxu0 %v2117_v8  ;;  %v774_v58 = vshrl.u32 %v2165_v55, 16  ;;  %v777_v59 = vshll.u32 %v2165_v55, 16  ;;  %v782_v61 = vshrl.u32 %v2166_v57, 16  ;;  %v785_v62 = vshll.u32 %v2166_v57, 16  ;;  %v2152_v5 = vld [vmem:[%s2517_s1 + $0x170] sm:$0xff]   ;;  %v2168_v7 = vld [vmem:[%s2278_s16 + $0x4] sm:$0xff]   ;;  %vm1506_vm8 = vmor %vm1504_vm6, %vm1505_vm7 }
  0x1b   : > { %1947 = vmatprep.subr.bf16.mxu1 %v2118_v9  ;;  %v2156_v12 = vld [vmem:[%s2517_s1 + $0x160] sm:$0xff]   ;;  %v2157_v13 = vld [vmem:[%s2517_s1 + $0x118] sm:$0xff]   ;;  %v2160_v16 = vld [vmem:[%s2517_s1 + $0x150] sm:$0xff]  }
  0x1c   : > { %v776_v0 = vrot.slane %v774_v58, 3  ;;  %v779_v1 = vrot.slane %v777_v59, 4  ;;  %v784_v2 = vrot.slane %v782_v61, 3  ;;  %v787_v3 = vrot.slane %v785_v62, 4  ;;  %v2158_v14 = vld [vmem:[%s2517_s1 + $0x158] sm:$0xff]   ;;  %v2162_v20 = vld [vmem:[%s2517_s1 + $0x148] sm:$0xff]   ;;  %vm1508_vm10 = vmor %vm1506_vm8, %vm1507_vm9 }
  0x1d   : > { %1928 = vmatpush3.bf16.msra.mxu0 %v2117_v8  ;;  %v2188_v17 = vld [vmem:[%s2278_s16 + $0x4] sm:$0xfc]   ;;  %v2189_v18 = vld [vmem:[%s2278_s16 + $0xc] sm:$0x7f]   ;;  %v2187_v58 = vld [vmem:[%s2517_s1 + $0x238] sm:$0xff]  }
  0x1e   : > { %1948 = vmatpush3.bf16.msra.mxu1 %v2118_v9  ;;  %1929 = vmatprep.subr.bf16.mxu0 %v2119_v10  ;;  %v780_v4 = vor.u32 %v779_v1, %v776_v0  ;;  %v2366_v6 = vor.u32 %v787_v3, %v784_v2  ;;  %v2153_v9 = vld [vmem:[%s2517_s1 + $0x128] sm:$0xff]   ;;  %v1207_v21 = vshrl.u32 %v2188_v17, 16  ;;  %v2163_v23 = vld [vmem:[%s2517_s1 + $0x100] sm:$0xff]   ;;  %v1215_v25 = vshrl.u32 %v2189_v18, 16  ;;  %v2172_v41 = vld [vmem:[%s2517_s1 + $0x1f0] sm:$0xff]  }
  0x1f   : > { %1949 = vmatprep.subr.bf16.mxu1 %v2120_v11  ;;  %v1218_v26 = vshll.u32 %v2189_v18, 16  ;;  %v2169_v37 = vld [vmem:[%s2278_s16 + $0xc] ss:$0 sps:$4 sm:$0xff]   ;;  %v2184_v55 = vld [vmem:[%s2517_s1 + $0x1c0] sm:$0xff]   ;;  %v2190_v61 = vld [vmem:[%s2517_s1 + $0x230] sm:$0xff]  }
  0x20   : > { %v789_v8 = vsel %vm772_vm3, %v780_v4, %v2366_v6  ;;  %v2173_v44 = vld [vmem:[%s2517_s1 + $0x1a8] sm:$0xff]   ;;  %v2192_v0 = vld [vmem:[%s2517_s1 + $0x220] sm:$0xff]   ;;  %v2193_v1 = vld [vmem:[%s2517_s1 + $0x218] sm:$0xff]  }
  0x21   : > { %1930 = vmatpush3.bf16.msra.mxu0 %v2119_v10  ;;  %v2154_v10 = vld [vmem:[%s2517_s1 + $0x168] sm:$0xff]   ;;  %v2194_v2 = vld [vmem:[%s2517_s1 + $0x210] sm:$0xff]   ;;  %v2196_v4 = vld [vmem:[%s2517_s1 + $0x200] sm:$0xff]  }
  0x22   : > { %1950 = vmatpush3.bf16.msra.mxu1 %v2120_v11  ;;  %1931 = vmatprep.subr.bf16.mxu0 %v2121_v15  ;;  %v2155_v11 = vld [vmem:[%s2517_s1 + $0x120] sm:$0xff]   ;;  %v2198_v57 = vld [vmem:[%s2278_s16 + $0xc] sm:$0x7f]   ;;  %vm2502_vm12 = vmor %vm1508_vm10, %vm1509_vm11 }
  0x23   : > { %1951 = vmatprep.subr.bf16.mxu1 %v2122_v19  ;;  %v2195_v3 = vld [vmem:[%s2517_s1 + $0x208] sm:$0xff]  }
  0x25   : > { %1932 = vmatpush3.bf16.msra.mxu0 %v2121_v15  ;;  %v2159_v15 = vld [vmem:[%s2517_s1 + $0x110] sm:$0xff]  }
  0x26   : > { %1952 = vmatpush3.bf16.msra.mxu1 %v2122_v19  ;;  %1933 = vmatprep.subr.bf16.mxu0 %v2123_v22  ;;  %v2161_v19 = vld [vmem:[%s2517_s1 + $0x108] sm:$0xff]  }
  0x27   : > { %1953 = vmatprep.subr.bf16.mxu1 %v2124_v24 }
  0x29   : > { %1934 = vmatpush3.bf16.msra.mxu0 %v2123_v22  ;;  %v1210_v22 = vshll.u32 %v2188_v17, 16 }
  0x2a   : > { %1954 = vmatpush3.bf16.msra.mxu1 %v2124_v24  ;;  %1959 = vmatprep.subr.bf16.mxu0 %v2129_v27  ;;  %v2164_v24 = vld [vmem:[%s2517_s1 + $0x140] sm:$0xff]  }
  0x2b   : > { %1979 = vmatprep.subr.bf16.mxu1 %v2130_v28 }
  0x2c   : > { %1936 = vmatmul.mubr.bf16.vlgmr.msra.gmra.mxu0 %v2128_v29  ;;  %v1209_v29 = vrot.slane %v1207_v21, 2 }
  0x2d   : > { %1956 = vmatmul.mubr.bf16.vlgmr.msra.gmra.mxu1 %v349_v30  ;;  %1960 = vmatpush3.bf16.msra.mxu0 %v2129_v27  ;;  %v2185_v27 = vld [vmem:[%s2278_s16 + $0x4] sm:$0xfc]   ;;  %v1212_v30 = vrot.slane %v1210_v22, 3 }
  0x2e   : > { %1980 = vmatpush3.bf16.msra.mxu1 %v2130_v28  ;;  %1961 = vmatprep.subr.bf16.mxu0 %v2131_v31  ;;  %v2410_v28 = vld [vmem:[%s2278_s16 + $0xc] sm:$0x3f]  }
  0x2f   : > { %1981 = vmatprep.subr.bf16.mxu1 %v2132_v32  ;;  %1975 = vmatprep.mubr.bf16.mxu0 %v491_v43  ;;  %v1065_v36 = vrot.slane %v2410_v28, 2 }
  0x30   : > { %1995 = vmatprep.mubr.bf16.mxu1 %v633_v48  ;;  %v2177_v48 = vld [vmem:[%s2517_s1 + $0x198] sm:$0xff]  }
  0x31   : > { %1962 = vmatpush3.bf16.msra.mxu0 %v2131_v31  ;;  %v1217_v31 = vrot.slane %v1215_v25, 2 }
  0x32   : > { %1982 = vmatpush3.bf16.msra.mxu1 %v2132_v32  ;;  %1963 = vmatprep.subr.bf16.mxu0 %v2133_v33  ;;  %v1220_v32 = vrot.slane %v1218_v26, 3 }
  0x33   : > { %1983 = vmatprep.subr.bf16.mxu1 %v2134_v34 }
  0x34   : > { %v2420_v39 = vor.u32 %v1220_v32, %v1217_v31 }
  0x35   : > { %1964 = vmatpush3.bf16.msra.mxu0 %v2133_v33  ;;  %v2167_v33 = vld [vmem:[%s2517_s1 + $0x1b8] sm:$0xff]  }
  0x36   : > { %1984 = vmatpush3.bf16.msra.mxu1 %v2134_v34  ;;  %1965 = vmatprep.subr.bf16.mxu0 %v2135_v35  ;;  %v2170_v34 = vld [vmem:[%s2517_s1 + $0x1f8] sm:$0xff]  }
  0x37   : > { %1985 = vmatprep.subr.bf16.mxu1 %v2136_v38 }
  0x39   : > { %1966 = vmatpush3.bf16.msra.mxu0 %v2135_v35  ;;  %v1064_v35 = vrot.slane %v2185_v27, 2 }
  0x3a   : > { %1986 = vmatpush3.bf16.msra.mxu1 %v2136_v38  ;;  %1967 = vmatprep.subr.bf16.mxu0 %v2137_v46  ;;  %v1213_v38 = vor.u32 %v1212_v30, %v1209_v29 }
  0x3b   : > { %1987 = vmatprep.subr.bf16.mxu1 %v2138_v47  ;;  %v1066_v42 = vsel %vm1063_vm4, %v1064_v35, %v1065_v36 }
  0x3c   : > { %v1222_v43 = vsel %vm1205_vm5, %v1213_v38, %v2420_v39 }
  0x3d   : > { %1968 = vmatpush3.bf16.msra.mxu0 %v2137_v46  ;;  %v2175_v46 = vld [vmem:[%s2517_s1 + $0x1a0] sm:$0xff]  }
  0x3e   : > { %1988 = vmatpush3.bf16.msra.mxu1 %v2138_v47  ;;  %1969 = vmatprep.subr.bf16.mxu0 %v2139_v49  ;;  %v2176_v47 = vld [vmem:[%s2517_s1 + $0x1e0] sm:$0xff]  }
  0x3f   : > { %1989 = vmatprep.subr.bf16.mxu1 %v2140_v50 }
  0x41   : > { %1970 = vmatpush3.bf16.msra.mxu0 %v2139_v49  ;;  %v2178_v49 = vld [vmem:[%s2517_s1 + $0x1d8] sm:$0xff]  }
  0x42   : > { %1990 = vmatpush3.bf16.msra.mxu1 %v2140_v50  ;;  %1971 = vmatprep.subr.bf16.mxu0 %v2141_v51  ;;  %v2179_v50 = vld [vmem:[%s2517_s1 + $0x190] sm:$0xff]  }
  0x43   : > { %1991 = vmatprep.subr.bf16.mxu1 %v2142_v52 }
  0x45   : > { %1972 = vmatpush3.bf16.msra.mxu0 %v2141_v51  ;;  %v2180_v51 = vld [vmem:[%s2517_s1 + $0x1d0] sm:$0xff]  }
  0x46   : > { %1992 = vmatpush3.bf16.msra.mxu1 %v2142_v52  ;;  %1973 = vmatprep.subr.bf16.mxu0 %v2143_v53  ;;  %v2181_v52 = vld [vmem:[%s2517_s1 + $0x188] sm:$0xff]  }
  0x47   : > { %1993 = vmatprep.subr.bf16.mxu1 %v2144_v54 }
  0x49   : > { %1974 = vmatpush3.bf16.msra.mxu0 %v2143_v53  ;;  %v2182_v53 = vld [vmem:[%s2517_s1 + $0x1c8] sm:$0xff]  }
  0x4a   : > { %1994 = vmatpush3.bf16.msra.mxu1 %v2144_v54  ;;  %1999 = vmatprep.subr.bf16.mxu0 %v2147_v56  ;;  %v2183_v54 = vld [vmem:[%s2517_s1 + $0x180] sm:$0xff]  }
  0x4b   : > { %2019 = vmatprep.subr.bf16.mxu1 %v2150_v60 }
  0x4c   : > { %1976 = vmatmul.mubr.bf16.vlgmr.msra.gmra.mxu0 %v490_v40  ;;  %v2171_v40 = vld [vmem:[%s2517_s1 + $0x1b0] sm:$0xff]  }
  0x4d   : > { %2000 = vmatpush3.bf16.msra.mxu0 %v2147_v56  ;;  %1996 = vmatmul.mubr.bf16.vlgmr.msra.gmra.mxu1 %v632_v45  ;;  %v2174_v45 = vld [vmem:[%s2517_s1 + $0x1e8] sm:$0xff]  }
  0x4e   : > { %2020 = vmatpush3.bf16.msra.mxu1 %v2150_v60  ;;  %2001 = vmatprep.subr.bf16.mxu0 %v2151_v63  ;;  %v2197_v56 = vld [vmem:[%s2278_s16 + $0x4] sm:$0xf8]   ;;  %v1362_v60 = vrot.slane %v2198_v57, 3 }
  0x4f   : > { %2021 = vmatprep.subr.bf16.mxu1 %v2152_v5  ;;  %2015 = vmatprep.mubr.bf16.mxu0 %v789_v8  ;;  %v1361_v59 = vrot.slane %v2197_v56, 3 }
  0x50   : > { %2035 = vmatprep.mubr.bf16.mxu1 %v2168_v7 }
  0x51   : > { %2002 = vmatpush3.bf16.msra.mxu0 %v2151_v63  ;;  %v1363_v62 = vsel %vm630_vm2, %v1361_v59, %v1362_v60  ;;  %v2191_v63 = vld [vmem:[%s2517_s1 + $0x228] sm:$0xff]  }
  0x52   : > { %2022 = vmatpush3.bf16.msra.mxu1 %v2152_v5  ;;  %2003 = vmatprep.subr.bf16.mxu0 %v2153_v9 }
  0x53   : > { %2023 = vmatprep.subr.bf16.mxu1 %v2154_v10 }
  0x55   : > { %2004 = vmatpush3.bf16.msra.mxu0 %v2153_v9 }
  0x56   : > { %2024 = vmatpush3.bf16.msra.mxu1 %v2154_v10  ;;  %2005 = vmatprep.subr.bf16.mxu0 %v2155_v11 }
  0x57   : > { %2025 = vmatprep.subr.bf16.mxu1 %v2156_v12 }
  0x59   : > { %2006 = vmatpush3.bf16.msra.mxu0 %v2155_v11 }
  0x5a   : > { %2026 = vmatpush3.bf16.msra.mxu1 %v2156_v12  ;;  %2007 = vmatprep.subr.bf16.mxu0 %v2157_v13 }
  0x5b   : > { %2027 = vmatprep.subr.bf16.mxu1 %v2158_v14 }
  0x5d   : > { %2008 = vmatpush3.bf16.msra.mxu0 %v2157_v13 }
  0x5e   : > { %2028 = vmatpush3.bf16.msra.mxu1 %v2158_v14  ;;  %2009 = vmatprep.subr.bf16.mxu0 %v2159_v15 }
  0x5f   : > { %2029 = vmatprep.subr.bf16.mxu1 %v2160_v16 }
  0x61   : > { %2010 = vmatpush3.bf16.msra.mxu0 %v2159_v15 }
  0x62   : > { %2030 = vmatpush3.bf16.msra.mxu1 %v2160_v16  ;;  %2011 = vmatprep.subr.bf16.mxu0 %v2161_v19 }
  0x63   : > { %2031 = vmatprep.subr.bf16.mxu1 %v2162_v20 }
  0x65   : > { %2012 = vmatpush3.bf16.msra.mxu0 %v2161_v19 }
  0x66   : > { %2032 = vmatpush3.bf16.msra.mxu1 %v2162_v20  ;;  %2013 = vmatprep.subr.bf16.mxu0 %v2163_v23 }
  0x67   : > { %2033 = vmatprep.subr.bf16.mxu1 %v2164_v24 }
  0x69   : > { %2014 = vmatpush3.bf16.msra.mxu0 %v2163_v23 }
  0x6a   : > { %2034 = vmatpush3.bf16.msra.mxu1 %v2164_v24  ;;  %2039 = vmatprep.subr.bf16.mxu0 %v2167_v33 }
  0x6b   : > { %2059 = vmatprep.subr.bf16.mxu1 %v2170_v34 }
  0x6c   : > { %2016 = vmatmul.mubr.bf16.vlgmr.msra.gmra.mxu0 %v2366_v6 }
  0x6d   : > { %2040 = vmatpush3.bf16.msra.mxu0 %v2167_v33  ;;  %2036 = vmatmul.mubr.bf16.vlgmr.msra.gmra.mxu1 %v2169_v37 }
  0x6e   : > { %2060 = vmatpush3.bf16.msra.mxu1 %v2170_v34  ;;  %2041 = vmatprep.subr.bf16.mxu0 %v2171_v40 }
  0x6f   : > { %2061 = vmatprep.subr.bf16.mxu1 %v2172_v41  ;;  %2055 = vmatprep.mubr.bf16.mxu0 %v1066_v42 }
  0x70   : > { %2075 = vmatprep.mubr.bf16.mxu1 %v1222_v43 }
  0x71   : > { %2042 = vmatpush3.bf16.msra.mxu0 %v2171_v40 }
  0x72   : > { %2062 = vmatpush3.bf16.msra.mxu1 %v2172_v41  ;;  %2043 = vmatprep.subr.bf16.mxu0 %v2173_v44 }
  0x73   : > { %2063 = vmatprep.subr.bf16.mxu1 %v2174_v45 }
  0x75   : > { %2044 = vmatpush3.bf16.msra.mxu0 %v2173_v44 }
  0x76   : > { %2064 = vmatpush3.bf16.msra.mxu1 %v2174_v45  ;;  %2045 = vmatprep.subr.bf16.mxu0 %v2175_v46 }
  0x77   : > { %2065 = vmatprep.subr.bf16.mxu1 %v2176_v47 }
  0x79   : > { %2046 = vmatpush3.bf16.msra.mxu0 %v2175_v46 }
  0x7a   : > { %2066 = vmatpush3.bf16.msra.mxu1 %v2176_v47  ;;  %2047 = vmatprep.subr.bf16.mxu0 %v2177_v48 }
  0x7b   : > { %2067 = vmatprep.subr.bf16.mxu1 %v2178_v49 }
  0x7d   : > { %2048 = vmatpush3.bf16.msra.mxu0 %v2177_v48 }
  0x7e   : > { %2068 = vmatpush3.bf16.msra.mxu1 %v2178_v49  ;;  %2049 = vmatprep.subr.bf16.mxu0 %v2179_v50 }
  0x7f   : > { %2069 = vmatprep.subr.bf16.mxu1 %v2180_v51 }
  0x81   : > { %2050 = vmatpush3.bf16.msra.mxu0 %v2179_v50  ;;  %v2207_v50 = vmov 1983009808  }
  0x82   : > { %2070 = vmatpush3.bf16.msra.mxu1 %v2180_v51  ;;  %2051 = vmatprep.subr.bf16.mxu0 %v2181_v52  ;;  %v1490_v51 = vunpack.c.l.s4 %v2207_v50 }
  0x83   : > { %2071 = vmatprep.subr.bf16.mxu1 %v2182_v53 }
  0x84   : > { %v1491_v59 = vunpack.c.0.s8 %v1490_v51 }
  0x85   : > { %2052 = vmatpush3.bf16.msra.mxu0 %v2181_v52 }
  0x86   : > { %2072 = vmatpush3.bf16.msra.mxu1 %v2182_v53  ;;  %2053 = vmatprep.subr.bf16.mxu0 %v2183_v54  ;;  %v1492_v53 = vlaneseq }
  0x87   : > { %2073 = vmatprep.subr.bf16.mxu1 %v2184_v55 }
  0x89   : > { %2054 = vmatpush3.bf16.msra.mxu0 %v2183_v54 }
  0x8a   : > { %2074 = vmatpush3.bf16.msra.mxu1 %v2184_v55  ;;  %2079 = vmatprep.subr.bf16.mxu0 %v2187_v58 }
  0x8c   : > { %2056 = vmatmul.mubr.bf16.vlgmr.msra.gmra.mxu0 %v1065_v36 }
  0x8d   : > { %2080 = vmatpush3.bf16.msra.mxu0 %v2187_v58  ;;  %2076 = vmatmul.mubr.bf16.vlgmr.msra.gmra.mxu1 %v2420_v39  ;;  %v1819_v58 = vld [vmem:[%s2518_s2] ss:$0 sm:$0xff] }
  0x8e   : > { %2081 = vmatprep.subr.bf16.mxu0 %v2190_v61  ;;  %2095 = vmatprep.mubr.bf16.mxu0 %v1363_v62 }
  0x91   : > { %2082 = vmatpush3.bf16.msra.mxu0 %v2190_v61 }
  0x92   : > { %2083 = vmatprep.subr.bf16.mxu0 %v2191_v63 }
  0x95   : > { %2084 = vmatpush3.bf16.msra.mxu0 %v2191_v63  ;;  %v1493_v63 = vshrl.u32 %v1492_v53, 7 }
  0x96   : > { %2085 = vmatprep.subr.bf16.mxu0 %v2192_v0 }
  0x99   : > { %2086 = vmatpush3.bf16.msra.mxu0 %v2192_v0 }
  0x9a   : > { %2087 = vmatprep.subr.bf16.mxu0 %v2193_v1 }
  0x9d   : > { %2088 = vmatpush3.bf16.msra.mxu0 %v2193_v1 }
  0x9e   : > { %2089 = vmatprep.subr.bf16.mxu0 %v2194_v2 }
  0xa1   : > { %2090 = vmatpush3.bf16.msra.mxu0 %v2194_v2 }
  0xa2   : > { %2091 = vmatprep.subr.bf16.mxu0 %v2195_v3 }
  0xa5   : > { %2092 = vmatpush3.bf16.msra.mxu0 %v2195_v3 }
  0xa6   : > { %2093 = vmatprep.subr.bf16.mxu0 %v2196_v4 }
  0xa9   : > { %2094 = vmatpush3.bf16.msra.mxu0 %v2196_v4 }
  0xac   : > { %2096 = vmatmul.mubr.bf16.vlgmr.msra.gmra.mxu0 %v1362_v60 }
  0xec   : > { %v1937_v5 = vpop.f32.mrf.mxu0 }
  0xed   : > { %v1957_v6 = vpop.f32.mrf.mxu1 }
  0xee   : > { %v450_v7 = vadd.f32 %v1957_v6, %v1937_v5  ;;  %v283_v8 = vpop.f32.mrf.mxu0 }
  0xef   : > { %v434_v9 = vpop.f32.mrf.mxu1 }
  0xf0   : > { %v448_v10 = vadd.f32 %v434_v9, %v283_v8  ;;  %v1938_v11 = vpop.f32.mrf.mxu0 }
  0xf1   : > { %v1958_v12 = vpop.f32.mrf.mxu1 }
  0xf2   : > { %v286_v13 = vpop.f32.mrf.mxu0 }
  0xf3   : > { %v437_v14 = vpop.f32.mrf.mxu1 }
  0xf4   : > { %v449_v15 = vadd.f32 %v437_v14, %v286_v13 }
 0x10c   : > { %v1977_v16 = vpop.f32.mrf.mxu0 }
 0x10d   : > { %v592_v17 = vadd.f32 %v1977_v16, %v450_v7  ;;  %v1997_v18 = vpop.f32.mrf.mxu1  ;;  %v1494_v7 = vsub.s32 %v1491_v59, %v1493_v63 }
 0x10e   : > { %v576_v19 = vpop.f32.mrf.mxu0 }
 0x10f   : > { %v590_v20 = vadd.f32 %v576_v19, %v448_v10  ;;  %v734_v21 = vadd.f32 %v1997_v18, %v592_v17  ;;  %v718_v22 = vpop.f32.mrf.mxu1 }
 0x110   : > { %v1978_v23 = vpop.f32.mrf.mxu0 }
 0x111   : > { %v732_v24 = vadd.f32 %v718_v22, %v590_v20  ;;  %v1998_v25 = vpop.f32.mrf.mxu1 }
 0x112   : > { %v579_v26 = vpop.f32.mrf.mxu0 }
 0x113   : > { %v721_v27 = vpop.f32.mrf.mxu1  ;;  %v591_v42 = vadd.f32 %v579_v26, %v449_v15 }
 0x115   : > { %v733_v45 = vadd.f32 %v721_v27, %v591_v42 }
 0x12c   : > { %v2017_v28 = vpop.f32.mrf.mxu0 }
 0x12d   : > { %v2037_v29 = vpop.f32.mrf.mxu1  ;;  %v890_v43 = vadd.f32 %v2017_v28, %v734_v21 }
 0x12e   : > { %v874_v30 = vpop.f32.mrf.mxu0 }
 0x12f   : > { %v1009_v31 = vpop.f32.mrf.mxu1  ;;  %v888_v44 = vadd.f32 %v874_v30, %v732_v24  ;;  %v1025_v46 = vadd.f32 %v2037_v29, %v890_v43 }
 0x130   : > { %v2018_v32 = vpop.f32.mrf.mxu0 }
 0x131   : > { %v2038_v33 = vpop.f32.mrf.mxu1  ;;  %v1023_v47 = vadd.f32 %v1009_v31, %v888_v44 }
 0x132   : > { %v877_v34 = vpop.f32.mrf.mxu0 }
 0x133   : > { %v1012_v35 = vpop.f32.mrf.mxu1  ;;  %v889_v48 = vadd.f32 %v877_v34, %v733_v45 }
 0x135   : > { %v1024_v55 = vadd.f32 %v1012_v35, %v889_v48 }
 0x14c   : > { %v2057_v36 = vpop.f32.mrf.mxu0 }
 0x14d   : > { %v2077_v37 = vpop.f32.mrf.mxu1  ;;  %v1167_v49 = vadd.f32 %v2057_v36, %v1025_v46 }
 0x14e   : > { %v1151_v38 = vpop.f32.mrf.mxu0 }
 0x14f   : > { %v1307_v39 = vpop.f32.mrf.mxu1  ;;  %v1165_v52 = vadd.f32 %v1151_v38, %v1023_v47  ;;  %v1323_v56 = vadd.f32 %v2077_v37, %v1167_v49 }
 0x150   : > { %v2058_v40 = vpop.f32.mrf.mxu0 }
 0x151   : > { %v2078_v41 = vpop.f32.mrf.mxu1  ;;  %v1321_v60 = vadd.f32 %v1307_v39, %v1165_v52 }
 0x152   : > { %v1154_v54 = vpop.f32.mrf.mxu0 }
 0x153   : > { %v1166_v61 = vadd.f32 %v1154_v54, %v1024_v55  ;;  %v1310_v0 = vpop.f32.mrf.mxu1 }
 0x155   : > { %v1322_v5 = vadd.f32 %v1310_v0, %v1166_v61 }
 0x16c   : > { %v2097_v57 = vpop.f32.mrf.mxu0 }
 0x16d   : > { %v1464_v62 = vadd.f32 %v2097_v57, %v1323_v56 }
 0x16e   : > { %v1448_v1 = vpop.f32.mrf.mxu0 }
 0x16f   : > { %v1480_v2 = vadd.f32 %v1819_v58, %v1464_v62  ;;  %v1462_v3 = vadd.f32 %v1448_v1, %v1321_v60 }
 0x170   : > { %v2098_v4 = vpop.f32.mrf.mxu0 }
 0x171   : > { %v1483_v6 = vmax.f32 %v1480_v2, 0.0  ;;  %v1478_v10 = vadd.f32 %v1819_v58, %v1462_v3 }
 0x172   : > { %v1451_v8 = vpop.f32.mrf.mxu0 }
 0x173   : > { %v1485_v9 = vpack.c.bf16 %v1483_v6, %v1483_v6  ;;  %v1463_v11 = vadd.f32 %v1451_v8, %v1322_v5  ;;  %v1481_v15 = vmax.f32 %v1478_v10, 0.0 }
 0x175   : > { %v1529_v12 = vrot.slane %v1485_v9, %v1494_v7  ;;  %v1479_v13 = vadd.f32 %v1819_v58, %v1463_v11 }
 0x177   : > { %v1530_v14 = vcombine.high %v1529_v12, %v1529_v12  ;;  %v1482_v16 = vmax.f32 %v1479_v13, 0.0  ;;  %v1824_v18 = vrot.slane %v1529_v12, 9 }
 0x179   : > { %v1533_v19 = vrot.slane %v1530_v14, 7  ;;  %v1484_v20 = vpack.c.bf16 %v1482_v16, %v1481_v15  ;;  %v1820_v21 = vpack.c.bf16 %v1482_v16, %v1482_v16 }
 0x17b   : > { %v1534_v22 = vsel %vm2502_vm12, %v1824_v18, %v1533_v19  ;;  %1486 = vst [vmem:[%s170_s21] sm:$0x3] %v1484_v20  ;;  %v1495_v23 = vrot.slane %v1484_v20, %v1494_v7  ;;  %v1502_v24 = vrot.slane %v1820_v21, %v1494_v7 }
 0x17c   : > { %1825 = vst [vmem:[%s170_s21 + $0x6] sm:$0x3] %v1534_v22 }
 0x17d   : > { %v1503_v25 = vcombine.high %v1495_v23, %v1495_v23  ;;  %v1518_v26 = vcombine.high %v1502_v24, %v1502_v24  ;;  %v1513_v28 = vrot.slane %v1502_v24, 7 }
 0x17f   : > { %v1821_v27 = vrot.slane %v1503_v25, 9  ;;  %1823 = vst [vmem:[%s170_s21 + $0x4] sm:$0x3] %v1518_v26 }
 0x181   : > { %v1514_v29 = vsel %vm2502_vm12, %v1821_v27, %v1513_v28 }
 0x182   : > { %1822 = vst [vmem:[%s170_s21 + $0x2] sm:$0x3] %v1514_v29 }
 0x183 PF: > { %s13_s12 = sadd.s32 1, %s2205_s12  }
 0x184   : > { %p10_p4 = scmp.ge.s32.totalorder %s13_s12, 4  }
 0x186   :  { %12 = sbr.rel (!%p10_p4) target bundleno = 1 (0x1), region = 73 }

// kernel: forward_pallas.19
= control target key start
LH: loop header
LB: loop body
LE: loop exit
PB: predicated region body
PF: predicated region fallthrough
CT: control target
= control target key end

     0   :  { %s7222_s12 = smov 0   ;;  %s8423_s0 = inlined_call_operand.vmem [shape: bf16[2,342,128], index: 0, kind: input, shape index: {}]   ;;  %s8424_s1 = inlined_call_operand.vmem [shape: bf16[9,128,128], index: 1, kind: input, shape index: {}]   ;;  %s8425_s2 = inlined_call_operand.vmem [shape: f32[1,128], index: 2, kind: input, shape index: {}]   ;;  %s8426_s3 = inlined_call_operand.vmem [shape: bf16[2,16,16,128], index: 3, kind: output, shape index: {}]  }
   0x1 LB: > { %s5706_s13 = sadd.s32 4294967295, %s7200_s12   ;;  %p5710_p0 = scmp.ge.s32.totalorder %s7200_s12, 1  ;;  %s7200_s12 = sphi %s7222_s12, %s13_s12  }
   0x2   : > { %p137_p1 = scmp.lt.s32.totalorder %s7200_s12, 3 }
   0x4   : > { %p138_p2 = pnand %p5710_p0, %p137_p1 }
   0x6   : > { %141 = sbr.rel (%p138_p2) target bundleno = 577 (0x241), region = 32 }
   0xb   : > { %v6952_v0 = vld [vmem:[%s8424_s1 + $0x38] sm:$0xff]   ;;  %p161_p3 = scmp.lt.s32.totalorder %s5706_s13, 1  ;;  %v6953_v1 = vld [vmem:[%s8424_s1 + $0x30] sm:$0xff]   ;;  %v6954_v2 = vld [vmem:[%s8424_s1 + $0x28] sm:$0xff]   ;;  %vm1423_vm0 = vcmask 1046528   ;;  %vm3163_vm3 = vcmask 1045504  }
   0xc   : > { %6927 = vmatprep.subr.bf16.mxu1 %v6952_v0  ;;  %6459 = vmatprep.subr.bf16.mxu0 %v6952_v0  ;;  %v6955_v3 = vld [vmem:[%s8424_s1 + $0x20] sm:$0xff]   ;;  %v6956_v6 = vld [vmem:[%s8424_s1 + $0x18] sm:$0xff]   ;;  %v6957_v7 = vld [vmem:[%s8424_s1 + $0x10] sm:$0xff]   ;;  %vm776_vm1 = vsmask.f32 7424  ;;  %vm4903_vm4 = vcmask 1044480  }
   0xd   : > { %s8456_s13 = smov (!%p161_p3, %s5706_s13), 1  ;;  %6935 = vmatpush3.bf16.msra.mxu1 %v6952_v0  ;;  %6460 = vmatpush3.bf16.msra.mxu0 %v6952_v0  ;;  %v6958_v8 = vld [vmem:[%s8424_s1 + $0x8] sm:$0xff]   ;;  %v6959_v9 = vld [vmem:[%s8424_s1] sm:$0xff]   ;;  %v6962_v10 = vld [vmem:[%s8424_s1 + $0x78] sm:$0xff]   ;;  %vm2494_vm2 = vsmask.f32 6400 }
   0xe   : > { %6928 = vmatprep.subr.bf16.mxu1 %v6953_v1  ;;  %6461 = vmatprep.subr.bf16.mxu0 %v6953_v1  ;;  %s6943_s20 = smul.u32 172, %s8456_s13  ;;  %v6966_v12 = vld [vmem:[%s8424_s1 + $0xb8] sm:$0xff]   ;;  %v6965_v14 = vld [vmem:[%s8424_s1 + $0x70] sm:$0xff]   ;;  %v6970_v18 = vld [vmem:[%s8424_s1 + $0x68] sm:$0xff]   ;;  %vm4234_vm5 = vsmask.f32 5376 }
   0xf   : > { %v6969_v16 = vld [vmem:[%s8424_s1 + $0xb0] sm:$0xff]   ;;  %v6973_v20 = vld [vmem:[%s8424_s1 + $0xa8] sm:$0xff]   ;;  %v6975_v23 = vld [vmem:[%s8424_s1 + $0x60] sm:$0xff]   ;;  %vm5406_vm6 = vcmask 1042432   ;;  %s6165_s18 = sshll.u32 %s8456_s13, 7  ;;  %vm5407_vm7 = vcmask 1046532  }
  0x10   : > { %s7245_s23 = scalar_lea.vmem %s8423_s0, %s6943_s20  ;;  %v6977_v24 = vld [vmem:[%s8424_s1 + $0xa0] sm:$0xff]   ;;  %v6979_v26 = vld [vmem:[%s8424_s1 + $0x58] sm:$0xff]   ;;  %v6984_v31 = vld [vmem:[%s8424_s1 + $0x50] sm:$0xff]   ;;  %s8261_s13 = scalar_lea.vmem %s8426_s3, %s6165_s18  ;;  %vm5446_vm9 = vcmask 1040384   ;;  %vm5447_vm10 = vcmask 1044484   ;;  %vm5426_vm11 = vcmask 1041408  }
  0x11   : > { %6936 = vmatpush3.bf16.msra.mxu1 %v6953_v1  ;;  %6462 = vmatpush3.bf16.msra.mxu0 %v6953_v1  ;;  %v6960_v4 = vld [vmem:[%s7245_s23 + $0x40] sm:$0xff]   ;;  %v6961_v11 = vld [vmem:[%s7245_s23 + $0x48] sm:$0xff]   ;;  %v6967_v15 = vld [vmem:[%s7245_s23 + $0x50] sm:$0xff]   ;;  %vm5427_vm12 = vcmask 1045508  }
  0x12   : > { %6929 = vmatprep.subr.bf16.mxu1 %v6954_v2  ;;  %6463 = vmatprep.subr.bf16.mxu0 %v6954_v2  ;;  %v6963_v5 = vld [vmem:[%s7245_s23] sm:$0xff]   ;;  %v6964_v13 = vld [vmem:[%s7245_s23 + $0x8] sm:$0xff]   ;;  %v6971_v17 = vld [vmem:[%s7245_s23 + $0x10] sm:$0xff]  }
  0x13   : > { %6491 = vmatprep.mubr.bf16.mxu1 %v6960_v4  ;;  %6475 = vmatprep.mubr.bf16.mxu0 %v6963_v5  ;;  %v6968_v19 = vld [vmem:[%s7245_s23 + $0x58] sm:$0xff]   ;;  %v6974_v22 = vld [vmem:[%s7245_s23 + $0x60] sm:$0xff]   ;;  %v6976_v27 = vld [vmem:[%s7245_s23 + $0x68] sm:$0xff]  }
  0x14   : > { %v6972_v21 = vld [vmem:[%s7245_s23 + $0x18] sm:$0xff]   ;;  %v6978_v25 = vld [vmem:[%s7245_s23 + $0x20] sm:$0xff]   ;;  %v6980_v29 = vld [vmem:[%s7245_s23 + $0x28] sm:$0xff]  }
  0x15   : > { %6937 = vmatpush3.bf16.msra.mxu1 %v6954_v2  ;;  %6464 = vmatpush3.bf16.msra.mxu0 %v6954_v2  ;;  %v6981_v28 = vld [vmem:[%s8424_s1 + $0x98] sm:$0xff]   ;;  %v6982_v30 = vld [vmem:[%s7245_s23 + $0x70] sm:$0xff]   ;;  %v6997_v33 = vld [vmem:[%s7245_s23] sm:$0xff]  }
  0x16   : > { %6930 = vmatprep.subr.bf16.mxu1 %v6955_v3  ;;  %6465 = vmatprep.subr.bf16.mxu0 %v6955_v3  ;;  %v6985_v32 = vld [vmem:[%s8424_s1 + $0x90] sm:$0xff]   ;;  %v6994_v35 = vld [vmem:[%s7245_s23] sm:$0xfe]   ;;  %v6988_v36 = vld [vmem:[%s8424_s1 + $0x88] sm:$0xff]   ;;  %v780_v42 = vshll.u32 %v6997_v33, 16  ;;  %v778_v49 = vshrl.u32 %v6997_v33, 16 }
  0x17   : > { %v6986_v34 = vld [vmem:[%s7245_s23 + $0x30] sm:$0xff]   ;;  %v6995_v37 = vld [vmem:[%s7245_s23 + $0x8] sm:$0xff]   ;;  %v6983_v39 = vld [vmem:[%s7245_s23 + $0x78] sm:$0xff]   ;;  %v1424_v45 = vrot.slane %v6994_v35, 1 }
  0x18   : > { %v6989_v38 = vld [vmem:[%s8424_s1 + $0x48] sm:$0xff]   ;;  %v6987_v40 = vld [vmem:[%s7245_s23 + $0x38] sm:$0xff]   ;;  %v6990_v43 = vld [vmem:[%s7245_s23 + $0x80] sm:$0xff]   ;;  %v1425_v46 = vrot.slane %v6995_v37, 1  ;;  %v782_v50 = vrot.slane %v780_v42, 1 }
  0x19   : > { %6938 = vmatpush3.bf16.msra.mxu1 %v6955_v3  ;;  %6466 = vmatpush3.bf16.msra.mxu0 %v6955_v3  ;;  %v6998_v41 = vld [vmem:[%s7245_s23 + $0x8] sm:$0xff]   ;;  %v6992_v44 = vld [vmem:[%s8424_s1 + $0x80] sm:$0xff]   ;;  %v6996_v48 = vld [vmem:[%s7245_s23 + $0x10] sm:$0xff]  }
  0x1a   : > { %6931 = vmatprep.subr.bf16.mxu1 %v6956_v6  ;;  %6467 = vmatprep.subr.bf16.mxu0 %v6956_v6  ;;  %v6993_v47 = vld [vmem:[%s8424_s1 + $0x40] sm:$0xff]   ;;  %v785_v51 = vshll.u32 %v6998_v41, 16  ;;  %v7002_v52 = vld [vmem:[%s7245_s23 + $0x18] sm:$0xff]   ;;  %v1426_v53 = vsel %vm1423_vm0, %v1424_v45, %v1425_v46  ;;  %v6999_v54 = vld [vmem:[%s7245_s23 + $0x10] sm:$0xff]   ;;  %v1427_v55 = vrot.slane %v6996_v48, 1  ;;  %v783_v57 = vor.u32 %v782_v50, %v778_v49 }
  0x1b   : > { %v7000_v56 = vld [vmem:[%s8424_s1 + $0xf8] sm:$0xff]   ;;  %v1429_v60 = vrot.slane %v7002_v52, 1  ;;  %v6991_v62 = vld [vmem:[%s7245_s23 + $0x88] sm:$0xff]   ;;  %v793_v63 = vshll.u32 %v6999_v54, 16  ;;  %v789_v1 = vshrl.u32 %v6998_v41, 16  ;;  %v7003_v2 = vld [vmem:[%s7245_s23 + $0x20] sm:$0xff]  }
  0x1c   : > { %v787_v58 = vrot.slane %v785_v51, 1  ;;  %v7001_v59 = vld [vmem:[%s8424_s1 + $0x138] sm:$0xff]   ;;  %v1428_v0 = vsel %vm1423_vm0, %v1425_v46, %v1427_v55  ;;  %v797_v3 = vshrl.u32 %v6999_v54, 16  ;;  %v7005_v4 = vld [vmem:[%s7245_s23 + $0x20] sm:$0xff]   ;;  %v7012_v37 = vld [vmem:[%s8424_s1 + $0xe8] sm:$0xff]  }
  0x1d   : > { %6939 = vmatpush3.bf16.msra.mxu1 %v6956_v6  ;;  %6468 = vmatpush3.bf16.msra.mxu0 %v6956_v6  ;;  %v7004_v61 = vld [vmem:[%s7245_s23 + $0x18] sm:$0xff]   ;;  %v7015_v41 = vld [vmem:[%s7245_s23 + $0x40] sm:$0xff]   ;;  %v7019_v48 = vld [vmem:[%s7245_s23 + $0x48] sm:$0xff]  }
  0x1e   : > { %6932 = vmatprep.subr.bf16.mxu1 %v6957_v7  ;;  %6469 = vmatprep.subr.bf16.mxu0 %v6957_v7  ;;  %v788_v5 = vsel %vm776_vm1, %v783_v57, %v787_v58  ;;  %v801_v6 = vshll.u32 %v7004_v61, 16  ;;  %v7018_v45 = vld [vmem:[%s8424_s1 + $0xe0] sm:$0xff]   ;;  %v7027_v51 = vld [vmem:[%s8424_s1 + $0x118] sm:$0xff]   ;;  %v1439_v52 = vrot.slane %v7015_v41, 1  ;;  %vm8264_vm8 = vmor %vm5406_vm6, %vm5407_vm7 }
  0x1f   : > { %vm8283_vm13 = vmor %vm5446_vm9, %vm5447_vm10 }
  0x20   : > { %vm8299_vm14 = vmor %vm5426_vm11, %vm5427_vm12 }
  0x21   : > { %6940 = vmatpush3.bf16.msra.mxu1 %v6957_v7  ;;  %6470 = vmatpush3.bf16.msra.mxu0 %v6957_v7  ;;  %v7007_v7 = vld [vmem:[%s8424_s1 + $0x130] sm:$0xff]  }
  0x22   : > { %6933 = vmatprep.subr.bf16.mxu1 %v6958_v8  ;;  %6471 = vmatprep.subr.bf16.mxu0 %v6958_v8 }
  0x25   : > { %6941 = vmatpush3.bf16.msra.mxu1 %v6958_v8  ;;  %6472 = vmatpush3.bf16.msra.mxu0 %v6958_v8  ;;  %v1430_v8 = vsel %vm1423_vm0, %v1427_v55, %v1429_v60 }
  0x26   : > { %6934 = vmatprep.subr.bf16.mxu1 %v6959_v9  ;;  %6473 = vmatprep.subr.bf16.mxu0 %v6959_v9 }
  0x29   : > { %6942 = vmatpush3.bf16.msra.mxu1 %v6959_v9  ;;  %6474 = vmatpush3.bf16.msra.mxu0 %v6959_v9  ;;  %v7008_v9 = vld [vmem:[%s7245_s23 + $0x28] sm:$0xff]  }
  0x2a   : > { %6511 = vmatprep.subr.bf16.mxu1 %v6962_v10  ;;  %6563 = vmatprep.subr.bf16.mxu0 %v6966_v12 }
  0x2c   : > { %6492 = vmatmul.mubr.bf16.vlgmr.msra.gmra.mxu1 %v6961_v11  ;;  %6476 = vmatmul.mubr.bf16.vlgmr.msra.gmra.mxu0 %v6964_v13  ;;  %v791_v11 = vor.u32 %v789_v1, %v787_v58  ;;  %v7010_v13 = vld [vmem:[%s7245_s23 + $0x28] sm:$0xff]   ;;  %v1441_v58 = vrot.slane %v7019_v48, 1  ;;  %v7020_v1 = vld [vmem:[%s7245_s23 + $0x50] sm:$0xff]  }
  0x2d   : > { %6512 = vmatpush3.bf16.msra.mxu1 %v6962_v10  ;;  %6564 = vmatpush3.bf16.msra.mxu0 %v6966_v12  ;;  %v795_v10 = vrot.slane %v793_v63, 1  ;;  %v1431_v12 = vrot.slane %v7003_v2, 1  ;;  %v7035_v48 = vld [vmem:[%s7245_s23 + $0x70] sm:$0xff]  }
  0x2e   : > { %6513 = vmatprep.subr.bf16.mxu1 %v6965_v14  ;;  %6495 = vmatprep.mubr.bf16.mxu1 %v6967_v15  ;;  %v803_v15 = vrot.slane %v801_v6, 1  ;;  %v1442_v6 = vsel %vm1423_vm0, %v1439_v52, %v1441_v58 }
  0x2f   : > { %6565 = vmatprep.subr.bf16.mxu0 %v6969_v16  ;;  %6479 = vmatprep.mubr.bf16.mxu0 %v6971_v17  ;;  %v809_v17 = vshll.u32 %v7005_v4, 16 }
  0x31   : > { %6514 = vmatpush3.bf16.msra.mxu1 %v6965_v14  ;;  %6566 = vmatpush3.bf16.msra.mxu0 %v6969_v16  ;;  %v799_v14 = vor.u32 %v797_v3, %v795_v10  ;;  %v7014_v16 = vld [vmem:[%s8424_s1 + $0x128] sm:$0xff]  }
  0x32   : > { %6515 = vmatprep.subr.bf16.mxu1 %v6970_v18  ;;  %6567 = vmatprep.subr.bf16.mxu0 %v6973_v20 }
  0x34   : > { %6496 = vmatmul.mubr.bf16.gmra.mxu1 %v6968_v19  ;;  %6480 = vmatmul.mubr.bf16.gmra.mxu0 %v6972_v21  ;;  %v805_v19 = vshrl.u32 %v7004_v61, 16  ;;  %v796_v21 = vsel %vm776_vm1, %v791_v11, %v795_v10  ;;  %v1443_v11 = vrot.slane %v7020_v1, 1 }
  0x35   : > { %6516 = vmatpush3.bf16.msra.mxu1 %v6970_v18  ;;  %6568 = vmatpush3.bf16.msra.mxu0 %v6973_v20  ;;  %v1433_v18 = vrot.slane %v7008_v9, 1  ;;  %v7006_v20 = vld [vmem:[%s8424_s1 + $0xf0] sm:$0xff]  }
  0x36   : > { %6499 = vmatprep.mubr.bf16.mxu1 %v6974_v22  ;;  %6517 = vmatprep.subr.bf16.mxu1 %v6975_v23  ;;  %v1432_v22 = vsel %vm1423_vm0, %v1429_v60, %v1431_v12  ;;  %v7023_v9 = vld [vmem:[%s7245_s23 + $0x50] sm:$0xff]  }
  0x37   : > { %6569 = vmatprep.subr.bf16.mxu0 %v6977_v24  ;;  %6483 = vmatprep.mubr.bf16.mxu0 %v6978_v25  ;;  %v804_v25 = vsel %vm776_vm1, %v799_v14, %v803_v15 }
  0x39   : > { %6518 = vmatpush3.bf16.msra.mxu1 %v6975_v23  ;;  %6570 = vmatpush3.bf16.msra.mxu0 %v6977_v24  ;;  %v7009_v23 = vld [vmem:[%s7245_s23 + $0x30] sm:$0xff]   ;;  %v813_v24 = vshrl.u32 %v7005_v4, 16  ;;  %v7024_v4 = vld [vmem:[%s7245_s23 + $0x58] sm:$0xff]  }
  0x3a   : > { %6519 = vmatprep.subr.bf16.mxu1 %v6979_v26  ;;  %6571 = vmatprep.subr.bf16.mxu0 %v6981_v28  ;;  %v1435_v33 = vrot.slane %v7009_v23, 1  ;;  %v1445_v14 = vrot.slane %v7024_v4, 1 }
  0x3c   : > { %6500 = vmatmul.mubr.bf16.gmra.mxu1 %v6976_v27  ;;  %6484 = vmatmul.mubr.bf16.gmra.mxu0 %v6980_v29  ;;  %v7011_v27 = vld [vmem:[%s7245_s23 + $0x30] sm:$0xff]   ;;  %v1434_v29 = vsel %vm1423_vm0, %v1431_v12, %v1433_v18 }
  0x3d   : > { %6520 = vmatpush3.bf16.msra.mxu1 %v6979_v26  ;;  %6572 = vmatpush3.bf16.msra.mxu0 %v6981_v28  ;;  %v817_v26 = vshll.u32 %v7010_v13, 16  ;;  %v811_v28 = vrot.slane %v809_v17, 1  ;;  %v7041_v17 = vld [vmem:[%s8424_s1 + $0x108] sm:$0xff]  }
  0x3e   : > { %6503 = vmatprep.mubr.bf16.mxu1 %v6982_v30  ;;  %6521 = vmatprep.subr.bf16.mxu1 %v6984_v31  ;;  %v7013_v30 = vld [vmem:[%s7245_s23 + $0x38] sm:$0xff]  }
  0x3f   : > { %6573 = vmatprep.subr.bf16.mxu0 %v6985_v32  ;;  %6487 = vmatprep.mubr.bf16.mxu0 %v6986_v34  ;;  %v7016_v34 = vld [vmem:[%s7245_s23 + $0x38] sm:$0xff]   ;;  %v815_v35 = vor.u32 %v813_v24, %v811_v28  ;;  %v1446_v24 = vsel %vm1423_vm0, %v1443_v11, %v1445_v14 }
  0x40   : > { %v837_v60 = vshrl.u32 %v7016_v34, 16 }
  0x41   : > { %6522 = vmatpush3.bf16.msra.mxu1 %v6984_v31  ;;  %6574 = vmatpush3.bf16.msra.mxu0 %v6985_v32  ;;  %v7021_v31 = vld [vmem:[%s8424_s1 + $0x120] sm:$0xff]   ;;  %v807_v32 = vor.u32 %v805_v19, %v803_v15  ;;  %v7028_v15 = vld [vmem:[%s7245_s23 + $0x58] sm:$0xff]  }
  0x42   : > { %6575 = vmatprep.subr.bf16.mxu0 %v6988_v36  ;;  %6523 = vmatprep.subr.bf16.mxu1 %v6989_v38 }
  0x43   : > { %v812_v42 = vsel %vm776_vm1, %v807_v32, %v811_v28  ;;  %v7045_v28 = vld [vmem:[%s8424_s1 + $0xc0] sm:$0xff]  }
  0x44   : > { %6504 = vmatmul.mubr.bf16.gmra.mxu1 %v6983_v39  ;;  %6488 = vmatmul.mubr.bf16.gmra.mxu0 %v6987_v40  ;;  %v1437_v39 = vrot.slane %v7013_v30, 1  ;;  %v821_v40 = vshrl.u32 %v7010_v13, 16  ;;  %v7029_v30 = vld [vmem:[%s7245_s23 + $0x60] sm:$0xff]  }
  0x45   : > { %6576 = vmatpush3.bf16.msra.mxu0 %v6988_v36  ;;  %6507 = vmatprep.mubr.bf16.mxu1 %v6990_v43  ;;  %v819_v36 = vrot.slane %v817_v26, 1  ;;  %v1436_v43 = vsel %vm1423_vm0, %v1433_v18, %v1435_v33  ;;  %v857_v18 = vshll.u32 %v7023_v9, 16  ;;  %v865_v26 = vshll.u32 %v7028_v15, 16 }
  0x46   : > { %6524 = vmatpush3.bf16.msra.mxu1 %v6989_v38  ;;  %6577 = vmatprep.subr.bf16.mxu0 %v6992_v44  ;;  %v825_v38 = vshll.u32 %v7011_v27, 16  ;;  %v1438_v50 = vsel %vm1423_vm0, %v1435_v33, %v1437_v39 }
  0x47   : > { %6525 = vmatprep.subr.bf16.mxu1 %v6993_v47  ;;  %6579 = vmatprep.mubr.bf16.mxu0 %v1426_v53  ;;  %v820_v46 = vsel %vm776_vm1, %v815_v35, %v819_v36  ;;  %v7017_v53 = vld [vmem:[%s7245_s23 + $0x40] sm:$0xff]   ;;  %v823_v54 = vor.u32 %v821_v40, %v819_v36  ;;  %v867_v36 = vrot.slane %v865_v26, 1 }
  0x48   : > { %v827_v49 = vrot.slane %v825_v38, 1  ;;  %v841_v61 = vshll.u32 %v7017_v53, 16  ;;  %v845_v2 = vshrl.u32 %v7017_v53, 16  ;;  %v873_v38 = vshll.u32 %v7029_v30, 16 }
  0x49   : > { %6578 = vmatpush3.bf16.msra.mxu0 %v6992_v44  ;;  %v833_v44 = vshll.u32 %v7016_v34, 16  ;;  %v7033_v34 = vld [vmem:[%s7245_s23 + $0x68] sm:$0xff]  }
  0x4a   : > { %6526 = vmatpush3.bf16.msra.mxu1 %v6993_v47  ;;  %6667 = vmatprep.subr.bf16.mxu0 %v7001_v59  ;;  %v829_v47 = vshrl.u32 %v7011_v27, 16  ;;  %v828_v63 = vsel %vm776_vm1, %v823_v54, %v827_v49  ;;  %v7030_v27 = vld [vmem:[%s7245_s23 + $0x68] sm:$0xff]   ;;  %v7039_v54 = vld [vmem:[%s7245_s23 + $0x78] sm:$0xff]  }
  0x4b   : > { %6615 = vmatprep.subr.bf16.mxu1 %v7000_v56  ;;  %v835_v55 = vrot.slane %v833_v44, 1  ;;  %v897_v1 = vshll.u32 %v7039_v54, 16 }
  0x4c   : > { %6508 = vmatmul.mubr.bf16.gmra.mxu1 %v6991_v62  ;;  %6580 = vmatmul.mubr.bf16.vlgmr.msra.gmra.mxu0 %v1428_v0  ;;  %v831_v57 = vor.u32 %v829_v47, %v827_v49  ;;  %v7034_v62 = vld [vmem:[%s8424_s1 + $0x110] sm:$0xff]   ;;  %v1440_v0 = vsel %vm1423_vm0, %v1437_v39, %v1439_v52  ;;  %v7036_v47 = vld [vmem:[%s7245_s23 + $0x78] sm:$0xff]   ;;  %v875_v49 = vrot.slane %v873_v38, 1 }
  0x4d   : > { %6527 = vmatprep.mubr.bf16.mxu1 %v788_v5  ;;  %6668 = vmatpush3.bf16.msra.mxu0 %v7001_v59  ;;  %v7025_v59 = vld [vmem:[%s8424_s1 + $0xd8] sm:$0xff]   ;;  %v839_v10 = vor.u32 %v837_v60, %v835_v55  ;;  %v7031_v39 = vld [vmem:[%s7245_s23 + $0x70] sm:$0xff]  }
  0x4e   : > { %6583 = vmatprep.mubr.bf16.mxu0 %v1430_v8  ;;  %6669 = vmatprep.subr.bf16.mxu0 %v7007_v7  ;;  %v836_v5 = vsel %vm776_vm1, %v831_v57, %v835_v55  ;;  %v843_v8 = vrot.slane %v841_v61, 1  ;;  %v7037_v57 = vld [vmem:[%s7245_s23 + $0x80] sm:$0xff]   ;;  %v7439_v60 = vld [vmem:[%s8424_s1 + $0x178] sm:$0xff]   ;;  %v893_v61 = vshrl.u32 %v7035_v48, 16 }
  0x50   : > { %v847_v13 = vor.u32 %v845_v2, %v843_v8  ;;  %v844_v19 = vsel %vm776_vm1, %v839_v10, %v843_v8  ;;  %v7049_v2 = vld [vmem:[%s7245_s23 + $0x10] sm:$0xff]   ;;  %v7456_v10 = vld [vmem:[%s7245_s23 + $0x88] sm:$0xff]  }
  0x51   : > { %6670 = vmatpush3.bf16.msra.mxu0 %v7007_v7  ;;  %v7032_v7 = vld [vmem:[%s8424_s1 + $0xd0] sm:$0xff]  }
  0x52   : > { %6671 = vmatprep.subr.bf16.mxu0 %v7014_v16 }
  0x54   : > { %6528 = vmatmul.mubr.bf16.vlgmr.msra.gmra.mxu1 %v796_v21  ;;  %6584 = vmatmul.mubr.bf16.gmra.mxu0 %v1432_v22  ;;  %v7026_v22 = vld [vmem:[%s7245_s23 + $0x60] sm:$0xff]  }
  0x55   : > { %6616 = vmatpush3.bf16.msra.mxu1 %v7000_v56  ;;  %6531 = vmatprep.mubr.bf16.mxu1 %v804_v25  ;;  %v7022_v56 = vld [vmem:[%s7245_s23 + $0x48] sm:$0xff]   ;;  %v861_v25 = vshrl.u32 %v7023_v9, 16  ;;  %v1447_v33 = vrot.slane %v7026_v22, 1  ;;  %v1455_v9 = vrot.slane %v7037_v57, 1  ;;  %v913_v22 = vshll.u32 %v7456_v10, 16 }
  0x56   : > { %6617 = vmatprep.subr.bf16.mxu1 %v7006_v20  ;;  %6587 = vmatprep.mubr.bf16.mxu0 %v1434_v29  ;;  %v849_v3 = vshll.u32 %v7022_v56, 16  ;;  %v853_v21 = vshrl.u32 %v7022_v56, 16  ;;  %v859_v29 = vrot.slane %v857_v18, 1  ;;  %v1453_v56 = vrot.slane %v7036_v47, 1  ;;  %v7057_v47 = vld [vmem:[%s7245_s23 + $0x28] sm:$0xff]  }
  0x57   : > { %6672 = vmatpush3.bf16.msra.mxu0 %v7014_v16  ;;  %v7038_v16 = vld [vmem:[%s8424_s1 + $0xc8] sm:$0xff]   ;;  %v1448_v41 = vsel %vm1423_vm0, %v1445_v14, %v1447_v33  ;;  %v2504_v18 = vshrl.u32 %v7049_v2, 16 }
  0x58   : > { %6673 = vmatprep.subr.bf16.mxu0 %v7021_v31  ;;  %v851_v12 = vrot.slane %v849_v3, 1  ;;  %v863_v35 = vor.u32 %v861_v25, %v859_v29 }
  0x59   : > { %6618 = vmatpush3.bf16.msra.mxu1 %v7006_v20  ;;  %v1444_v20 = vsel %vm1423_vm0, %v1441_v58, %v1443_v11  ;;  %v889_v58 = vshll.u32 %v7035_v48, 16  ;;  %v7052_v48 = vld [vmem:[%s7245_s23 + $0x10] sm:$0xff]  }
  0x5a   : > { %6619 = vmatprep.subr.bf16.mxu1 %v7012_v37  ;;  %v852_v23 = vsel %vm776_vm1, %v847_v13, %v851_v12  ;;  %v855_v32 = vor.u32 %v853_v21, %v851_v12  ;;  %v868_v44 = vsel %vm776_vm1, %v863_v35, %v867_v36  ;;  %v899_v12 = vrot.slane %v897_v1, 1 }
  0x5b   : > { %6674 = vmatpush3.bf16.msra.mxu0 %v7021_v31  ;;  %v7047_v31 = vld [vmem:[%s8424_s1 + $0x100] sm:$0xff]   ;;  %v901_v13 = vshrl.u32 %v7039_v54, 16 }
  0x5c   : > { %6532 = vmatmul.mubr.bf16.gmra.mxu1 %v812_v42  ;;  %6588 = vmatmul.mubr.bf16.gmra.mxu0 %v1436_v43  ;;  %v860_v40 = vsel %vm776_vm1, %v855_v32, %v859_v29  ;;  %v869_v42 = vshrl.u32 %v7028_v15, 16  ;;  %v881_v43 = vshll.u32 %v7033_v34, 16  ;;  %v7043_v15 = vld [vmem:[%s7245_s23 + $0x90] ss:$0 sps:$4 sm:$0x11]  }
  0x5d   : > { %6535 = vmatprep.mubr.bf16.mxu1 %v820_v46  ;;  %6620 = vmatpush3.bf16.msra.mxu1 %v7012_v37  ;;  %v1449_v37 = vrot.slane %v7030_v27, 1  ;;  %v877_v46 = vshrl.u32 %v7029_v30, 16  ;;  %v7046_v27 = vld [vmem:[%s7245_s23 + $0x90] ss:$0 sps:$4 sm:$0x11]   ;;  %v1459_v35 = vrot.slane %v7043_v15, 1  ;;  %v903_v38 = vor.u32 %v901_v13, %v899_v12 }
  0x5e   : > { %6591 = vmatprep.mubr.bf16.mxu0 %v1438_v50  ;;  %6621 = vmatprep.subr.bf16.mxu1 %v7018_v45  ;;  %v1451_v50 = vrot.slane %v7031_v39, 1  ;;  %v871_v52 = vor.u32 %v869_v42, %v867_v36  ;;  %v883_v53 = vrot.slane %v881_v43, 1  ;;  %v915_v36 = vrot.slane %v913_v22, 1  ;;  %v7063_v13 = vld [vmem:[%s7245_s23 + $0x38] sm:$0xff]   ;;  %v7061_v15 = vld [vmem:[%s8424_s1 + $0x1b0] sm:$0xff]  }
  0x5f   : > { %6675 = vmatprep.subr.bf16.mxu0 %v7027_v51  ;;  %v879_v55 = vor.u32 %v877_v46, %v875_v49  ;;  %v2549_v22 = vshrl.u32 %v7063_v13, 16 }
  0x60   : > { %6676 = vmatpush3.bf16.msra.mxu0 %v7027_v51  ;;  %v885_v51 = vshrl.u32 %v7033_v34, 16  ;;  %v1454_v4 = vsel %vm1423_vm0, %v1451_v50, %v1453_v56 }
  0x61   : > { %6622 = vmatpush3.bf16.msra.mxu1 %v7018_v45  ;;  %6677 = vmatprep.subr.bf16.mxu0 %v7034_v62  ;;  %v1450_v45 = vsel %vm1423_vm0, %v1447_v33, %v1449_v37  ;;  %v884_v3 = vsel %vm776_vm1, %v879_v55, %v883_v53  ;;  %v7056_v33 = vld [vmem:[%s7245_s23 + $0x20] sm:$0xff]  }
  0x62   : > { %6623 = vmatprep.subr.bf16.mxu1 %v7025_v59  ;;  %v887_v8 = vor.u32 %v885_v51, %v883_v53  ;;  %v2525_v46 = vshll.u32 %v7056_v33, 16  ;;  %v7051_v53 = vld [vmem:[%s7245_s23 + $0x8] sm:$0xfe]  }
  0x64   : > { %6536 = vmatmul.mubr.bf16.gmra.mxu1 %v828_v63  ;;  %6592 = vmatmul.mubr.bf16.gmra.mxu0 %v1440_v0  ;;  %v876_v63 = vsel %vm776_vm1, %v871_v52, %v875_v49  ;;  %v1452_v0 = vsel %vm1423_vm0, %v1449_v37, %v1451_v50  ;;  %v917_v37 = vshrl.u32 %v7456_v10, 16 }
  0x65   : > { %6539 = vmatprep.mubr.bf16.mxu1 %v836_v5  ;;  %6595 = vmatprep.mubr.bf16.mxu0 %v1442_v6  ;;  %v7048_v5 = vld [vmem:[%s7245_s23 + $0x8] sm:$0xfe]   ;;  %v891_v6 = vrot.slane %v889_v58, 1  ;;  %v2527_v58 = vrot.slane %v2525_v46, 2  ;;  %v7065_v46 = vld [vmem:[%s7245_s23 + $0x38] sm:$0xff]  }
  0x66   : > { %6624 = vmatpush3.bf16.msra.mxu1 %v7025_v59  ;;  %6678 = vmatpush3.bf16.msra.mxu0 %v7034_v62  ;;  %v7434_v59 = vld [vmem:[%s7245_s23 + $0x88] sm:$0xff]   ;;  %v7444_v62 = vld [vmem:[%s8424_s1 + $0x1b8] sm:$0xff]  }
  0x67   : > { %6625 = vmatprep.subr.bf16.mxu1 %v7032_v7  ;;  %6679 = vmatprep.subr.bf16.mxu0 %v7041_v17  ;;  %v895_v11 = vor.u32 %v893_v61, %v891_v6  ;;  %v1457_v14 = vrot.slane %v7434_v59, 1  ;;  %v2531_v61 = vshrl.u32 %v7057_v47, 16 }
  0x69   : > { %v1458_v25 = vsel %vm1423_vm0, %v1455_v9, %v1457_v14  ;;  %v1460_v50 = vsel %vm1423_vm0, %v1457_v14, %v1459_v35  ;;  %v7073_v35 = vld [vmem:[%s7245_s23 + $0x50] sm:$0xff]  }
  0x6a   : > { %6626 = vmatpush3.bf16.msra.mxu1 %v7032_v7  ;;  %6680 = vmatpush3.bf16.msra.mxu0 %v7041_v17  ;;  %v7040_v7 = vld [vmem:[%s7245_s23 + $0x80] sm:$0xff]   ;;  %v2499_v17 = vshll.u32 %v7048_v5, 16 }
  0x6b   : > { %6627 = vmatprep.subr.bf16.mxu1 %v7038_v16  ;;  %6681 = vmatprep.subr.bf16.mxu0 %v7047_v31  ;;  %v905_v21 = vshll.u32 %v7040_v7, 16  ;;  %v909_v26 = vshrl.u32 %v7040_v7, 16  ;;  %v7053_v7 = vld [vmem:[%s7245_s23 + $0x18] sm:$0xff]  }
  0x6c   : > { %6540 = vmatmul.mubr.bf16.gmra.mxu1 %v844_v19  ;;  %6596 = vmatmul.mubr.bf16.gmra.mxu0 %v1444_v20  ;;  %v2507_v19 = vshll.u32 %v7049_v2, 16  ;;  %v892_v20 = vsel %vm776_vm1, %v887_v8, %v891_v6  ;;  %v2501_v30 = vrot.slane %v2499_v17, 2  ;;  %v1959_v2 = vrot.slane %v7051_v53, 1 }
  0x6d   : > { %6543 = vmatprep.mubr.bf16.mxu1 %v852_v23  ;;  %6599 = vmatprep.mubr.bf16.mxu0 %v1446_v24  ;;  %v1456_v23 = vsel %vm1423_vm0, %v1453_v56, %v1455_v9  ;;  %v900_v24 = vsel %vm776_vm1, %v895_v11, %v899_v12  ;;  %v907_v34 = vrot.slane %v905_v21, 1  ;;  %v7062_v56 = vld [vmem:[%s7245_s23 + $0x30] sm:$0xff]   ;;  %v2533_v8 = vrot.slane %v2531_v61, 1  ;;  %v7479_v9 = vld [vmem:[%s7245_s23 + $0x20] sm:$0xff]  }
  0x6e   : > { %6628 = vmatpush3.bf16.msra.mxu1 %v7038_v16  ;;  %6682 = vmatpush3.bf16.msra.mxu0 %v7047_v31  ;;  %v2496_v16 = vshrl.u32 %v7048_v5, 16  ;;  %v2506_v31 = vrot.slane %v2504_v18, 1  ;;  %v2509_v32 = vrot.slane %v2507_v19, 2  ;;  %v2543_v5 = vshll.u32 %v7062_v56, 16  ;;  %v7067_v18 = vld [vmem:[%s7245_s23 + $0x40] sm:$0xff]  }
  0x6f   : > { %6629 = vmatprep.subr.bf16.mxu1 %v7045_v28  ;;  %6771 = vmatprep.subr.bf16.mxu0 %v7444_v62  ;;  %v908_v49 = vsel %vm776_vm1, %v903_v38, %v907_v34  ;;  %v7506_v38 = vld [vmem:[%s7245_s23 + $0x30] sm:$0xff]   ;;  %v7078_v61 = vld [vmem:[%s7245_s23 + $0x60] sm:$0xff]  }
  0x70   : > { %v2498_v29 = vrot.slane %v2496_v16, 1  ;;  %v2510_v43 = vor.u32 %v2509_v32, %v2506_v31  ;;  %v2545_v17 = vrot.slane %v2543_v5, 2  ;;  %v7060_v32 = vld [vmem:[%s8424_s1 + $0x170] sm:$0xff]  }
  0x72   : > { %6630 = vmatpush3.bf16.msra.mxu1 %v7045_v28  ;;  %v7050_v28 = vld [vmem:[%s7245_s23 + $0x18] sm:$0xff]   ;;  %v2502_v42 = vor.u32 %v2501_v30, %v2498_v29  ;;  %v7069_v29 = vld [vmem:[%s7245_s23 + $0x48] sm:$0xff]  }
  0x73   : > { %6719 = vmatprep.subr.bf16.mxu1 %v7439_v60  ;;  %v2513_v39 = vshrl.u32 %v7050_v28, 16  ;;  %v7059_v30 = vld [vmem:[%s7245_s23 + $0x28] sm:$0xff]  }
  0x74   : > { %6544 = vmatmul.mubr.bf16.gmra.mxu1 %v860_v40  ;;  %6600 = vmatmul.mubr.bf16.gmra.mxu0 %v1448_v41  ;;  %v2516_v40 = vshll.u32 %v7050_v28, 16  ;;  %v911_v41 = vor.u32 %v909_v26, %v907_v34  ;;  %v2511_v55 = vsel %vm2494_vm2, %v2502_v42, %v2510_v43  ;;  %v2558_v26 = vshrl.u32 %v7067_v18, 16 }
  0x75   : > { %6547 = vmatprep.mubr.bf16.mxu1 %v868_v44  ;;  %6603 = vmatprep.mubr.bf16.mxu0 %v1450_v45  ;;  %v921_v44 = vshll.u32 %v7046_v27, 16  ;;  %v2522_v45 = vshrl.u32 %v7056_v33, 16  ;;  %v2515_v51 = vrot.slane %v2513_v39, 1  ;;  %v7068_v27 = vld [vmem:[%s8424_s1 + $0x1a8] sm:$0xff]   ;;  %v2561_v28 = vshll.u32 %v7067_v18, 16 }
  0x76   : > { %v2518_v52 = vrot.slane %v2516_v40, 2  ;;  %v916_v54 = vsel %vm776_vm1, %v911_v41, %v915_v36  ;;  %v2551_v33 = vrot.slane %v2549_v22, 1  ;;  %v2560_v39 = vrot.slane %v2558_v26, 1  ;;  %v7086_v26 = vld [vmem:[%s8424_s1 + $0x150] sm:$0xff]  }
  0x77   : > { %v2524_v57 = vrot.slane %v2522_v45, 1  ;;  %v923_v59 = vrot.slane %v921_v44, 1  ;;  %v2563_v40 = vrot.slane %v2561_v28, 2  ;;  %v2567_v41 = vshrl.u32 %v7069_v29, 16  ;;  %v7075_v44 = vld [vmem:[%s8424_s1 + $0x1a0] sm:$0xff]  }
  0x78   : > { %v2519_v1 = vor.u32 %v2518_v52, %v2515_v51  ;;  %v2570_v42 = vshll.u32 %v7069_v29, 16  ;;  %v7518_v51 = vld [vmem:[%s7245_s23 + $0x40] sm:$0xff]  }
  0x79   : > { %v2528_v6 = vor.u32 %v2527_v58, %v2524_v57  ;;  %v2564_v52 = vor.u32 %v2563_v40, %v2560_v39  ;;  %v2569_v53 = vrot.slane %v2567_v41, 1  ;;  %v7085_v39 = vld [vmem:[%s7245_s23 + $0x78] sm:$0xff]  }
  0x7a   : > { %v2520_v11 = vsel %vm2494_vm2, %v2510_v43, %v2519_v1  ;;  %v1966_v43 = vrot.slane %v7059_v30, 1 }
  0x7b   : > { %v2529_v19 = vsel %vm2494_vm2, %v2519_v1, %v2528_v6 }
  0x7c   : > { %6548 = vmatmul.mubr.bf16.gmra.mxu1 %v876_v63  ;;  %6604 = vmatmul.mubr.bf16.gmra.mxu0 %v1452_v0  ;;  %v2534_v63 = vshll.u32 %v7057_v47, 16  ;;  %v919_v0 = vor.u32 %v917_v37, %v915_v36  ;;  %v7066_v47 = vld [vmem:[%s8424_s1 + $0x168] sm:$0xff]  }
  0x7d   : > { %6551 = vmatprep.mubr.bf16.mxu1 %v884_v3  ;;  %6607 = vmatprep.mubr.bf16.mxu0 %v1454_v4  ;;  %v1960_v3 = vrot.slane %v7052_v48, 1  ;;  %v2540_v4 = vshrl.u32 %v7062_v56, 16  ;;  %v2576_v48 = vshrl.u32 %v7073_v35, 16 }
  0x7e   : > { %v924_v10 = vsel %vm776_vm1, %v919_v0, %v923_v59  ;;  %v2536_v12 = vrot.slane %v2534_v63, 2  ;;  %v7074_v59 = vld [vmem:[%s7245_s23 + $0x58] sm:$0xff]   ;;  %v1970_v0 = vrot.slane %v7065_v46, 1 }
  0x7f   : > { %v1961_v14 = vsel %vm1423_vm0, %v1959_v2, %v1960_v3  ;;  %v2542_v16 = vrot.slane %v2540_v4, 1  ;;  %v2578_v57 = vrot.slane %v2576_v48, 1  ;;  %v7081_v2 = vld [vmem:[%s8424_s1 + $0x198] sm:$0xff]   ;;  %v7071_v4 = vld [vmem:[%s7245_s23 + $0x48] sm:$0xff]  }
  0x80   : > { %v2537_v21 = vor.u32 %v2536_v12, %v2533_v8  ;;  %v7079_v8 = vld [vmem:[%s8424_s1 + $0x158] sm:$0xff]   ;;  %v2597_v12 = vshll.u32 %v7078_v61, 16 }
  0x82   : > { %v2538_v31 = vsel %vm2494_vm2, %v2528_v6, %v2537_v21  ;;  %v2585_v6 = vshrl.u32 %v7074_v59, 16 }
  0x84   : > { %6552 = vmatmul.mubr.bf16.gmra.mxu1 %v892_v20  ;;  %6608 = vmatmul.mubr.bf16.gmra.mxu0 %v1456_v23  ;;  %v1962_v20 = vrot.slane %v7053_v7, 1  ;;  %v2552_v23 = vshll.u32 %v7063_v13, 16  ;;  %v2588_v7 = vshll.u32 %v7074_v59, 16  ;;  %v1974_v13 = vrot.slane %v7071_v4, 1 }
  0x85   : > { %6555 = vmatprep.mubr.bf16.mxu1 %v900_v24  ;;  %6611 = vmatprep.mubr.bf16.mxu0 %v1458_v25  ;;  %v1964_v24 = vrot.slane %v7479_v9, 1  ;;  %v2546_v25 = vor.u32 %v2545_v17, %v2542_v16  ;;  %v7088_v9 = vld [vmem:[%s8424_s1 + $0x190] sm:$0xff]  }
  0x86   : > { %v2554_v34 = vrot.slane %v2552_v23, 2  ;;  %v7084_v16 = vld [vmem:[%s7245_s23 + $0x70] sm:$0xff]  }
  0x87   : > { %v1965_v36 = vsel %vm1423_vm0, %v1962_v20, %v1964_v24  ;;  %v2547_v37 = vsel %vm2494_vm2, %v2537_v21, %v2546_v25  ;;  %v7548_v21 = vld [vmem:[%s7245_s23 + $0x58] sm:$0xff]  }
  0x88   : > { %v2555_v45 = vor.u32 %v2554_v34, %v2551_v33  ;;  %v2615_v34 = vshll.u32 %v7084_v16, 16 }
  0x8a   : > { %v2556_v56 = vsel %vm2494_vm2, %v2546_v25, %v2555_v45  ;;  %v2565_v1 = vsel %vm2494_vm2, %v2555_v45, %v2564_v52  ;;  %v2599_v25 = vrot.slane %v2597_v12, 2 }
  0x8c   : > { %6556 = vmatmul.mubr.bf16.gmra.mxu1 %v908_v49  ;;  %6612 = vmatmul.mubr.bf16.gmra.mxu0 %v1460_v50  ;;  %v2579_v49 = vshll.u32 %v7073_v35, 16  ;;  %v1968_v50 = vrot.slane %v7506_v38, 1  ;;  %v7092_v35 = vld [vmem:[%s8424_s1 + $0x148] sm:$0xff]  }
  0x8d   : > { %6559 = vmatprep.mubr.bf16.mxu1 %v916_v54  ;;  %6683 = vmatprep.mubr.bf16.mxu0 %v2511_v55  ;;  %v7072_v54 = vld [vmem:[%s8424_s1 + $0x160] sm:$0xff]   ;;  %v1967_v55 = vsel %vm1423_vm0, %v1964_v24, %v1966_v43 }
  0x8e   : > { %v2581_v58 = vrot.slane %v2579_v49, 2  ;;  %v1969_v63 = vsel %vm1423_vm0, %v1966_v43, %v1968_v50  ;;  %v1971_v17 = vsel %vm1423_vm0, %v1968_v50, %v1970_v0  ;;  %v7090_v43 = vld [vmem:[%s7245_s23 + $0x80] sm:$0xff]   ;;  %v2621_v50 = vshrl.u32 %v7085_v39, 16 }
  0x8f   : > { %v7099_v49 = vld [vmem:[%s8424_s1 + $0x140] sm:$0xff]  }
  0x90   : > { %v2623_v59 = vrot.slane %v2621_v50, 1  ;;  %v7106_v50 = vld [vmem:[%s7245_s23 + $0x10] sm:$0xff]  }
  0x94   : > { %6560 = vmatmul.mubr.bf16.gmra.mxu1 %v924_v10  ;;  %6684 = vmatmul.mubr.bf16.vlgmr.msra.gmra.mxu0 %v2520_v11  ;;  %v2582_v10 = vor.u32 %v2581_v58, %v2578_v57  ;;  %v2594_v11 = vshrl.u32 %v7078_v61, 16  ;;  %v2633_v57 = vshll.u32 %v7090_v43, 16  ;;  %v7589_v58 = vld [vmem:[%s8424_s1 + $0x1f8] sm:$0xff]  }
  0x95   : > { %6631 = vmatprep.mubr.bf16.mxu1 %v1961_v14  ;;  %6772 = vmatpush3.bf16.msra.mxu0 %v7444_v62  ;;  %v1963_v62 = vsel %vm1423_vm0, %v1960_v3, %v1962_v20  ;;  %v1972_v3 = vrot.slane %v7518_v51, 1  ;;  %v7541_v14 = vld [vmem:[%s7245_s23 + $0x50] sm:$0xff]   ;;  %v2590_v20 = vrot.slane %v2588_v7, 2  ;;  %v2624_v51 = vshll.u32 %v7085_v39, 16 }
  0x96   : > { %6687 = vmatprep.mubr.bf16.mxu0 %v2529_v19  ;;  %6773 = vmatprep.subr.bf16.mxu0 %v7061_v15  ;;  %v2587_v19 = vrot.slane %v2585_v6, 1  ;;  %v2596_v24 = vrot.slane %v2594_v11, 1  ;;  %v1976_v28 = vrot.slane %v7541_v14, 1  ;;  %v7096_v6 = vld [vmem:[%s7245_s23 + $0x90] sm:$0xff]  }
  0x97   : > { %v1973_v22 = vsel %vm1423_vm0, %v1970_v0, %v1972_v3  ;;  %v1975_v40 = vsel %vm1423_vm0, %v1972_v3, %v1974_v13  ;;  %v2626_v61 = vrot.slane %v2624_v51, 2  ;;  %v2651_v14 = vshll.u32 %v7096_v6, 16 }
  0x98   : > { %v2600_v33 = vor.u32 %v2599_v25, %v2596_v24 }
  0x99   : > { %6774 = vmatpush3.bf16.msra.mxu0 %v7061_v15  ;;  %v7080_v15 = vld [vmem:[%s7245_s23 + $0x68] sm:$0xff]   ;;  %v2653_v25 = vrot.slane %v2651_v14, 2  ;;  %v7114_v14 = vld [vmem:[%s8424_s1 + $0x1f0] sm:$0xff]  }
  0x9a   : > { %6775 = vmatprep.subr.bf16.mxu0 %v7068_v27  ;;  %v2603_v29 = vshrl.u32 %v7080_v15, 16  ;;  %v2606_v30 = vshll.u32 %v7080_v15, 16  ;;  %v7097_v15 = vld [vmem:[%s7245_s23 + $0x98] ss:$0 sps:$4 sm:$0x33]  }
  0x9c   : > { %6632 = vmatmul.mubr.bf16.vlgmr.msra.gmra.mxu1 %v1963_v62  ;;  %6688 = vmatmul.mubr.bf16.gmra.mxu0 %v2538_v31  ;;  %v2612_v62 = vshrl.u32 %v7084_v16, 16  ;;  %v2591_v31 = vor.u32 %v2590_v20, %v2587_v19  ;;  %v2605_v38 = vrot.slane %v2603_v29, 1  ;;  %v7089_v16 = vld [vmem:[%s7245_s23 + $0x78] sm:$0xff]   ;;  %v2660_v29 = vshll.u32 %v7097_v15, 16 }
  0x9d   : > { %6720 = vmatpush3.bf16.msra.mxu1 %v7439_v60  ;;  %6635 = vmatprep.mubr.bf16.mxu1 %v1965_v36  ;;  %v2572_v60 = vrot.slane %v2570_v42, 2  ;;  %v1978_v36 = vrot.slane %v7548_v21, 1  ;;  %v2608_v42 = vrot.slane %v2606_v30, 2 }
  0x9e   : > { %6721 = vmatprep.subr.bf16.mxu1 %v7060_v32  ;;  %6691 = vmatprep.mubr.bf16.mxu0 %v2547_v37  ;;  %v7101_v37 = vld [vmem:[%s8424_s1 + $0x180] sm:$0xff]   ;;  %v2592_v41 = vsel %vm2494_vm2, %v2582_v10, %v2591_v31  ;;  %v2601_v45 = vsel %vm2494_vm2, %v2591_v31, %v2600_v33  ;;  %v2614_v46 = vrot.slane %v2612_v62, 1  ;;  %v7094_v31 = vld [vmem:[%s7245_s23 + $0x88] sm:$0xff]  }
  0x9f   : > { %6776 = vmatpush3.bf16.msra.mxu0 %v7068_v27  ;;  %v2573_v5 = vor.u32 %v2572_v60, %v2569_v53  ;;  %v7095_v27 = vld [vmem:[%s8424_s1 + $0x188] sm:$0xff]   ;;  %v2630_v53 = vshrl.u32 %v7090_v43, 16  ;;  %v7582_v60 = vld [vmem:[%s8424_s1 + $0x238] sm:$0xff]  }
  0xa0   : > { %6777 = vmatprep.subr.bf16.mxu0 %v7075_v44 }
  0xa1   : > { %6722 = vmatpush3.bf16.msra.mxu1 %v7060_v32  ;;  %v2574_v18 = vsel %vm2494_vm2, %v2564_v52, %v2573_v5  ;;  %v2583_v23 = vsel %vm2494_vm2, %v2573_v5, %v2582_v10  ;;  %v7560_v32 = vld [vmem:[%s7245_s23 + $0x60] sm:$0xff]   ;;  %v2609_v52 = vor.u32 %v2608_v42, %v2605_v38  ;;  %v2635_v5 = vrot.slane %v2633_v57, 2 }
  0xa2   : > { %6723 = vmatprep.subr.bf16.mxu1 %v7066_v47  ;;  %v1980_v48 = vrot.slane %v7560_v32, 1 }
  0xa3   : > { %6778 = vmatpush3.bf16.msra.mxu0 %v7075_v44  ;;  %v1977_v44 = vsel %vm1423_vm0, %v1974_v13, %v1976_v28  ;;  %v2610_v0 = vsel %vm2494_vm2, %v2600_v33, %v2609_v52  ;;  %v2648_v13 = vshrl.u32 %v7096_v6, 16  ;;  %v7098_v33 = vld [vmem:[%s7245_s23 + $0x90] sm:$0xff]  }
  0xa4   : > { %6636 = vmatmul.mubr.bf16.gmra.mxu1 %v1967_v55  ;;  %6692 = vmatmul.mubr.bf16.gmra.mxu0 %v2556_v56  ;;  %v7087_v56 = vld [vmem:[%s7245_s23 + $0x70] sm:$0xff]   ;;  %v1981_v3 = vsel %vm1423_vm0, %v1978_v36, %v1980_v48  ;;  %v1992_v43 = vrot.slane %v7098_v33, 1 }
  0xa5   : > { %6639 = vmatprep.mubr.bf16.mxu1 %v1969_v63  ;;  %6724 = vmatpush3.bf16.msra.mxu1 %v7066_v47  ;;  %v2617_v47 = vrot.slane %v2615_v34, 2  ;;  %v1979_v63 = vsel %vm1423_vm0, %v1976_v28, %v1978_v36  ;;  %v2650_v24 = vrot.slane %v2648_v13, 1  ;;  %v2662_v36 = vrot.slane %v2660_v29, 2 }
  0xa6   : > { %6695 = vmatprep.mubr.bf16.mxu0 %v2565_v1  ;;  %6725 = vmatprep.subr.bf16.mxu1 %v7072_v54  ;;  %v2632_v1 = vrot.slane %v2630_v53, 1  ;;  %v7105_v53 = vld [vmem:[%s7245_s23 + $0x8] sm:$0xfc]  }
  0xa7   : > { %6779 = vmatprep.subr.bf16.mxu0 %v7081_v2  ;;  %v2618_v55 = vor.u32 %v2617_v47, %v2614_v46  ;;  %v2654_v62 = vor.u32 %v2653_v25, %v2650_v24  ;;  %v7100_v46 = vld [vmem:[%s7245_s23 + $0x98] ss:$0 sps:$4 sm:$0x11]   ;;  %v7104_v47 = vld [vmem:[%s7245_s23 + $0x20] sm:$0xff]   ;;  %v3164_v57 = vrot.slane %v7105_v53, 2  ;;  %v7120_v25 = vld [vmem:[%s8424_s1 + $0x1e8] sm:$0xff]  }
  0xa8   : > { %6780 = vmatpush3.bf16.msra.mxu0 %v7081_v2  ;;  %v7091_v2 = vld [vmem:[%s7245_s23 + $0x88] sm:$0xff]   ;;  %v2636_v12 = vor.u32 %v2635_v5, %v2632_v1  ;;  %v7115_v5 = vld [vmem:[%s8424_s1 + $0x230] sm:$0xff]  }
  0xa9   : > { %6726 = vmatpush3.bf16.msra.mxu1 %v7072_v54  ;;  %6781 = vmatprep.subr.bf16.mxu0 %v7088_v9  ;;  %v7083_v54 = vld [vmem:[%s7245_s23 + $0x68] sm:$0xff]   ;;  %v2619_v4 = vsel %vm2494_vm2, %v2609_v52, %v2618_v55  ;;  %v2639_v10 = vshrl.u32 %v7091_v2, 16  ;;  %v2642_v11 = vshll.u32 %v7091_v2, 16 }
  0xaa   : > { %6727 = vmatprep.subr.bf16.mxu1 %v7079_v8  ;;  %v1982_v7 = vrot.slane %v7083_v54, 1  ;;  %v7110_v54 = vld [vmem:[%s7245_s23 + $0x28] sm:$0xff]  }
  0xab   : > { %v2641_v20 = vrot.slane %v2639_v10, 1  ;;  %v2644_v21 = vrot.slane %v2642_v11, 2  ;;  %v7122_v11 = vld [vmem:[%s8424_s1 + $0x228] sm:$0xff]  }
  0xac   : > { %6640 = vmatmul.mubr.bf16.gmra.mxu1 %v1971_v17  ;;  %6696 = vmatmul.mubr.bf16.gmra.mxu0 %v2574_v18  ;;  %v7093_v17 = vld [vmem:[%s7245_s23 + $0x80] sm:$0xff]   ;;  %v1983_v18 = vsel %vm1423_vm0, %v1980_v48, %v1982_v7 }
  0xad   : > { %6643 = vmatprep.mubr.bf16.mxu1 %v1973_v22  ;;  %6699 = vmatprep.mubr.bf16.mxu0 %v2583_v23  ;;  %v2645_v28 = vor.u32 %v2644_v21, %v2641_v20  ;;  %v1988_v30 = vrot.slane %v7093_v17, 1  ;;  %v7129_v21 = vld [vmem:[%s8424_s1 + $0x220] sm:$0xff]  }
  0xae   : > { %6728 = vmatpush3.bf16.msra.mxu1 %v7079_v8  ;;  %6782 = vmatpush3.bf16.msra.mxu0 %v7088_v9  ;;  %v1984_v8 = vrot.slane %v7087_v56, 1  ;;  %v2627_v9 = vor.u32 %v2626_v61, %v2623_v59  ;;  %v3702_v56 = vrot.slane %v7104_v47, 2  ;;  %v3165_v59 = vrot.slane %v7106_v50, 2  ;;  %v7107_v61 = vld [vmem:[%s7245_s23 + $0x18] sm:$0xff]   ;;  %v7125_v47 = vld [vmem:[%s7245_s23 + $0x48] sm:$0xff]   ;;  %v7128_v50 = vld [vmem:[%s7245_s23 + $0x60] sm:$0xff]  }
  0xaf   : > { %6729 = vmatprep.subr.bf16.mxu1 %v7086_v26  ;;  %6783 = vmatprep.subr.bf16.mxu0 %v7095_v27  ;;  %v2655_v39 = vsel %vm2494_vm2, %v2645_v28, %v2654_v62 }
  0xb0   : > { %v2628_v19 = vsel %vm2494_vm2, %v2618_v55, %v2627_v9  ;;  %v1985_v22 = vsel %vm1423_vm0, %v1982_v7, %v1984_v8  ;;  %v2637_v23 = vsel %vm2494_vm2, %v2627_v9, %v2636_v12  ;;  %v1994_v55 = vrot.slane %v7100_v46, 1  ;;  %v7116_v7 = vld [vmem:[%s7245_s23 + $0x38] sm:$0xff]  }
  0xb1   : > { %v3708_v13 = vrot.slane %v7116_v7, 2  ;;  %v7146_v7 = vld [vmem:[%s8424_s1 + $0x1c8] sm:$0xff]  }
  0xb2   : > { %6730 = vmatpush3.bf16.msra.mxu1 %v7086_v26  ;;  %6784 = vmatpush3.bf16.msra.mxu0 %v7095_v27  ;;  %v2657_v26 = vshrl.u32 %v7097_v15, 16  ;;  %v1986_v27 = vrot.slane %v7089_v16, 1  ;;  %v1995_v1 = vsel %vm1423_vm0, %v1992_v43, %v1994_v55  ;;  %v7130_v55 = vld [vmem:[%s7245_s23 + $0x50] sm:$0xff]  }
  0xb3   : > { %6731 = vmatprep.subr.bf16.mxu1 %v7092_v35  ;;  %6785 = vmatprep.subr.bf16.mxu0 %v7101_v37 }
  0xb4   : > { %6644 = vmatmul.mubr.bf16.gmra.mxu1 %v1975_v40  ;;  %6700 = vmatmul.mubr.bf16.gmra.mxu0 %v2592_v41  ;;  %v2659_v32 = vrot.slane %v2657_v26, 1  ;;  %v1987_v34 = vsel %vm1423_vm0, %v1984_v8, %v1986_v27  ;;  %v1989_v38 = vsel %vm1423_vm0, %v1986_v27, %v1988_v30  ;;  %v7102_v40 = vld [vmem:[%s7245_s23 + $0x10] sm:$0xfc]   ;;  %v1990_v41 = vrot.slane %v7094_v31, 1  ;;  %v7119_v27 = vld [vmem:[%s7245_s23 + $0x38] sm:$0xff]   ;;  %v7126_v31 = vld [vmem:[%s8424_s1 + $0x1e0] sm:$0xff]  }
  0xb5   : > { %6647 = vmatprep.mubr.bf16.mxu1 %v1977_v44  ;;  %6703 = vmatprep.mubr.bf16.mxu0 %v2601_v45  ;;  %v3699_v44 = vrot.slane %v7102_v40, 2  ;;  %v3167_v8 = vrot.slane %v7107_v61, 2  ;;  %v7142_v40 = vld [vmem:[%s8424_s1 + $0x210] sm:$0xff]  }
  0xb6   : > { %6732 = vmatpush3.bf16.msra.mxu1 %v7092_v35  ;;  %6786 = vmatpush3.bf16.msra.mxu0 %v7101_v37  ;;  %v2646_v35 = vsel %vm2494_vm2, %v2636_v12, %v2645_v28  ;;  %v7103_v37 = vld [vmem:[%s7245_s23 + $0x18] sm:$0xff]   ;;  %v2663_v42 = vor.u32 %v2662_v36, %v2659_v32  ;;  %v1991_v48 = vsel %vm1423_vm0, %v1988_v30, %v1990_v41  ;;  %v7113_v12 = vld [vmem:[%s7245_s23 + $0x28] sm:$0xff]   ;;  %v7123_v28 = vld [vmem:[%s7245_s23 + $0x50] sm:$0xff]  }
  0xb7   : > { %6733 = vmatprep.subr.bf16.mxu1 %v7099_v49  ;;  %6875 = vmatprep.subr.bf16.mxu0 %v7582_v60  ;;  %v3700_v45 = vrot.slane %v7103_v37, 2  ;;  %v1993_v51 = vsel %vm1423_vm0, %v1990_v41, %v1992_v43  ;;  %v3168_v15 = vsel %vm3163_vm3, %v3165_v59, %v3167_v8  ;;  %v7661_v30 = vld [vmem:[%s7245_s23 + $0x40] sm:$0xff]   ;;  %v7668_v32 = vld [vmem:[%s7245_s23 + $0x58] sm:$0xff]   ;;  %v3175_v37 = vrot.slane %v7119_v27, 2 }
  0xb8   : > { %v3716_v43 = vrot.slane %v7668_v32, 2 }
  0xb9   : > { %v3701_v52 = vsel %vm3163_vm3, %v3699_v44, %v3700_v45  ;;  %v3703_v2 = vsel %vm3163_vm3, %v3700_v45, %v3702_v56  ;;  %v7133_v44 = vld [vmem:[%s8424_s1 + $0x1d8] sm:$0xff]  }
  0xba   : > { %6734 = vmatpush3.bf16.msra.mxu1 %v7099_v49  ;;  %v2664_v49 = vsel %vm2494_vm2, %v2654_v62, %v2663_v42 }
  0xbb   : > { %6823 = vmatprep.subr.bf16.mxu1 %v7589_v58 }
  0xbc   : > { %6648 = vmatmul.mubr.bf16.gmra.mxu1 %v1979_v63  ;;  %6704 = vmatmul.mubr.bf16.gmra.mxu0 %v2610_v0  ;;  %v3704_v63 = vrot.slane %v7110_v54, 2  ;;  %v7111_v0 = vld [vmem:[%s7245_s23 + $0x30] sm:$0xff]  }
  0xbd   : > { %6651 = vmatprep.mubr.bf16.mxu1 %v1981_v3  ;;  %6707 = vmatprep.mubr.bf16.mxu0 %v2619_v4  ;;  %v7112_v3 = vld [vmem:[%s7245_s23 + $0x20] sm:$0xff]   ;;  %v3166_v4 = vsel %vm3163_vm3, %v3164_v57, %v3165_v59  ;;  %v3706_v9 = vrot.slane %v7111_v0, 2  ;;  %v7140_v57 = vld [vmem:[%s8424_s1 + $0x1d0] sm:$0xff]   ;;  %v7149_v59 = vld [vmem:[%s8424_s1 + $0x208] sm:$0xff]   ;;  %v3179_v0 = vrot.slane %v7125_v47, 2 }
  0xbe   : > { %v3705_v6 = vsel %vm3163_vm3, %v3702_v56, %v3704_v63  ;;  %v3169_v10 = vrot.slane %v7112_v3, 2  ;;  %v7132_v56 = vld [vmem:[%s7245_s23 + $0x68] sm:$0xff]  }
  0xbf   : > { %v3707_v16 = vsel %vm3163_vm3, %v3704_v63, %v3706_v9  ;;  %v3709_v20 = vsel %vm3163_vm3, %v3706_v9, %v3708_v13 }
  0xc0   : > { %v3170_v17 = vsel %vm3163_vm3, %v3167_v8, %v3169_v10  ;;  %v7155_v8 = vld [vmem:[%s8424_s1 + $0x200] sm:$0xff]  }
  0xc4   : > { %6652 = vmatmul.mubr.bf16.gmra.mxu1 %v1983_v18  ;;  %6708 = vmatmul.mubr.bf16.gmra.mxu0 %v2628_v19  ;;  %v7118_v18 = vld [vmem:[%s7245_s23 + $0x30] sm:$0xff]   ;;  %v7121_v19 = vld [vmem:[%s7245_s23 + $0x48] sm:$0xff]  }
  0xc5   : > { %6655 = vmatprep.mubr.bf16.mxu1 %v1985_v22  ;;  %6711 = vmatprep.mubr.bf16.mxu0 %v2637_v23  ;;  %v3171_v22 = vrot.slane %v7113_v12, 2  ;;  %v3173_v24 = vrot.slane %v7118_v18, 2  ;;  %v3712_v26 = vrot.slane %v7121_v19, 2  ;;  %v7136_v12 = vld [vmem:[%s7245_s23 + $0x60] sm:$0xff]  }
  0xc6   : > { %v7153_v19 = vld [vmem:[%s8424_s1 + $0x1c0] sm:$0xff]  }
  0xc7   : > { %v3172_v29 = vsel %vm3163_vm3, %v3169_v10, %v3171_v22  ;;  %v3174_v62 = vsel %vm3163_vm3, %v3171_v22, %v3173_v24 }
  0xcc   : > { %6656 = vmatmul.mubr.bf16.gmra.mxu1 %v1987_v34  ;;  %6712 = vmatmul.mubr.bf16.gmra.mxu0 %v2646_v35  ;;  %v7135_v34 = vld [vmem:[%s8424_s1 + $0x218] sm:$0xff]  }
  0xcd   : > { %6659 = vmatprep.mubr.bf16.mxu1 %v1989_v38  ;;  %6715 = vmatprep.mubr.bf16.mxu0 %v2655_v39  ;;  %v3714_v38 = vrot.slane %v7123_v28, 2  ;;  %v3177_v39 = vrot.slane %v7661_v30, 2 }
  0xcf   : > { %v3178_v53 = vsel %vm3163_vm3, %v3175_v37, %v3177_v39  ;;  %v3717_v54 = vsel %vm3163_vm3, %v3714_v38, %v3716_v43 }
  0xd4   : > { %6660 = vmatmul.mubr.bf16.gmra.mxu1 %v1991_v48  ;;  %6716 = vmatmul.mubr.bf16.gmra.mxu0 %v2664_v49  ;;  %v3176_v48 = vsel %vm3163_vm3, %v3173_v24, %v3175_v37  ;;  %v3715_v49 = vsel %vm3163_vm3, %v3712_v26, %v3714_v38  ;;  %v3185_v24 = vrot.slane %v7136_v12, 2  ;;  %v7141_v38 = vld [vmem:[%s7245_s23 + $0x70] sm:$0xff]  }
  0xd5   : > { %6663 = vmatprep.mubr.bf16.mxu1 %v1993_v51  ;;  %6787 = vmatprep.mubr.bf16.mxu0 %v3701_v52 }
  0xdc   : > { %6664 = vmatmul.mubr.bf16.gmra.mxu1 %v1995_v1  ;;  %6788 = vmatmul.mubr.bf16.vlgmr.msra.gmra.mxu0 %v3703_v2  ;;  %v3718_v1 = vrot.slane %v7128_v50, 2  ;;  %v3189_v50 = vrot.slane %v7141_v38, 2 }
  0xdd   : > { %6735 = vmatprep.mubr.bf16.mxu1 %v3166_v4  ;;  %6876 = vmatpush3.bf16.msra.mxu0 %v7582_v60  ;;  %v7117_v60 = vld [vmem:[%s7245_s23 + $0x40] sm:$0xff]   ;;  %v3181_v4 = vrot.slane %v7130_v55, 2  ;;  %v7145_v55 = vld [vmem:[%s7245_s23 + $0x90] sm:$0xff]  }
  0xde   : > { %6791 = vmatprep.mubr.bf16.mxu0 %v3705_v6  ;;  %6877 = vmatprep.subr.bf16.mxu0 %v7115_v5  ;;  %v3710_v23 = vrot.slane %v7117_v60, 2  ;;  %v7131_v6 = vld [vmem:[%s7245_s23 + $0x58] sm:$0xff]  }
  0xdf   : > { %v3183_v22 = vrot.slane %v7131_v6, 2 }
  0xe0   : > { %v3713_v33 = vsel %vm3163_vm3, %v3710_v23, %v3712_v26 }
  0xe1   : > { %6878 = vmatpush3.bf16.msra.mxu0 %v7115_v5  ;;  %v3720_v5 = vrot.slane %v7132_v56, 2  ;;  %v3184_v30 = vsel %vm3163_vm3, %v3181_v4, %v3183_v22 }
  0xe2   : > { %6879 = vmatprep.subr.bf16.mxu0 %v7122_v11 }
  0xe3   : > { %v3721_v18 = vsel %vm3163_vm3, %v3718_v1, %v3720_v5 }
  0xe4   : > { %6736 = vmatmul.mubr.bf16.vlgmr.msra.gmra.mxu1 %v3168_v15  ;;  %6792 = vmatmul.mubr.bf16.gmra.mxu0 %v3707_v16  ;;  %v7138_v15 = vld [vmem:[%s7245_s23 + $0x78] sm:$0xff]  }
  0xe5   : > { %6824 = vmatpush3.bf16.msra.mxu1 %v7589_v58  ;;  %6739 = vmatprep.mubr.bf16.mxu1 %v3170_v17  ;;  %v3711_v58 = vsel %vm3163_vm3, %v3708_v13, %v3710_v23  ;;  %v3180_v13 = vsel %vm3163_vm3, %v3177_v39, %v3179_v0  ;;  %v3182_v17 = vsel %vm3163_vm3, %v3179_v0, %v3181_v4  ;;  %v7144_v39 = vld [vmem:[%s7245_s23 + $0x88] sm:$0xff]  }
  0xe6   : > { %6825 = vmatprep.subr.bf16.mxu1 %v7114_v14  ;;  %6795 = vmatprep.mubr.bf16.mxu0 %v3709_v20 }
  0xe7   : > { %6880 = vmatpush3.bf16.msra.mxu0 %v7122_v11  ;;  %v7134_v11 = vld [vmem:[%s7245_s23 + $0x70] sm:$0xff]  }
  0xe8   : > { %6881 = vmatprep.subr.bf16.mxu0 %v7129_v21  ;;  %v3722_v23 = vrot.slane %v7134_v11, 2 }
  0xe9   : > { %6826 = vmatpush3.bf16.msra.mxu1 %v7114_v14  ;;  %v3719_v14 = vsel %vm3163_vm3, %v3716_v43, %v3718_v1 }
  0xea   : > { %6827 = vmatprep.subr.bf16.mxu1 %v7120_v25 }
  0xeb   : > { %6882 = vmatpush3.bf16.msra.mxu0 %v7129_v21 }
  0xec   : > { %v7674_v35 = vpop.f32.mrf.mxu1  ;;  %6740 = vmatmul.mubr.bf16.gmra.mxu1 %v3172_v29  ;;  %v7676_v36 = vpop.f32.mrf.mxu0  ;;  %6796 = vmatmul.mubr.bf16.gmra.mxu0 %v3711_v58  ;;  %v7137_v58 = vld [vmem:[%s7245_s23 + $0x68] sm:$0xff]  }
  0xed   : > { %6743 = vmatprep.mubr.bf16.mxu1 %v3174_v62  ;;  %6828 = vmatpush3.bf16.msra.mxu1 %v7120_v25  ;;  %v3724_v25 = vrot.slane %v7138_v15, 2  ;;  %v3723_v62 = vsel %vm3163_vm3, %v3720_v5, %v3722_v23 }
  0xee   : > { %v7682_v41 = vpop.f32.mrf.mxu1  ;;  %v7684_v42 = vpop.f32.mrf.mxu0  ;;  %6799 = vmatprep.mubr.bf16.mxu0 %v3713_v33  ;;  %6829 = vmatprep.subr.bf16.mxu1 %v7126_v31 }
  0xef   : > { %6883 = vmatprep.subr.bf16.mxu0 %v7135_v34  ;;  %v3725_v37 = vsel %vm3163_vm3, %v3722_v23, %v3724_v25 }
  0xf0   : > { %v7690_v45 = vpop.f32.mrf.mxu1  ;;  %v7692_v46 = vpop.f32.mrf.mxu0  ;;  %6884 = vmatpush3.bf16.msra.mxu0 %v7135_v34  ;;  %v3186_v34 = vsel %vm3163_vm3, %v3183_v22, %v3185_v24  ;;  %v7151_v22 = vld [vmem:[%s7245_s23 + $0xa0] ss:$0 sps:$4 sm:$0x33]  }
  0xf1   : > { %6830 = vmatpush3.bf16.msra.mxu1 %v7126_v31  ;;  %6885 = vmatprep.subr.bf16.mxu0 %v7142_v40  ;;  %v7139_v31 = vld [vmem:[%s7245_s23 + $0x80] sm:$0xff]  }
  0xf2   : > { %v7698_v51 = vpop.f32.mrf.mxu1  ;;  %v7700_v52 = vpop.f32.mrf.mxu0  ;;  %6831 = vmatprep.subr.bf16.mxu1 %v7133_v44  ;;  %v3726_v47 = vrot.slane %v7139_v31, 2  ;;  %v7156_v31 = vld [vmem:[%s7245_s23 + $0x10] sm:$0xf8]  }
  0xf4   : > { %v7712_v61 = vpop.f32.mrf.mxu1  ;;  %6744 = vmatmul.mubr.bf16.gmra.mxu1 %v3176_v48  ;;  %v7714_v63 = vpop.f32.mrf.mxu0  ;;  %6800 = vmatmul.mubr.bf16.gmra.mxu0 %v3715_v49  ;;  %v3727_v0 = vsel %vm3163_vm3, %v3724_v25, %v3726_v47  ;;  %v7148_v25 = vld [vmem:[%s7245_s23 + $0x88] sm:$0xff]  }
  0xf5   : > { %6747 = vmatprep.mubr.bf16.mxu1 %v3178_v53  ;;  %6803 = vmatprep.mubr.bf16.mxu0 %v3717_v54  ;;  %v3728_v53 = vrot.slane %v7144_v39, 2  ;;  %v7143_v54 = vld [vmem:[%s7245_s23 + $0x78] sm:$0xff]  }
  0xf6   : > { %v7716_v2 = vpop.f32.mrf.mxu1  ;;  %v7718_v3 = vpop.f32.mrf.mxu0  ;;  %6832 = vmatpush3.bf16.msra.mxu1 %v7133_v44  ;;  %6886 = vmatpush3.bf16.msra.mxu0 %v7142_v40  ;;  %v3187_v44 = vrot.slane %v7137_v58, 2 }
  0xf7   : > { %6833 = vmatprep.subr.bf16.mxu1 %v7140_v57  ;;  %6887 = vmatprep.subr.bf16.mxu0 %v7149_v59  ;;  %v3729_v6 = vsel %vm3163_vm3, %v3726_v47, %v3728_v53  ;;  %v7159_v47 = vld [vmem:[%s7245_s23 + $0x10] sm:$0xfc]  }
  0xf8   : > { %v7727_v9 = vpop.f32.mrf.mxu1  ;;  %v7729_v10 = vpop.f32.mrf.mxu0  ;;  %v3190_v5 = vsel %vm3163_vm3, %v3187_v44, %v3189_v50 }
  0xfa   : > { %v7736_v16 = vpop.f32.mrf.mxu1  ;;  %v7738_v60 = vpop.f32.mrf.mxu0  ;;  %6834 = vmatpush3.bf16.msra.mxu1 %v7140_v57  ;;  %6888 = vmatpush3.bf16.msra.mxu0 %v7149_v59  ;;  %v3188_v59 = vsel %vm3163_vm3, %v3185_v24, %v3187_v44 }
  0xfb   : > { %6835 = vmatprep.subr.bf16.mxu1 %v7146_v7  ;;  %6889 = vmatprep.subr.bf16.mxu0 %v7155_v8 }
  0xfc   : > { %v7745_v20 = vpop.f32.mrf.mxu1  ;;  %6748 = vmatmul.mubr.bf16.gmra.mxu1 %v3180_v13  ;;  %v7747_v21 = vpop.f32.mrf.mxu0  ;;  %6804 = vmatmul.mubr.bf16.gmra.mxu0 %v3719_v14  ;;  %v3191_v13 = vrot.slane %v7143_v54, 2  ;;  %v3730_v14 = vrot.slane %v7145_v55, 2  ;;  %v7160_v54 = vld [vmem:[%s7245_s23 + $0x18] sm:$0xff]  }
  0xfd   : > { %6751 = vmatprep.mubr.bf16.mxu1 %v3182_v17  ;;  %6807 = vmatprep.mubr.bf16.mxu0 %v3721_v18 }
  0xfe   : > { %v7749_v26 = vpop.f32.mrf.mxu1  ;;  %v7751_v27 = vpop.f32.mrf.mxu0  ;;  %6836 = vmatpush3.bf16.msra.mxu1 %v7146_v7  ;;  %6890 = vmatpush3.bf16.msra.mxu0 %v7155_v8  ;;  %v7147_v7 = vld [vmem:[%s7245_s23 + $0x80] sm:$0xff]   ;;  %v7150_v8 = vld [vmem:[%s7245_s23 + $0x98] sm:$0xff]   ;;  %v3192_v58 = vsel %vm3163_vm3, %v3189_v50, %v3191_v13  ;;  %v3195_v50 = vrot.slane %v7148_v25, 2  ;;  %v4244_v25 = vshrl.u32 %v7160_v54, 16 }
  0xff   : > { %6837 = vmatprep.subr.bf16.mxu1 %v7153_v19  ;;  %v3193_v18 = vrot.slane %v7147_v7, 2 }
 0x100   : > { %v7753_v28 = vpop.f32.mrf.mxu1  ;;  %v7755_v29 = vpop.f32.mrf.mxu0 }
 0x101   : > { %v3194_v39 = vsel %vm3163_vm3, %v3191_v13, %v3193_v18 }
 0x102   : > { %v7761_v32 = vpop.f32.mrf.mxu1  ;;  %v7763_v33 = vpop.f32.mrf.mxu0  ;;  %6838 = vmatpush3.bf16.msra.mxu1 %v7153_v19  ;;  %v3732_v19 = vrot.slane %v7150_v8, 2 }
 0x104   : > { %v7769_v40 = vpop.f32.mrf.mxu1  ;;  %6752 = vmatmul.mubr.bf16.gmra.mxu1 %v3184_v30  ;;  %v7771_v43 = vpop.f32.mrf.mxu0  ;;  %6808 = vmatmul.mubr.bf16.gmra.mxu0 %v3723_v62  ;;  %v3731_v30 = vsel %vm3163_vm3, %v3728_v53, %v3730_v14  ;;  %v7804_v62 = vld [vmem:[%s7245_s23 + $0x90] sm:$0xff]   ;;  %v3733_v44 = vsel %vm3163_vm3, %v3730_v14, %v3732_v19  ;;  %v3734_v53 = vrot.slane %v7151_v22, 2  ;;  %v4236_v14 = vshrl.u32 %v7159_v47, 16 }
 0x105   : > { %6755 = vmatprep.mubr.bf16.mxu1 %v3186_v34  ;;  %6811 = vmatprep.mubr.bf16.mxu0 %v3725_v37  ;;  %v7808_v34 = vld [vmem:[%s7245_s23 + $0x18] sm:$0xff]   ;;  %v4247_v22 = vshll.u32 %v7160_v54, 16 }
 0x106   : > { %v7773_v48 = vpop.f32.mrf.mxu1  ;;  %v7775_v49 = vpop.f32.mrf.mxu0  ;;  %v4905_v7 = vrot.slane %v7808_v34, 3  ;;  %v7158_v34 = vld [vmem:[%s7245_s23 + $0x20] sm:$0xff]  }
 0x108   : > { %v7779_v56 = vpop.f32.mrf.mxu1  ;;  %v7781_v57 = vpop.f32.mrf.mxu0 }
 0x109   : > { %8427 = vst [vmem:[#allocation3_spill] sm:$0xff] %v7779_v56 }
 0x10a   : > { %v7785_v1 = vpop.f32.mrf.mxu1  ;;  %v7787_v4 = vpop.f32.mrf.mxu0 }
 0x10b   : > { %8428 = vst [vmem:[#allocation4_spill] sm:$0xff] %v7785_v1 }
 0x10c   : > { %v7793_v11 = vpop.f32.mrf.mxu1  ;;  %6756 = vmatmul.mubr.bf16.gmra.mxu1 %v3188_v59  ;;  %v6581_v12 = vpop.f32.mrf.mxu0  ;;  %6812 = vmatmul.mubr.bf16.gmra.mxu0 %v3727_v0 }
 0x10d   : > { %8429 = vst [vmem:[#allocation5_spill] sm:$0xff] %v7793_v11  ;;  %6759 = vmatprep.mubr.bf16.mxu1 %v3190_v5  ;;  %6815 = vmatprep.mubr.bf16.mxu0 %v3729_v6  ;;  %v3197_v5 = vrot.slane %v7804_v62, 2  ;;  %v4904_v6 = vrot.slane %v7156_v31, 3  ;;  %v3735_v31 = vsel %vm3163_vm3, %v3732_v19, %v3734_v53  ;;  %v4249_v11 = vrot.slane %v4247_v22, 3  ;;  %v7164_v19 = vld [vmem:[%s7245_s23 + $0x28] sm:$0xff]  }
 0x10e   : > { %v7795_v15 = vpop.f32.mrf.mxu1  ;;  %v1561_v17 = vpop.f32.mrf.mxu0 }
 0x10f   : > { %8430 = vst [vmem:[#allocation6_spill] sm:$0xff] %v7795_v15  ;;  %v4906_v54 = vsel %vm4903_vm4, %v4904_v6, %v4905_v7  ;;  %v7831_v15 = vld [vmem:[%s7245_s23 + $0x28] sm:$0xff]  }
 0x110   : > { %v7798_v23 = vpop.f32.mrf.mxu1  ;;  %v6582_v24 = vpop.f32.mrf.mxu0 }
 0x111   : > { %8431 = vst [vmem:[#allocation7_spill] sm:$0xff] %v7798_v23 }
 0x112   : > { %v7810_v37 = vpop.f32.mrf.mxu1  ;;  %v1564_v38 = vpop.f32.mrf.mxu0 }
 0x113   : > { %8432 = vst [vmem:[#allocation8_spill] sm:$0xff] %v7810_v37  ;;  %v7161_v37 = vld [vmem:[%s7245_s23 + $0x20] sm:$0xff]  }
 0x114   : > { %v6529_v55 = vpop.f32.mrf.mxu1  ;;  %6760 = vmatmul.mubr.bf16.gmra.mxu1 %v3192_v58  ;;  %v6585_v59 = vpop.f32.mrf.mxu0  ;;  %6816 = vmatmul.mubr.bf16.gmra.mxu0 %v3731_v30  ;;  %v4239_v58 = vshll.u32 %v7159_v47, 16  ;;  %v3198_v47 = vsel %vm3163_vm3, %v3195_v50, %v3197_v5  ;;  %v4253_v56 = vshrl.u32 %v7161_v37, 16 }
 0x115   : > { %v1170_v0 = vadd.f32 %v6529_v55, %v7676_v36  ;;  %6763 = vmatprep.mubr.bf16.mxu1 %v3194_v39  ;;  %6819 = vmatprep.mubr.bf16.mxu0 %v3733_v44  ;;  %v3196_v44 = vsel %vm3163_vm3, %v3193_v18, %v3195_v50  ;;  %v7154_v55 = vld [vmem:[%s7245_s23 + $0x98] ss:$0 sps:$4 sm:$0x33]   ;;  %v4238_v18 = vrot.slane %v4236_v14, 2  ;;  %v4256_v14 = vshll.u32 %v7161_v37, 16 }
 0x116   : > { %v1025_v8 = vpop.f32.mrf.mxu1  ;;  %v1577_v13 = vpop.f32.mrf.mxu0  ;;  %v3199_v6 = vrot.slane %v7154_v55, 2 }
 0x117   : > { %v1168_v30 = vadd.f32 %v1025_v8, %v7684_v42  ;;  %v7820_v36 = vadd.f32 %v6581_v12, %v1170_v0  ;;  %v4241_v8 = vrot.slane %v4239_v58, 3  ;;  %v4909_v58 = vrot.slane %v7831_v15, 3 }
 0x118   : > { %v6530_v39 = vpop.f32.mrf.mxu1  ;;  %v6586_v62 = vpop.f32.mrf.mxu0  ;;  %v3200_v37 = vsel %vm3163_vm3, %v3197_v5, %v3199_v6 }
 0x119   : > { %8433 = vst [vmem:[#allocation9_spill] sm:$0xff] %v7820_v36  ;;  %v1171_v23 = vadd.f32 %v6530_v39, %v7692_v46  ;;  %v7833_v42 = vadd.f32 %v1561_v17, %v1168_v30  ;;  %v4246_v36 = vrot.slane %v4244_v25, 2  ;;  %v4907_v39 = vrot.slane %v7158_v34, 3  ;;  %v7165_v34 = vld [vmem:[%s7245_s23 + $0x30] sm:$0xff]  }
 0x11a   : > { %v1028_v12 = vpop.f32.mrf.mxu1  ;;  %v1580_v0 = vpop.f32.mrf.mxu0  ;;  %v4262_v30 = vshrl.u32 %v7164_v19, 16 }
 0x11b   : > { %v1169_v53 = vadd.f32 %v1028_v12, %v7700_v52  ;;  %v7837_v1 = vadd.f32 %v6582_v24, %v1171_v23  ;;  %v4242_v24 = vor.u32 %v4241_v8, %v4238_v18  ;;  %v4250_v22 = vor.u32 %v4249_v11, %v4246_v36  ;;  %v7163_v36 = vld [vmem:[%s7245_s23 + $0x30] sm:$0xff]  }
 0x11c   : > { %v6533_v46 = vpop.f32.mrf.mxu1  ;;  %6764 = vmatmul.mubr.bf16.gmra.mxu1 %v3196_v44  ;;  %v6589_v50 = vpop.f32.mrf.mxu0  ;;  %6820 = vmatmul.mubr.bf16.gmra.mxu0 %v3735_v31  ;;  %v4265_v44 = vshll.u32 %v7164_v19, 16  ;;  %v4258_v11 = vrot.slane %v4256_v14, 3  ;;  %v4910_v8 = vsel %vm4903_vm4, %v4907_v39, %v4909_v58  ;;  %v4264_v19 = vrot.slane %v4262_v30, 2 }
 0x11d   : > { %v1174_v17 = vadd.f32 %v6533_v46, %v7714_v63  ;;  %6767 = vmatprep.mubr.bf16.mxu1 %v3198_v47  ;;  %6891 = vmatprep.mubr.bf16.mxu0 %v4906_v54  ;;  %v7841_v25 = vadd.f32 %v1564_v38, %v1169_v53  ;;  %v4908_v38 = vsel %vm4903_vm4, %v4905_v7, %v4907_v39  ;;  %v4255_v54 = vrot.slane %v4253_v56, 2  ;;  %v7856_v53 = vld [vmem:[%s7245_s23 + $0x38] sm:$0xff]  }
 0x11e   : > { %v1041_v52 = vpop.f32.mrf.mxu1  ;;  %v1593_v23 = vpop.f32.mrf.mxu0  ;;  %v4267_v5 = vrot.slane %v4265_v44, 3  ;;  %v7168_v46 = vld [vmem:[%s7245_s23 + $0x38] sm:$0xff]   ;;  %v4911_v39 = vrot.slane %v7163_v36, 3  ;;  %v4913_v44 = vrot.slane %v7856_v53, 3 }
 0x11f   : > { %v1172_v31 = vadd.f32 %v1041_v52, %v7718_v3  ;;  %v7844_v55 = vadd.f32 %v6585_v59, %v1174_v17  ;;  %v4251_v59 = vsel %vm4234_vm5, %v4242_v24, %v4250_v22  ;;  %v4274_v17 = vshll.u32 %v7165_v34, 16 }
 0x120   : > { %v6534_v63 = vpop.f32.mrf.mxu1  ;;  %v6590_v15 = vpop.f32.mrf.mxu0  ;;  %v4259_v52 = vor.u32 %v4258_v11, %v4255_v54 }
 0x121   : > { %v1175_v47 = vadd.f32 %v6534_v63, %v7729_v10  ;;  %v7851_v12 = vadd.f32 %v1577_v13, %v1172_v31  ;;  %v4271_v13 = vshrl.u32 %v7165_v34, 16  ;;  %v4280_v31 = vshrl.u32 %v7168_v46, 16 }
 0x122   : > { %v1044_v3 = vpop.f32.mrf.mxu1  ;;  %v1596_v18 = vpop.f32.mrf.mxu0  ;;  %v4283_v63 = vshll.u32 %v7168_v46, 16  ;;  %v4276_v54 = vrot.slane %v4274_v17, 3  ;;  %v4260_v36 = vsel %vm4234_vm5, %v4250_v22, %v4259_v52 }
 0x123   : > { %v1173_v7 = vadd.f32 %v1044_v3, %v7738_v60  ;;  %v7860_v6 = vadd.f32 %v6586_v62, %v1175_v47  ;;  %v4268_v62 = vor.u32 %v4267_v5, %v4264_v19  ;;  %v4273_v47 = vrot.slane %v4271_v13, 2 }
 0x124   : > { %v6537_v10 = vpop.f32.mrf.mxu1  ;;  %6768 = vmatmul.mubr.bf16.gmra.mxu1 %v3200_v37  ;;  %v6593_v56 = vpop.f32.mrf.mxu0  ;;  %6892 = vmatmul.mubr.bf16.vlgmr.msra.gmra.mxu0 %v4908_v38  ;;  %v4912_v3 = vsel %vm4903_vm4, %v4909_v58, %v4911_v39  ;;  %v4914_v5 = vsel %vm4903_vm4, %v4911_v39, %v4913_v44  ;;  %v4282_v53 = vrot.slane %v4280_v31, 2  ;;  %v4285_v46 = vrot.slane %v4283_v63, 3 }
 0x125   : > { %v1178_v14 = vadd.f32 %v6537_v10, %v7747_v21  ;;  %6839 = vmatprep.mubr.bf16.mxu1 %v4251_v59  ;;  %6895 = vmatprep.mubr.bf16.mxu0 %v4910_v8  ;;  %v7863_v24 = vadd.f32 %v1580_v0, %v1173_v7  ;;  %v7167_v0 = vld [vmem:[%s7245_s23 + $0x40] sm:$0xff]   ;;  %v7879_v7 = vld [vmem:[%s7245_s23 + $0x48] sm:$0xff]  }
 0x126   : > { %v1057_v30 = vpop.f32.mrf.mxu1  ;;  %v1609_v60 = vpop.f32.mrf.mxu0  ;;  %v7169_v59 = vld [vmem:[%s7245_s23 + $0x40] sm:$0xff]   ;;  %v7172_v10 = vld [vmem:[%s7245_s23 + $0x48] sm:$0xff]   ;;  %v4915_v17 = vrot.slane %v7167_v0, 3  ;;  %v4917_v63 = vrot.slane %v7879_v7, 3 }
 0x127   : > { %v1176_v37 = vadd.f32 %v1057_v30, %v7751_v27  ;;  %v7867_v38 = vadd.f32 %v6589_v50, %v1178_v14  ;;  %v4269_v50 = vsel %vm4234_vm5, %v4259_v52, %v4268_v62  ;;  %v4289_v52 = vshrl.u32 %v7169_v59, 16 }
 0x128   : > { %v6538_v21 = vpop.f32.mrf.mxu1  ;;  %v6594_v34 = vpop.f32.mrf.mxu0  ;;  %v4292_v39 = vshll.u32 %v7169_v59, 16 }
 0x129   : > { %v1179_v11 = vadd.f32 %v6538_v21, %v7755_v29  ;;  %v7874_v8 = vadd.f32 %v1593_v23, %v1176_v37  ;;  %v4277_v23 = vor.u32 %v4276_v54, %v4273_v47  ;;  %v4298_v37 = vshrl.u32 %v7172_v10, 16 }
 0x12a   : > { %v1060_v19 = vpop.f32.mrf.mxu1  ;;  %v1612_v27 = vpop.f32.mrf.mxu0  ;;  %v4301_v21 = vshll.u32 %v7172_v10, 16  ;;  %v4291_v59 = vrot.slane %v4289_v52, 2  ;;  %v7902_v10 = vld [vmem:[%s7245_s23 + $0x58] sm:$0xff]  }
 0x12b   : > { %v1177_v29 = vadd.f32 %v1060_v19, %v7763_v33  ;;  %v7883_v13 = vadd.f32 %v6590_v15, %v1179_v11  ;;  %v4286_v15 = vor.u32 %v4285_v46, %v4282_v53  ;;  %v4278_v0 = vsel %vm4234_vm5, %v4268_v62, %v4277_v23 }
 0x12c   : > { %v6541_v22 = vpop.f32.mrf.mxu1  ;;  %6840 = vmatmul.mubr.bf16.vlgmr.msra.gmra.mxu1 %v4260_v36  ;;  %v6597_v58 = vpop.f32.mrf.mxu0  ;;  %6896 = vmatmul.mubr.bf16.gmra.mxu0 %v4912_v3  ;;  %v7173_v36 = vld [vmem:[%s7245_s23 + $0x50] sm:$0xff]   ;;  %v4294_v19 = vrot.slane %v4292_v39, 3  ;;  %v4918_v46 = vsel %vm4903_vm4, %v4915_v17, %v4917_v63  ;;  %v4300_v7 = vrot.slane %v4298_v37, 2  ;;  %v4303_v62 = vrot.slane %v4301_v21, 3 }
 0x12d   : > { %v1182_v14 = vadd.f32 %v6541_v22, %v7771_v43  ;;  %6843 = vmatprep.mubr.bf16.mxu1 %v4269_v50  ;;  %6899 = vmatprep.mubr.bf16.mxu0 %v4914_v5  ;;  %v7886_v30 = vadd.f32 %v1596_v18, %v1177_v29  ;;  %v4916_v18 = vsel %vm4903_vm4, %v4913_v44, %v4915_v17  ;;  %v7171_v50 = vld [vmem:[%s7245_s23 + $0x50] sm:$0xff]   ;;  %v7176_v29 = vld [vmem:[%s7245_s23 + $0x58] sm:$0xff]   ;;  %v4310_v52 = vshll.u32 %v7173_v36, 16 }
 0x12e   : > { %v1073_v31 = vpop.f32.mrf.mxu1  ;;  %v1625_v33 = vpop.f32.mrf.mxu0  ;;  %v4919_v17 = vrot.slane %v7171_v50, 3  ;;  %v4921_v21 = vrot.slane %v7902_v10, 3 }
 0x12f   : > { %v1180_v47 = vadd.f32 %v1073_v31, %v7775_v49  ;;  %v7890_v54 = vadd.f32 %v6593_v56, %v1182_v14  ;;  %v4287_v56 = vsel %vm4234_vm5, %v4277_v23, %v4286_v15  ;;  %v4295_v23 = vor.u32 %v4294_v19, %v4291_v59 }
 0x130   : > { %v6542_v43 = vpop.f32.mrf.mxu1  ;;  %v6598_v11 = vpop.f32.mrf.mxu0  ;;  %v4312_v59 = vrot.slane %v4310_v52, 3 }
 0x131   : > { %v1183_v3 = vadd.f32 %v6542_v43, %v7781_v57  ;;  %v7897_v5 = vadd.f32 %v1609_v60, %v1180_v47  ;;  %v4307_v60 = vshrl.u32 %v7173_v36, 16  ;;  %v4316_v47 = vshrl.u32 %v7176_v29, 16 }
 0x132   : > { %v1076_v53 = vpop.f32.mrf.mxu1  ;;  %v1628_v49 = vpop.f32.mrf.mxu0  ;;  %v4319_v43 = vshll.u32 %v7176_v29, 16  ;;  %v4296_v50 = vsel %vm4234_vm5, %v4286_v15, %v4295_v23 }
 0x133   : > { %v1181_v44 = vadd.f32 %v1076_v53, %v7787_v4  ;;  %v7906_v22 = vadd.f32 %v6594_v34, %v1183_v3  ;;  %v4304_v34 = vor.u32 %v4303_v62, %v4300_v7  ;;  %v4309_v3 = vrot.slane %v4307_v60, 2 }
 0x134   : > { %v6545_v57 = vpop.f32.mrf.mxu1  ;;  %6844 = vmatmul.mubr.bf16.gmra.mxu1 %v4278_v0  ;;  %v6601_v14 = vpop.f32.mrf.mxu0  ;;  %6900 = vmatmul.mubr.bf16.gmra.mxu0 %v4916_v18  ;;  %v4920_v53 = vsel %vm4903_vm4, %v4917_v63, %v4919_v17  ;;  %v4922_v62 = vsel %vm4903_vm4, %v4919_v17, %v4921_v21  ;;  %v4318_v10 = vrot.slane %v4316_v47, 2  ;;  %v4321_v29 = vrot.slane %v4319_v43, 3 }
 0x135   : > { %v1186_v39 = vadd.f32 %v6545_v57, %v7674_v35  ;;  %6847 = vmatprep.mubr.bf16.mxu1 %v4287_v56  ;;  %6903 = vmatprep.mubr.bf16.mxu0 %v4918_v46  ;;  %v7909_v31 = vadd.f32 %v1612_v27, %v1181_v44  ;;  %v7175_v27 = vld [vmem:[%s7245_s23 + $0x60] sm:$0xff]   ;;  %v7925_v44 = vld [vmem:[%s7245_s23 + $0x68] sm:$0xff]  }
 0x136   : > { %v1089_v37 = vpop.f32.mrf.mxu1  ;;  %v1641_v4 = vpop.f32.mrf.mxu0  ;;  %v7177_v56 = vld [vmem:[%s7245_s23 + $0x60] sm:$0xff]   ;;  %v7180_v57 = vld [vmem:[%s7245_s23 + $0x68] sm:$0xff]   ;;  %v4923_v52 = vrot.slane %v7175_v27, 3  ;;  %v4925_v43 = vrot.slane %v7925_v44, 3 }
 0x137   : > { %v1184_v0 = vadd.f32 %v1089_v37, %v7682_v41  ;;  %v7913_v18 = vadd.f32 %v6597_v58, %v1186_v39  ;;  %v4305_v58 = vsel %vm4234_vm5, %v4295_v23, %v4304_v34  ;;  %v4325_v23 = vshrl.u32 %v7177_v56, 16 }
 0x138   : > { %v6546_v35 = vpop.f32.mrf.mxu1  ;;  %v6602_v36 = vpop.f32.mrf.mxu0  ;;  %v4328_v17 = vshll.u32 %v7177_v56, 16 }
 0x139   : > { %v1187_v19 = vadd.f32 %v6546_v35, %v7690_v45  ;;  %v7920_v46 = vadd.f32 %v1625_v33, %v1184_v0  ;;  %v4313_v33 = vor.u32 %v4312_v59, %v4309_v3  ;;  %v4334_v0 = vshrl.u32 %v7180_v57, 16 }
 0x13a   : > { %v1092_v7 = vpop.f32.mrf.mxu1  ;;  %v1644_v41 = vpop.f32.mrf.mxu0  ;;  %v4337_v35 = vshll.u32 %v7180_v57, 16  ;;  %v4327_v56 = vrot.slane %v4325_v23, 2  ;;  %v7948_v57 = vld [vmem:[%s7245_s23 + $0x78] sm:$0xff]  }
 0x13b   : > { %v1185_v45 = vadd.f32 %v1092_v7, %v7698_v51  ;;  %v7929_v60 = vadd.f32 %v6598_v11, %v1187_v19  ;;  %v4322_v11 = vor.u32 %v4321_v29, %v4318_v10  ;;  %v4314_v27 = vsel %vm4234_vm5, %v4304_v34, %v4313_v33 }
 0x13c   : > { %v6549_v15 = vpop.f32.mrf.mxu1  ;;  %6848 = vmatmul.mubr.bf16.gmra.mxu1 %v4296_v50  ;;  %v6605_v63 = vpop.f32.mrf.mxu0  ;;  %6904 = vmatmul.mubr.bf16.gmra.mxu0 %v4920_v53  ;;  %v7181_v50 = vld [vmem:[%s7245_s23 + $0x70] sm:$0xff]   ;;  %v4330_v7 = vrot.slane %v4328_v17, 3  ;;  %v4926_v29 = vsel %vm4903_vm4, %v4923_v52, %v4925_v43  ;;  %v4336_v44 = vrot.slane %v4334_v0, 2  ;;  %v4339_v34 = vrot.slane %v4337_v35, 3 }
 0x13d   : > { %v1190_v39 = vadd.f32 %v6549_v15, %v7712_v61  ;;  %6851 = vmatprep.mubr.bf16.mxu1 %v4305_v58  ;;  %6907 = vmatprep.mubr.bf16.mxu0 %v4922_v62  ;;  %v7932_v37 = vadd.f32 %v1628_v49, %v1185_v45  ;;  %v4924_v49 = vsel %vm4903_vm4, %v4921_v21, %v4923_v52  ;;  %v7179_v58 = vld [vmem:[%s7245_s23 + $0x70] sm:$0xff]   ;;  %v7184_v45 = vld [vmem:[%s7245_s23 + $0x78] sm:$0xff]   ;;  %v4346_v23 = vshll.u32 %v7181_v50, 16 }
 0x13e   : > { %v1105_v47 = vpop.f32.mrf.mxu1  ;;  %v1657_v51 = vpop.f32.mrf.mxu0  ;;  %v4927_v52 = vrot.slane %v7179_v58, 3  ;;  %v4929_v35 = vrot.slane %v7948_v57, 3 }
 0x13f   : > { %v1188_v3 = vadd.f32 %v1105_v47, %v7716_v2  ;;  %v7936_v59 = vadd.f32 %v6601_v14, %v1190_v39  ;;  %v4323_v14 = vsel %vm4234_vm5, %v4313_v33, %v4322_v11  ;;  %v4331_v33 = vor.u32 %v4330_v7, %v4327_v56 }
 0x140   : > { %v6550_v61 = vpop.f32.mrf.mxu1  ;;  %v6606_v19 = vpop.f32.mrf.mxu0  ;;  %v4348_v56 = vrot.slane %v4346_v23, 3 }
 0x141   : > { %v1191_v53 = vadd.f32 %v6550_v61, %v7727_v9  ;;  %v7943_v62 = vadd.f32 %v1641_v4, %v1188_v3  ;;  %v4343_v4 = vshrl.u32 %v7181_v50, 16  ;;  %v4352_v3 = vshrl.u32 %v7184_v45, 16 }
 0x142   : > { %v1108_v10 = vpop.f32.mrf.mxu1  ;;  %v1660_v2 = vpop.f32.mrf.mxu0  ;;  %v4355_v61 = vshll.u32 %v7184_v45, 16  ;;  %v4332_v58 = vsel %vm4234_vm5, %v4322_v11, %v4331_v33 }
 0x143   : > { %v1189_v21 = vadd.f32 %v1108_v10, %v7736_v16  ;;  %v7952_v15 = vadd.f32 %v6602_v36, %v1191_v53  ;;  %v4340_v36 = vor.u32 %v4339_v34, %v4336_v44  ;;  %v4345_v53 = vrot.slane %v4343_v4, 2 }
 0x144   : > { %v6553_v9 = vpop.f32.mrf.mxu1  ;;  %6852 = vmatmul.mubr.bf16.gmra.mxu1 %v4314_v27  ;;  %v6609_v39 = vpop.f32.mrf.mxu0  ;;  %6908 = vmatmul.mubr.bf16.gmra.mxu0 %v4924_v49  ;;  %v4928_v10 = vsel %vm4903_vm4, %v4925_v43, %v4927_v52  ;;  %v4930_v34 = vsel %vm4903_vm4, %v4927_v52, %v4929_v35  ;;  %v4354_v57 = vrot.slane %v4352_v3, 2  ;;  %v4357_v45 = vrot.slane %v4355_v61, 3 }
 0x145   : > { %v1194_v17 = vadd.f32 %v6553_v9, %v7745_v20  ;;  %6855 = vmatprep.mubr.bf16.mxu1 %v4323_v14  ;;  %6911 = vmatprep.mubr.bf16.mxu0 %v4926_v29  ;;  %v7955_v47 = vadd.f32 %v1644_v41, %v1189_v21  ;;  %v7183_v41 = vld [vmem:[%s7245_s23 + $0x80] sm:$0xff]   ;;  %v7971_v21 = vld [vmem:[%s7245_s23 + $0x88] sm:$0xff]  }
 0x146   : > { %v1121_v0 = vpop.f32.mrf.mxu1  ;;  %v1673_v16 = vpop.f32.mrf.mxu0  ;;  %v7185_v14 = vld [vmem:[%s7245_s23 + $0x80] sm:$0xff]   ;;  %v7188_v9 = vld [vmem:[%s7245_s23 + $0x88] sm:$0xff]   ;;  %v4931_v23 = vrot.slane %v7183_v41, 3  ;;  %v4933_v61 = vrot.slane %v7971_v21, 3 }
 0x147   : > { %v1192_v27 = vadd.f32 %v1121_v0, %v7749_v26  ;;  %v7959_v49 = vadd.f32 %v6605_v63, %v1194_v17  ;;  %v4341_v63 = vsel %vm4234_vm5, %v4331_v33, %v4340_v36  ;;  %v4361_v33 = vshrl.u32 %v7185_v14, 16 }
 0x148   : > { %v6554_v20 = vpop.f32.mrf.mxu1  ;;  %v6610_v50 = vpop.f32.mrf.mxu0  ;;  %v4364_v52 = vshll.u32 %v7185_v14, 16  ;;  %v4934_v21 = vsel %vm4903_vm4, %v4931_v23, %v4933_v61 }
 0x149   : > { %v1195_v7 = vadd.f32 %v6554_v20, %v7753_v28  ;;  %v7966_v29 = vadd.f32 %v1657_v51, %v1192_v27  ;;  %v4349_v51 = vor.u32 %v4348_v56, %v4345_v53  ;;  %v4370_v27 = vshrl.u32 %v7188_v9, 16 }
 0x14a   : > { %v1124_v44 = vpop.f32.mrf.mxu1  ;;  %v1676_v26 = vpop.f32.mrf.mxu0  ;;  %v4373_v20 = vshll.u32 %v7188_v9, 16 }
 0x14b   : > { %v1193_v28 = vadd.f32 %v1124_v44, %v7761_v32  ;;  %v7975_v4 = vadd.f32 %v6606_v19, %v1195_v7  ;;  %v4358_v19 = vor.u32 %v4357_v45, %v4354_v57  ;;  %v4350_v41 = vsel %vm4234_vm5, %v4340_v36, %v4349_v51 }
 0x14c   : > { %v6557_v11 = vpop.f32.mrf.mxu1  ;;  %6856 = vmatmul.mubr.bf16.gmra.mxu1 %v4332_v58  ;;  %v6613_v43 = vpop.f32.mrf.mxu0  ;;  %6912 = vmatmul.mubr.bf16.gmra.mxu0 %v4928_v10  ;;  %v7189_v58 = vld [vmem:[%s7245_s23 + $0x90] sm:$0xff]   ;;  %v8434_v10 = vld [vmem:[#allocation3_spill] sm:$0xff]  ;;  %v4363_v44 = vrot.slane %v4361_v33, 2  ;;  %v4372_v9 = vrot.slane %v4370_v27, 2  ;;  %v4375_v36 = vrot.slane %v4373_v20, 3 }
 0x14d   : > { %v1198_v17 = vadd.f32 %v6557_v11, %v7769_v40  ;;  %6859 = vmatprep.mubr.bf16.mxu1 %v4341_v63  ;;  %6915 = vmatprep.mubr.bf16.mxu0 %v4930_v34  ;;  %v7978_v0 = vadd.f32 %v1660_v2, %v1193_v28  ;;  %v4932_v2 = vsel %vm4903_vm4, %v4929_v35, %v4931_v23  ;;  %v4366_v63 = vrot.slane %v4364_v52, 3  ;;  %v7187_v34 = vld [vmem:[%s7245_s23 + $0x90] sm:$0xff]   ;;  %v7994_v28 = vld [vmem:[%s7245_s23 + $0x98] sm:$0xff]   ;;  %v8435_v35 = vld [vmem:[#allocation4_spill] sm:$0xff] }
 0x14e   : > { %v1137_v3 = vpop.f32.mrf.mxu1  ;;  %v1689_v32 = vpop.f32.mrf.mxu0  ;;  %v7192_v11 = vld [vmem:[%s7245_s23 + $0x98] sm:$0xff]   ;;  %v4935_v23 = vrot.slane %v7187_v34, 3  ;;  %v8441_v34 = vld [vmem:[#allocation7_spill] sm:$0xff] }
 0x14f   : > { %v1196_v53 = vadd.f32 %v1137_v3, %v7773_v48  ;;  %v7982_v56 = vadd.f32 %v6609_v39, %v1198_v17  ;;  %v4359_v39 = vsel %vm4234_vm5, %v4349_v51, %v4358_v19  ;;  %v4367_v51 = vor.u32 %v4366_v63, %v4363_v44 }
 0x150   : > { %v6558_v40 = vpop.f32.mrf.mxu1  ;;  %v6614_v7 = vpop.f32.mrf.mxu0 }
 0x151   : > { %v1199_v14 = vadd.f32 %v6558_v40, %v8434_v10  ;;  %v7989_v57 = vadd.f32 %v1673_v16, %v1196_v53  ;;  %v4379_v16 = vshrl.u32 %v7189_v58, 16  ;;  %v4382_v53 = vshll.u32 %v7189_v58, 16  ;;  %v8437_v40 = vld [vmem:[#allocation5_spill] sm:$0xff] }
 0x152   : > { %v1140_v45 = vpop.f32.mrf.mxu1  ;;  %v1692_v48 = vpop.f32.mrf.mxu0 }
 0x153   : > { %v1197_v17 = vadd.f32 %v1140_v45, %v8435_v35  ;;  %v7998_v3 = vadd.f32 %v6610_v50, %v1199_v14  ;;  %v4376_v50 = vor.u32 %v4375_v36, %v4372_v9  ;;  %v4937_v14 = vrot.slane %v7994_v28, 3  ;;  %v7193_v9 = vld [vmem:[%s7245_s23 + $0xa0] ss:$0 sps:$4 sm:$0x77]  }
 0x154   : > { %v6561_v33 = vpop.f32.mrf.mxu1  ;;  %6860 = vmatmul.mubr.bf16.gmra.mxu1 %v4350_v41  ;;  %v6685_v52 = vpop.f32.mrf.mxu0  ;;  %6916 = vmatmul.mubr.bf16.gmra.mxu0 %v4932_v2  ;;  %v4388_v41 = vshrl.u32 %v7192_v11, 16  ;;  %v4391_v35 = vshll.u32 %v7192_v11, 16  ;;  %v8439_v2 = vld [vmem:[#allocation6_spill] sm:$0xff]  ;;  %v4381_v44 = vrot.slane %v4379_v16, 2  ;;  %v4384_v63 = vrot.slane %v4382_v53, 3  ;;  %v8443_v16 = vld [vmem:[#allocation8_spill] sm:$0xff] }
 0x155   : > { %8436 = vst [vmem:[#allocation3_spill] sm:$0xff] %v7998_v3  ;;  %v1202_v10 = vadd.f32 %v6561_v33, %v8437_v40  ;;  %6863 = vmatprep.mubr.bf16.mxu1 %v4359_v39  ;;  %6919 = vmatprep.mubr.bf16.mxu0 %v4934_v21  ;;  %v8001_v27 = vadd.f32 %v1676_v26, %v1197_v17  ;;  %v7191_v21 = vld [vmem:[%s7245_s23 + $0xa0] ss:$0 sps:$4 sm:$0x77]  }
 0x156   : > { %v1153_v20 = vpop.f32.mrf.mxu1  ;;  %v2765_v45 = vpop.f32.mrf.mxu0  ;;  %v4368_v17 = vsel %vm4234_vm5, %v4358_v19, %v4367_v51  ;;  %v4936_v40 = vsel %vm4903_vm4, %v4933_v61, %v4935_v23  ;;  %v4385_v61 = vor.u32 %v4384_v63, %v4381_v44 }
 0x157   : > { %8438 = vst [vmem:[#allocation4_spill] sm:$0xff] %v8001_v27  ;;  %v1200_v3 = vadd.f32 %v1153_v20, %v8439_v2  ;;  %v8005_v58 = vadd.f32 %v6613_v43, %v1202_v10  ;;  %v4377_v20 = vsel %vm4234_vm5, %v4367_v51, %v4376_v50  ;;  %v4938_v43 = vsel %vm4903_vm4, %v4935_v23, %v4937_v14 }
 0x158   : > { %v6562_v33 = vpop.f32.mrf.mxu1  ;;  %v6686_v39 = vpop.f32.mrf.mxu0  ;;  %v4390_v10 = vrot.slane %v4388_v41, 2  ;;  %v4393_v2 = vrot.slane %v4391_v35, 3  ;;  %v4400_v51 = vshll.u32 %v7193_v9, 16 }
 0x159   : > { %8440 = vst [vmem:[#allocation5_spill] sm:$0xff] %v8005_v58  ;;  %v1203_v26 = vadd.f32 %v6562_v33, %v8441_v34  ;;  %v8012_v36 = vadd.f32 %v1689_v32, %v1200_v3  ;;  %v4939_v34 = vrot.slane %v7191_v21, 3  ;;  %v8444_v32 = vld [vmem:[#allocation9_spill] sm:$0xff] }
 0x15a   : > { %v1156_v28 = vpop.f32.mrf.mxu1  ;;  %v2768_v11 = vpop.f32.mrf.mxu0  ;;  %v4394_v35 = vor.u32 %v4393_v2, %v4390_v10 }
 0x15b   : > { %8442 = vst [vmem:[#allocation6_spill] sm:$0xff] %v8012_v36  ;;  %v1201_v53 = vadd.f32 %v1156_v28, %v8443_v16  ;;  %v8017_v58 = vadd.f32 %v6614_v7, %v1203_v26  ;;  %v4397_v36 = vshrl.u32 %v7193_v9, 16  ;;  %v4940_v63 = vsel %vm4903_vm4, %v4937_v14, %v4939_v34 }
 0x15c   : > { %v6633_v33 = vpop.f32.mrf.mxu1  ;;  %6864 = vmatmul.mubr.bf16.gmra.mxu1 %v4368_v17  ;;  %v6689_v19 = vpop.f32.mrf.mxu0  ;;  %6920 = vmatmul.mubr.bf16.gmra.mxu0 %v4936_v40  ;;  %v4386_v40 = vsel %vm4234_vm5, %v4376_v50, %v4385_v61  ;;  %v4395_v10 = vsel %vm4234_vm5, %v4385_v61, %v4394_v35 }
 0x15d   : > { %v2241_v3 = vadd.f32 %v6633_v33, %v8444_v32  ;;  %6867 = vmatprep.mubr.bf16.mxu1 %v4377_v20  ;;  %6923 = vmatprep.mubr.bf16.mxu0 %v4938_v43  ;;  %v8020_v27 = vadd.f32 %v1692_v48, %v1201_v53  ;;  %v4399_v28 = vrot.slane %v4397_v36, 2  ;;  %v4402_v20 = vrot.slane %v4400_v51, 3 }
 0x15e   : > { %v2096_v23 = vpop.f32.mrf.mxu1  ;;  %v2781_v41 = vpop.f32.mrf.mxu0 }
 0x15f   : > { %v2239_v7 = vadd.f32 %v2096_v23, %v7833_v42  ;;  %v8023_v26 = vadd.f32 %v6685_v52, %v2241_v3 }
 0x160   : > { %v6634_v17 = vpop.f32.mrf.mxu1  ;;  %v6690_v44 = vpop.f32.mrf.mxu0 }
 0x161   : > { %v2242_v21 = vadd.f32 %v6634_v17, %v7837_v1  ;;  %v8028_v9 = vadd.f32 %v2765_v45, %v2239_v7  ;;  %v4403_v1 = vor.u32 %v4402_v20, %v4399_v28 }
 0x162   : > { %v2099_v48 = vpop.f32.mrf.mxu1  ;;  %v2784_v43 = vpop.f32.mrf.mxu0 }
 0x163   : > { %v2240_v42 = vadd.f32 %v2099_v48, %v7841_v25  ;;  %v8032_v52 = vadd.f32 %v6686_v39, %v2242_v21  ;;  %v4404_v34 = vsel %vm4234_vm5, %v4394_v35, %v4403_v1 }
 0x164   : > { %v6637_v2 = vpop.f32.mrf.mxu1  ;;  %6868 = vmatmul.mubr.bf16.gmra.mxu1 %v4386_v40  ;;  %v6693_v50 = vpop.f32.mrf.mxu0  ;;  %6924 = vmatmul.mubr.bf16.gmra.mxu0 %v4940_v63 }
 0x165   : > { %v2245_v14 = vadd.f32 %v6637_v2, %v7844_v55  ;;  %6871 = vmatprep.mubr.bf16.mxu1 %v4395_v10  ;;  %v8035_v36 = vadd.f32 %v2768_v11, %v2240_v42 }
 0x166   : > { %v2112_v45 = vpop.f32.mrf.mxu1  ;;  %v2797_v16 = vpop.f32.mrf.mxu0 }
 0x167   : > { %v2243_v53 = vadd.f32 %v2112_v45, %v7851_v12  ;;  %v8038_v33 = vadd.f32 %v6689_v19, %v2245_v14 }
 0x168   : > { %v6638_v61 = vpop.f32.mrf.mxu1  ;;  %v6694_v25 = vpop.f32.mrf.mxu0 }
 0x169   : > { %v2246_v39 = vadd.f32 %v6638_v61, %v7860_v6  ;;  %v8042_v32 = vadd.f32 %v2781_v41, %v2243_v53 }
 0x16a   : > { %v2115_v3 = vpop.f32.mrf.mxu1  ;;  %v2800_v55 = vpop.f32.mrf.mxu0 }
 0x16b   : > { %v2244_v51 = vadd.f32 %v2115_v3, %v7863_v24  ;;  %v8045_v11 = vadd.f32 %v6690_v44, %v2246_v39 }
 0x16c   : > { %v6641_v23 = vpop.f32.mrf.mxu1  ;;  %6872 = vmatmul.mubr.bf16.gmra.mxu1 %v4404_v34  ;;  %v6697_v7 = vpop.f32.mrf.mxu0 }
 0x16d   : > { %v2249_v12 = vadd.f32 %v6641_v23, %v7867_v38  ;;  %v8048_v19 = vadd.f32 %v2784_v43, %v2244_v51 }
 0x16e   : > { %v2128_v17 = vpop.f32.mrf.mxu1  ;;  %v2813_v40 = vpop.f32.mrf.mxu0 }
 0x16f   : > { %v2247_v6 = vadd.f32 %v2128_v17, %v7874_v8  ;;  %v8051_v35 = vadd.f32 %v6693_v50, %v2249_v12 }
 0x170   : > { %v6642_v41 = vpop.f32.mrf.mxu1  ;;  %v6698_v63 = vpop.f32.mrf.mxu0 }
 0x171   : > { %v2250_v21 = vadd.f32 %v6642_v41, %v7883_v13  ;;  %v8054_v24 = vadd.f32 %v2797_v16, %v2247_v6 }
 0x172   : > { %v2131_v44 = vpop.f32.mrf.mxu1  ;;  %v2816_v28 = vpop.f32.mrf.mxu0 }
 0x173   : > { %v2248_v20 = vadd.f32 %v2131_v44, %v7886_v30  ;;  %v8057_v48 = vadd.f32 %v6694_v25, %v2250_v21 }
 0x174   : > { %v6645_v38 = vpop.f32.mrf.mxu1  ;;  %v6701_v43 = vpop.f32.mrf.mxu0 }
 0x175   : > { %v2253_v10 = vadd.f32 %v6645_v38, %v7890_v54  ;;  %v8060_v42 = vadd.f32 %v2800_v55, %v2248_v20 }
 0x176   : > { %v2144_v8 = vpop.f32.mrf.mxu1  ;;  %v2829_v2 = vpop.f32.mrf.mxu0 }
 0x177   : > { %v2251_v50 = vadd.f32 %v2144_v8, %v7897_v5  ;;  %v8063_v14 = vadd.f32 %v6697_v7, %v2253_v10 }
 0x178   : > { %v6646_v13 = vpop.f32.mrf.mxu1  ;;  %v6702_v1 = vpop.f32.mrf.mxu0 }
 0x179   : > { %v2254_v45 = vadd.f32 %v6646_v13, %v7906_v22  ;;  %v8066_v16 = vadd.f32 %v2813_v40, %v2251_v50 }
 0x17a   : > { %v2147_v30 = vpop.f32.mrf.mxu1  ;;  %v2832_v53 = vpop.f32.mrf.mxu0 }
 0x17b   : > { %v2252_v61 = vadd.f32 %v2147_v30, %v7909_v31  ;;  %v8069_v25 = vadd.f32 %v6698_v63, %v2254_v45 }
 0x17c   : > { %v6649_v54 = vpop.f32.mrf.mxu1  ;;  %v6705_v39 = vpop.f32.mrf.mxu0 }
 0x17d   : > { %v2257_v34 = vadd.f32 %v6649_v54, %v7913_v18  ;;  %v8072_v3 = vadd.f32 %v2816_v28, %v2252_v61 }
 0x17e   : > { %v2160_v5 = vpop.f32.mrf.mxu1  ;;  %v2845_v55 = vpop.f32.mrf.mxu0 }
 0x17f   : > { %v2255_v51 = vadd.f32 %v2160_v5, %v7920_v46  ;;  %v8075_v23 = vadd.f32 %v6701_v43, %v2257_v34 }
 0x180   : > { %v6650_v22 = vpop.f32.mrf.mxu1  ;;  %v6706_v7 = vpop.f32.mrf.mxu0 }
 0x181   : > { %v2258_v12 = vadd.f32 %v6650_v22, %v7929_v60  ;;  %v8078_v17 = vadd.f32 %v2829_v2, %v2255_v51 }
 0x182   : > { %v2163_v31 = vpop.f32.mrf.mxu1  ;;  %v2848_v40 = vpop.f32.mrf.mxu0 }
 0x183   : > { %v2256_v6 = vadd.f32 %v2163_v31, %v7932_v37  ;;  %v8081_v41 = vadd.f32 %v6702_v1, %v2258_v12 }
 0x184   : > { %v6653_v18 = vpop.f32.mrf.mxu1  ;;  %v6709_v63 = vpop.f32.mrf.mxu0 }
 0x185   : > { %v2261_v21 = vadd.f32 %v6653_v18, %v7936_v59  ;;  %v8084_v44 = vadd.f32 %v2832_v53, %v2256_v6 }
 0x186   : > { %v2176_v46 = vpop.f32.mrf.mxu1  ;;  %v2861_v28 = vpop.f32.mrf.mxu0 }
 0x187   : > { %v2259_v20 = vadd.f32 %v2176_v46, %v7943_v62  ;;  %v8087_v38 = vadd.f32 %v6705_v39, %v2261_v21  ;;  %v8445_v21 = vld [vmem:[#allocation3_spill] sm:$0xff] }
 0x188   : > { %v6654_v60 = vpop.f32.mrf.mxu1  ;;  %v6710_v43 = vpop.f32.mrf.mxu0 }
 0x189   : > { %v2262_v10 = vadd.f32 %v6654_v60, %v7952_v15  ;;  %v8090_v8 = vadd.f32 %v2845_v55, %v2259_v20  ;;  %v8446_v60 = vld [vmem:[#allocation4_spill] sm:$0xff] }
 0x18a   : > { %v2179_v37 = vpop.f32.mrf.mxu1  ;;  %v2864_v2 = vpop.f32.mrf.mxu0 }
 0x18b   : > { %v2260_v50 = vadd.f32 %v2179_v37, %v7955_v47  ;;  %v8093_v13 = vadd.f32 %v6706_v7, %v2262_v10 }
 0x18c   : > { %v6657_v59 = vpop.f32.mrf.mxu1  ;;  %v6713_v1 = vpop.f32.mrf.mxu0 }
 0x18d   : > { %v2265_v45 = vadd.f32 %v6657_v59, %v7959_v49  ;;  %v8096_v30 = vadd.f32 %v2848_v40, %v2260_v50 }
 0x18e   : > { %v2192_v62 = vpop.f32.mrf.mxu1  ;;  %v2877_v53 = vpop.f32.mrf.mxu0 }
 0x18f   : > { %v2263_v61 = vadd.f32 %v2192_v62, %v7966_v29  ;;  %v8099_v54 = vadd.f32 %v6709_v63, %v2265_v45  ;;  %v8448_v45 = vld [vmem:[#allocation6_spill] sm:$0xff] }
 0x190   : > { %v6658_v15 = vpop.f32.mrf.mxu1  ;;  %v6714_v39 = vpop.f32.mrf.mxu0 }
 0x191   : > { %v2266_v34 = vadd.f32 %v6658_v15, %v7975_v4  ;;  %v8102_v5 = vadd.f32 %v2861_v28, %v2263_v61 }
 0x192   : > { %v2195_v47 = vpop.f32.mrf.mxu1  ;;  %v2880_v55 = vpop.f32.mrf.mxu0 }
 0x193   : > { %v2264_v51 = vadd.f32 %v2195_v47, %v7978_v0  ;;  %v8105_v22 = vadd.f32 %v6710_v43, %v2266_v34 }
 0x194   : > { %v6661_v49 = vpop.f32.mrf.mxu1  ;;  %v6717_v7 = vpop.f32.mrf.mxu0 }
 0x195   : > { %v2269_v12 = vadd.f32 %v6661_v49, %v7982_v56  ;;  %v8108_v31 = vadd.f32 %v2864_v2, %v2264_v51  ;;  %v8447_v2 = vld [vmem:[#allocation5_spill] sm:$0xff] }
 0x196   : > { %v2208_v29 = vpop.f32.mrf.mxu1  ;;  %v2893_v40 = vpop.f32.mrf.mxu0 }
 0x197   : > { %v2267_v6 = vadd.f32 %v2208_v29, %v7989_v57  ;;  %v8111_v18 = vadd.f32 %v6713_v1, %v2269_v12 }
 0x198   : > { %v6662_v4 = vpop.f32.mrf.mxu1  ;;  %v6718_v63 = vpop.f32.mrf.mxu0 }
 0x199   : > { %v2270_v46 = vadd.f32 %v6662_v4, %v8445_v21  ;;  %v8114_v28 = vadd.f32 %v2877_v53, %v2267_v6 }
 0x19a   : > { %v2211_v0 = vpop.f32.mrf.mxu1  ;;  %v2896_v20 = vpop.f32.mrf.mxu0 }
 0x19b   : > { %v2268_v43 = vadd.f32 %v2211_v0, %v8446_v60  ;;  %v8117_v10 = vadd.f32 %v6714_v39, %v2270_v46 }
 0x19c   : > { %v6665_v56 = vpop.f32.mrf.mxu1  ;;  %v6789_v37 = vpop.f32.mrf.mxu0 }
 0x19d   : > { %v2273_v50 = vadd.f32 %v6665_v56, %v8447_v2  ;;  %v8120_v59 = vadd.f32 %v2880_v55, %v2268_v43 }
 0x19e   : > { %v2224_v57 = vpop.f32.mrf.mxu1  ;;  %v3836_v1 = vpop.f32.mrf.mxu0 }
 0x19f   : > { %v2271_v62 = vadd.f32 %v2224_v57, %v8448_v45  ;;  %v8123_v61 = vadd.f32 %v6717_v7, %v2273_v50 }
 0x1a0   : > { %v6666_v53 = vpop.f32.mrf.mxu1  ;;  %v6790_v15 = vpop.f32.mrf.mxu0 }
 0x1a1   : > { %v2274_v34 = vadd.f32 %v6666_v53, %v8017_v58  ;;  %v8126_v47 = vadd.f32 %v2893_v40, %v2271_v62 }
 0x1a2   : > { %v2227_v39 = vpop.f32.mrf.mxu1  ;;  %v3839_v51 = vpop.f32.mrf.mxu0 }
 0x1a3   : > { %v2272_v49 = vadd.f32 %v2227_v39, %v8020_v27  ;;  %v8129_v12 = vadd.f32 %v6718_v63, %v2274_v34 }
 0x1a4   : > { %v6737_v55 = vpop.f32.mrf.mxu1  ;;  %v6793_v29 = vpop.f32.mrf.mxu0 }
 0x1a5   : > { %v3446_v6 = vadd.f32 %v6737_v55, %v8023_v26  ;;  %v8132_v4 = vadd.f32 %v2896_v20, %v2272_v49 }
 0x1a6   : > { %v3301_v7 = vpop.f32.mrf.mxu1  ;;  %v3852_v21 = vpop.f32.mrf.mxu0 }
 0x1a7   : > { %v3444_v46 = vadd.f32 %v3301_v7, %v8028_v9  ;;  %v8135_v0 = vadd.f32 %v6789_v37, %v3446_v6 }
 0x1a8   : > { %v6738_v58 = vpop.f32.mrf.mxu1  ;;  %v6794_v40 = vpop.f32.mrf.mxu0 }
 0x1a9   : > { %v3447_v60 = vadd.f32 %v6738_v58, %v8032_v52  ;;  %v8138_v43 = vadd.f32 %v3836_v1, %v3444_v46 }
 0x1aa   : > { %v3304_v27 = vpop.f32.mrf.mxu1  ;;  %v3855_v63 = vpop.f32.mrf.mxu0 }
 0x1ab   : > { %v3445_v56 = vadd.f32 %v3304_v27, %v8035_v36  ;;  %v8141_v2 = vadd.f32 %v6790_v15, %v3447_v60 }
 0x1ac   : > { %v6741_v26 = vpop.f32.mrf.mxu1  ;;  %v6797_v20 = vpop.f32.mrf.mxu0 }
 0x1ad   : > { %v3450_v50 = vadd.f32 %v6741_v26, %v8038_v33  ;;  %v8144_v57 = vadd.f32 %v3839_v51, %v3445_v56 }
 0x1ae   : > { %v3317_v9 = vpop.f32.mrf.mxu1  ;;  %v3868_v37 = vpop.f32.mrf.mxu0 }
 0x1af   : > { %v3448_v45 = vadd.f32 %v3317_v9, %v8042_v32  ;;  %v8147_v62 = vadd.f32 %v6793_v29, %v3450_v50 }
 0x1b0   : > { %v6742_v52 = vpop.f32.mrf.mxu1  ;;  %v6798_v1 = vpop.f32.mrf.mxu0 }
 0x1b1   : > { %v3451_v53 = vadd.f32 %v6742_v52, %v8045_v11  ;;  %v8150_v34 = vadd.f32 %v3852_v21, %v3448_v45 }
 0x1b2   : > { %v3320_v36 = vpop.f32.mrf.mxu1  ;;  %v3871_v15 = vpop.f32.mrf.mxu0 }
 0x1b3   : > { %v3449_v39 = vadd.f32 %v3320_v36, %v8048_v19  ;;  %v8153_v49 = vadd.f32 %v6794_v40, %v3451_v53 }
 0x1b4   : > { %v6745_v33 = vpop.f32.mrf.mxu1  ;;  %v6801_v51 = vpop.f32.mrf.mxu0 }
 0x1b5   : > { %v3454_v55 = vadd.f32 %v6745_v33, %v8051_v35  ;;  %v8156_v6 = vadd.f32 %v3855_v63, %v3449_v39 }
 0x1b6   : > { %v3333_v32 = vpop.f32.mrf.mxu1  ;;  %v3884_v29 = vpop.f32.mrf.mxu0 }
 0x1b7   : > { %v3452_v7 = vadd.f32 %v3333_v32, %v8054_v24  ;;  %v8159_v46 = vadd.f32 %v6797_v20, %v3454_v55 }
 0x1b8   : > { %v6746_v11 = vpop.f32.mrf.mxu1  ;;  %v6802_v21 = vpop.f32.mrf.mxu0 }
 0x1b9   : > { %v3455_v58 = vadd.f32 %v6746_v11, %v8057_v48  ;;  %v8162_v60 = vadd.f32 %v3868_v37, %v3452_v7 }
 0x1ba   : > { %v3336_v19 = vpop.f32.mrf.mxu1  ;;  %v3887_v40 = vpop.f32.mrf.mxu0 }
 0x1bb   : > { %v3453_v27 = vadd.f32 %v3336_v19, %v8060_v42  ;;  %v8165_v56 = vadd.f32 %v6798_v1, %v3455_v58 }
 0x1bc   : > { %v6749_v35 = vpop.f32.mrf.mxu1  ;;  %v6805_v63 = vpop.f32.mrf.mxu0 }
 0x1bd   : > { %v3458_v26 = vadd.f32 %v6749_v35, %v8063_v14  ;;  %v8168_v50 = vadd.f32 %v3871_v15, %v3453_v27 }
 0x1be   : > { %v3349_v24 = vpop.f32.mrf.mxu1  ;;  %v3900_v20 = vpop.f32.mrf.mxu0 }
 0x1bf   : > { %v3456_v9 = vadd.f32 %v3349_v24, %v8066_v16  ;;  %v8171_v45 = vadd.f32 %v6801_v51, %v3458_v26 }
 0x1c0   : > { %v6750_v48 = vpop.f32.mrf.mxu1  ;;  %v6806_v37 = vpop.f32.mrf.mxu0 }
 0x1c1   : > { %v3459_v52 = vadd.f32 %v6750_v48, %v8069_v25  ;;  %v8174_v53 = vadd.f32 %v3884_v29, %v3456_v9 }
 0x1c2   : > { %v3352_v42 = vpop.f32.mrf.mxu1  ;;  %v3903_v1 = vpop.f32.mrf.mxu0 }
 0x1c3   : > { %v3457_v36 = vadd.f32 %v3352_v42, %v8072_v3  ;;  %v8177_v39 = vadd.f32 %v6802_v21, %v3459_v52 }
 0x1c4   : > { %v6753_v14 = vpop.f32.mrf.mxu1  ;;  %v6809_v15 = vpop.f32.mrf.mxu0 }
 0x1c5   : > { %v3462_v33 = vadd.f32 %v6753_v14, %v8075_v23  ;;  %v8180_v55 = vadd.f32 %v3887_v40, %v3457_v36 }
 0x1c6   : > { %v3365_v16 = vpop.f32.mrf.mxu1  ;;  %v3916_v51 = vpop.f32.mrf.mxu0 }
 0x1c7   : > { %v3460_v32 = vadd.f32 %v3365_v16, %v8078_v17  ;;  %v8183_v7 = vadd.f32 %v6805_v63, %v3462_v33 }
 0x1c8   : > { %v6754_v25 = vpop.f32.mrf.mxu1  ;;  %v6810_v29 = vpop.f32.mrf.mxu0 }
 0x1c9   : > { %v3463_v11 = vadd.f32 %v6754_v25, %v8081_v41  ;;  %v8186_v58 = vadd.f32 %v3900_v20, %v3460_v32 }
 0x1ca   : > { %v3368_v3 = vpop.f32.mrf.mxu1  ;;  %v3919_v21 = vpop.f32.mrf.mxu0 }
 0x1cb   : > { %v3461_v19 = vadd.f32 %v3368_v3, %v8084_v44  ;;  %v8189_v27 = vadd.f32 %v6806_v37, %v3463_v11 }
 0x1cc   : > { %v6757_v23 = vpop.f32.mrf.mxu1  ;;  %v6813_v40 = vpop.f32.mrf.mxu0 }
 0x1cd   : > { %v3466_v35 = vadd.f32 %v6757_v23, %v8087_v38  ;;  %v8192_v26 = vadd.f32 %v3903_v1, %v3461_v19 }
 0x1ce   : > { %v3381_v17 = vpop.f32.mrf.mxu1  ;;  %v3932_v63 = vpop.f32.mrf.mxu0 }
 0x1cf   : > { %v3464_v24 = vadd.f32 %v3381_v17, %v8090_v8  ;;  %v8195_v9 = vadd.f32 %v6809_v15, %v3466_v35 }
 0x1d0   : > { %v6758_v41 = vpop.f32.mrf.mxu1  ;;  %v6814_v20 = vpop.f32.mrf.mxu0 }
 0x1d1   : > { %v3467_v48 = vadd.f32 %v6758_v41, %v8093_v13  ;;  %v8198_v52 = vadd.f32 %v3916_v51, %v3464_v24 }
 0x1d2   : > { %v3384_v44 = vpop.f32.mrf.mxu1  ;;  %v3935_v37 = vpop.f32.mrf.mxu0 }
 0x1d3   : > { %v3465_v42 = vadd.f32 %v3384_v44, %v8096_v30  ;;  %v8201_v36 = vadd.f32 %v6810_v29, %v3467_v48 }
 0x1d4   : > { %v6761_v38 = vpop.f32.mrf.mxu1  ;;  %v6817_v1 = vpop.f32.mrf.mxu0 }
 0x1d5   : > { %v3470_v14 = vadd.f32 %v6761_v38, %v8099_v54  ;;  %v8204_v33 = vadd.f32 %v3919_v21, %v3465_v42 }
 0x1d6   : > { %v3397_v8 = vpop.f32.mrf.mxu1  ;;  %v3948_v15 = vpop.f32.mrf.mxu0 }
 0x1d7   : > { %v3468_v16 = vadd.f32 %v3397_v8, %v8102_v5  ;;  %v8207_v32 = vadd.f32 %v6813_v40, %v3470_v14 }
 0x1d8   : > { %v6762_v13 = vpop.f32.mrf.mxu1  ;;  %v6818_v51 = vpop.f32.mrf.mxu0 }
 0x1d9   : > { %v3471_v25 = vadd.f32 %v6762_v13, %v8105_v22  ;;  %v8210_v11 = vadd.f32 %v3932_v63, %v3468_v16 }
 0x1da   : > { %v3400_v30 = vpop.f32.mrf.mxu1  ;;  %v3951_v29 = vpop.f32.mrf.mxu0 }
 0x1db   : > { %v3469_v3 = vadd.f32 %v3400_v30, %v8108_v31  ;;  %v8213_v19 = vadd.f32 %v6814_v20, %v3471_v25 }
 0x1dc   : > { %v6765_v54 = vpop.f32.mrf.mxu1  ;;  %v6821_v21 = vpop.f32.mrf.mxu0 }
 0x1dd   : > { %v3474_v23 = vadd.f32 %v6765_v54, %v8111_v18  ;;  %v8216_v35 = vadd.f32 %v3935_v37, %v3469_v3 }
 0x1de   : > { %v3413_v5 = vpop.f32.mrf.mxu1  ;;  %v3964_v40 = vpop.f32.mrf.mxu0 }
 0x1df   : > { %v3472_v17 = vadd.f32 %v3413_v5, %v8114_v28  ;;  %v8219_v24 = vadd.f32 %v6817_v1, %v3474_v23 }
 0x1e0   : > { %v6766_v22 = vpop.f32.mrf.mxu1  ;;  %v6822_v63 = vpop.f32.mrf.mxu0 }
 0x1e1   : > { %v3475_v41 = vadd.f32 %v6766_v22, %v8117_v10  ;;  %v8222_v48 = vadd.f32 %v3948_v15, %v3472_v17 }
 0x1e2   : > { %v3416_v31 = vpop.f32.mrf.mxu1  ;;  %v3967_v20 = vpop.f32.mrf.mxu0 }
 0x1e3   : > { %v3473_v44 = vadd.f32 %v3416_v31, %v8120_v59  ;;  %v8225_v42 = vadd.f32 %v6818_v51, %v3475_v41 }
 0x1e4   : > { %v6769_v18 = vpop.f32.mrf.mxu1  ;;  %v6893_v37 = vpop.f32.mrf.mxu0 }
 0x1e5   : > { %v3478_v38 = vadd.f32 %v6769_v18, %v8123_v61  ;;  %v8228_v14 = vadd.f32 %v3951_v29, %v3473_v44 }
 0x1e6   : > { %v3429_v28 = vpop.f32.mrf.mxu1  ;;  %v5041_v1 = vpop.f32.mrf.mxu0 }
 0x1e7   : > { %v3476_v8 = vadd.f32 %v3429_v28, %v8126_v47  ;;  %v8231_v16 = vadd.f32 %v6821_v21, %v3478_v38  ;;  %v8245_v47 = vld [vmem:[%s8425_s2] ss:$0 sm:$0xff] }
 0x1e8   : > { %v6770_v10 = vpop.f32.mrf.mxu1  ;;  %v6894_v15 = vpop.f32.mrf.mxu0 }
 0x1e9   : > { %v3479_v13 = vadd.f32 %v6770_v10, %v8129_v12  ;;  %v8234_v25 = vadd.f32 %v3964_v40, %v3476_v8 }
 0x1ea   : > { %v3432_v59 = vpop.f32.mrf.mxu1  ;;  %v5044_v51 = vpop.f32.mrf.mxu0 }
 0x1eb   : > { %v3477_v30 = vadd.f32 %v3432_v59, %v8132_v4  ;;  %v8237_v3 = vadd.f32 %v6822_v63, %v3479_v13 }
 0x1ec   : > { %v6841_v61 = vpop.f32.mrf.mxu1  ;;  %v6897_v29 = vpop.f32.mrf.mxu0 }
 0x1ed   : > { %v4650_v54 = vadd.f32 %v6841_v61, %v8135_v0  ;;  %v8240_v23 = vadd.f32 %v3967_v20, %v3477_v30 }
 0x1ee   : > { %v4505_v12 = vpop.f32.mrf.mxu1  ;;  %v5057_v21 = vpop.f32.mrf.mxu0 }
 0x1ef   : > { %v5186_v5 = vadd.f32 %v6893_v37, %v4650_v54  ;;  %v4648_v40 = vadd.f32 %v4505_v12, %v8138_v43 }
 0x1f0   : > { %v6842_v17 = vpop.f32.mrf.mxu1  ;;  %v6898_v4 = vpop.f32.mrf.mxu0 }
 0x1f1   : > { %v5301_v22 = vadd.f32 %v8245_v47, %v5186_v5  ;;  %v5184_v63 = vadd.f32 %v5041_v1, %v4648_v40  ;;  %v4651_v41 = vadd.f32 %v6842_v17, %v8141_v2 }
 0x1f2   : > { %v4508_v0 = vpop.f32.mrf.mxu1  ;;  %v5060_v31 = vpop.f32.mrf.mxu0 }
 0x1f3   : > { %v5337_v20 = vmax.f32 %v5301_v22, 0.0  ;;  %v5187_v44 = vadd.f32 %v6894_v15, %v4651_v41  ;;  %v4649_v18 = vadd.f32 %v4508_v0, %v8144_v57  ;;  %v5299_v38 = vadd.f32 %v8245_v47, %v5184_v63 }
 0x1f4   : > { %v6845_v28 = vpop.f32.mrf.mxu1  ;;  %v6901_v37 = vpop.f32.mrf.mxu0 }
 0x1f5   : > { %v5302_v43 = vadd.f32 %v8245_v47, %v5187_v44  ;;  %v5185_v8 = vadd.f32 %v5044_v51, %v4649_v18  ;;  %v6168_v10 = vpack.c.bf16 %v5337_v20, %v5337_v20  ;;  %v4654_v1 = vadd.f32 %v6845_v28, %v8147_v62 }
 0x1f6   : > { %v4521_v13 = vpop.f32.mrf.mxu1  ;;  %v5073_v2 = vpop.f32.mrf.mxu0  ;;  %v5335_v30 = vmax.f32 %v5299_v38, 0.0 }
 0x1f7   : > { %v5338_v59 = vmax.f32 %v5302_v43, 0.0  ;;  %v5300_v15 = vadd.f32 %v8245_v47, %v5185_v8  ;;  %v4652_v57 = vadd.f32 %v4521_v13, %v8150_v34  ;;  %v5190_v61 = vadd.f32 %v6897_v29, %v4654_v1 }
 0x1f8   : > { %v6846_v54 = vpop.f32.mrf.mxu1  ;;  %v6902_v12 = vpop.f32.mrf.mxu0  ;;  %v6090_v22 = vrot.slane %v6168_v10, 9 }
 0x1f9   : > { %v6169_v5 = vpack.c.bf16 %v5338_v59, %v5338_v59  ;;  %v5336_v40 = vmax.f32 %v5300_v15, 0.0  ;;  %v5188_v51 = vadd.f32 %v5057_v21, %v4652_v57  ;;  %v4655_v17 = vadd.f32 %v6846_v54, %v8153_v49 }
 0x1fa   : > { %v5305_v34 = vadd.f32 %v8245_v47, %v5190_v61  ;;  %v4524_v29 = vpop.f32.mrf.mxu1  ;;  %v5076_v63 = vpop.f32.mrf.mxu0 }
 0x1fb   : > { %v5411_v21 = vrot.slane %v6169_v5, 5  ;;  %v6205_v41 = vpack.c.bf16 %v5336_v40, %v5335_v30  ;;  %v5303_v49 = vadd.f32 %v8245_v47, %v5188_v51  ;;  %v5191_v0 = vadd.f32 %v6898_v4, %v4655_v17 }
 0x1fc   : > { %v5341_v20 = vmax.f32 %v5305_v34, 0.0  ;;  %v4653_v44 = vadd.f32 %v4524_v29, %v8156_v6  ;;  %v6849_v18 = vpop.f32.mrf.mxu1  ;;  %v6905_v38 = vpop.f32.mrf.mxu0 }
 0x1fd   : > { %v5412_v28 = vsel %vm8264_vm8, %v6090_v22, %v5411_v21  ;;  %6206 = vst [vmem:[%s8261_s13] sm:$0xff] %v6205_v41   ;;  %v5339_v43 = vmax.f32 %v5303_v49, 0.0  ;;  %v5306_v8 = vadd.f32 %v8245_v47, %v5191_v0  ;;  %v4658_v13 = vadd.f32 %v6849_v18, %v8159_v46 }
 0x1fe   : > { %6091 = vst [vmem:[%s8261_s13 + $0x8] sm:$0xf] %v5412_v28  ;;  %v8276_v10 = vpack.c.bf16 %v5341_v20, %v5341_v20  ;;  %v5189_v1 = vadd.f32 %v5060_v31, %v4653_v44  ;;  %v4537_v4 = vpop.f32.mrf.mxu1  ;;  %v5089_v59 = vpop.f32.mrf.mxu0  ;;  %v5413_v40 = vrot.slane %v5411_v21, 4 }
 0x1ff   : > { %v6170_v15 = vpack.c.bf16 %v5339_v43, %v5339_v43  ;;  %v5342_v6 = vmax.f32 %v5306_v8, 0.0  ;;  %v4656_v57 = vadd.f32 %v4537_v4, %v8162_v60  ;;  %v5194_v61 = vadd.f32 %v6901_v37, %v4658_v13 }
 0x200   : > { %v5304_v30 = vadd.f32 %v8245_v47, %v5189_v1  ;;  %v6850_v54 = vpop.f32.mrf.mxu1  ;;  %v6906_v5 = vpop.f32.mrf.mxu0  ;;  %v6100_v46 = vrot.slane %v8276_v10, 11  ;;  %v5434_v20 = vrot.slane %v8276_v10, 6 }
 0x201   : > { %v5414_v51 = vrot.slane %v6170_v15, 5  ;;  %v6173_v31 = vpack.c.bf16 %v5342_v6, %v5342_v6  ;;  %v5192_v17 = vadd.f32 %v5073_v2, %v4656_v57  ;;  %v5309_v34 = vadd.f32 %v8245_v47, %v5194_v61 }
 0x202   : > { %v5340_v60 = vmax.f32 %v5304_v30, 0.0  ;;  %v4659_v29 = vadd.f32 %v6850_v54, %v8165_v56  ;;  %v4540_v37 = vpop.f32.mrf.mxu1  ;;  %v5092_v41 = vpop.f32.mrf.mxu0  ;;  %v6095_v8 = vrot.slane %v6170_v15, 10 }
 0x203   : > { %v5415_v21 = vsel %vm8264_vm8, %v5413_v40, %v5414_v51  ;;  %v5451_v49 = vrot.slane %v6173_v31, 7  ;;  %v5307_v2 = vadd.f32 %v8245_v47, %v5192_v17  ;;  %v4657_v0 = vadd.f32 %v4540_v37, %v8168_v50 }
 0x204   : > { %6092 = vst [vmem:[%s8261_s13 + $0xc] sm:$0xf] %v5415_v21  ;;  %v6171_v44 = vpack.c.bf16 %v5340_v60, %v5340_v60  ;;  %v5195_v18 = vadd.f32 %v6902_v12, %v4659_v29  ;;  %v6853_v28 = vpop.f32.mrf.mxu1  ;;  %v6909_v43 = vpop.f32.mrf.mxu0  ;;  %v5345_v10 = vmax.f32 %v5309_v34, 0.0 }
 0x205   : > { %v5452_v56 = vsel %vm8283_vm13, %v6100_v46, %v5451_v49  ;;  %v5343_v13 = vmax.f32 %v5307_v2, 0.0  ;;  %v5193_v4 = vadd.f32 %v5076_v63, %v4657_v0  ;;  %v4662_v6 = vadd.f32 %v6853_v28, %v8171_v45 }
 0x206   : > { %6101 = vst [vmem:[%s8261_s13 + $0x18] sm:$0xf] %v5452_v56  ;;  %v5431_v50 = vrot.slane %v6171_v44, 6  ;;  %v5310_v12 = vadd.f32 %v8245_v47, %v5195_v18  ;;  %v4553_v15 = vpop.f32.mrf.mxu1  ;;  %v5105_v57 = vpop.f32.mrf.mxu0  ;;  %v5453_v30 = vrot.slane %v5451_v49, 4 }
 0x207   : > { %v6174_v61 = vpack.c.bf16 %v5343_v13, %v5343_v13  ;;  %v5308_v54 = vadd.f32 %v8245_v47, %v5193_v4  ;;  %v4660_v40 = vadd.f32 %v4553_v15, %v8174_v53  ;;  %v5198_v17 = vadd.f32 %v6905_v38, %v4662_v6 }
 0x208   : > { %v5432_v63 = vsel %vm8299_vm14, %v6095_v8, %v5431_v50  ;;  %v5433_v51 = vrot.slane %v5431_v50, 4  ;;  %v5346_v31 = vmax.f32 %v5310_v12, 0.0  ;;  %v6854_v46 = vpop.f32.mrf.mxu1  ;;  %v6910_v60 = vpop.f32.mrf.mxu0 }
 0x209   : > { %6096 = vst [vmem:[%s8261_s13 + $0x10] sm:$0xf] %v5432_v63  ;;  %v5454_v45 = vrot.slane %v6174_v61, 7  ;;  %v5344_v34 = vmax.f32 %v5308_v54, 0.0  ;;  %v5196_v29 = vadd.f32 %v5089_v59, %v4660_v40  ;;  %v4663_v37 = vadd.f32 %v6854_v46, %v8177_v39 }
 0x20a   : > { %v5435_v53 = vsel %vm8299_vm14, %v5433_v51, %v5434_v20  ;;  %v5313_v21 = vadd.f32 %v8245_v47, %v5198_v17  ;;  %v4556_v49 = vpop.f32.mrf.mxu1  ;;  %v5108_v2 = vpop.f32.mrf.mxu0  ;;  %v6177_v56 = vpack.c.bf16 %v5346_v31, %v5346_v31 }
 0x20b   : > { %6097 = vst [vmem:[%s8261_s13 + $0x14] sm:$0xf] %v5435_v53  ;;  %v5455_v38 = vsel %vm8283_vm13, %v5453_v30, %v5454_v45  ;;  %v6210_v0 = vpack.c.bf16 %v5345_v10, %v5344_v34  ;;  %v5311_v44 = vadd.f32 %v8245_v47, %v5196_v29  ;;  %v5199_v18 = vadd.f32 %v6906_v5, %v4663_v37 }
 0x20c   : > { %6102 = vst [vmem:[%s8261_s13 + $0x1c] sm:$0xf] %v5455_v38  ;;  %v5349_v59 = vmax.f32 %v5313_v21, 0.0  ;;  %v4661_v39 = vadd.f32 %v4556_v49, %v8180_v55  ;;  %v6857_v28 = vpop.f32.mrf.mxu1  ;;  %v6913_v8 = vpop.f32.mrf.mxu0  ;;  %v6110_v51 = vrot.slane %v6177_v56, 9 }
 0x20d   : > { %6222 = vst [vmem:[%s8261_s13 + $0x20] sm:$0xff] %v6210_v0   ;;  %v5347_v20 = vmax.f32 %v5311_v44, 0.0  ;;  %v5314_v13 = vadd.f32 %v8245_v47, %v5199_v18  ;;  %v4666_v4 = vadd.f32 %v6857_v28, %v8183_v7 }
 0x20e   : > { %v6180_v50 = vpack.c.bf16 %v5349_v59, %v5349_v59  ;;  %v5197_v12 = vadd.f32 %v5092_v41, %v4661_v39  ;;  %v4569_v6 = vpop.f32.mrf.mxu1  ;;  %v5121_v10 = vpop.f32.mrf.mxu0 }
 0x20f   : > { %v6178_v15 = vpack.c.bf16 %v5347_v20, %v5347_v20  ;;  %v5350_v30 = vmax.f32 %v5314_v13, 0.0  ;;  %v5202_v5 = vadd.f32 %v6909_v43, %v4666_v4  ;;  %v4664_v61 = vadd.f32 %v4569_v6, %v8186_v58 }
 0x210   : > { %v5497_v54 = vrot.slane %v6180_v50, 6  ;;  %v5312_v55 = vadd.f32 %v8245_v47, %v5197_v12  ;;  %v6858_v40 = vpop.f32.mrf.mxu1  ;;  %v6914_v63 = vpop.f32.mrf.mxu0 }
 0x211   : > { %v5480_v31 = vrot.slane %v6178_v15, 5  ;;  %v6181_v17 = vpack.c.bf16 %v5350_v30, %v5350_v30  ;;  %v5200_v46 = vadd.f32 %v5105_v57, %v4664_v61  ;;  %v4667_v41 = vadd.f32 %v6858_v40, %v8189_v27 }
 0x212   : > { %v5348_v7 = vmax.f32 %v5312_v55, 0.0  ;;  %v4572_v45 = vpop.f32.mrf.mxu1  ;;  %v5124_v34 = vpop.f32.mrf.mxu0  ;;  %v5499_v29 = vrot.slane %v5497_v54, 4  ;;  %v5317_v37 = vadd.f32 %v8245_v47, %v5202_v5 }
 0x213   : > { %v5481_v58 = vsel %vm8264_vm8, %v6110_v51, %v5480_v31  ;;  %v5500_v43 = vrot.slane %v6181_v17, 6  ;;  %v5315_v21 = vadd.f32 %v8245_v47, %v5200_v46  ;;  %v5203_v49 = vadd.f32 %v6910_v60, %v4667_v41 }
 0x214   : > { %6111 = vst [vmem:[%s8261_s13 + $0x28] sm:$0xf] %v5481_v58  ;;  %v6179_v53 = vpack.c.bf16 %v5348_v7, %v5348_v7  ;;  %v6861_v38 = vpop.f32.mrf.mxu1  ;;  %v6917_v57 = vpop.f32.mrf.mxu0  ;;  %v5482_v0 = vrot.slane %v5480_v31, 4  ;;  %v4665_v44 = vadd.f32 %v4572_v45, %v8192_v26  ;;  %v5353_v13 = vmax.f32 %v5317_v37, 0.0 }
 0x215   : > { %v5501_v27 = vsel %vm8299_vm14, %v5499_v29, %v5500_v43  ;;  %v4670_v18 = vadd.f32 %v6861_v38, %v8195_v9  ;;  %v5351_v28 = vmax.f32 %v5315_v21, 0.0  ;;  %v5318_v56 = vadd.f32 %v8245_v47, %v5203_v49 }
 0x216   : > { %6117 = vst [vmem:[%s8261_s13 + $0x34] sm:$0xf] %v5501_v27  ;;  %v5483_v59 = vrot.slane %v6179_v53, 5  ;;  %v6115_v39 = vrot.slane %v6179_v53, 10  ;;  %v4585_v20 = vpop.f32.mrf.mxu1  ;;  %v5137_v60 = vpop.f32.mrf.mxu0  ;;  %v5201_v4 = vadd.f32 %v5108_v2, %v4665_v44  ;;  %v6120_v55 = vrot.slane %v6181_v17, 11 }
 0x217   : > { %v5206_v50 = vadd.f32 %v6913_v8, %v4670_v18  ;;  %v4668_v12 = vadd.f32 %v4585_v20, %v8198_v52  ;;  %v6182_v6 = vpack.c.bf16 %v5351_v28, %v5351_v28  ;;  %v5354_v15 = vmax.f32 %v5318_v56, 0.0 }
 0x218   : > { %v5484_v26 = vsel %vm8264_vm8, %v5482_v0, %v5483_v59  ;;  %v5498_v9 = vsel %vm8299_vm14, %v6115_v39, %v5497_v54  ;;  %v6862_v30 = vpop.f32.mrf.mxu1  ;;  %v6918_v5 = vpop.f32.mrf.mxu0  ;;  %v5316_v61 = vadd.f32 %v8245_v47, %v5201_v4 }
 0x219   : > { %6112 = vst [vmem:[%s8261_s13 + $0x2c] sm:$0xf] %v5484_v26  ;;  %6116 = vst [vmem:[%s8261_s13 + $0x30] sm:$0xf] %v5498_v9  ;;  %v5321_v2 = vadd.f32 %v8245_v47, %v5206_v50  ;;  %v5204_v8 = vadd.f32 %v5121_v10, %v4668_v12  ;;  %v4671_v52 = vadd.f32 %v6862_v30, %v8201_v36  ;;  %v5514_v40 = vrot.slane %v6182_v6, 7 }
 0x21a   : > { %v6215_v51 = vpack.c.bf16 %v5354_v15, %v5353_v13  ;;  %v4588_v31 = vpop.f32.mrf.mxu1  ;;  %v5140_v54 = vpop.f32.mrf.mxu0  ;;  %v5352_v46 = vmax.f32 %v5316_v61, 0.0 }
 0x21b   : > { %v5357_v7 = vmax.f32 %v5321_v2, 0.0  ;;  %v5319_v41 = vadd.f32 %v8245_v47, %v5204_v8  ;;  %v5207_v45 = vadd.f32 %v6914_v63, %v4671_v52  ;;  %v5515_v29 = vsel %vm8283_vm13, %v6120_v55, %v5514_v40 }
 0x21c   : > { %6223 = vst [vmem:[%s8261_s13 + $0x40] sm:$0xff] %v6215_v51   ;;  %v4669_v58 = vadd.f32 %v4588_v31, %v8204_v33  ;;  %v6865_v10 = vpop.f32.mrf.mxu1  ;;  %v6921_v43 = vpop.f32.mrf.mxu0  ;;  %6121 = vst [vmem:[%s8261_s13 + $0x38] sm:$0xf] %v5515_v29  ;;  %v6183_v36 = vpack.c.bf16 %v5352_v46, %v5352_v46  ;;  %v5516_v63 = vrot.slane %v5514_v40, 4 }
 0x21d   : > { %v5355_v17 = vmax.f32 %v5319_v41, 0.0  ;;  %v5322_v37 = vadd.f32 %v8245_v47, %v5207_v45  ;;  %v4674_v21 = vadd.f32 %v6865_v10, %v8207_v32  ;;  %v6188_v27 = vpack.c.bf16 %v5357_v7, %v5357_v7 }
 0x21e   : > { %v5205_v53 = vadd.f32 %v5124_v34, %v4669_v58  ;;  %v4601_v49 = vpop.f32.mrf.mxu1  ;;  %v5153_v38 = vpop.f32.mrf.mxu0  ;;  %v5517_v0 = vrot.slane %v6183_v36, 7 }
 0x21f   : > { %v5358_v44 = vmax.f32 %v5322_v37, 0.0  ;;  %v5210_v33 = vadd.f32 %v6917_v57, %v4674_v21  ;;  %v4672_v59 = vadd.f32 %v4601_v49, %v8210_v11  ;;  %v6186_v34 = vpack.c.bf16 %v5355_v17, %v5355_v17 }
 0x220   : > { %v5320_v18 = vadd.f32 %v8245_v47, %v5205_v53  ;;  %v6866_v39 = vpop.f32.mrf.mxu1  ;;  %v6922_v28 = vpop.f32.mrf.mxu0  ;;  %v5518_v56 = vsel %vm8283_vm13, %v5516_v63, %v5517_v0  ;;  %v6135_v11 = vrot.slane %v6188_v27, 10  ;;  %v5547_v46 = vrot.slane %v6188_v27, 5 }
 0x221   : > { %v4675_v20 = vadd.f32 %v6866_v39, %v8213_v19  ;;  %6122 = vst [vmem:[%s8261_s13 + $0x3c] sm:$0xf] %v5518_v56  ;;  %v6189_v32 = vpack.c.bf16 %v5358_v44, %v5358_v44  ;;  %v5325_v4 = vadd.f32 %v8245_v47, %v5210_v33  ;;  %v5208_v50 = vadd.f32 %v5137_v60, %v4672_v59 }
 0x222   : > { %v5356_v13 = vmax.f32 %v5320_v18, 0.0  ;;  %v4604_v12 = vpop.f32.mrf.mxu1  ;;  %v5156_v61 = vpop.f32.mrf.mxu0  ;;  %v6130_v8 = vrot.slane %v6186_v34, 9 }
 0x223   : > { %v5211_v26 = vadd.f32 %v6918_v5, %v4675_v20  ;;  %v4673_v57 = vadd.f32 %v4604_v12, %v8216_v35  ;;  %v5561_v9 = vrot.slane %v6189_v32, 6  ;;  %v5323_v15 = vadd.f32 %v8245_v47, %v5208_v50 }
 0x224   : > { %v6187_v6 = vpack.c.bf16 %v5356_v13, %v5356_v13  ;;  %v6869_v30 = vpop.f32.mrf.mxu1  ;;  %v5361_v55 = vmax.f32 %v5325_v4, 0.0  ;;  %v6925_v45 = vpop.f32.mrf.mxu0 }
 0x225   : > { %v5209_v2 = vadd.f32 %v5140_v54, %v4673_v57  ;;  %v4678_v19 = vadd.f32 %v6869_v30, %v8219_v24  ;;  %v5562_v60 = vsel %vm8299_vm14, %v6135_v11, %v5561_v9  ;;  %v5359_v35 = vmax.f32 %v5323_v15, 0.0 }
 0x226   : > { %v5544_v52 = vrot.slane %v6187_v6, 5  ;;  %v4617_v5 = vpop.f32.mrf.mxu1  ;;  %6136 = vst [vmem:[%s8261_s13 + $0x50] sm:$0xf] %v5562_v60  ;;  %v5326_v40 = vadd.f32 %v8245_v47, %v5211_v26  ;;  %v5563_v17 = vrot.slane %v5561_v9, 4  ;;  %v6192_v37 = vpack.c.bf16 %v5361_v55, %v5361_v55 }
 0x227   : > { %v5324_v51 = vadd.f32 %v8245_v47, %v5209_v2  ;;  %v5214_v31 = vadd.f32 %v6921_v43, %v4678_v19  ;;  %v4676_v7 = vadd.f32 %v4617_v5, %v8222_v48  ;;  %v6190_v29 = vpack.c.bf16 %v5359_v35, %v5359_v35 }
 0x228   : > { %v5545_v24 = vsel %vm8264_vm8, %v6130_v8, %v5544_v52  ;;  %v5546_v54 = vrot.slane %v5544_v52, 4  ;;  %v6870_v41 = vpop.f32.mrf.mxu1  ;;  %v5362_v48 = vmax.f32 %v5326_v40, 0.0  ;;  %v5581_v20 = vrot.slane %v6192_v37, 7 }
 0x229   : > { %6131 = vst [vmem:[%s8261_s13 + $0x48] sm:$0xf] %v5545_v24  ;;  %v5360_v58 = vmax.f32 %v5324_v51, 0.0  ;;  %v5329_v10 = vadd.f32 %v8245_v47, %v5214_v31  ;;  %v4679_v36 = vadd.f32 %v6870_v41, %v8225_v42  ;;  %v5212_v53 = vadd.f32 %v5153_v38, %v4676_v7  ;;  %v5169_v42 = vpop.f32.mrf.mxu0 }
 0x22a   : > { %v5548_v43 = vsel %vm8264_vm8, %v5546_v54, %v5547_v46  ;;  %v4620_v21 = vpop.f32.mrf.mxu1  ;;  %v5564_v49 = vrot.slane %v6190_v29, 6  ;;  %v6140_v27 = vrot.slane %v6190_v29, 11 }
 0x22b   : > { %6132 = vst [vmem:[%s8261_s13 + $0x4c] sm:$0xf] %v5548_v43  ;;  %v6191_v63 = vpack.c.bf16 %v5360_v58, %v5360_v58  ;;  %v5365_v0 = vmax.f32 %v5329_v10, 0.0  ;;  %v5327_v44 = vadd.f32 %v8245_v47, %v5212_v53  ;;  %v5215_v18 = vadd.f32 %v6922_v28, %v4679_v36  ;;  %v6926_v9 = vpop.f32.mrf.mxu0 }
 0x22c   : > { %v4677_v33 = vadd.f32 %v4620_v21, %v8228_v14  ;;  %v6873_v59 = vpop.f32.mrf.mxu1  ;;  %v5565_v39 = vsel %vm8299_vm14, %v5563_v17, %v5564_v49 }
 0x22d   : > { %v5578_v38 = vrot.slane %v6191_v63, 7  ;;  %v6196_v56 = vpack.c.bf16 %v5365_v0, %v5365_v0  ;;  %v4682_v34 = vadd.f32 %v6873_v59, %v8231_v16  ;;  %6137 = vst [vmem:[%s8261_s13 + $0x54] sm:$0xf] %v5565_v39  ;;  %v5363_v32 = vmax.f32 %v5327_v44, 0.0  ;;  %v5172_v46 = vpop.f32.mrf.mxu0 }
 0x22e   : > { %v5330_v13 = vadd.f32 %v8245_v47, %v5215_v18  ;;  %v5213_v4 = vadd.f32 %v5156_v61, %v4677_v33  ;;  %v4633_v28 = vpop.f32.mrf.mxu1 }
 0x22f   : > { %v5579_v14 = vsel %vm8283_vm13, %v6140_v27, %v5578_v38  ;;  %v5580_v50 = vrot.slane %v5578_v38, 4  ;;  %v5607_v12 = vrot.slane %v6196_v56, 5  ;;  %v5218_v26 = vadd.f32 %v6925_v45, %v4682_v34 }
 0x230   : > { %6141 = vst [vmem:[%s8261_s13 + $0x58] sm:$0xf] %v5579_v14  ;;  %v6220_v57 = vpack.c.bf16 %v5363_v32, %v5362_v48  ;;  %v5366_v11 = vmax.f32 %v5330_v13, 0.0  ;;  %v5328_v16 = vadd.f32 %v8245_v47, %v5213_v4  ;;  %v4680_v6 = vadd.f32 %v4633_v28, %v8234_v25  ;;  %v6874_v15 = vpop.f32.mrf.mxu1 }
 0x231   : > { %v5582_v30 = vsel %vm8283_vm13, %v5580_v50, %v5581_v20  ;;  %v5333_v61 = vadd.f32 %v8245_v47, %v5218_v26  ;;  %v4683_v2 = vadd.f32 %v6874_v15, %v8237_v3  ;;  %v5609_v25 = vrot.slane %v5607_v12, 4 }
 0x232   : > { %6142 = vst [vmem:[%s8261_s13 + $0x5c] sm:$0xf] %v5582_v30  ;;  %6224 = vst [vmem:[%s8261_s13 + $0x60] sm:$0xff] %v6220_v57   ;;  %v6197_v19 = vpack.c.bf16 %v5366_v11, %v5366_v11  ;;  %v5364_v8 = vmax.f32 %v5328_v16, 0.0  ;;  %v5216_v60 = vadd.f32 %v5169_v42, %v4680_v6  ;;  %v4636_v52 = vpop.f32.mrf.mxu1 }
 0x233   : > { %v5369_v55 = vmax.f32 %v5333_v61, 0.0  ;;  %v5219_v5 = vadd.f32 %v6926_v9, %v4683_v2  ;;  %v4681_v35 = vadd.f32 %v4636_v52, %v8240_v23 }
 0x234   : > { %v5610_v40 = vrot.slane %v6197_v19, 5  ;;  %v6195_v51 = vpack.c.bf16 %v5364_v8, %v5364_v8  ;;  %v5331_v31 = vadd.f32 %v8245_v47, %v5216_v60  ;;  %v6155_v37 = vrot.slane %v6197_v19, 10 }
 0x235   : > { %v6200_v24 = vpack.c.bf16 %v5369_v55, %v5369_v55  ;;  %v5334_v3 = vadd.f32 %v8245_v47, %v5219_v5  ;;  %v5217_v54 = vadd.f32 %v5172_v46, %v4681_v35 }
 0x236   : > { %v5611_v7 = vsel %vm8264_vm8, %v5609_v25, %v5610_v40  ;;  %v6150_v41 = vrot.slane %v6195_v51, 9  ;;  %v5367_v45 = vmax.f32 %v5331_v31, 0.0 }
 0x237   : > { %6152 = vst [vmem:[%s8261_s13 + $0x6c] sm:$0xf] %v5611_v7  ;;  %v5641_v29 = vrot.slane %v6200_v24, 7  ;;  %v5370_v23 = vmax.f32 %v5334_v3, 0.0  ;;  %v5332_v58 = vadd.f32 %v8245_v47, %v5217_v54 }
 0x238   : > { %v5608_v10 = vsel %vm8264_vm8, %v6150_v41, %v5607_v12  ;;  %v6198_v36 = vpack.c.bf16 %v5367_v45, %v5367_v45 }
 0x239   : > { %6151 = vst [vmem:[%s8261_s13 + $0x68] sm:$0xf] %v5608_v10  ;;  %v6201_v17 = vpack.c.bf16 %v5370_v23, %v5370_v23  ;;  %v5368_v43 = vmax.f32 %v5332_v58, 0.0  ;;  %v5643_v21 = vrot.slane %v5641_v29, 4 }
 0x23a   : > { %v5624_v53 = vrot.slane %v6198_v36, 6 }
 0x23b   : > { %v5644_v49 = vrot.slane %v6201_v17, 7  ;;  %v6199_v48 = vpack.c.bf16 %v5368_v43, %v5368_v43 }
 0x23c   : > { %v5625_v63 = vsel %vm8299_vm14, %v6155_v37, %v5624_v53  ;;  %v5626_v0 = vrot.slane %v5624_v53, 4 }
 0x23d   : > { %6156 = vst [vmem:[%s8261_s13 + $0x70] sm:$0xf] %v5625_v63  ;;  %v5645_v47 = vsel %vm8283_vm13, %v5643_v21, %v5644_v49  ;;  %v5627_v62 = vrot.slane %v6199_v48, 6  ;;  %v6160_v27 = vrot.slane %v6199_v48, 11 }
 0x23e   : > { %6162 = vst [vmem:[%s8261_s13 + $0x7c] sm:$0xf] %v5645_v47 }
 0x23f   : > { %v5628_v44 = vsel %vm8299_vm14, %v5626_v0, %v5627_v62  ;;  %v5642_v18 = vsel %vm8283_vm13, %v6160_v27, %v5641_v29 }
 0x240   : > { %6157 = vst [vmem:[%s8261_s13 + $0x74] sm:$0xf] %v5628_v44  ;;  %6161 = vst [vmem:[%s8261_s13 + $0x78] sm:$0xf] %v5642_v18 }
 0x241 PF: > { %s13_s12 = sadd.s32 1, %s7200_s12  }
 0x242   : > { %p10_p4 = scmp.ge.s32.totalorder %s13_s12, 4  }
 0x244   :  { %12 = sbr.rel (!%p10_p4) target bundleno = 1 (0x1), region = 85 }

// kernel: forward_pallas.31
= control target key start
LH: loop header
LB: loop body
LE: loop exit
PB: predicated region body
PF: predicated region fallthrough
CT: control target
= control target key end

     0   :  { %s853_s12 = smov 0   ;;  %s984_s0 = inlined_call_operand.vmem [shape: bf16[4,2,128], index: 0, kind: input, shape index: {}]   ;;  %s985_s1 = inlined_call_operand.vmem [shape: bf16[2,128,256], index: 1, kind: input, shape index: {}]   ;;  %s986_s2 = inlined_call_operand.vmem [shape: f32[1,256], index: 2, kind: input, shape index: {}]   ;;  %s987_s3 = inlined_call_operand.vmem [shape: bf16[4,2,2,256], index: 3, kind: output, shape index: {}]  }
   0x1 LB: > { %s695_s13 = sadd.s32 4294967295, %s828_s12   ;;  %p699_p0 = scmp.ge.s32.totalorder %s828_s12, 1  ;;  %s828_s12 = sphi %s853_s12, %s13_s12  }
   0x2   : > { %p137_p1 = scmp.lt.s32.totalorder %s828_s12, 3 }
   0x4   : > { %p138_p2 = pnand %p699_p0, %p137_p1 }
   0x5   : > { %s700_s5 = sshll.u32 (!%p138_p2), %s695_s13, 1 }
   0x6   : > { %141 = sbr.rel (%p138_p2) target bundleno = 260 (0x104), region = 32  ;;  %p161_p3 = scmp.lt.s32.totalorder (!%p138_p2), %s700_s5, 3 }
   0xb   : > { %v774_v0 = vld [vmem:[%s985_s1 + $0x74] ss:$8 sps:$4 sm:$0xff]   ;;  %v830_v2 = vmov 0   ;;  %v778_v3 = vld [vmem:[%s985_s1 + $0x70] ss:$8 sps:$4 sm:$0xff]   ;;  %s989_s5 = smov (!%p161_p3, %s700_s5), 3  ;;  %v192_v21 = vlaneseq }
   0xc   : > { %v776_v1 = vld [vmem:[%s985_s1 + $0xf4] ss:$8 sps:$4 sm:$0xff]   ;;  %332 = vmatprep.mubr.bf16.mxu0 %v830_v2  ;;  %557 = vmatprep.mubr.bf16.mxu1 %v830_v2  ;;  %v779_v4 = vld [vmem:[%s985_s1 + $0xf0] ss:$8 sps:$4 sm:$0xff]   ;;  %v780_v5 = vld [vmem:[%s985_s1 + $0x64] ss:$8 sps:$4 sm:$0xff]   ;;  %s163_s9 = scalar_lea.vmem %s984_s0, %s989_s5 }
   0xd   : > { %300 = vmatprep.subr.bf16.mxu0 %v774_v0  ;;  %525 = vmatprep.subr.bf16.mxu1 %v776_v1  ;;  %v782_v6 = vld [vmem:[%s985_s1 + $0xe4] ss:$8 sps:$4 sm:$0xff]   ;;  %v784_v7 = vld [vmem:[%s985_s1 + $0x60] ss:$8 sps:$4 sm:$0xff]   ;;  %v786_v9 = vld [vmem:[%s985_s1 + $0x54] ss:$8 sps:$4 sm:$0xff]  }
   0xe   : > { %301 = vmatpush1.bf16.msra.mxu0 %v778_v3  ;;  %526 = vmatpush1.bf16.msra.mxu1 %v779_v4  ;;  %v785_v8 = vld [vmem:[%s985_s1 + $0xe0] ss:$8 sps:$4 sm:$0xff]   ;;  %v788_v10 = vld [vmem:[%s985_s1 + $0xd4] ss:$8 sps:$4 sm:$0xff]   ;;  %v790_v11 = vld [vmem:[%s985_s1 + $0x50] ss:$8 sps:$4 sm:$0xff]  }
   0xf   : > { %302 = vmatprep.subr.bf16.mxu0 %v780_v5  ;;  %527 = vmatprep.subr.bf16.mxu1 %v782_v6  ;;  %v791_v12 = vld [vmem:[%s985_s1 + $0xd0] ss:$8 sps:$4 sm:$0xff]   ;;  %v792_v13 = vld [vmem:[%s985_s1 + $0x44] ss:$8 sps:$4 sm:$0xff]   ;;  %v796_v15 = vld [vmem:[%s985_s1 + $0x40] ss:$8 sps:$4 sm:$0xff]  }
  0x10   : > { %v794_v14 = vld [vmem:[%s985_s1 + $0xc4] ss:$8 sps:$4 sm:$0xff]   ;;  %v797_v16 = vld [vmem:[%s985_s1 + $0xc0] ss:$8 sps:$4 sm:$0xff]   ;;  %v798_v17 = vld [vmem:[%s985_s1 + $0x34] ss:$8 sps:$4 sm:$0xff]  }
  0x11   : > { %v800_v18 = vld [vmem:[%s985_s1 + $0xb4] ss:$8 sps:$4 sm:$0xff]   ;;  %v802_v19 = vld [vmem:[%s985_s1 + $0x30] ss:$8 sps:$4 sm:$0xff]   ;;  %v831_v22 = vmov 1966171168  }
  0x12   : > { %303 = vmatpush1.bf16.msra.mxu0 %v784_v7  ;;  %528 = vmatpush1.bf16.msra.mxu1 %v785_v8  ;;  %v803_v20 = vld [vmem:[%s985_s1 + $0xb0] ss:$8 sps:$4 sm:$0xff]   ;;  %v206_v23 = vunpack.c.l.s4 %v831_v22  ;;  %v804_v24 = vld [vmem:[%s985_s1 + $0x24] ss:$8 sps:$4 sm:$0xff]   ;;  %v808_v26 = vld [vmem:[%s985_s1 + $0x20] ss:$8 sps:$4 sm:$0xff]  }
  0x13   : > { %304 = vmatprep.subr.bf16.mxu0 %v786_v9  ;;  %529 = vmatprep.subr.bf16.mxu1 %v788_v10  ;;  %v806_v25 = vld [vmem:[%s985_s1 + $0xa4] ss:$8 sps:$4 sm:$0xff]   ;;  %v193_v27 = vshrl.u32 %v192_v21, 7  ;;  %v809_v29 = vld [vmem:[%s985_s1 + $0xa0] ss:$8 sps:$4 sm:$0xff]  }
  0x14   : > { %v207_v28 = vunpack.c.0.s8 %v206_v23  ;;  %v810_v30 = vld [vmem:[%s985_s1 + $0x14] ss:$8 sps:$4 sm:$0xff]   ;;  %v172_v32 = vld [vmem:[%s163_s9] sm:$0x1]  ;;  %v173_v33 = vld [vmem:[%s163_s9 + $0x1] sm:$0x1] }
  0x15   : > { %v812_v31 = vld [vmem:[%s985_s1 + $0x94] ss:$8 sps:$4 sm:$0xff]   ;;  %v204_v34 = vcombine.low %v172_v32, %v173_v33  ;;  %v814_v36 = vld [vmem:[%s985_s1 + $0x10] ss:$8 sps:$4 sm:$0xff]   ;;  %v816_v38 = vld [vmem:[%s985_s1 + $0x4] ss:$8 sps:$4 sm:$0xff]  }
  0x16   : > { %305 = vmatpush1.bf16.msra.mxu0 %v790_v11  ;;  %530 = vmatpush1.bf16.msra.mxu1 %v791_v12  ;;  %v945_v35 = vsub.s32 %v207_v28, %v193_v27  ;;  %v815_v37 = vld [vmem:[%s985_s1 + $0x90] ss:$8 sps:$4 sm:$0xff]   ;;  %v818_v39 = vld [vmem:[%s985_s1 + $0x84] ss:$8 sps:$4 sm:$0xff]   ;;  %v820_v41 = vld [vmem:[%s985_s1] ss:$8 sps:$4 sm:$0xff]  }
  0x17   : > { %306 = vmatprep.subr.bf16.mxu0 %v792_v13  ;;  %531 = vmatprep.subr.bf16.mxu1 %v794_v14  ;;  %v821_v42 = vld [vmem:[%s985_s1 + $0x80] ss:$8 sps:$4 sm:$0xff]   ;;  %v194_v44 = vsub.s32 0, %v193_v27  ;;  %v198_v47 = vsub.s32 1, %v193_v27  ;;  %v832_v48 = vmov 1983009808  }
  0x18   : > { %v211_v40 = vrot.slane %v204_v34, %v945_v35  ;;  %v190_v45 = vld [vmem:[%s986_s2] sm:$0x3]  ;;  %v347_v49 = vunpack.c.l.s4 %v832_v48  ;;  %s702_s9 = sshll.u32 %s989_s5, 2 }
  0x19   : > { %v433_v46 = vld [vmem:[%s986_s2] sm:$0x3]  ;;  %v195_v50 = vrot.slane %v190_v45, %v194_v44  ;;  %v199_v52 = vrot.slane %v190_v45, %v198_v47  ;;  %s169_s14 = scalar_lea.vmem %s987_s3, %s702_s9 }
  0x1a   : > { %307 = vmatpush1.bf16.msra.mxu0 %v796_v15  ;;  %532 = vmatpush1.bf16.msra.mxu1 %v797_v16  ;;  %v218_v43 = vrot.slane %v211_v40, %v945_v35  ;;  %v438_v51 = vrot.slane %v433_v46, %v194_v44  ;;  %v442_v53 = vrot.slane %v433_v46, %v198_v47  ;;  %v348_v56 = vunpack.c.0.s8 %v347_v49 }
  0x1b   : > { %308 = vmatprep.subr.bf16.mxu0 %v798_v17  ;;  %533 = vmatprep.subr.bf16.mxu1 %v800_v18 }
  0x1c   : > { %v351_v63 = vsub.s32 %v348_v56, %v193_v27 }
  0x1e   : > { %309 = vmatpush1.bf16.msra.mxu0 %v802_v19  ;;  %534 = vmatpush1.bf16.msra.mxu1 %v803_v20 }
  0x1f   : > { %310 = vmatprep.subr.bf16.mxu0 %v804_v24  ;;  %535 = vmatprep.subr.bf16.mxu1 %v806_v25 }
  0x22   : > { %311 = vmatpush1.bf16.msra.mxu0 %v808_v26  ;;  %536 = vmatpush1.bf16.msra.mxu1 %v809_v29 }
  0x23   : > { %312 = vmatprep.subr.bf16.mxu0 %v810_v30  ;;  %537 = vmatprep.subr.bf16.mxu1 %v812_v31 }
  0x26   : > { %313 = vmatpush1.bf16.msra.mxu0 %v814_v36  ;;  %538 = vmatpush1.bf16.msra.mxu1 %v815_v37 }
  0x27   : > { %314 = vmatprep.subr.bf16.mxu0 %v816_v38  ;;  %539 = vmatprep.subr.bf16.mxu1 %v818_v39 }
  0x2a   : > { %315 = vmatpush1.bf16.msra.mxu0 %v820_v41  ;;  %540 = vmatpush1.bf16.msra.mxu1 %v821_v42 }
  0x2d   : > { %333 = vmatmul.mubr.bf16.vlgmr.msra.gmra.mxu0 %v218_v43  ;;  %558 = vmatmul.mubr.bf16.vlgmr.msra.gmra.mxu1 %v218_v43 }
  0xed   : > { %v334_v54 = vpop.f32.mrf.mxu0  ;;  %v559_v55 = vpop.f32.mrf.mxu1 }
  0xee   : > { %v335_v57 = vadd.f32 %v334_v54, %v195_v50  ;;  %v560_v58 = vadd.f32 %v559_v55, %v438_v51 }
  0xef   : > { %v336_v59 = vpop.f32.mrf.mxu0  ;;  %v561_v60 = vpop.f32.mrf.mxu1 }
  0xf0   : > { %v337_v61 = vadd.f32 %v336_v59, %v199_v52  ;;  %v562_v62 = vadd.f32 %v561_v60, %v442_v53  ;;  %v341_v2 = vmax.f32 %v335_v57, 0.0  ;;  %v566_v3 = vmax.f32 %v560_v58, 0.0 }
  0xf1   : > { %v338_v0 = vpop.f32.mrf.mxu0  ;;  %v563_v1 = vpop.f32.mrf.mxu1 }
  0xf2   : > { %v342_v4 = vmax.f32 %v337_v61, 0.0  ;;  %v567_v5 = vmax.f32 %v562_v62, 0.0 }
  0xf3   : > { %v339_v6 = vpop.f32.mrf.mxu0  ;;  %v564_v7 = vpop.f32.mrf.mxu1 }
  0xf4   : > { %v345_v8 = vcombine.low %v341_v2, %v342_v4  ;;  %v570_v9 = vcombine.low %v566_v3, %v567_v5 }
  0xf6   : > { %v352_v10 = vrot.slane %v345_v8, %v351_v63  ;;  %v577_v11 = vrot.slane %v570_v9, %v351_v63 }
  0xf8   : > { %v353_v12 = vcombine.high %v352_v10, %v352_v10  ;;  %v360_v13 = vrot.slane %v352_v10, %v351_v63  ;;  %v578_v14 = vcombine.high %v577_v11, %v577_v11  ;;  %v585_v15 = vrot.slane %v577_v11, %v351_v63 }
  0xfa   : > { %v361_v16 = vcombine.high %v360_v13, %v360_v13  ;;  %v368_v17 = vrot.slane %v353_v12, %v351_v63  ;;  %v586_v18 = vcombine.high %v585_v15, %v585_v15  ;;  %v593_v19 = vrot.slane %v578_v14, %v351_v63 }
  0xfc   : > { %v369_v20 = vcombine.high %v368_v17, %v368_v17  ;;  %v719_v21 = vpack.c.bf16 %v361_v16, %v360_v13  ;;  %v594_v22 = vcombine.high %v593_v19, %v593_v19  ;;  %v755_v23 = vpack.c.bf16 %v586_v18, %v585_v15 }
  0xfe   : > { %v389_v24 = vrot.slane %v719_v21, %v945_v35  ;;  %v720_v25 = vpack.c.bf16 %v369_v20, %v368_v17  ;;  %v614_v26 = vrot.slane %v755_v23, %v945_v35  ;;  %v756_v27 = vpack.c.bf16 %v594_v22, %v593_v19 }
 0x100   : > { %v404_v28 = vrot.slane %v720_v25, %v945_v35  ;;  %721 = vst.sshfl [vmem:[%s169_s14] sm:$0x5 pattern:$0x73625140] %v389_v24  ;;  %v629_v29 = vrot.slane %v756_v27, %v945_v35 }
 0x101   : > { %761 = vst.sshfl [vmem:[%s169_s14 + $0x2] sm:$0x5 pattern:$0x73625140] %v614_v26 }
 0x102   : > { %722 = vst.sshfl [vmem:[%s169_s14 + $0x4] sm:$0x5 pattern:$0x73625140] %v404_v28 }
 0x103   : > { %762 = vst.sshfl [vmem:[%s169_s14 + $0x6] sm:$0x5 pattern:$0x73625140] %v629_v29 }
 0x104 PF: > { %s13_s12 = sadd.s32 1, %s828_s12  }
 0x105   : > { %p10_p4 = scmp.ge.s32.totalorder %s13_s12, 4  }
 0x107   :  { %12 = sbr.rel (!%p10_p4) target bundleno = 1 (0x1), region = 64 }

// kernel: forward_pallas.34
= control target key start
LH: loop header
LB: loop body
LE: loop exit
PB: predicated region body
PF: predicated region fallthrough
CT: control target
= control target key end

     0   :  { %s902_s12 = smov 0   ;;  %s1035_s0 = inlined_call_operand.vmem [shape: bf16[8,4,128], index: 0, kind: input, shape index: {}]   ;;  %s1036_s1 = inlined_call_operand.vmem [shape: bf16[2,128,256], index: 1, kind: input, shape index: {}]   ;;  %s1037_s2 = inlined_call_operand.vmem [shape: f32[1,256], index: 2, kind: input, shape index: {}]   ;;  %s1038_s3 = inlined_call_operand.vmem [shape: bf16[8,2,4,256], index: 3, kind: output, shape index: {}]  }
   0x1 LB: > { %s725_s13 = sadd.s32 4294967295, %s878_s12   ;;  %p729_p0 = scmp.ge.s32.totalorder %s878_s12, 1  ;;  %s878_s12 = sphi %s902_s12, %s13_s12  }
   0x2   : > { %p138_p1 = scmp.lt.s32.totalorder %s878_s12, 3 }
   0x4   : > { %p139_p2 = pnand %p729_p0, %p138_p1 }
   0x5   : > { %s730_s24 = sshll.u32 (!%p139_p2), %s725_s13, 2 }
   0x6   : > { %142 = sbr.rel (%p139_p2) target bundleno = 258 (0x102), region = 32  ;;  %p164_p3 = scmp.lt.s32.totalorder (!%p139_p2), %s730_s24, 7 }
   0xb   : > { %v824_v0 = vld [vmem:[%s1036_s1 + $0x74] ss:$8 sps:$4 sm:$0xff]   ;;  %v880_v2 = vmov 0   ;;  %v828_v3 = vld [vmem:[%s1036_s1 + $0x70] ss:$8 sps:$4 sm:$0xff]   ;;  %s1040_s24 = smov (!%p164_p3, %s730_s24), 7  ;;  %v199_v21 = vlaneseq }
   0xc   : > { %v826_v1 = vld [vmem:[%s1036_s1 + $0xf4] ss:$8 sps:$4 sm:$0xff]   ;;  %343 = vmatprep.mubr.bf16.mxu0 %v880_v2  ;;  %575 = vmatprep.mubr.bf16.mxu1 %v880_v2  ;;  %v829_v4 = vld [vmem:[%s1036_s1 + $0xf0] ss:$8 sps:$4 sm:$0xff]   ;;  %v830_v5 = vld [vmem:[%s1036_s1 + $0x64] ss:$8 sps:$4 sm:$0xff]  }
   0xd   : > { %311 = vmatprep.subr.bf16.mxu0 %v824_v0  ;;  %543 = vmatprep.subr.bf16.mxu1 %v826_v1  ;;  %v832_v6 = vld [vmem:[%s1036_s1 + $0xe4] ss:$8 sps:$4 sm:$0xff]   ;;  %v834_v7 = vld [vmem:[%s1036_s1 + $0x60] ss:$8 sps:$4 sm:$0xff]   ;;  %v836_v9 = vld [vmem:[%s1036_s1 + $0x54] ss:$8 sps:$4 sm:$0xff]  }
   0xe   : > { %312 = vmatpush1.bf16.msra.mxu0 %v828_v3  ;;  %544 = vmatpush1.bf16.msra.mxu1 %v829_v4  ;;  %v835_v8 = vld [vmem:[%s1036_s1 + $0xe0] ss:$8 sps:$4 sm:$0xff]   ;;  %v838_v10 = vld [vmem:[%s1036_s1 + $0xd4] ss:$8 sps:$4 sm:$0xff]   ;;  %v840_v11 = vld [vmem:[%s1036_s1 + $0x50] ss:$8 sps:$4 sm:$0xff]  }
   0xf   : > { %313 = vmatprep.subr.bf16.mxu0 %v830_v5  ;;  %545 = vmatprep.subr.bf16.mxu1 %v832_v6  ;;  %v841_v12 = vld [vmem:[%s1036_s1 + $0xd0] ss:$8 sps:$4 sm:$0xff]   ;;  %v842_v13 = vld [vmem:[%s1036_s1 + $0x44] ss:$8 sps:$4 sm:$0xff]   ;;  %v846_v15 = vld [vmem:[%s1036_s1 + $0x40] ss:$8 sps:$4 sm:$0xff]  }
  0x10   : > { %v844_v14 = vld [vmem:[%s1036_s1 + $0xc4] ss:$8 sps:$4 sm:$0xff]   ;;  %v847_v16 = vld [vmem:[%s1036_s1 + $0xc0] ss:$8 sps:$4 sm:$0xff]   ;;  %v848_v17 = vld [vmem:[%s1036_s1 + $0x34] ss:$8 sps:$4 sm:$0xff]  }
  0x11   : > { %v850_v18 = vld [vmem:[%s1036_s1 + $0xb4] ss:$8 sps:$4 sm:$0xff]   ;;  %v852_v19 = vld [vmem:[%s1036_s1 + $0x30] ss:$8 sps:$4 sm:$0xff]   ;;  %s731_s30 = sshll.u32 %s1040_s24, 1  ;;  %v200_v27 = vshrl.u32 %v199_v21, 7 }
  0x12   : > { %314 = vmatpush1.bf16.msra.mxu0 %v834_v7  ;;  %546 = vmatpush1.bf16.msra.mxu1 %v835_v8  ;;  %v853_v20 = vld [vmem:[%s1036_s1 + $0xb0] ss:$8 sps:$4 sm:$0xff]   ;;  %v881_v22 = vmov 1983009808   ;;  %v854_v24 = vld [vmem:[%s1036_s1 + $0x24] ss:$8 sps:$4 sm:$0xff]   ;;  %s167_s10 = scalar_lea.vmem %s1035_s0, %s731_s30 }
  0x13   : > { %315 = vmatprep.subr.bf16.mxu0 %v836_v9  ;;  %547 = vmatprep.subr.bf16.mxu1 %v838_v10  ;;  %v216_v23 = vunpack.c.l.s4 %v881_v22  ;;  %v856_v25 = vld [vmem:[%s1036_s1 + $0xa4] ss:$8 sps:$4 sm:$0xff]   ;;  %v858_v26 = vld [vmem:[%s1036_s1 + $0x20] ss:$8 sps:$4 sm:$0xff]   ;;  %v860_v30 = vld [vmem:[%s1036_s1 + $0x14] ss:$8 sps:$4 sm:$0xff]  }
  0x14   : > { %v859_v29 = vld [vmem:[%s1036_s1 + $0xa0] ss:$8 sps:$4 sm:$0xff]   ;;  %v862_v31 = vld [vmem:[%s1036_s1 + $0x94] ss:$8 sps:$4 sm:$0xff]   ;;  %v179_v34 = vld [vmem:[%s167_s10 + $0x4] sm:$0x3] }
  0x15   : > { %v217_v28 = vunpack.c.0.s8 %v216_v23  ;;  %v177_v32 = vld [vmem:[%s167_s10] sm:$0x3]  ;;  %v178_v33 = vld [vmem:[%s167_s10 + $0x2] sm:$0x3]  ;;  %v180_v35 = vld [vmem:[%s167_s10 + $0x6] sm:$0x3] }
  0x16   : > { %316 = vmatpush1.bf16.msra.mxu0 %v840_v11  ;;  %548 = vmatpush1.bf16.msra.mxu1 %v841_v12  ;;  %v213_v36 = vcombine.low %v177_v32, %v178_v33  ;;  %v214_v37 = vcombine.low %v179_v34, %v180_v35  ;;  %v864_v39 = vld [vmem:[%s1036_s1 + $0x10] ss:$8 sps:$4 sm:$0xff]   ;;  %v866_v41 = vld [vmem:[%s1036_s1 + $0x4] ss:$8 sps:$4 sm:$0xff]   ;;  %v870_v45 = vld [vmem:[%s1036_s1] ss:$8 sps:$4 sm:$0xff]  }
  0x17   : > { %317 = vmatprep.subr.bf16.mxu0 %v842_v13  ;;  %549 = vmatprep.subr.bf16.mxu1 %v844_v14  ;;  %v220_v38 = vsub.s32 %v217_v28, %v200_v27  ;;  %v865_v40 = vld [vmem:[%s1036_s1 + $0x90] ss:$8 sps:$4 sm:$0xff]   ;;  %v868_v42 = vld [vmem:[%s1036_s1 + $0x84] ss:$8 sps:$4 sm:$0xff]   ;;  %v871_v46 = vld [vmem:[%s1036_s1 + $0x80] ss:$8 sps:$4 sm:$0xff]  }
  0x18   : > { %v201_v48 = vsub.s32 0, %v200_v27  ;;  %v197_v49 = vld [vmem:[%s1037_s2] sm:$0x3]  ;;  %v205_v51 = vsub.s32 1, %v200_v27  ;;  %s809_s10 = sshll.u32 %s1040_s24, 3 }
  0x19   : > { %v221_v43 = vrot.slane %v213_v36, %v220_v38  ;;  %v228_v44 = vrot.slane %v214_v37, %v220_v38  ;;  %v451_v50 = vld [vmem:[%s1037_s2] sm:$0x3]  ;;  %s1022_s14 = scalar_lea.vmem %s1038_s3, %s809_s10 }
  0x1a   : > { %318 = vmatpush1.bf16.msra.mxu0 %v846_v15  ;;  %550 = vmatpush1.bf16.msra.mxu1 %v847_v16  ;;  %v202_v52 = vrot.slane %v197_v49, %v201_v48  ;;  %v456_v53 = vrot.slane %v451_v50, %v201_v48  ;;  %v206_v54 = vrot.slane %v197_v49, %v205_v51 }
  0x1b   : > { %319 = vmatprep.subr.bf16.mxu0 %v848_v17  ;;  %551 = vmatprep.subr.bf16.mxu1 %v850_v18  ;;  %v229_v47 = vcombine.low %v221_v43, %v228_v44  ;;  %v460_v55 = vrot.slane %v451_v50, %v205_v51 }
  0x1e   : > { %320 = vmatpush1.bf16.msra.mxu0 %v852_v19  ;;  %552 = vmatpush1.bf16.msra.mxu1 %v853_v20 }
  0x1f   : > { %321 = vmatprep.subr.bf16.mxu0 %v854_v24  ;;  %553 = vmatprep.subr.bf16.mxu1 %v856_v25 }
  0x22   : > { %322 = vmatpush1.bf16.msra.mxu0 %v858_v26  ;;  %554 = vmatpush1.bf16.msra.mxu1 %v859_v29 }
  0x23   : > { %323 = vmatprep.subr.bf16.mxu0 %v860_v30  ;;  %555 = vmatprep.subr.bf16.mxu1 %v862_v31 }
  0x26   : > { %324 = vmatpush1.bf16.msra.mxu0 %v864_v39  ;;  %556 = vmatpush1.bf16.msra.mxu1 %v865_v40 }
  0x27   : > { %325 = vmatprep.subr.bf16.mxu0 %v866_v41  ;;  %557 = vmatprep.subr.bf16.mxu1 %v868_v42 }
  0x2a   : > { %326 = vmatpush1.bf16.msra.mxu0 %v870_v45  ;;  %558 = vmatpush1.bf16.msra.mxu1 %v871_v46 }
  0x2d   : > { %344 = vmatmul.mubr.bf16.vlgmr.msra.gmra.mxu0 %v229_v47  ;;  %576 = vmatmul.mubr.bf16.vlgmr.msra.gmra.mxu1 %v229_v47 }
  0xed   : > { %v345_v56 = vpop.f32.mrf.mxu0  ;;  %v577_v57 = vpop.f32.mrf.mxu1 }
  0xee   : > { %v346_v58 = vadd.f32 %v345_v56, %v202_v52  ;;  %v578_v59 = vadd.f32 %v577_v57, %v456_v53 }
  0xef   : > { %v347_v60 = vpop.f32.mrf.mxu0  ;;  %v579_v61 = vpop.f32.mrf.mxu1 }
  0xf0   : > { %v348_v62 = vadd.f32 %v347_v60, %v206_v54  ;;  %v580_v63 = vadd.f32 %v579_v61, %v460_v55  ;;  %v354_v2 = vmax.f32 %v346_v58, 0.0  ;;  %v586_v5 = vmax.f32 %v578_v59, 0.0 }
  0xf1   : > { %v349_v0 = vpop.f32.mrf.mxu0  ;;  %v581_v1 = vpop.f32.mrf.mxu1 }
  0xf2   : > { %v355_v3 = vmax.f32 %v348_v62, 0.0  ;;  %v587_v4 = vmax.f32 %v580_v63, 0.0  ;;  %v350_v6 = vadd.f32 %v349_v0, %v202_v52  ;;  %v582_v19 = vadd.f32 %v581_v1, %v456_v53 }
  0xf3   : > { %v351_v11 = vpop.f32.mrf.mxu0  ;;  %v583_v12 = vpop.f32.mrf.mxu1 }
  0xf4   : > { %v362_v7 = vcombine.low %v354_v2, %v355_v3  ;;  %v363_v8 = vcombine.high %v354_v2, %v355_v3  ;;  %v751_v9 = vcombine.low %v355_v3, %v355_v3  ;;  %v752_v10 = vcombine.high %v355_v3, %v355_v3 }
  0xf5   : > { %v594_v13 = vcombine.low %v586_v5, %v587_v4  ;;  %v595_v14 = vcombine.high %v586_v5, %v587_v4  ;;  %v795_v15 = vcombine.low %v587_v4, %v587_v4  ;;  %v796_v16 = vcombine.high %v587_v4, %v587_v4 }
  0xf6   : > { %v755_v17 = vpack.c.bf16 %v751_v9, %v362_v7  ;;  %v756_v18 = vpack.c.bf16 %v752_v10, %v363_v8  ;;  %v352_v22 = vadd.f32 %v351_v11, %v206_v54  ;;  %v584_v23 = vadd.f32 %v583_v12, %v460_v55 }
  0xf7   : > { %v799_v20 = vpack.c.bf16 %v795_v15, %v594_v13  ;;  %v800_v21 = vpack.c.bf16 %v796_v16, %v595_v14  ;;  %v356_v24 = vmax.f32 %v350_v6, 0.0  ;;  %v588_v27 = vmax.f32 %v582_v19, 0.0 }
  0xf8   : > { %759 = vst.sshfl [vmem:[%s1022_s14] sm:$0x33 pattern:$0x76325410] %v755_v17  ;;  %v357_v25 = vmax.f32 %v352_v22, 0.0  ;;  %v589_v26 = vmax.f32 %v584_v23, 0.0 }
  0xf9   : > { %760 = vst.sshfl [vmem:[%s1022_s14 + $0x8] sm:$0x33 pattern:$0x76325410] %v756_v18 }
  0xfa   : > { %810 = vst.sshfl [vmem:[%s1022_s14 + $0x4] sm:$0x33 pattern:$0x76325410] %v799_v20  ;;  %v364_v28 = vcombine.low %v356_v24, %v357_v25  ;;  %v365_v29 = vcombine.high %v356_v24, %v357_v25  ;;  %v753_v30 = vcombine.low %v357_v25, %v357_v25  ;;  %v754_v31 = vcombine.high %v357_v25, %v357_v25 }
  0xfb   : > { %811 = vst.sshfl [vmem:[%s1022_s14 + $0xc] sm:$0x33 pattern:$0x76325410] %v800_v21  ;;  %v596_v32 = vcombine.low %v588_v27, %v589_v26  ;;  %v597_v33 = vcombine.high %v588_v27, %v589_v26  ;;  %v797_v34 = vcombine.low %v589_v26, %v589_v26  ;;  %v798_v35 = vcombine.high %v589_v26, %v589_v26 }
  0xfc   : > { %v757_v36 = vpack.c.bf16 %v753_v30, %v364_v28  ;;  %v758_v37 = vpack.c.bf16 %v754_v31, %v365_v29 }
  0xfd   : > { %v801_v38 = vpack.c.bf16 %v797_v34, %v596_v32  ;;  %v802_v39 = vpack.c.bf16 %v798_v35, %v597_v33 }
  0xfe   : > { %761 = vst.sshfl [vmem:[%s1022_s14 + $0x10] sm:$0x33 pattern:$0x76325410] %v757_v36 }
  0xff   : > { %762 = vst.sshfl [vmem:[%s1022_s14 + $0x18] sm:$0x33 pattern:$0x76325410] %v758_v37 }
 0x100   : > { %812 = vst.sshfl [vmem:[%s1022_s14 + $0x14] sm:$0x33 pattern:$0x76325410] %v801_v38 }
 0x101   : > { %813 = vst.sshfl [vmem:[%s1022_s14 + $0x1c] sm:$0x33 pattern:$0x76325410] %v802_v39 }
 0x102 PF: > { %s13_s12 = sadd.s32 1, %s878_s12  }
 0x103   : > { %p10_p4 = scmp.ge.s32.totalorder %s13_s12, 4  }
 0x105   :  { %12 = sbr.rel (!%p10_p4) target bundleno = 1 (0x1), region = 64 }

// kernel: forward_pallas.28
= control target key start
LH: loop header
LB: loop body
LE: loop exit
PB: predicated region body
PF: predicated region fallthrough
CT: control target
= control target key end

     0   :  { %s1908_s12 = smov 0   ;;  %s2249_s0 = inlined_call_operand.vmem [shape: bf16[2,20,128], index: 0, kind: input, shape index: {}]   ;;  %s2250_s1 = inlined_call_operand.vmem [shape: bf16[9,128,128], index: 1, kind: input, shape index: {}]   ;;  %s2251_s2 = inlined_call_operand.vmem [shape: f32[1,128], index: 2, kind: input, shape index: {}]   ;;  %s2252_s3 = inlined_call_operand.vmem [shape: bf16[2,2,2,128], index: 3, kind: output, shape index: {}]  }
   0x1 LB: > { %s1307_s13 = sadd.s32 4294967295, %s1883_s12   ;;  %p1311_p0 = scmp.ge.s32.totalorder %s1883_s12, 1  ;;  %s1883_s12 = sphi %s1908_s12, %s13_s12  }
   0x2   : > { %p137_p1 = scmp.lt.s32.totalorder %s1883_s12, 3 }
   0x4   : > { %p138_p2 = pnand %p1311_p0, %p137_p1 }
   0x5   : > { %p160_p3 = scmp.lt.s32.totalorder (!%p138_p2), %s1307_s13, 1 }
   0x6   : > { %141 = sbr.rel (%p138_p2) target bundleno = 380 (0x17c), region = 32 }
   0xb   : > { %v1798_v0 = vld [vmem:[%s2250_s1 + $0x38] sm:$0xff]   ;;  %v1885_v1 = vmov 0.0   ;;  %v1800_v3 = vld [vmem:[%s2250_s1 + $0x30] sm:$0xff]   ;;  %vm1886_vm0 = vmmov 0   ;;  %v1802_v5 = vld [vmem:[%s2250_s1 + $0x28] sm:$0xff]   ;;  %s2254_s13 = smov (!%p160_p3, %s1307_s13), 1 }
   0xc   : > { %1606 = vmatprep.subr.bf16.mxu0 %v1885_v1  ;;  %1626 = vmatprep.subr.bf16.mxu1 %v1885_v1  ;;  %v1799_v2 = vld [vmem:[%s2250_s1 + $0x78] sm:$0xff]   ;;  %v1801_v4 = vld [vmem:[%s2250_s1 + $0x70] sm:$0xff]   ;;  %v1803_v6 = vld [vmem:[%s2250_s1 + $0x68] sm:$0xff]   ;;  %s1786_s30 = smul.u32 12, %s2254_s13  ;;  %s1313_s18 = sshll.u32 %s2254_s13, 1 }
   0xd   : > { %1607 = vmatpush3.bf16.msra.mxu0 %v1798_v0  ;;  %1622 = vmatprep.mubr.msk.bf16.mxu0 %vm1886_vm0, %v1885_v1  ;;  %v1804_v7 = vld [vmem:[%s2250_s1 + $0x20] sm:$0xff]   ;;  %v1806_v9 = vld [vmem:[%s2250_s1 + $0x18] sm:$0xff]   ;;  %v1808_v11 = vld [vmem:[%s2250_s1 + $0x10] sm:$0xff]   ;;  %s168_s21 = scalar_lea.vmem %s2252_s3, %s1313_s18 }
   0xe   : > { %1627 = vmatpush3.bf16.msra.mxu1 %v1799_v2  ;;  %1608 = vmatprep.subr.bf16.mxu0 %v1885_v1  ;;  %v1805_v8 = vld [vmem:[%s2250_s1 + $0x60] sm:$0xff]   ;;  %v1807_v10 = vld [vmem:[%s2250_s1 + $0x58] sm:$0xff]   ;;  %s1965_s10 = scalar_lea.vmem %s2249_s0, %s1786_s30  ;;  %v1809_v13 = vld [vmem:[%s2250_s1 + $0x50] sm:$0xff]  }
   0xf   : > { %1628 = vmatprep.subr.bf16.mxu1 %v1885_v1  ;;  %1642 = vmatprep.mubr.msk.bf16.mxu1 %vm1886_vm0, %v1885_v1  ;;  %v1814_v12 = vld [vmem:[%s1965_s10] sm:$0x1f]   ;;  %v1810_v14 = vld [vmem:[%s2250_s1 + $0x8] sm:$0xff]   ;;  %v1815_v23 = vld [vmem:[%s2250_s1 + $0xb8] sm:$0xff]  }
  0x10   : > { %v304_v15 = vshll.u32 %v1814_v12, 16  ;;  %v1811_v16 = vld [vmem:[%s2250_s1 + $0x48] sm:$0xff]   ;;  %v1812_v17 = vld [vmem:[%s2250_s1] sm:$0xff]   ;;  %v302_v18 = vshrl.u32 %v1814_v12, 16  ;;  %v1816_v24 = vld [vmem:[%s2250_s1 + $0xf8] sm:$0xff]  }
  0x11   : > { %1609 = vmatpush3.bf16.msra.mxu0 %v1800_v3  ;;  %v1813_v20 = vld [vmem:[%s2250_s1 + $0x40] sm:$0xff]   ;;  %v1817_v25 = vld [vmem:[%s2250_s1 + $0xb0] sm:$0xff]   ;;  %v1819_v27 = vld [vmem:[%s2250_s1 + $0xa8] sm:$0xff]  }
  0x12   : > { %1629 = vmatpush3.bf16.msra.mxu1 %v1801_v4  ;;  %1610 = vmatprep.subr.bf16.mxu0 %v1885_v1  ;;  %v306_v19 = vrot.slane %v304_v15, 1  ;;  %v170_v21 = vld [vmem:[%s1965_s10] sm:$0xf]  ;;  %v1818_v26 = vld [vmem:[%s2250_s1 + $0xf0] sm:$0xff]   ;;  %v1820_v28 = vld [vmem:[%s2250_s1 + $0xe8] sm:$0xff]  }
  0x13   : > { %1630 = vmatprep.subr.bf16.mxu1 %v1885_v1  ;;  %v1821_v29 = vld [vmem:[%s2250_s1 + $0xa0] sm:$0xff]   ;;  %v1823_v31 = vld [vmem:[%s2250_s1 + $0x98] sm:$0xff]   ;;  %v1825_v33 = vld [vmem:[%s2250_s1 + $0x90] sm:$0xff]  }
  0x14   : > { %v307_v22 = vor.u32 %v306_v19, %v302_v18  ;;  %v1822_v30 = vld [vmem:[%s2250_s1 + $0xe0] sm:$0xff]   ;;  %v1824_v32 = vld [vmem:[%s2250_s1 + $0xd8] sm:$0xff]   ;;  %v1826_v34 = vld [vmem:[%s2250_s1 + $0xd0] sm:$0xff]  }
  0x15   : > { %1611 = vmatpush3.bf16.msra.mxu0 %v1802_v5  ;;  %v1827_v35 = vld [vmem:[%s2250_s1 + $0x88] sm:$0xff]   ;;  %v1829_v37 = vld [vmem:[%s2250_s1 + $0x80] sm:$0xff]   ;;  %v1832_v42 = vld [vmem:[%s2250_s1 + $0x138] sm:$0xff]  }
  0x16   : > { %1631 = vmatpush3.bf16.msra.mxu1 %v1803_v6  ;;  %1612 = vmatprep.subr.bf16.mxu0 %v1885_v1  ;;  %v1828_v36 = vld [vmem:[%s2250_s1 + $0xc8] sm:$0xff]   ;;  %v1831_v38 = vld [vmem:[%s1965_s10] sm:$0x1e]   ;;  %v1834_v44 = vld [vmem:[%s2250_s1 + $0x178] sm:$0xff]  }
  0x17   : > { %1632 = vmatprep.subr.bf16.mxu1 %v1885_v1  ;;  %v1833_v39 = vld [vmem:[%s1965_s10] sm:$0x3c]   ;;  %v424_v41 = vrot.slane %v1831_v38, 1  ;;  %v1835_v45 = vld [vmem:[%s2250_s1 + $0x130] sm:$0xff]   ;;  %v1837_v47 = vld [vmem:[%s2250_s1 + $0x128] sm:$0xff]  }
  0x18   : > { %v1830_v40 = vld [vmem:[%s2250_s1 + $0xc0] sm:$0xff]   ;;  %v541_v43 = vrot.slane %v1833_v39, 2  ;;  %v1836_v46 = vld [vmem:[%s2250_s1 + $0x170] sm:$0xff]   ;;  %v1838_v48 = vld [vmem:[%s2250_s1 + $0x168] sm:$0xff]  }
  0x19   : > { %1613 = vmatpush3.bf16.msra.mxu0 %v1804_v7  ;;  %v1839_v49 = vld [vmem:[%s2250_s1 + $0x120] sm:$0xff]   ;;  %v1841_v51 = vld [vmem:[%s2250_s1 + $0x118] sm:$0xff]   ;;  %v1843_v54 = vld [vmem:[%s2250_s1 + $0x110] sm:$0xff]  }
  0x1a   : > { %1633 = vmatpush3.bf16.msra.mxu1 %v1805_v8  ;;  %1614 = vmatprep.subr.bf16.mxu0 %v1885_v1  ;;  %v1840_v50 = vld [vmem:[%s2250_s1 + $0x160] sm:$0xff]   ;;  %v1842_v52 = vld [vmem:[%s2250_s1 + $0x158] sm:$0xff]   ;;  %v1844_v55 = vld [vmem:[%s2250_s1 + $0x150] sm:$0xff]  }
  0x1b   : > { %1634 = vmatprep.subr.bf16.mxu1 %v1885_v1  ;;  %v1849_v53 = vld [vmem:[%s1965_s10] sm:$0x7c]   ;;  %v1845_v58 = vld [vmem:[%s2250_s1 + $0x108] sm:$0xff]   ;;  %v1850_v3 = vld [vmem:[%s2250_s1 + $0x1b8] sm:$0xff]  }
  0x1c   : > { %v659_v56 = vshrl.u32 %v1849_v53, 16  ;;  %v662_v57 = vshll.u32 %v1849_v53, 16  ;;  %v1846_v59 = vld [vmem:[%s2250_s1 + $0x148] sm:$0xff]   ;;  %v1847_v62 = vld [vmem:[%s2250_s1 + $0x100] sm:$0xff]   ;;  %v1852_v5 = vld [vmem:[%s2250_s1 + $0x1f8] sm:$0xff]  }
  0x1d   : > { %1615 = vmatpush3.bf16.msra.mxu0 %v1806_v9  ;;  %v1851_v63 = vld [vmem:[%s1965_s10] sm:$0x78]   ;;  %v1853_v6 = vld [vmem:[%s2250_s1 + $0x1b0] sm:$0xff]   ;;  %v1855_v8 = vld [vmem:[%s2250_s1 + $0x1a8] sm:$0xff]  }
  0x1e   : > { %1635 = vmatpush3.bf16.msra.mxu1 %v1807_v10  ;;  %1616 = vmatprep.subr.bf16.mxu0 %v1885_v1  ;;  %v661_v60 = vrot.slane %v659_v56, 2  ;;  %v664_v61 = vrot.slane %v662_v57, 3  ;;  %v1848_v0 = vld [vmem:[%s2250_s1 + $0x140] sm:$0xff]   ;;  %v782_v4 = vrot.slane %v1851_v63, 3  ;;  %v1854_v7 = vld [vmem:[%s2250_s1 + $0x1f0] sm:$0xff]   ;;  %v1856_v9 = vld [vmem:[%s2250_s1 + $0x1e8] sm:$0xff]  }
  0x1f   : > { %1636 = vmatprep.subr.bf16.mxu1 %v1885_v1  ;;  %v1857_v10 = vld [vmem:[%s2250_s1 + $0x1a0] sm:$0xff]   ;;  %v1859_v12 = vld [vmem:[%s2250_s1 + $0x198] sm:$0xff]   ;;  %v1864_v19 = vld [vmem:[%s2250_s1 + $0x1c8] sm:$0xff]  }
  0x20   : > { %v665_v2 = vor.u32 %v664_v61, %v661_v60  ;;  %v1868_v15 = vld [vmem:[%s1965_s10 + $0x4] sm:$0x1f]  }
  0x21   : > { %1617 = vmatpush3.bf16.msra.mxu0 %v1808_v11  ;;  %v1858_v11 = vld [vmem:[%s2250_s1 + $0x1e0] sm:$0xff]   ;;  %v1011_v18 = vshll.u32 %v1868_v15, 16 }
  0x22   : > { %1637 = vmatpush3.bf16.msra.mxu1 %v1809_v13  ;;  %1618 = vmatprep.subr.bf16.mxu0 %v1885_v1  ;;  %v1860_v13 = vld [vmem:[%s2250_s1 + $0x1d8] sm:$0xff]  }
  0x23   : > { %1638 = vmatprep.subr.bf16.mxu1 %v1885_v1 }
  0x25   : > { %1619 = vmatpush3.bf16.msra.mxu0 %v1810_v14  ;;  %v1861_v14 = vld [vmem:[%s2250_s1 + $0x190] sm:$0xff]  }
  0x26   : > { %1639 = vmatpush3.bf16.msra.mxu1 %v1811_v16  ;;  %1620 = vmatprep.subr.bf16.mxu0 %v1885_v1  ;;  %v1862_v16 = vld [vmem:[%s2250_s1 + $0x1d0] sm:$0xff]  }
  0x27   : > { %1640 = vmatprep.subr.bf16.mxu1 %v1885_v1 }
  0x29   : > { %1621 = vmatpush3.bf16.msra.mxu0 %v1812_v17  ;;  %v1863_v17 = vld [vmem:[%s2250_s1 + $0x188] sm:$0xff]  }
  0x2a   : > { %1641 = vmatpush3.bf16.msra.mxu1 %v1813_v20  ;;  %1646 = vmatprep.subr.bf16.mxu0 %v1885_v1  ;;  %v1865_v20 = vld [vmem:[%s2250_s1 + $0x180] sm:$0xff]  }
  0x2b   : > { %1666 = vmatprep.subr.bf16.mxu1 %v1885_v1 }
  0x2c   : > { %1623 = vmatmul.mubr.bf16.vlgmr.msra.gmra.mxu0 %v170_v21  ;;  %v1009_v21 = vshrl.u32 %v1868_v15, 16  ;;  %v1521_v15 = vld [vmem:[%s2251_s2] ss:$0 sm:$0xff] }
  0x2d   : > { %1643 = vmatmul.mubr.bf16.vlgmr.msra.gmra.mxu1 %v307_v22  ;;  %1647 = vmatpush3.bf16.msra.mxu0 %v1815_v23  ;;  %v1013_v22 = vrot.slane %v1011_v18, 1  ;;  %v1866_v23 = vld [vmem:[%s2250_s1 + $0x1c0] sm:$0xff]  }
  0x2e   : > { %1667 = vmatpush3.bf16.msra.mxu1 %v1816_v24  ;;  %1648 = vmatprep.subr.bf16.mxu0 %v1885_v1  ;;  %v875_v24 = vld [vmem:[%s1965_s10 + $0x4] sm:$0xf] }
  0x2f   : > { %1668 = vmatprep.subr.bf16.mxu1 %v1885_v1  ;;  %1662 = vmatprep.mubr.msk.bf16.mxu0 %vm1886_vm0, %v1885_v1 }
  0x30   : > { %1682 = vmatprep.mubr.msk.bf16.mxu1 %vm1886_vm0, %v1885_v1 }
  0x31   : > { %1649 = vmatpush3.bf16.msra.mxu0 %v1817_v25  ;;  %v1867_v25 = vld [vmem:[%s2250_s1 + $0x238] sm:$0xff]  }
  0x32   : > { %1669 = vmatpush3.bf16.msra.mxu1 %v1818_v26  ;;  %1650 = vmatprep.subr.bf16.mxu0 %v1885_v1  ;;  %v1014_v26 = vor.u32 %v1013_v22, %v1009_v21 }
  0x33   : > { %1670 = vmatprep.subr.bf16.mxu1 %v1885_v1 }
  0x35   : > { %1651 = vmatpush3.bf16.msra.mxu0 %v1819_v27  ;;  %v1869_v27 = vld [vmem:[%s2250_s1 + $0x230] sm:$0xff]  }
  0x36   : > { %1671 = vmatpush3.bf16.msra.mxu1 %v1820_v28  ;;  %1652 = vmatprep.subr.bf16.mxu0 %v1885_v1  ;;  %v1870_v28 = vld [vmem:[%s2250_s1 + $0x228] sm:$0xff]  }
  0x37   : > { %1672 = vmatprep.subr.bf16.mxu1 %v1885_v1 }
  0x39   : > { %1653 = vmatpush3.bf16.msra.mxu0 %v1821_v29  ;;  %v1871_v29 = vld [vmem:[%s2250_s1 + $0x220] sm:$0xff]  }
  0x3a   : > { %1673 = vmatpush3.bf16.msra.mxu1 %v1822_v30  ;;  %1654 = vmatprep.subr.bf16.mxu0 %v1885_v1  ;;  %v1872_v30 = vld [vmem:[%s2250_s1 + $0x218] sm:$0xff]  }
  0x3b   : > { %1674 = vmatprep.subr.bf16.mxu1 %v1885_v1 }
  0x3d   : > { %1655 = vmatpush3.bf16.msra.mxu0 %v1823_v31  ;;  %v1873_v31 = vld [vmem:[%s2250_s1 + $0x210] sm:$0xff]  }
  0x3e   : > { %1675 = vmatpush3.bf16.msra.mxu1 %v1824_v32  ;;  %1656 = vmatprep.subr.bf16.mxu0 %v1885_v1  ;;  %v1874_v32 = vld [vmem:[%s2250_s1 + $0x208] sm:$0xff]  }
  0x3f   : > { %1676 = vmatprep.subr.bf16.mxu1 %v1885_v1 }
  0x41   : > { %1657 = vmatpush3.bf16.msra.mxu0 %v1825_v33  ;;  %v1876_v33 = vld [vmem:[%s1965_s10 + $0x4] sm:$0x1e]  }
  0x42   : > { %1677 = vmatpush3.bf16.msra.mxu1 %v1826_v34  ;;  %1658 = vmatprep.subr.bf16.mxu0 %v1885_v1  ;;  %v1875_v34 = vld [vmem:[%s2250_s1 + $0x200] sm:$0xff]  }
  0x43   : > { %1678 = vmatprep.subr.bf16.mxu1 %v1885_v1 }
  0x45   : > { %1659 = vmatpush3.bf16.msra.mxu0 %v1827_v35  ;;  %v1131_v35 = vrot.slane %v1876_v33, 1 }
  0x46   : > { %1679 = vmatpush3.bf16.msra.mxu1 %v1828_v36  ;;  %1660 = vmatprep.subr.bf16.mxu0 %v1885_v1 }
  0x47   : > { %1680 = vmatprep.subr.bf16.mxu1 %v1885_v1 }
  0x49   : > { %1661 = vmatpush3.bf16.msra.mxu0 %v1829_v37 }
  0x4a   : > { %1681 = vmatpush3.bf16.msra.mxu1 %v1830_v40  ;;  %1686 = vmatprep.subr.bf16.mxu0 %v1885_v1 }
  0x4b   : > { %1706 = vmatprep.subr.bf16.mxu1 %v1885_v1 }
  0x4c   : > { %1663 = vmatmul.mubr.bf16.vlgmr.msra.gmra.mxu0 %v424_v41 }
  0x4d   : > { %1687 = vmatpush3.bf16.msra.mxu0 %v1832_v42  ;;  %1683 = vmatmul.mubr.bf16.vlgmr.msra.gmra.mxu1 %v541_v43 }
  0x4e   : > { %1707 = vmatpush3.bf16.msra.mxu1 %v1834_v44  ;;  %1688 = vmatprep.subr.bf16.mxu0 %v1885_v1 }
  0x4f   : > { %1708 = vmatprep.subr.bf16.mxu1 %v1885_v1  ;;  %1702 = vmatprep.mubr.msk.bf16.mxu0 %vm1886_vm0, %v1885_v1 }
  0x50   : > { %1722 = vmatprep.mubr.msk.bf16.mxu1 %vm1886_vm0, %v1885_v1 }
  0x51   : > { %1689 = vmatpush3.bf16.msra.mxu0 %v1835_v45 }
  0x52   : > { %1709 = vmatpush3.bf16.msra.mxu1 %v1836_v46  ;;  %1690 = vmatprep.subr.bf16.mxu0 %v1885_v1 }
  0x53   : > { %1710 = vmatprep.subr.bf16.mxu1 %v1885_v1 }
  0x55   : > { %1691 = vmatpush3.bf16.msra.mxu0 %v1837_v47 }
  0x56   : > { %1711 = vmatpush3.bf16.msra.mxu1 %v1838_v48  ;;  %1692 = vmatprep.subr.bf16.mxu0 %v1885_v1 }
  0x57   : > { %1712 = vmatprep.subr.bf16.mxu1 %v1885_v1 }
  0x59   : > { %1693 = vmatpush3.bf16.msra.mxu0 %v1839_v49 }
  0x5a   : > { %1713 = vmatpush3.bf16.msra.mxu1 %v1840_v50  ;;  %1694 = vmatprep.subr.bf16.mxu0 %v1885_v1 }
  0x5b   : > { %1714 = vmatprep.subr.bf16.mxu1 %v1885_v1 }
  0x5d   : > { %1695 = vmatpush3.bf16.msra.mxu0 %v1841_v51 }
  0x5e   : > { %1715 = vmatpush3.bf16.msra.mxu1 %v1842_v52  ;;  %1696 = vmatprep.subr.bf16.mxu0 %v1885_v1 }
  0x5f   : > { %1716 = vmatprep.subr.bf16.mxu1 %v1885_v1 }
  0x61   : > { %1697 = vmatpush3.bf16.msra.mxu0 %v1843_v54 }
  0x62   : > { %1717 = vmatpush3.bf16.msra.mxu1 %v1844_v55  ;;  %1698 = vmatprep.subr.bf16.mxu0 %v1885_v1 }
  0x63   : > { %1718 = vmatprep.subr.bf16.mxu1 %v1885_v1 }
  0x65   : > { %1699 = vmatpush3.bf16.msra.mxu0 %v1845_v58 }
  0x66   : > { %1719 = vmatpush3.bf16.msra.mxu1 %v1846_v59  ;;  %1700 = vmatprep.subr.bf16.mxu0 %v1885_v1 }
  0x67   : > { %1720 = vmatprep.subr.bf16.mxu1 %v1885_v1 }
  0x69   : > { %1701 = vmatpush3.bf16.msra.mxu0 %v1847_v62 }
  0x6a   : > { %1721 = vmatpush3.bf16.msra.mxu1 %v1848_v0  ;;  %1726 = vmatprep.subr.bf16.mxu0 %v1885_v1 }
  0x6b   : > { %1746 = vmatprep.subr.bf16.mxu1 %v1885_v1 }
  0x6c   : > { %1703 = vmatmul.mubr.bf16.vlgmr.msra.gmra.mxu0 %v665_v2 }
  0x6d   : > { %1727 = vmatpush3.bf16.msra.mxu0 %v1850_v3  ;;  %1723 = vmatmul.mubr.bf16.vlgmr.msra.gmra.mxu1 %v782_v4 }
  0x6e   : > { %1747 = vmatpush3.bf16.msra.mxu1 %v1852_v5  ;;  %1728 = vmatprep.subr.bf16.mxu0 %v1885_v1 }
  0x6f   : > { %1748 = vmatprep.subr.bf16.mxu1 %v1885_v1  ;;  %1742 = vmatprep.mubr.msk.bf16.mxu0 %vm1886_vm0, %v1885_v1 }
  0x70   : > { %1762 = vmatprep.mubr.msk.bf16.mxu1 %vm1886_vm0, %v1885_v1 }
  0x71   : > { %1729 = vmatpush3.bf16.msra.mxu0 %v1853_v6 }
  0x72   : > { %1749 = vmatpush3.bf16.msra.mxu1 %v1854_v7  ;;  %1730 = vmatprep.subr.bf16.mxu0 %v1885_v1 }
  0x73   : > { %1750 = vmatprep.subr.bf16.mxu1 %v1885_v1 }
  0x75   : > { %1731 = vmatpush3.bf16.msra.mxu0 %v1855_v8 }
  0x76   : > { %1751 = vmatpush3.bf16.msra.mxu1 %v1856_v9  ;;  %1732 = vmatprep.subr.bf16.mxu0 %v1885_v1 }
  0x77   : > { %1752 = vmatprep.subr.bf16.mxu1 %v1885_v1 }
  0x79   : > { %1733 = vmatpush3.bf16.msra.mxu0 %v1857_v10  ;;  %v1887_v10 = vmov 1966171168  }
  0x7a   : > { %1753 = vmatpush3.bf16.msra.mxu1 %v1858_v11  ;;  %1734 = vmatprep.subr.bf16.mxu0 %v1885_v1  ;;  %v1237_v11 = vunpack.c.l.s4 %v1887_v10 }
  0x7b   : > { %1754 = vmatprep.subr.bf16.mxu1 %v1885_v1 }
  0x7d   : > { %1735 = vmatpush3.bf16.msra.mxu0 %v1859_v12  ;;  %v1239_v12 = vlaneseq }
  0x7e   : > { %1755 = vmatpush3.bf16.msra.mxu1 %v1860_v13  ;;  %1736 = vmatprep.subr.bf16.mxu0 %v1885_v1 }
  0x7f   : > { %1756 = vmatprep.subr.bf16.mxu1 %v1885_v1  ;;  %v1240_v18 = vshrl.u32 %v1239_v12, 7 }
  0x81   : > { %1737 = vmatpush3.bf16.msra.mxu0 %v1861_v14 }
  0x82   : > { %1757 = vmatpush3.bf16.msra.mxu1 %v1862_v16  ;;  %1738 = vmatprep.subr.bf16.mxu0 %v1885_v1 }
  0x83   : > { %1758 = vmatprep.subr.bf16.mxu1 %v1885_v1 }
  0x85   : > { %1739 = vmatpush3.bf16.msra.mxu0 %v1863_v17  ;;  %v1238_v17 = vunpack.c.0.s8 %v1237_v11 }
  0x86   : > { %1759 = vmatpush3.bf16.msra.mxu1 %v1864_v19  ;;  %1740 = vmatprep.subr.bf16.mxu0 %v1885_v1 }
  0x87   : > { %1760 = vmatprep.subr.bf16.mxu1 %v1885_v1 }
  0x89   : > { %1741 = vmatpush3.bf16.msra.mxu0 %v1865_v20 }
  0x8a   : > { %1761 = vmatpush3.bf16.msra.mxu1 %v1866_v23  ;;  %1766 = vmatprep.subr.bf16.mxu0 %v1885_v1  ;;  %v1241_v23 = vsub.s32 %v1238_v17, %v1240_v18 }
  0x8c   : > { %1743 = vmatmul.mubr.bf16.vlgmr.msra.gmra.mxu0 %v875_v24 }
  0x8d   : > { %1767 = vmatpush3.bf16.msra.mxu0 %v1867_v25  ;;  %1763 = vmatmul.mubr.bf16.vlgmr.msra.gmra.mxu1 %v1014_v26 }
  0x8e   : > { %1768 = vmatprep.subr.bf16.mxu0 %v1885_v1  ;;  %1782 = vmatprep.mubr.msk.bf16.mxu0 %vm1886_vm0, %v1885_v1 }
  0x91   : > { %1769 = vmatpush3.bf16.msra.mxu0 %v1869_v27 }
  0x92   : > { %1770 = vmatprep.subr.bf16.mxu0 %v1885_v1 }
  0x95   : > { %1771 = vmatpush3.bf16.msra.mxu0 %v1870_v28 }
  0x96   : > { %1772 = vmatprep.subr.bf16.mxu0 %v1885_v1 }
  0x99   : > { %1773 = vmatpush3.bf16.msra.mxu0 %v1871_v29 }
  0x9a   : > { %1774 = vmatprep.subr.bf16.mxu0 %v1885_v1 }
  0x9d   : > { %1775 = vmatpush3.bf16.msra.mxu0 %v1872_v30 }
  0x9e   : > { %1776 = vmatprep.subr.bf16.mxu0 %v1885_v1 }
  0xa1   : > { %1777 = vmatpush3.bf16.msra.mxu0 %v1873_v31 }
  0xa2   : > { %1778 = vmatprep.subr.bf16.mxu0 %v1885_v1 }
  0xa5   : > { %1779 = vmatpush3.bf16.msra.mxu0 %v1874_v32 }
  0xa6   : > { %1780 = vmatprep.subr.bf16.mxu0 %v1885_v1 }
  0xa9   : > { %1781 = vmatpush3.bf16.msra.mxu0 %v1875_v34 }
  0xac   : > { %1783 = vmatmul.mubr.bf16.vlgmr.msra.gmra.mxu0 %v1131_v35 }
  0xec   : > { %v269_v36 = vpop.f32.mrf.mxu0 }
  0xed   : > { %v391_v37 = vpop.f32.mrf.mxu1 }
  0xee   : > { %v397_v38 = vadd.f32 %v391_v37, %v269_v36  ;;  %v1624_v39 = vpop.f32.mrf.mxu0 }
  0xef   : > { %v1644_v40 = vpop.f32.mrf.mxu1 }
  0xf0   : > { %v272_v41 = vpop.f32.mrf.mxu0 }
  0xf1   : > { %v394_v42 = vpop.f32.mrf.mxu1 }
  0xf2   : > { %v1625_v43 = vpop.f32.mrf.mxu0 }
  0xf3   : > { %v1645_v44 = vpop.f32.mrf.mxu1 }
 0x10c   : > { %v508_v45 = vpop.f32.mrf.mxu0 }
 0x10d   : > { %v514_v46 = vadd.f32 %v508_v45, %v397_v38  ;;  %v625_v47 = vpop.f32.mrf.mxu1 }
 0x10e   : > { %v1664_v48 = vpop.f32.mrf.mxu0 }
 0x10f   : > { %v631_v49 = vadd.f32 %v625_v47, %v514_v46  ;;  %v1684_v50 = vpop.f32.mrf.mxu1 }
 0x110   : > { %v511_v51 = vpop.f32.mrf.mxu0 }
 0x111   : > { %v628_v1 = vpop.f32.mrf.mxu1 }
 0x112   : > { %v1665_v52 = vpop.f32.mrf.mxu0 }
 0x113   : > { %v1685_v53 = vpop.f32.mrf.mxu1 }
 0x12c   : > { %v749_v54 = vpop.f32.mrf.mxu0 }
 0x12d   : > { %v866_v55 = vpop.f32.mrf.mxu1  ;;  %v755_v7 = vadd.f32 %v749_v54, %v631_v49 }
 0x12e   : > { %v1704_v56 = vpop.f32.mrf.mxu0 }
 0x12f   : > { %v1724_v57 = vpop.f32.mrf.mxu1  ;;  %v872_v8 = vadd.f32 %v866_v55, %v755_v7 }
 0x130   : > { %v752_v58 = vpop.f32.mrf.mxu0 }
 0x131   : > { %v869_v59 = vpop.f32.mrf.mxu1 }
 0x132   : > { %v1705_v60 = vpop.f32.mrf.mxu0 }
 0x133   : > { %v1725_v61 = vpop.f32.mrf.mxu1 }
 0x14c   : > { %v975_v62 = vpop.f32.mrf.mxu0 }
 0x14d   : > { %v1098_v63 = vpop.f32.mrf.mxu1  ;;  %v981_v9 = vadd.f32 %v975_v62, %v872_v8 }
 0x14e   : > { %v1744_v0 = vpop.f32.mrf.mxu0 }
 0x14f   : > { %v1764_v2 = vpop.f32.mrf.mxu1  ;;  %v1104_v13 = vadd.f32 %v1098_v63, %v981_v9 }
 0x150   : > { %v978_v3 = vpop.f32.mrf.mxu0 }
 0x151   : > { %v1101_v4 = vpop.f32.mrf.mxu1 }
 0x152   : > { %v1745_v5 = vpop.f32.mrf.mxu0 }
 0x153   : > { %v1765_v6 = vpop.f32.mrf.mxu1 }
 0x16c   : > { %v1215_v14 = vpop.f32.mrf.mxu0 }
 0x16d   : > { %v1221_v16 = vadd.f32 %v1215_v14, %v1104_v13 }
 0x16e   : > { %v1784_v19 = vpop.f32.mrf.mxu0 }
 0x16f   : > { %v1231_v20 = vadd.f32 %v1521_v15, %v1221_v16 }
 0x170   : > { %v1218_v21 = vpop.f32.mrf.mxu0 }
 0x171   : > { %v1232_v22 = vmax.f32 %v1231_v20, 0.0 }
 0x172   : > { %v1785_v24 = vpop.f32.mrf.mxu0 }
 0x173   : > { %v1233_v25 = vpack.c.bf16 %v1232_v22, %v1232_v22 }
 0x175   : > { %1234 = vst [vmem:[%s168_s21] sm:$0x1] %v1233_v25  ;;  %v1242_v26 = vrot.slane %v1233_v25, %v1241_v23 }
 0x177   : > { %v1249_v27 = vrot.slane %v1242_v26, %v1241_v23 }
 0x179   : > { %v1250_v28 = vcombine.high %v1249_v27, %v1249_v27 }
 0x17b   : > { %1522 = vst [vmem:[%s168_s21 + $0x1] sm:$0x1] %v1250_v28 }
 0x17c PF: > { %s13_s12 = sadd.s32 1, %s1883_s12  }
 0x17d   : > { %p10_p4 = scmp.ge.s32.totalorder %s13_s12, 4  }
 0x17f   :  { %12 = sbr.rel (!%p10_p4) target bundleno = 1 (0x1), region = 71 }

// kernel: forward_pallas.37
= control target key start
LH: loop header
LB: loop body
LE: loop exit
PB: predicated region body
PF: predicated region fallthrough
CT: control target
= control target key end

     0   :  { %s1002_s12 = smov 0   ;;  %s1197_s0 = inlined_call_operand.vmem [shape: bf16[16,8,128], index: 0, kind: input, shape index: {}]   ;;  %s1198_s1 = inlined_call_operand.vmem [shape: bf16[2,128,256], index: 1, kind: input, shape index: {}]   ;;  %s1199_s2 = inlined_call_operand.vmem [shape: f32[1,256], index: 2, kind: input, shape index: {}]   ;;  %s1200_s3 = inlined_call_operand.vmem [shape: bf16[16,2,8,256], index: 3, kind: output, shape index: {}]  }
   0x1 LB: > { %s807_s13 = sadd.s32 4294967295, %s979_s12   ;;  %p811_p0 = scmp.ge.s32.totalorder %s979_s12, 1  ;;  %s979_s12 = sphi %s1002_s12, %s13_s12  }
   0x2   : > { %p138_p1 = scmp.lt.s32.totalorder %s979_s12, 3 }
   0x4   : > { %p139_p2 = pnand %p811_p0, %p138_p1 }
   0x5   : > { %s812_s5 = sshll.u32 (!%p139_p2), %s807_s13, 3 }
   0x6   : > { %142 = sbr.rel (%p139_p2) target bundleno = 275 (0x113), region = 32  ;;  %p164_p3 = scmp.lt.s32.totalorder (!%p139_p2), %s812_s5, 15 }
   0xb   : > { %v921_v0 = vld [vmem:[%s1198_s1 + $0x74] ss:$8 sps:$4 sm:$0xff]   ;;  %v981_v2 = vmov 0   ;;  %v925_v3 = vld [vmem:[%s1198_s1 + $0x70] ss:$8 sps:$4 sm:$0xff]   ;;  %s1202_s5 = smov (!%p164_p3, %s812_s5), 15  ;;  %v203_v37 = vlaneseq }
   0xc   : > { %v923_v1 = vld [vmem:[%s1198_s1 + $0xf4] ss:$8 sps:$4 sm:$0xff]   ;;  %349 = vmatprep.mubr.bf16.mxu0 %v981_v2  ;;  %619 = vmatprep.mubr.bf16.mxu1 %v981_v2  ;;  %v926_v4 = vld [vmem:[%s1198_s1 + $0xf0] ss:$8 sps:$4 sm:$0xff]   ;;  %v927_v5 = vld [vmem:[%s1198_s1 + $0x64] ss:$8 sps:$4 sm:$0xff]  }
   0xd   : > { %317 = vmatprep.subr.bf16.mxu0 %v921_v0  ;;  %587 = vmatprep.subr.bf16.mxu1 %v923_v1  ;;  %v929_v6 = vld [vmem:[%s1198_s1 + $0xe4] ss:$8 sps:$4 sm:$0xff]   ;;  %v931_v7 = vld [vmem:[%s1198_s1 + $0x60] ss:$8 sps:$4 sm:$0xff]   ;;  %v933_v9 = vld [vmem:[%s1198_s1 + $0x54] ss:$8 sps:$4 sm:$0xff]  }
   0xe   : > { %318 = vmatpush1.bf16.msra.mxu0 %v925_v3  ;;  %588 = vmatpush1.bf16.msra.mxu1 %v926_v4  ;;  %v932_v8 = vld [vmem:[%s1198_s1 + $0xe0] ss:$8 sps:$4 sm:$0xff]   ;;  %v935_v10 = vld [vmem:[%s1198_s1 + $0xd4] ss:$8 sps:$4 sm:$0xff]   ;;  %v937_v11 = vld [vmem:[%s1198_s1 + $0x50] ss:$8 sps:$4 sm:$0xff]  }
   0xf   : > { %319 = vmatprep.subr.bf16.mxu0 %v927_v5  ;;  %589 = vmatprep.subr.bf16.mxu1 %v929_v6  ;;  %v938_v12 = vld [vmem:[%s1198_s1 + $0xd0] ss:$8 sps:$4 sm:$0xff]   ;;  %v939_v13 = vld [vmem:[%s1198_s1 + $0x44] ss:$8 sps:$4 sm:$0xff]   ;;  %v943_v15 = vld [vmem:[%s1198_s1 + $0x40] ss:$8 sps:$4 sm:$0xff]  }
  0x10   : > { %v941_v14 = vld [vmem:[%s1198_s1 + $0xc4] ss:$8 sps:$4 sm:$0xff]   ;;  %v944_v16 = vld [vmem:[%s1198_s1 + $0xc0] ss:$8 sps:$4 sm:$0xff]   ;;  %v945_v17 = vld [vmem:[%s1198_s1 + $0x34] ss:$8 sps:$4 sm:$0xff]  }
  0x11   : > { %v947_v18 = vld [vmem:[%s1198_s1 + $0xb4] ss:$8 sps:$4 sm:$0xff]   ;;  %v949_v19 = vld [vmem:[%s1198_s1 + $0x30] ss:$8 sps:$4 sm:$0xff]   ;;  %v951_v21 = vld [vmem:[%s1198_s1 + $0x24] ss:$8 sps:$4 sm:$0xff]  }
  0x12   : > { %320 = vmatpush1.bf16.msra.mxu0 %v931_v7  ;;  %590 = vmatpush1.bf16.msra.mxu1 %v932_v8  ;;  %v950_v20 = vld [vmem:[%s1198_s1 + $0xb0] ss:$8 sps:$4 sm:$0xff]   ;;  %v953_v22 = vld [vmem:[%s1198_s1 + $0xa4] ss:$8 sps:$4 sm:$0xff]   ;;  %s813_s7 = sshll.u32 %s1202_s5, 2  ;;  %v204_v38 = vshrl.u32 %v203_v37, 7 }
  0x13   : > { %321 = vmatprep.subr.bf16.mxu0 %v933_v9  ;;  %591 = vmatprep.subr.bf16.mxu1 %v935_v10  ;;  %v955_v23 = vld [vmem:[%s1198_s1 + $0x20] ss:$8 sps:$4 sm:$0xff]   ;;  %v957_v25 = vld [vmem:[%s1198_s1 + $0x14] ss:$8 sps:$4 sm:$0xff]   ;;  %s1093_s17 = scalar_lea.vmem %s1197_s0, %s813_s7  ;;  %v961_v27 = vld [vmem:[%s1198_s1 + $0x10] ss:$8 sps:$4 sm:$0xff]  }
  0x14   : > { %v956_v24 = vld [vmem:[%s1198_s1 + $0xa0] ss:$8 sps:$4 sm:$0xff]   ;;  %v959_v26 = vld [vmem:[%s1198_s1 + $0x94] ss:$8 sps:$4 sm:$0xff]   ;;  %v962_v28 = vld [vmem:[%s1198_s1 + $0x90] ss:$8 sps:$4 sm:$0xff]  }
  0x15   : > { %v963_v29 = vld [vmem:[%s1198_s1 + $0x4] ss:$8 sps:$4 sm:$0xff]   ;;  %v967_v31 = vld [vmem:[%s1198_s1] ss:$8 sps:$4 sm:$0xff]   ;;  %v971_v35 = vld [vmem:[%s1093_s17 + $0x10] sm:$0xff]   ;;  %v205_v39 = vsub.s32 0, %v204_v38 }
  0x16   : > { %322 = vmatpush1.bf16.msra.mxu0 %v937_v11  ;;  %592 = vmatpush1.bf16.msra.mxu1 %v938_v12  ;;  %v965_v30 = vld [vmem:[%s1198_s1 + $0x84] ss:$8 sps:$4 sm:$0xff]   ;;  %v968_v32 = vld [vmem:[%s1198_s1 + $0x80] ss:$8 sps:$4 sm:$0xff]   ;;  %v972_v36 = vld [vmem:[%s1093_s17 + $0x18] sm:$0xff]   ;;  %v209_v42 = vsub.s32 1, %v204_v38 }
  0x17   : > { %323 = vmatprep.subr.bf16.mxu0 %v939_v13  ;;  %593 = vmatprep.subr.bf16.mxu1 %v941_v14  ;;  %v969_v33 = vld [vmem:[%s1093_s17] sm:$0xff]   ;;  %v970_v34 = vld [vmem:[%s1093_s17 + $0x8] sm:$0xff]   ;;  %s895_s10 = sshll.u32 %s1202_s5, 4 }
  0x18   : > { %v201_v40 = vld [vmem:[%s1199_s2] sm:$0x3]  ;;  %s1148_s15 = scalar_lea.vmem %s1200_s3, %s895_s10 }
  0x19   : > { %v495_v41 = vld [vmem:[%s1199_s2] sm:$0x3]  ;;  %v1132_v43 = vrot.slane %v201_v40, %v205_v39  ;;  %v1136_v45 = vrot.slane %v201_v40, %v209_v42 }
  0x1a   : > { %324 = vmatpush1.bf16.msra.mxu0 %v943_v15  ;;  %594 = vmatpush1.bf16.msra.mxu1 %v944_v16  ;;  %v1134_v44 = vrot.slane %v495_v41, %v205_v39  ;;  %v1138_v46 = vrot.slane %v495_v41, %v209_v42 }
  0x1b   : > { %325 = vmatprep.subr.bf16.mxu0 %v945_v17  ;;  %595 = vmatprep.subr.bf16.mxu1 %v947_v18 }
  0x1e   : > { %326 = vmatpush1.bf16.msra.mxu0 %v949_v19  ;;  %596 = vmatpush1.bf16.msra.mxu1 %v950_v20 }
  0x1f   : > { %327 = vmatprep.subr.bf16.mxu0 %v951_v21  ;;  %597 = vmatprep.subr.bf16.mxu1 %v953_v22 }
  0x22   : > { %328 = vmatpush1.bf16.msra.mxu0 %v955_v23  ;;  %598 = vmatpush1.bf16.msra.mxu1 %v956_v24 }
  0x23   : > { %329 = vmatprep.subr.bf16.mxu0 %v957_v25  ;;  %599 = vmatprep.subr.bf16.mxu1 %v959_v26 }
  0x26   : > { %330 = vmatpush1.bf16.msra.mxu0 %v961_v27  ;;  %600 = vmatpush1.bf16.msra.mxu1 %v962_v28 }
  0x27   : > { %331 = vmatprep.subr.bf16.mxu0 %v963_v29  ;;  %601 = vmatprep.subr.bf16.mxu1 %v965_v30 }
  0x2a   : > { %332 = vmatpush1.bf16.msra.mxu0 %v967_v31  ;;  %602 = vmatpush1.bf16.msra.mxu1 %v968_v32 }
  0x2d   : > { %350 = vmatmul.mubr.bf16.vlgmr.msra.gmra.mxu0 %v969_v33  ;;  %620 = vmatmul.mubr.bf16.vlgmr.msra.gmra.mxu1 %v969_v33 }
  0x2e   : > { %359 = vmatprep.mubr.bf16.mxu0 %v981_v2  ;;  %629 = vmatprep.mubr.bf16.mxu1 %v981_v2 }
  0x35   : > { %360 = vmatmul.mubr.bf16.gmra.mxu0 %v970_v34  ;;  %630 = vmatmul.mubr.bf16.gmra.mxu1 %v970_v34 }
  0x36   : > { %369 = vmatprep.mubr.bf16.mxu0 %v981_v2  ;;  %639 = vmatprep.mubr.bf16.mxu1 %v981_v2 }
  0x3d   : > { %370 = vmatmul.mubr.bf16.gmra.mxu0 %v971_v35  ;;  %640 = vmatmul.mubr.bf16.gmra.mxu1 %v971_v35 }
  0x3e   : > { %379 = vmatprep.mubr.bf16.mxu0 %v981_v2  ;;  %649 = vmatprep.mubr.bf16.mxu1 %v981_v2 }
  0x45   : > { %380 = vmatmul.mubr.bf16.gmra.mxu0 %v972_v36  ;;  %650 = vmatmul.mubr.bf16.gmra.mxu1 %v972_v36 }
  0xed   : > { %v351_v47 = vpop.f32.mrf.mxu0  ;;  %v621_v48 = vpop.f32.mrf.mxu1 }
  0xee   : > { %v352_v49 = vadd.f32 %v351_v47, %v1132_v43  ;;  %v622_v50 = vadd.f32 %v621_v48, %v1134_v44 }
  0xef   : > { %v353_v51 = vpop.f32.mrf.mxu0  ;;  %v623_v52 = vpop.f32.mrf.mxu1 }
  0xf0   : > { %v354_v53 = vadd.f32 %v353_v51, %v1136_v45  ;;  %v624_v54 = vadd.f32 %v623_v52, %v1138_v46  ;;  %v390_v57 = vmax.f32 %v352_v49, 0.0  ;;  %v660_v58 = vmax.f32 %v622_v50, 0.0 }
  0xf1   : > { %v355_v55 = vpop.f32.mrf.mxu0  ;;  %v625_v56 = vpop.f32.mrf.mxu1 }
  0xf2   : > { %v391_v59 = vmax.f32 %v354_v53, 0.0  ;;  %v661_v60 = vmax.f32 %v624_v54, 0.0  ;;  %v356_v61 = vadd.f32 %v355_v55, %v1132_v43  ;;  %v626_v62 = vadd.f32 %v625_v56, %v1134_v44 }
  0xf3   : > { %v357_v63 = vpop.f32.mrf.mxu0  ;;  %v627_v0 = vpop.f32.mrf.mxu1 }
  0xf4   : > { %v896_v1 = vpack.c.bf16 %v391_v59, %v390_v57  ;;  %v904_v2 = vpack.c.bf16 %v661_v60, %v660_v58  ;;  %v358_v3 = vadd.f32 %v357_v63, %v1136_v45  ;;  %v628_v4 = vadd.f32 %v627_v0, %v1138_v46 }
  0xf5   : > { %v361_v5 = vpop.f32.mrf.mxu0  ;;  %v631_v6 = vpop.f32.mrf.mxu1  ;;  %v392_v9 = vmax.f32 %v356_v61, 0.0  ;;  %v662_v10 = vmax.f32 %v626_v62, 0.0 }
  0xf6   : > { %470 = vst [vmem:[%s1148_s15] sm:$0xff] %v896_v1  ;;  %885 = vst [vmem:[%s1148_s15 + $0x8] sm:$0xff] %v904_v2  ;;  %v362_v7 = vadd.f32 %v361_v5, %v1132_v43  ;;  %v632_v8 = vadd.f32 %v631_v6, %v1134_v44  ;;  %v393_v11 = vmax.f32 %v358_v3, 0.0  ;;  %v663_v12 = vmax.f32 %v628_v4, 0.0 }
  0xf7   : > { %v363_v13 = vpop.f32.mrf.mxu0  ;;  %v633_v14 = vpop.f32.mrf.mxu1 }
  0xf8   : > { %v364_v15 = vadd.f32 %v363_v13, %v1136_v45  ;;  %v634_v16 = vadd.f32 %v633_v14, %v1138_v46  ;;  %v897_v17 = vpack.c.bf16 %v393_v11, %v392_v9  ;;  %v905_v18 = vpack.c.bf16 %v663_v12, %v662_v10 }
  0xf9   : > { %v365_v19 = vpop.f32.mrf.mxu0  ;;  %v635_v20 = vpop.f32.mrf.mxu1  ;;  %v394_v21 = vmax.f32 %v362_v7, 0.0  ;;  %v664_v22 = vmax.f32 %v632_v8, 0.0 }
  0xfa   : > { %v395_v23 = vmax.f32 %v364_v15, 0.0  ;;  %v665_v24 = vmax.f32 %v634_v16, 0.0  ;;  %471 = vst [vmem:[%s1148_s15 + $0x10] sm:$0xff] %v897_v17  ;;  %886 = vst [vmem:[%s1148_s15 + $0x18] sm:$0xff] %v905_v18  ;;  %v366_v25 = vadd.f32 %v365_v19, %v1132_v43  ;;  %v636_v26 = vadd.f32 %v635_v20, %v1134_v44 }
  0xfb   : > { %v367_v27 = vpop.f32.mrf.mxu0  ;;  %v637_v28 = vpop.f32.mrf.mxu1 }
  0xfc   : > { %v898_v29 = vpack.c.bf16 %v395_v23, %v394_v21  ;;  %v906_v30 = vpack.c.bf16 %v665_v24, %v664_v22  ;;  %v368_v31 = vadd.f32 %v367_v27, %v1136_v45  ;;  %v638_v32 = vadd.f32 %v637_v28, %v1138_v46 }
  0xfd   : > { %v371_v33 = vpop.f32.mrf.mxu0  ;;  %v641_v34 = vpop.f32.mrf.mxu1  ;;  %v396_v37 = vmax.f32 %v366_v25, 0.0  ;;  %v666_v38 = vmax.f32 %v636_v26, 0.0 }
  0xfe   : > { %472 = vst [vmem:[%s1148_s15 + $0x20] sm:$0xff] %v898_v29  ;;  %887 = vst [vmem:[%s1148_s15 + $0x28] sm:$0xff] %v906_v30  ;;  %v372_v35 = vadd.f32 %v371_v33, %v1132_v43  ;;  %v642_v36 = vadd.f32 %v641_v34, %v1134_v44  ;;  %v397_v39 = vmax.f32 %v368_v31, 0.0  ;;  %v667_v40 = vmax.f32 %v638_v32, 0.0 }
  0xff   : > { %v373_v41 = vpop.f32.mrf.mxu0  ;;  %v643_v42 = vpop.f32.mrf.mxu1 }
 0x100   : > { %v374_v47 = vadd.f32 %v373_v41, %v1136_v45  ;;  %v644_v48 = vadd.f32 %v643_v42, %v1138_v46  ;;  %v899_v49 = vpack.c.bf16 %v397_v39, %v396_v37  ;;  %v907_v50 = vpack.c.bf16 %v667_v40, %v666_v38 }
 0x101   : > { %v375_v51 = vpop.f32.mrf.mxu0  ;;  %v645_v52 = vpop.f32.mrf.mxu1  ;;  %v398_v53 = vmax.f32 %v372_v35, 0.0  ;;  %v668_v54 = vmax.f32 %v642_v36, 0.0 }
 0x102   : > { %v399_v55 = vmax.f32 %v374_v47, 0.0  ;;  %v669_v56 = vmax.f32 %v644_v48, 0.0  ;;  %473 = vst [vmem:[%s1148_s15 + $0x30] sm:$0xff] %v899_v49  ;;  %888 = vst [vmem:[%s1148_s15 + $0x38] sm:$0xff] %v907_v50  ;;  %v376_v57 = vadd.f32 %v375_v51, %v1132_v43  ;;  %v646_v58 = vadd.f32 %v645_v52, %v1134_v44 }
 0x103   : > { %v377_v59 = vpop.f32.mrf.mxu0  ;;  %v647_v60 = vpop.f32.mrf.mxu1 }
 0x104   : > { %v900_v61 = vpack.c.bf16 %v399_v55, %v398_v53  ;;  %v908_v62 = vpack.c.bf16 %v669_v56, %v668_v54  ;;  %v378_v63 = vadd.f32 %v377_v59, %v1136_v45  ;;  %v648_v0 = vadd.f32 %v647_v60, %v1138_v46 }
 0x105   : > { %v381_v1 = vpop.f32.mrf.mxu0  ;;  %v651_v2 = vpop.f32.mrf.mxu1  ;;  %v400_v5 = vmax.f32 %v376_v57, 0.0  ;;  %v670_v6 = vmax.f32 %v646_v58, 0.0 }
 0x106   : > { %474 = vst [vmem:[%s1148_s15 + $0x40] sm:$0xff] %v900_v61  ;;  %889 = vst [vmem:[%s1148_s15 + $0x48] sm:$0xff] %v908_v62  ;;  %v382_v3 = vadd.f32 %v381_v1, %v1132_v43  ;;  %v652_v4 = vadd.f32 %v651_v2, %v1134_v44  ;;  %v401_v7 = vmax.f32 %v378_v63, 0.0  ;;  %v671_v8 = vmax.f32 %v648_v0, 0.0 }
 0x107   : > { %v383_v9 = vpop.f32.mrf.mxu0  ;;  %v653_v10 = vpop.f32.mrf.mxu1 }
 0x108   : > { %v384_v11 = vadd.f32 %v383_v9, %v1136_v45  ;;  %v654_v12 = vadd.f32 %v653_v10, %v1138_v46  ;;  %v901_v13 = vpack.c.bf16 %v401_v7, %v400_v5  ;;  %v909_v14 = vpack.c.bf16 %v671_v8, %v670_v6 }
 0x109   : > { %v385_v15 = vpop.f32.mrf.mxu0  ;;  %v655_v16 = vpop.f32.mrf.mxu1  ;;  %v402_v17 = vmax.f32 %v382_v3, 0.0  ;;  %v672_v18 = vmax.f32 %v652_v4, 0.0 }
 0x10a   : > { %v403_v19 = vmax.f32 %v384_v11, 0.0  ;;  %v673_v20 = vmax.f32 %v654_v12, 0.0  ;;  %475 = vst [vmem:[%s1148_s15 + $0x50] sm:$0xff] %v901_v13  ;;  %890 = vst [vmem:[%s1148_s15 + $0x58] sm:$0xff] %v909_v14  ;;  %v386_v21 = vadd.f32 %v385_v15, %v1132_v43  ;;  %v656_v22 = vadd.f32 %v655_v16, %v1134_v44 }
 0x10b   : > { %v387_v23 = vpop.f32.mrf.mxu0  ;;  %v657_v24 = vpop.f32.mrf.mxu1 }
 0x10c   : > { %v902_v25 = vpack.c.bf16 %v403_v19, %v402_v17  ;;  %v910_v26 = vpack.c.bf16 %v673_v20, %v672_v18  ;;  %v388_v27 = vadd.f32 %v387_v23, %v1136_v45  ;;  %v658_v28 = vadd.f32 %v657_v24, %v1138_v46 }
 0x10d   : > { %v404_v29 = vmax.f32 %v386_v21, 0.0  ;;  %v674_v30 = vmax.f32 %v656_v22, 0.0 }
 0x10e   : > { %476 = vst [vmem:[%s1148_s15 + $0x60] sm:$0xff] %v902_v25  ;;  %891 = vst [vmem:[%s1148_s15 + $0x68] sm:$0xff] %v910_v26  ;;  %v405_v31 = vmax.f32 %v388_v27, 0.0  ;;  %v675_v32 = vmax.f32 %v658_v28, 0.0 }
 0x110   : > { %v903_v33 = vpack.c.bf16 %v405_v31, %v404_v29  ;;  %v911_v43 = vpack.c.bf16 %v675_v32, %v674_v30 }
 0x112   : > { %477 = vst [vmem:[%s1148_s15 + $0x70] sm:$0xff] %v903_v33  ;;  %892 = vst [vmem:[%s1148_s15 + $0x78] sm:$0xff] %v911_v43 }
 0x113 PF: > { %s13_s12 = sadd.s32 1, %s979_s12  }
 0x114   : > { %p10_p4 = scmp.ge.s32.totalorder %s13_s12, 4  }
 0x116   :  { %12 = sbr.rel (!%p10_p4) target bundleno = 1 (0x1), region = 64 }

</bundles_post_ra>
